<compile_context>
chip_gen: v7x
topology: tpu7x:2x2x1
jax: 0.10.0
libtpu: 0.0.40
codegen_flags: <defaults>
</compile_context>

<pallas_src>
import functools

import jax
import jax.numpy as jnp
from jax.experimental import pallas as pl
from jax.experimental.pallas import tpu as pltpu

KW = 4        # kernel_size
PADW = 2      # int(np.ceil((4 - 1) / 2))
LANE = 128    # TPU lane width -> output-channel padding granularity
EPS = 1e-5    # nn.InstanceNorm2d default eps
SLOPE = 0.2   # LeakyReLU negative slope


def _round_up(x, m):
    return (x + m - 1) // m * m


@functools.lru_cache(maxsize=None)
def _vmem_limit_bytes():
    """Scoped-VMEM request: ~3/4 of physical capacity (96 MiB on v5e/v6e's
    128 MiB, 48 MiB on v7x's 64 MiB) -- never the full capacity, leaving
    headroom for compiler scratch and pipeline double buffers."""
    cap = 64 * 1024 * 1024                       # conservative fallback (v7x VMEM)
    try:
        cap = int(getattr(pltpu.get_tpu_info(), "vmem_capacity_bytes", cap))
    except Exception:
        pass
    return int(min(cap * 3 // 4, 100 * 1024 * 1024))


def _tap_src(kh, kw, stride, wpp):
    """(phase index, row offset in the flattened Hpp*Wpp phase) for tap (kh,kw)."""
    if stride == 1:
        return 0, kh * wpp + kw
    return (kh % stride) * stride + (kw % stride), (kh // stride) * wpp + (kw // stride)


def _group_for(cin_eff):
    """Number of taps fused per matmul so the contraction dim is ~128 (partial
    im2col).  Layers with Cin >= 128 keep the duplication-free phase layout."""
    for g in (16, 8, 4, 2):
        if g * cin_eff <= 128:
            return g
    return 1


def _conv_in_lrelu_kernel(x_ref, w_ref, b_ref, o_ref, *,
                          tap_plan, lacc, wo, wpp, inv_cnt, do_norm, do_act):
    """One (sample, Cout-tile): 4x4 conv as an MXU accumulation over tap groups
    [+ InstanceNorm2d(affine=False)] [+ LeakyReLU(0.2)].

    x_ref : (1, n_src, L, K)   bf16  phase views / tap-grouped im2col
    w_ref : (n_grp, K, ctile)  bf16  per-group weight matrices
    b_ref : (1, ctile)         f32   bias (used only when do_norm=False)
    o_ref : (1, lacc, ctile)   bf16  output in "padded column" (Ho x Wpp) layout
    """
    acc = None
    for wi, (src, off) in enumerate(tap_plan):
        lhs = x_ref[0, src, pl.ds(off, lacc), :]
        part = jnp.dot(lhs, w_ref[wi], preferred_element_type=jnp.float32)
        acc = part if acc is None else acc + part     # init from first tap, no zeros+add

    # Valid-position mask from a (lacc, 1) row iota (column-within-row = l % Wpp);
    # it is only broadcast against the (lacc, ctile) tile inside jnp.where.
    row = jax.lax.broadcasted_iota(jnp.int32, (lacc, 1), 0)
    valid = (row % wpp) < wo

    if do_norm:
        # InstanceNorm2d(affine=False) over the Ho*Wo valid positions.  Bias is
        # skipped: it is cancelled exactly by the mean subtraction.  Shifted
        # (mean-then-centered-sum-of-squares) variance avoids E[x^2]-E[x]^2
        # cancellation; both passes run over the VMEM-resident accumulator.
        masked = jnp.where(valid, acc, 0.0)
        mean = jnp.sum(masked, axis=0, keepdims=True) * inv_cnt
        centered = acc - mean
        var = jnp.sum(jnp.where(valid, centered * centered, 0.0),
                      axis=0, keepdims=True) * inv_cnt
        y = centered * jax.lax.rsqrt(var + EPS)
    else:
        y = acc + b_ref[...]

    if do_act:
        y = jnp.where(y >= 0.0, y, SLOPE * y)          # LeakyReLU(0.2)

    # Zero the Wpp-Wo slack columns so the wrapper can fold "drop slack" and
    # "zero-pad for the next conv" into a single lax.pad (slack == pad == 0).
    y = jnp.where(valid, y, 0.0)
    o_ref[0] = y.astype(o_ref.dtype)


def fused_conv_layer(y4, w_valid, p):
    """Conv2d(k=4, stride, pad=2) [+ InstanceNorm2d] [+ LeakyReLU(0.2)] via Pallas.

    y4      : (N, H, Wcols, Cin_pad) bf16; columns >= w_valid are exactly zero.
    returns : ((N, Ho, Wpp, Coutp) bf16 with columns >= Wo zero, Wo)
    """
    n, h, wcols, cin = y4.shape
    stride, group = p["stride"], p["group"]
    w_taps, bias = p["w"], p["b"]
    ng, kdim, coutp = w_taps.shape
    assert kdim == group * cin

    ho = (h + 2 * PADW - KW) // stride + 1
    wo = (w_valid + 2 * PADW - KW) // stride + 1
    off = (KW - 1) // stride
    hpp, wpp = ho + off + 1, wo + off          # +1 slack row keeps tap slices in range
    lacc = ho * wpp
    hpad, wpad = stride * hpp, stride * wpp

    # Single fused relayout pad: add the PADW zero border, absorb the previous
    # layer's (already-zero) slack columns as padding (lax.pad handles the
    # negative edge this sometimes needs), and extend to the phase-aligned extent.
    yp = jax.lax.pad(
        y4, jnp.zeros((), y4.dtype),
        ((0, 0, 0),
         (PADW, hpad - h - PADW, 0),
         (PADW, wpad - wcols - PADW, 0),
         (0, 0, 0)))
    xp = yp.reshape(n, hpp, stride, wpp, stride, cin)
    xp = jnp.transpose(xp, (0, 2, 4, 1, 3, 5))
    phases = xp.reshape(n, stride * stride, hpp * wpp, cin)
    # TODO(synk): emit this phase layout directly from the previous layer's
    # kernel (per-phase out_specs) to drop the remaining transpose pass.

    taps = [(kh, kw) for kh in range(KW) for kw in range(KW)]
    if group == 1:
        # Duplication-free phase layout; 16 matmuls with K = Cin (>= 128).
        kern_in = phases
        tap_plan = tuple(_tap_src(kh, kw, stride, wpp) for kh, kw in taps)
        # TODO(synk): on v6e/v7x, pair taps in-kernel (concat along K) for K=256
        # when Cin == 128 to fill the 256-wide MXU contraction.
    else:
        # Small-Cin layers: partial im2col so each matmul has K = group*Cin ~ 128
        # (one lane-dense dot instead of `group` lane-sparse K=Cin dots).
        blocks = []
        for g0 in range(0, KW * KW, group):
            parts = []
            for kh, kw in taps[g0:g0 + group]:
                ph, base = _tap_src(kh, kw, stride, wpp)
                parts.append(phases[:, ph, base:base + lacc, :])
            blocks.append(jnp.concatenate(parts, axis=-1))
        kern_in = jnp.stack(blocks, axis=1)            # (N, ng, lacc, group*Cin)
        tap_plan = tuple((g, 0) for g in range(ng))

    # Cout tiling: parallel grid axis -> bounded VMEM per step at real sizes,
    # only a per-tile weight slice resident (no full-weight double buffer), and
    # work for both v7x TensorCores even at N=1.  IN stats are per-channel so
    # they stay exact under Cout tiling.  Cout tiles outermost so the weight
    # slice is fetched once per tile (input blocks change every step anyway).
    ctile = 256 if coutp % 256 == 0 else LANE
    n_ct = coutp // ctile

    kern = functools.partial(
        _conv_in_lrelu_kernel, tap_plan=tap_plan, lacc=lacc, wo=wo, wpp=wpp,
        inv_cnt=1.0 / float(ho * wo), do_norm=p["norm"], do_act=p["act"])

    out = pl.pallas_call(
        kern,
        out_shape=jax.ShapeDtypeStruct((n, lacc, coutp), jnp.bfloat16),
        grid_spec=pltpu.PrefetchScalarGridSpec(
            num_scalar_prefetch=0,
            grid=(n_ct, n),
            in_specs=[
                pl.BlockSpec((1,) + kern_in.shape[1:], lambda c, b: (b, 0, 0, 0)),
                pl.BlockSpec((ng, kdim, ctile), lambda c, b: (0, 0, c)),
                pl.BlockSpec((1, ctile), lambda c, b: (0, c)),
            ],
            out_specs=pl.BlockSpec((1, lacc, ctile), lambda c, b: (b, 0, c)),
        ),
        compiler_params=pltpu.CompilerParams(
            dimension_semantics=("parallel", "parallel"),
            vmem_limit_bytes=_vmem_limit_bytes()),
    )(kern_in, w_taps, bias)

    # TODO(synk): at >512x512 inputs a single (sample, Cout-tile) block can still
    # exceed v7x VMEM; that regime needs a spatial grid axis with cross-tile
    # InstanceNorm statistics (sum/sumsq accumulator + normalize epilogue).
    return out.reshape(n, ho, wpp, coutp), wo


def _layer_cfgs(input_nc, ndf, n_layers):
    cfgs = [(input_nc, ndf, 2, False, True)]             # conv + LeakyReLU
    nf = ndf
    for _ in range(1, n_layers):
        nf_prev, nf = nf, min(nf * 2, 512)
        cfgs.append((nf_prev, nf, 2, True, True))         # conv + IN + LeakyReLU
    nf_prev, nf = nf, min(nf * 2, 512)
    cfgs.append((nf_prev, nf, 1, True, True))             # conv(s=1) + IN + LeakyReLU
    cfgs.append((nf, 1, 1, False, False))                 # final 1-channel conv
    return cfgs                                           # use_sigmoid=False (default)


def init_params(key, input_nc, ndf, n_layers):
    """Deterministic synthetic params (PyTorch default Conv2d init), stored in the
    kernel layout (n_groups, group*Cin_pad, Cout_pad) bf16.  Real torch weights
    (Cout, Cin, KH, KW) would be permuted with transpose(2, 3, 1, 0) the same way."""
    params = []
    cin_eff = _round_up(input_nc, 8)                      # image channels -> sublane multiple
    for (cin, cout, stride, norm, act) in _layer_cfgs(input_nc, ndf, n_layers):
        key, k_w, k_b = jax.random.split(key, 3)
        coutp = _round_up(cout, LANE)                     # lane-dense output channels
        group = _group_for(cin_eff)
        bound = 1.0 / float(cin * KW * KW) ** 0.5
        w_t = jax.random.uniform(k_w, (cout, cin, KW, KW), jnp.float32, -bound, bound)
        w = jnp.transpose(w_t, (2, 3, 1, 0)).reshape(KW * KW, cin, cout)
        w_pad = jnp.zeros((KW * KW, cin_eff, coutp), jnp.float32)
        w_pad = w_pad.at[:, :cin, :cout].set(w)
        w_g = w_pad.reshape(KW * KW // group, group * cin_eff, coutp)
        b = jnp.zeros((1, coutp), jnp.float32)
        b = b.at[:, :cout].set(jax.random.uniform(k_b, (cout,), jnp.float32, -bound, bound))
        params.append(dict(w=w_g.astype(jnp.bfloat16), b=b, stride=stride,
                           norm=norm, act=act, group=group, cin_eff=cin_eff))
        cin_eff = coutp                                   # next layer consumes padded channels
    return params


def nlayer_discriminator(x_nchw, params):
    x = jnp.transpose(x_nchw, (0, 2, 3, 1)).astype(jnp.bfloat16)    # NCHW -> NHWC bf16
    cpad = params[0]["cin_eff"] - x.shape[-1]
    if cpad:
        x = jnp.pad(x, ((0, 0), (0, 0), (0, 0), (0, cpad)))
    y4, w_valid = x, x.shape[2]
    for p in params:
        y4, w_valid = fused_conv_layer(y4, w_valid, p)
    out = y4[:, :, :w_valid, :1].astype(jnp.float32)                # final Cout = 1
    return jnp.transpose(out, (0, 3, 1, 2))                         # NHWC -> NCHW


def reference_forward(x_nchw, params):
    """Pure-JAX reference: f32 conv on the same bf16 weights, with the same
    bf16 inter-layer activation storage as the Pallas path."""
    x = jnp.transpose(x_nchw, (0, 2, 3, 1)).astype(jnp.bfloat16).astype(jnp.float32)
    cpad = params[0]["cin_eff"] - x.shape[-1]
    if cpad:
        x = jnp.pad(x, ((0, 0), (0, 0), (0, 0), (0, cpad)))
    for p in params:
        cin, coutp = p["cin_eff"], p["w"].shape[-1]
        w = p["w"].astype(jnp.float32).reshape(KW, KW, cin, coutp)
        y = jax.lax.conv_general_dilated(
            x, w, window_strides=(p["stride"],) * 2,
            padding=((PADW, PADW), (PADW, PADW)),
            dimension_numbers=("NHWC", "HWIO", "NHWC"),
            precision=jax.lax.Precision.HIGHEST)
        y = y + p["b"].reshape(1, 1, 1, -1)
        if p["norm"]:
            mean = jnp.mean(y, axis=(1, 2), keepdims=True)
            var = jnp.var(y, axis=(1, 2), keepdims=True)
            y = (y - mean) * jax.lax.rsqrt(var + EPS)
        if p["act"]:
            y = jnp.where(y >= 0.0, y, SLOPE * y)
        x = y.astype(jnp.bfloat16).astype(jnp.float32)    # mirror bf16 inter-layer storage
    return jnp.transpose(x[..., :1], (0, 3, 1, 2))


if __name__ == "__main__":
    key = jax.random.PRNGKey(0)
    kx, kp = jax.random.split(key)
    input_nc, ndf, n_layers = 4, 8, 3                     # small synthetic config
    x = jax.random.normal(kx, (2, input_nc, 16, 16), jnp.float32)
    params = init_params(kp, input_nc, ndf, n_layers)

    fwd = jax.jit(lambda xx: nlayer_discriminator(xx, params))
    out = fwd(x)
    jax.block_until_ready(out)

    # 16 -> 9 -> 5 -> 3 -> 4 -> 5 spatial; final channels = 1 (PatchGAN logits, NCHW)
    assert out.shape == (2, 1, 5, 5), out.shape

    # Numerical sanity check against a pure-JAX reference (same bf16 weights /
    # inter-layer activations; only the bf16-MXU-vs-f32-conv path differs).
    ref = reference_forward(x, params)
    err = float(jnp.max(jnp.abs(out - ref)))
    assert err < 5e-2, f"mismatch vs reference (max abs err {err})"
    print("KERNEL_OK")
</pallas_src>

<mosaic_0001>
module attributes {stable_mosaic.version = 11 : i64} {
  func.func @_conv_in_lrelu_kernel(%arg0: i32, %arg1: i32, %arg2: memref<1x1x90x128xbf16, #tpu.memory_space<vmem>>, %arg3: memref<1x128x128xbf16, #tpu.memory_space<vmem>>, %arg4: memref<1x128xf32, #tpu.memory_space<vmem>>, %arg5: memref<1x90x128xbf16, #tpu.memory_space<vmem>>) attributes {dimension_semantics = [#tpu.dimension_semantics<parallel>, #tpu.dimension_semantics<parallel>], iteration_bounds = array<i64: 1, 2>, scalar_prefetch = 0 : i64, scratch_operands = 0 : i64, tpu.core_type = #tpu.core_type<tc>, window_params = [{transform_indices = @transform_0, window_bounds = array<i64: 1, 1, 90, 128>}, {transform_indices = @transform_1, window_bounds = array<i64: 1, 128, 128>}, {transform_indices = @transform_2, window_bounds = array<i64: 1, 128>}, {transform_indices = @transform_3, window_bounds = array<i64: 1, 90, 128>}]} {
    %c0 = arith.constant 0 : index
    %c0_0 = arith.constant 0 : index
    %c0_1 = arith.constant 0 : index
    %c0_2 = arith.constant 0 : index
    %0 = vector.load %arg2[%c0, %c0_0, %c0_1, %c0_2] : memref<1x1x90x128xbf16, #tpu.memory_space<vmem>>, vector<1x1x90x128xbf16>
    %1 = vector.shape_cast %0 : vector<1x1x90x128xbf16> to vector<90x128xbf16>
    %c0_3 = arith.constant 0 : index
    %c0_4 = arith.constant 0 : index
    %c0_5 = arith.constant 0 : index
    %2 = vector.load %arg3[%c0_3, %c0_4, %c0_5] : memref<1x128x128xbf16, #tpu.memory_space<vmem>>, vector<1x128x128xbf16>
    %3 = vector.shape_cast %2 : vector<1x128x128xbf16> to vector<128x128xbf16>
    %cst = arith.constant dense<0.000000e+00> : vector<90x128xf32>
    %4 = tpu.matmul %1, %3, %cst {dimension_numbers = #tpu.dot_dimension_numbers<[1], [0], [0], [1], [0, 0, 1, 1], [], []>} : vector<90x128xbf16>, vector<128x128xbf16>, vector<90x128xf32> -> vector<90x128xf32>
    %5 = tpu.iota {dimensions = array<i32: 0>} : vector<90x1xi32>
    %c10_i32 = arith.constant 10 : i32
    %c0_i32 = arith.constant 0 : i32
    %6 = arith.cmpi eq, %c10_i32, %c0_i32 : i32
    %c1_i32 = arith.constant 1 : i32
    %7 = arith.select %6, %c1_i32, %c10_i32 : i32
    %8 = vector.broadcast %7 : i32 to vector<90x1xi32>
    %9 = arith.remsi %5, %8 : vector<90x1xi32>
    %c0_i32_6 = arith.constant 0 : i32
    %10 = vector.broadcast %c0_i32_6 : i32 to vector<90x1xi32>
    %11 = arith.cmpi ne, %9, %10 : vector<90x1xi32>
    %c0_i32_7 = arith.constant 0 : i32
    %12 = vector.broadcast %c0_i32_7 : i32 to vector<90x1xi32>
    %13 = arith.cmpi slt, %9, %12 : vector<90x1xi32>
    %c0_i32_8 = arith.constant 0 : i32
    %14 = arith.cmpi slt, %7, %c0_i32_8 : i32
    %15 = vector.broadcast %14 : i1 to vector<90x1xi1>
    %16 = vector.broadcast %15 : vector<90x1xi1> to vector<90x1xi1>
    %17 = arith.xori %13, %16 : vector<90x1xi1>
    %18 = arith.andi %17, %11 : vector<90x1xi1>
    %19 = vector.broadcast %7 : i32 to vector<90x1xi32>
    %20 = arith.addi %9, %19 : vector<90x1xi32>
    %21 = arith.select %18, %20, %9 : vector<90x1xi1>, vector<90x1xi32>
    %c9_i32 = arith.constant 9 : i32
    %22 = vector.broadcast %c9_i32 : i32 to vector<90x1xi32>
    %23 = arith.cmpi slt, %21, %22 : vector<90x1xi32>
    %c0_9 = arith.constant 0 : index
    %c0_10 = arith.constant 0 : index
    %24 = vector.load %arg4[%c0_9, %c0_10] : memref<1x128xf32, #tpu.memory_space<vmem>>, vector<1x128xf32>
    %25 = vector.broadcast %24 : vector<1x128xf32> to vector<90x128xf32>
    %26 = arith.addf %4, %25 : vector<90x128xf32>
    %cst_11 = arith.constant 0.000000e+00 : f32
    %27 = vector.broadcast %cst_11 : f32 to vector<90x128xf32>
    %28 = arith.cmpf oge, %26, %27 : vector<90x128xf32>
    %cst_12 = arith.constant 2.000000e-01 : f32
    %29 = vector.broadcast %cst_12 : f32 to vector<90x128xf32>
    %30 = arith.mulf %29, %26 : vector<90x128xf32>
    %31 = arith.select %28, %26, %30 : vector<90x128xi1>, vector<90x128xf32>
    %cst_13 = arith.constant 0.000000e+00 : f32
    %32 = vector.shape_cast %23 : vector<90x1xi1> to vector<90x1xi1>
    %33 = vector.broadcast %32 : vector<90x1xi1> to vector<90x128xi1>
    %34 = vector.broadcast %cst_13 : f32 to vector<90x128xf32>
    %35 = arith.select %33, %31, %34 : vector<90x128xi1>, vector<90x128xf32>
    %36 = arith.truncf %35 : vector<90x128xf32> to vector<90x128xbf16>
    %c0_14 = arith.constant 0 : index
    %c0_15 = arith.constant 0 : index
    %c0_16 = arith.constant 0 : index
    %37 = vector.load %arg5[%c0_14, %c0_15, %c0_16] : memref<1x90x128xbf16, #tpu.memory_space<vmem>>, vector<1x90x128xbf16>
    %38 = vector.shape_cast %37 : vector<1x90x128xbf16> to vector<90x128xbf16>
    %39 = vector.shape_cast %36 : vector<90x128xbf16> to vector<1x90x128xbf16>
    tpu.vector_store %arg5[%c0_14, %c0_15, %c0_16], %39 {strides = array<i32>} : memref<1x90x128xbf16, #tpu.memory_space<vmem>>, vector<1x90x128xbf16>,
    return
  }
  func.func @transform_0(%arg0: i32, %arg1: i32) -> (i32, i32, i32, i32) {
    %c0_i32 = arith.constant 0 : i32
    %c0_i32_0 = arith.constant 0 : i32
    %c0_i32_1 = arith.constant 0 : i32
    %c0_i32_2 = arith.constant 0 : i32
    return %arg1, %c0_i32, %c0_i32_0, %c0_i32_1 : i32, i32, i32, i32
  }
  func.func @transform_1(%arg0: i32, %arg1: i32) -> (i32, i32, i32) {
    %c0_i32 = arith.constant 0 : i32
    %c0_i32_0 = arith.constant 0 : i32
    %c0_i32_1 = arith.constant 0 : i32
    return %c0_i32, %c0_i32_0, %arg0 : i32, i32, i32
  }
  func.func @transform_2(%arg0: i32, %arg1: i32) -> (i32, i32) {
    %c0_i32 = arith.constant 0 : i32
    %c0_i32_0 = arith.constant 0 : i32
    return %c0_i32, %arg0 : i32, i32
  }
  func.func @transform_3(%arg0: i32, %arg1: i32) -> (i32, i32, i32) {
    %c0_i32 = arith.constant 0 : i32
    %c0_i32_0 = arith.constant 0 : i32
    return %arg1, %c0_i32, %arg0 : i32, i32, i32
  }
}

module attributes {stable_mosaic.version = 11 : i64} {
  func.func @_conv_in_lrelu_kernel(%arg0: i32, %arg1: i32, %arg2: memref<1x4x42x128xbf16, #tpu.memory_space<vmem>>, %arg3: memref<16x128x128xbf16, #tpu.memory_space<vmem>>, %arg4: memref<1x128xf32, #tpu.memory_space<vmem>>, %arg5: memref<1x30x128xbf16, #tpu.memory_space<vmem>>) attributes {dimension_semantics = [#tpu.dimension_semantics<parallel>, #tpu.dimension_semantics<parallel>], iteration_bounds = array<i64: 1, 2>, scalar_prefetch = 0 : i64, scratch_operands = 0 : i64, tpu.core_type = #tpu.core_type<tc>, window_params = [{transform_indices = @transform_0, window_bounds = array<i64: 1, 4, 42, 128>}, {transform_indices = @transform_1, window_bounds = array<i64: 16, 128, 128>}, {transform_indices = @transform_2, window_bounds = array<i64: 1, 128>}, {transform_indices = @transform_3, window_bounds = array<i64: 1, 30, 128>}]} {
    %c0 = arith.constant 0 : index
    %c0_0 = arith.constant 0 : index
    %c0_1 = arith.constant 0 : index
    %c0_2 = arith.constant 0 : index
    %0 = vector.load %arg2[%c0, %c0_0, %c0_1, %c0_2] : memref<1x4x42x128xbf16, #tpu.memory_space<vmem>>, vector<1x1x30x128xbf16>
    %1 = vector.shape_cast %0 : vector<1x1x30x128xbf16> to vector<30x128xbf16>
    %c0_3 = arith.constant 0 : index
    %c0_4 = arith.constant 0 : index
    %c0_5 = arith.constant 0 : index
    %2 = vector.load %arg3[%c0_3, %c0_4, %c0_5] : memref<16x128x128xbf16, #tpu.memory_space<vmem>>, vector<1x128x128xbf16>
    %3 = vector.shape_cast %2 : vector<1x128x128xbf16> to vector<128x128xbf16>
    %cst = arith.constant dense<0.000000e+00> : vector<30x128xf32>
    %4 = tpu.matmul %1, %3, %cst {dimension_numbers = #tpu.dot_dimension_numbers<[1], [0], [0], [1], [0, 0, 1, 1], [], []>} : vector<30x128xbf16>, vector<128x128xbf16>, vector<30x128xf32> -> vector<30x128xf32>
    %c0_6 = arith.constant 0 : index
    %c1 = arith.constant 1 : index
    %c0_7 = arith.constant 0 : index
    %c0_8 = arith.constant 0 : index
    %5 = vector.load %arg2[%c0_6, %c1, %c0_7, %c0_8] : memref<1x4x42x128xbf16, #tpu.memory_space<vmem>>, vector<1x1x30x128xbf16>
    %6 = vector.shape_cast %5 : vector<1x1x30x128xbf16> to vector<30x128xbf16>
    %c1_9 = arith.constant 1 : index
    %c0_10 = arith.constant 0 : index
    %c0_11 = arith.constant 0 : index
    %7 = vector.load %arg3[%c1_9, %c0_10, %c0_11] : memref<16x128x128xbf16, #tpu.memory_space<vmem>>, vector<1x128x128xbf16>
    %8 = vector.shape_cast %7 : vector<1x128x128xbf16> to vector<128x128xbf16>
    %cst_12 = arith.constant dense<0.000000e+00> : vector<30x128xf32>
    %9 = tpu.matmul %6, %8, %cst_12 {dimension_numbers = #tpu.dot_dimension_numbers<[1], [0], [0], [1], [0, 0, 1, 1], [], []>} : vector<30x128xbf16>, vector<128x128xbf16>, vector<30x128xf32> -> vector<30x128xf32>
    %10 = arith.addf %4, %9 : vector<30x128xf32>
    %c0_13 = arith.constant 0 : index
    %c0_14 = arith.constant 0 : index
    %c1_15 = arith.constant 1 : index
    %c0_16 = arith.constant 0 : index
    %11 = vector.load %arg2[%c0_13, %c0_14, %c1_15, %c0_16] : memref<1x4x42x128xbf16, #tpu.memory_space<vmem>>, vector<1x1x30x128xbf16>
    %12 = vector.shape_cast %11 : vector<1x1x30x128xbf16> to vector<30x128xbf16>
    %c2 = arith.constant 2 : index
    %c0_17 = arith.constant 0 : index
    %c0_18 = arith.constant 0 : index
    %13 = vector.load %arg3[%c2, %c0_17, %c0_18] : memref<16x128x128xbf16, #tpu.memory_space<vmem>>, vector<1x128x128xbf16>
    %14 = vector.shape_cast %13 : vector<1x128x128xbf16> to vector<128x128xbf16>
    %cst_19 = arith.constant dense<0.000000e+00> : vector<30x128xf32>
    %15 = tpu.matmul %12, %14, %cst_19 {dimension_numbers = #tpu.dot_dimension_numbers<[1], [0], [0], [1], [0, 0, 1, 1], [], []>} : vector<30x128xbf16>, vector<128x128xbf16>, vector<30x128xf32> -> vector<30x128xf32>
    %16 = arith.addf %10, %15 : vector<30x128xf32>
    %c0_20 = arith.constant 0 : index
    %c1_21 = arith.constant 1 : index
    %c1_22 = arith.constant 1 : index
    %c0_23 = arith.constant 0 : index
    %17 = vector.load %arg2[%c0_20, %c1_21, %c1_22, %c0_23] : memref<1x4x42x128xbf16, #tpu.memory_space<vmem>>, vector<1x1x30x128xbf16>
    %18 = vector.shape_cast %17 : vector<1x1x30x128xbf16> to vector<30x128xbf16>
    %c3 = arith.constant 3 : index
    %c0_24 = arith.constant 0 : index
    %c0_25 = arith.constant 0 : index
    %19 = vector.load %arg3[%c3, %c0_24, %c0_25] : memref<16x128x128xbf16, #tpu.memory_space<vmem>>, vector<1x128x128xbf16>
    %20 = vector.shape_cast %19 : vector<1x128x128xbf16> to vector<128x128xbf16>
    %cst_26 = arith.constant dense<0.000000e+00> : vector<30x128xf32>
    %21 = tpu.matmul %18, %20, %cst_26 {dimension_numbers = #tpu.dot_dimension_numbers<[1], [0], [0], [1], [0, 0, 1, 1], [], []>} : vector<30x128xbf16>, vector<128x128xbf16>, vector<30x128xf32> -> vector<30x128xf32>
    %22 = arith.addf %16, %21 : vector<30x128xf32>
    %c0_27 = arith.constant 0 : index
    %c2_28 = arith.constant 2 : index
    %c0_29 = arith.constant 0 : index
    %c0_30 = arith.constant 0 : index
    %23 = vector.load %arg2[%c0_27, %c2_28, %c0_29, %c0_30] : memref<1x4x42x128xbf16, #tpu.memory_space<vmem>>, vector<1x1x30x128xbf16>
    %24 = vector.shape_cast %23 : vector<1x1x30x128xbf16> to vector<30x128xbf16>
    %c4 = arith.constant 4 : index
    %c0_31 = arith.constant 0 : index
    %c0_32 = arith.constant 0 : index
    %25 = vector.load %arg3[%c4, %c0_31, %c0_32] : memref<16x128x128xbf16, #tpu.memory_space<vmem>>, vector<1x128x128xbf16>
    %26 = vector.shape_cast %25 : vector<1x128x128xbf16> to vector<128x128xbf16>
    %cst_33 = arith.constant dense<0.000000e+00> : vector<30x128xf32>
    %27 = tpu.matmul %24, %26, %cst_33 {dimension_numbers = #tpu.dot_dimension_numbers<[1], [0], [0], [1], [0, 0, 1, 1], [], []>} : vector<30x128xbf16>, vector<128x128xbf16>, vector<30x128xf32> -> vector<30x128xf32>
    %28 = arith.addf %22, %27 : vector<30x128xf32>
    %c0_34 = arith.constant 0 : index
    %c3_35 = arith.constant 3 : index
    %c0_36 = arith.constant 0 : index
    %c0_37 = arith.constant 0 : index
    %29 = vector.load %arg2[%c0_34, %c3_35, %c0_36, %c0_37] : memref<1x4x42x128xbf16, #tpu.memory_space<vmem>>, vector<1x1x30x128xbf16>
    %30 = vector.shape_cast %29 : vector<1x1x30x128xbf16> to vector<30x128xbf16>
    %c5 = arith.constant 5 : index
    %c0_38 = arith.constant 0 : index
    %c0_39 = arith.constant 0 : index
    %31 = vector.load %arg3[%c5, %c0_38, %c0_39] : memref<16x128x128xbf16, #tpu.memory_space<vmem>>, vector<1x128x128xbf16>
    %32 = vector.shape_cast %31 : vector<1x128x128xbf16> to vector<128x128xbf16>
    %cst_40 = arith.constant dense<0.000000e+00> : vector<30x128xf32>
    %33 = tpu.matmul %30, %32, %cst_40 {dimension_numbers = #tpu.dot_dimension_numbers<[1], [0], [0], [1], [0, 0, 1, 1], [], []>} : vector<30x128xbf16>, vector<128x128xbf16>, vector<30x128xf32> -> vector<30x128xf32>
    %34 = arith.addf %28, %33 : vector<30x128xf32>
    %c0_41 = arith.constant 0 : index
    %c2_42 = arith.constant 2 : index
    %c1_43 = arith.constant 1 : index
    %c0_44 = arith.constant 0 : index
    %35 = vector.load %arg2[%c0_41, %c2_42, %c1_43, %c0_44] : memref<1x4x42x128xbf16, #tpu.memory_space<vmem>>, vector<1x1x30x128xbf16>
    %36 = vector.shape_cast %35 : vector<1x1x30x128xbf16> to vector<30x128xbf16>
    %c6 = arith.constant 6 : index
    %c0_45 = arith.constant 0 : index
    %c0_46 = arith.constant 0 : index
    %37 = vector.load %arg3[%c6, %c0_45, %c0_46] : memref<16x128x128xbf16, #tpu.memory_space<vmem>>, vector<1x128x128xbf16>
    %38 = vector.shape_cast %37 : vector<1x128x128xbf16> to vector<128x128xbf16>
    %cst_47 = arith.constant dense<0.000000e+00> : vector<30x128xf32>
    %39 = tpu.matmul %36, %38, %cst_47 {dimension_numbers = #tpu.dot_dimension_numbers<[1], [0], [0], [1], [0, 0, 1, 1], [], []>} : vector<30x128xbf16>, vector<128x128xbf16>, vector<30x128xf32> -> vector<30x128xf32>
    %40 = arith.addf %34, %39 : vector<30x128xf32>
    %c0_48 = arith.constant 0 : index
    %c3_49 = arith.constant 3 : index
    %c1_50 = arith.constant 1 : index
    %c0_51 = arith.constant 0 : index
    %41 = vector.load %arg2[%c0_48, %c3_49, %c1_50, %c0_51] : memref<1x4x42x128xbf16, #tpu.memory_space<vmem>>, vector<1x1x30x128xbf16>
    %42 = vector.shape_cast %41 : vector<1x1x30x128xbf16> to vector<30x128xbf16>
    %c7 = arith.constant 7 : index
    %c0_52 = arith.constant 0 : index
    %c0_53 = arith.constant 0 : index
    %43 = vector.load %arg3[%c7, %c0_52, %c0_53] : memref<16x128x128xbf16, #tpu.memory_space<vmem>>, vector<1x128x128xbf16>
    %44 = vector.shape_cast %43 : vector<1x128x128xbf16> to vector<128x128xbf16>
    %cst_54 = arith.constant dense<0.000000e+00> : vector<30x128xf32>
    %45 = tpu.matmul %42, %44, %cst_54 {dimension_numbers = #tpu.dot_dimension_numbers<[1], [0], [0], [1], [0, 0, 1, 1], [], []>} : vector<30x128xbf16>, vector<128x128xbf16>, vector<30x128xf32> -> vector<30x128xf32>
    %46 = arith.addf %40, %45 : vector<30x128xf32>
    %c0_55 = arith.constant 0 : index
    %c0_56 = arith.constant 0 : index
    %c6_57 = arith.constant 6 : index
    %c0_58 = arith.constant 0 : index
    %47 = vector.load %arg2[%c0_55, %c0_56, %c6_57, %c0_58] : memref<1x4x42x128xbf16, #tpu.memory_space<vmem>>, vector<1x1x30x128xbf16>
    %48 = vector.shape_cast %47 : vector<1x1x30x128xbf16> to vector<30x128xbf16>
    %c8 = arith.constant 8 : index
    %c0_59 = arith.constant 0 : index
    %c0_60 = arith.constant 0 : index
    %49 = vector.load %arg3[%c8, %c0_59, %c0_60] : memref<16x128x128xbf16, #tpu.memory_space<vmem>>, vector<1x128x128xbf16>
    %50 = vector.shape_cast %49 : vector<1x128x128xbf16> to vector<128x128xbf16>
    %cst_61 = arith.constant dense<0.000000e+00> : vector<30x128xf32>
    %51 = tpu.matmul %48, %50, %cst_61 {dimension_numbers = #tpu.dot_dimension_numbers<[1], [0], [0], [1], [0, 0, 1, 1], [], []>} : vector<30x128xbf16>, vector<128x128xbf16>, vector<30x128xf32> -> vector<30x128xf32>
    %52 = arith.addf %46, %51 : vector<30x128xf32>
    %c0_62 = arith.constant 0 : index
    %c1_63 = arith.constant 1 : index
    %c6_64 = arith.constant 6 : index
    %c0_65 = arith.constant 0 : index
    %53 = vector.load %arg2[%c0_62, %c1_63, %c6_64, %c0_65] : memref<1x4x42x128xbf16, #tpu.memory_space<vmem>>, vector<1x1x30x128xbf16>
    %54 = vector.shape_cast %53 : vector<1x1x30x128xbf16> to vector<30x128xbf16>
    %c9 = arith.constant 9 : index
    %c0_66 = arith.constant 0 : index
    %c0_67 = arith.constant 0 : index
    %55 = vector.load %arg3[%c9, %c0_66, %c0_67] : memref<16x128x128xbf16, #tpu.memory_space<vmem>>, vector<1x128x128xbf16>
    %56 = vector.shape_cast %55 : vector<1x128x128xbf16> to vector<128x128xbf16>
    %cst_68 = arith.constant dense<0.000000e+00> : vector<30x128xf32>
    %57 = tpu.matmul %54, %56, %cst_68 {dimension_numbers = #tpu.dot_dimension_numbers<[1], [0], [0], [1], [0, 0, 1, 1], [], []>} : vector<30x128xbf16>, vector<128x128xbf16>, vector<30x128xf32> -> vector<30x128xf32>
    %58 = arith.addf %52, %57 : vector<30x128xf32>
    %c0_69 = arith.constant 0 : index
    %c0_70 = arith.constant 0 : index
    %c7_71 = arith.constant 7 : index
    %c0_72 = arith.constant 0 : index
    %59 = vector.load %arg2[%c0_69, %c0_70, %c7_71, %c0_72] : memref<1x4x42x128xbf16, #tpu.memory_space<vmem>>, vector<1x1x30x128xbf16>
    %60 = vector.shape_cast %59 : vector<1x1x30x128xbf16> to vector<30x128xbf16>
    %c10 = arith.constant 10 : index
    %c0_73 = arith.constant 0 : index
    %c0_74 = arith.constant 0 : index
    %61 = vector.load %arg3[%c10, %c0_73, %c0_74] : memref<16x128x128xbf16, #tpu.memory_space<vmem>>, vector<1x128x128xbf16>
    %62 = vector.shape_cast %61 : vector<1x128x128xbf16> to vector<128x128xbf16>
    %cst_75 = arith.constant dense<0.000000e+00> : vector<30x128xf32>
    %63 = tpu.matmul %60, %62, %cst_75 {dimension_numbers = #tpu.dot_dimension_numbers<[1], [0], [0], [1], [0, 0, 1, 1], [], []>} : vector<30x128xbf16>, vector<128x128xbf16>, vector<30x128xf32> -> vector<30x128xf32>
    %64 = arith.addf %58, %63 : vector<30x128xf32>
    %c0_76 = arith.constant 0 : index
    %c1_77 = arith.constant 1 : index
    %c7_78 = arith.constant 7 : index
    %c0_79 = arith.constant 0 : index
    %65 = vector.load %arg2[%c0_76, %c1_77, %c7_78, %c0_79] : memref<1x4x42x128xbf16, #tpu.memory_space<vmem>>, vector<1x1x30x128xbf16>
    %66 = vector.shape_cast %65 : vector<1x1x30x128xbf16> to vector<30x128xbf16>
    %c11 = arith.constant 11 : index
    %c0_80 = arith.constant 0 : index
    %c0_81 = arith.constant 0 : index
    %67 = vector.load %arg3[%c11, %c0_80, %c0_81] : memref<16x128x128xbf16, #tpu.memory_space<vmem>>, vector<1x128x128xbf16>
    %68 = vector.shape_cast %67 : vector<1x128x128xbf16> to vector<128x128xbf16>
    %cst_82 = arith.constant dense<0.000000e+00> : vector<30x128xf32>
    %69 = tpu.matmul %66, %68, %cst_82 {dimension_numbers = #tpu.dot_dimension_numbers<[1], [0], [0], [1], [0, 0, 1, 1], [], []>} : vector<30x128xbf16>, vector<128x128xbf16>, vector<30x128xf32> -> vector<30x128xf32>
    %70 = arith.addf %64, %69 : vector<30x128xf32>
    %c0_83 = arith.constant 0 : index
    %c2_84 = arith.constant 2 : index
    %c6_85 = arith.constant 6 : index
    %c0_86 = arith.constant 0 : index
    %71 = vector.load %arg2[%c0_83, %c2_84, %c6_85, %c0_86] : memref<1x4x42x128xbf16, #tpu.memory_space<vmem>>, vector<1x1x30x128xbf16>
    %72 = vector.shape_cast %71 : vector<1x1x30x128xbf16> to vector<30x128xbf16>
    %c12 = arith.constant 12 : index
    %c0_87 = arith.constant 0 : index
    %c0_88 = arith.constant 0 : index
    %73 = vector.load %arg3[%c12, %c0_87, %c0_88] : memref<16x128x128xbf16, #tpu.memory_space<vmem>>, vector<1x128x128xbf16>
    %74 = vector.shape_cast %73 : vector<1x128x128xbf16> to vector<128x128xbf16>
    %cst_89 = arith.constant dense<0.000000e+00> : vector<30x128xf32>
    %75 = tpu.matmul %72, %74, %cst_89 {dimension_numbers = #tpu.dot_dimension_numbers<[1], [0], [0], [1], [0, 0, 1, 1], [], []>} : vector<30x128xbf16>, vector<128x128xbf16>, vector<30x128xf32> -> vector<30x128xf32>
    %76 = arith.addf %70, %75 : vector<30x128xf32>
    %c0_90 = arith.constant 0 : index
    %c3_91 = arith.constant 3 : index
    %c6_92 = arith.constant 6 : index
    %c0_93 = arith.constant 0 : index
    %77 = vector.load %arg2[%c0_90, %c3_91, %c6_92, %c0_93] : memref<1x4x42x128xbf16, #tpu.memory_space<vmem>>, vector<1x1x30x128xbf16>
    %78 = vector.shape_cast %77 : vector<1x1x30x128xbf16> to vector<30x128xbf16>
    %c13 = arith.constant 13 : index
    %c0_94 = arith.constant 0 : index
    %c0_95 = arith.constant 0 : index
    %79 = vector.load %arg3[%c13, %c0_94, %c0_95] : memref<16x128x128xbf16, #tpu.memory_space<vmem>>, vector<1x128x128xbf16>
    %80 = vector.shape_cast %79 : vector<1x128x128xbf16> to vector<128x128xbf16>
    %cst_96 = arith.constant dense<0.000000e+00> : vector<30x128xf32>
    %81 = tpu.matmul %78, %80, %cst_96 {dimension_numbers = #tpu.dot_dimension_numbers<[1], [0], [0], [1], [0, 0, 1, 1], [], []>} : vector<30x128xbf16>, vector<128x128xbf16>, vector<30x128xf32> -> vector<30x128xf32>
    %82 = arith.addf %76, %81 : vector<30x128xf32>
    %c0_97 = arith.constant 0 : index
    %c2_98 = arith.constant 2 : index
    %c7_99 = arith.constant 7 : index
    %c0_100 = arith.constant 0 : index
    %83 = vector.load %arg2[%c0_97, %c2_98, %c7_99, %c0_100] : memref<1x4x42x128xbf16, #tpu.memory_space<vmem>>, vector<1x1x30x128xbf16>
    %84 = vector.shape_cast %83 : vector<1x1x30x128xbf16> to vector<30x128xbf16>
    %c14 = arith.constant 14 : index
    %c0_101 = arith.constant 0 : index
    %c0_102 = arith.constant 0 : index
    %85 = vector.load %arg3[%c14, %c0_101, %c0_102] : memref<16x128x128xbf16, #tpu.memory_space<vmem>>, vector<1x128x128xbf16>
    %86 = vector.shape_cast %85 : vector<1x128x128xbf16> to vector<128x128xbf16>
    %cst_103 = arith.constant dense<0.000000e+00> : vector<30x128xf32>
    %87 = tpu.matmul %84, %86, %cst_103 {dimension_numbers = #tpu.dot_dimension_numbers<[1], [0], [0], [1], [0, 0, 1, 1], [], []>} : vector<30x128xbf16>, vector<128x128xbf16>, vector<30x128xf32> -> vector<30x128xf32>
    %88 = arith.addf %82, %87 : vector<30x128xf32>
    %c0_104 = arith.constant 0 : index
    %c3_105 = arith.constant 3 : index
    %c7_106 = arith.constant 7 : index
    %c0_107 = arith.constant 0 : index
    %89 = vector.load %arg2[%c0_104, %c3_105, %c7_106, %c0_107] : memref<1x4x42x128xbf16, #tpu.memory_space<vmem>>, vector<1x1x30x128xbf16>
    %90 = vector.shape_cast %89 : vector<1x1x30x128xbf16> to vector<30x128xbf16>
    %c15 = arith.constant 15 : index
    %c0_108 = arith.constant 0 : index
    %c0_109 = arith.constant 0 : index
    %91 = vector.load %arg3[%c15, %c0_108, %c0_109] : memref<16x128x128xbf16, #tpu.memory_space<vmem>>, vector<1x128x128xbf16>
    %92 = vector.shape_cast %91 : vector<1x128x128xbf16> to vector<128x128xbf16>
    %cst_110 = arith.constant dense<0.000000e+00> : vector<30x128xf32>
    %93 = tpu.matmul %90, %92, %cst_110 {dimension_numbers = #tpu.dot_dimension_numbers<[1], [0], [0], [1], [0, 0, 1, 1], [], []>} : vector<30x128xbf16>, vector<128x128xbf16>, vector<30x128xf32> -> vector<30x128xf32>
    %94 = arith.addf %88, %93 : vector<30x128xf32>
    %95 = tpu.iota {dimensions = array<i32: 0>} : vector<30x1xi32>
    %c6_i32 = arith.constant 6 : i32
    %c0_i32 = arith.constant 0 : i32
    %96 = arith.cmpi eq, %c6_i32, %c0_i32 : i32
    %c1_i32 = arith.constant 1 : i32
    %97 = arith.select %96, %c1_i32, %c6_i32 : i32
    %98 = vector.broadcast %97 : i32 to vector<30x1xi32>
    %99 = arith.remsi %95, %98 : vector<30x1xi32>
    %c0_i32_111 = arith.constant 0 : i32
    %100 = vector.broadcast %c0_i32_111 : i32 to vector<30x1xi32>
    %101 = arith.cmpi ne, %99, %100 : vector<30x1xi32>
    %c0_i32_112 = arith.constant 0 : i32
    %102 = vector.broadcast %c0_i32_112 : i32 to vector<30x1xi32>
    %103 = arith.cmpi slt, %99, %102 : vector<30x1xi32>
    %c0_i32_113 = arith.constant 0 : i32
    %104 = arith.cmpi slt, %97, %c0_i32_113 : i32
    %105 = vector.broadcast %104 : i1 to vector<30x1xi1>
    %106 = vector.broadcast %105 : vector<30x1xi1> to vector<30x1xi1>
    %107 = arith.xori %103, %106 : vector<30x1xi1>
    %108 = arith.andi %107, %101 : vector<30x1xi1>
    %109 = vector.broadcast %97 : i32 to vector<30x1xi32>
    %110 = arith.addi %99, %109 : vector<30x1xi32>
    %111 = arith.select %108, %110, %99 : vector<30x1xi1>, vector<30x1xi32>
    %c5_i32 = arith.constant 5 : i32
    %112 = vector.broadcast %c5_i32 : i32 to vector<30x1xi32>
    %113 = arith.cmpi slt, %111, %112 : vector<30x1xi32>
    %cst_114 = arith.constant 0.000000e+00 : f32
    %114 = vector.shape_cast %113 : vector<30x1xi1> to vector<30x1xi1>
    %115 = vector.broadcast %114 : vector<30x1xi1> to vector<30x128xi1>
    %116 = vector.broadcast %cst_114 : f32 to vector<30x128xf32>
    %117 = arith.select %115, %94, %116 : vector<30x128xi1>, vector<30x128xf32>
    %cst_115 = arith.constant dense<0.000000e+00> : vector<128xf32>
    %118 = vector.multi_reduction <add>, %117, %cst_115 [0] : vector<30x128xf32> to vector<128xf32>
    %119 = vector.shape_cast %118 : vector<128xf32> to vector<1x128xf32>
    %cst_116 = arith.constant 4.000000e-02 : f32
    %120 = vector.broadcast %cst_116 : f32 to vector<1x128xf32>
    %121 = arith.mulf %119, %120 : vector<1x128xf32>
    %122 = vector.broadcast %121 : vector<1x128xf32> to vector<30x128xf32>
    %123 = arith.subf %94, %122 : vector<30x128xf32>
    %124 = arith.mulf %123, %123 : vector<30x128xf32>
    %cst_117 = arith.constant 0.000000e+00 : f32
    %125 = vector.shape_cast %113 : vector<30x1xi1> to vector<30x1xi1>
    %126 = vector.broadcast %125 : vector<30x1xi1> to vector<30x128xi1>
    %127 = vector.broadcast %cst_117 : f32 to vector<30x128xf32>
    %128 = arith.select %126, %124, %127 : vector<30x128xi1>, vector<30x128xf32>
    %cst_118 = arith.constant dense<0.000000e+00> : vector<128xf32>
    %129 = vector.multi_reduction <add>, %128, %cst_118 [0] : vector<30x128xf32> to vector<128xf32>
    %130 = vector.shape_cast %129 : vector<128xf32> to vector<1x128xf32>
    %cst_119 = arith.constant 4.000000e-02 : f32
    %131 = vector.broadcast %cst_119 : f32 to vector<1x128xf32>
    %132 = arith.mulf %130, %131 : vector<1x128xf32>
    %cst_120 = arith.constant 9.99999974E-6 : f32
    %133 = vector.broadcast %cst_120 : f32 to vector<1x128xf32>
    %134 = arith.addf %132, %133 : vector<1x128xf32>
    %135 = math.rsqrt %134 : vector<1x128xf32>
    %136 = vector.broadcast %135 : vector<1x128xf32> to vector<30x128xf32>
    %137 = arith.mulf %123, %136 : vector<30x128xf32>
    %cst_121 = arith.constant 0.000000e+00 : f32
    %138 = vector.broadcast %cst_121 : f32 to vector<30x128xf32>
    %139 = arith.cmpf oge, %137, %138 : vector<30x128xf32>
    %cst_122 = arith.constant 2.000000e-01 : f32
    %140 = vector.broadcast %cst_122 : f32 to vector<30x128xf32>
    %141 = arith.mulf %140, %137 : vector<30x128xf32>
    %142 = arith.select %139, %137, %141 : vector<30x128xi1>, vector<30x128xf32>
    %cst_123 = arith.constant 0.000000e+00 : f32
    %143 = vector.shape_cast %113 : vector<30x1xi1> to vector<30x1xi1>
    %144 = vector.broadcast %143 : vector<30x1xi1> to vector<30x128xi1>
    %145 = vector.broadcast %cst_123 : f32 to vector<30x128xf32>
    %146 = arith.select %144, %142, %145 : vector<30x128xi1>, vector<30x128xf32>
    %147 = arith.truncf %146 : vector<30x128xf32> to vector<30x128xbf16>
    %c0_124 = arith.constant 0 : index
    %c0_125 = arith.constant 0 : index
    %c0_126 = arith.constant 0 : index
    %148 = vector.load %arg5[%c0_124, %c0_125, %c0_126] : memref<1x30x128xbf16, #tpu.memory_space<vmem>>, vector<1x30x128xbf16>
    %149 = vector.shape_cast %148 : vector<1x30x128xbf16> to vector<30x128xbf16>
    %150 = vector.shape_cast %147 : vector<30x128xbf16> to vector<1x30x128xbf16>
    tpu.vector_store %arg5[%c0_124, %c0_125, %c0_126], %150 {strides = array<i32>} : memref<1x30x128xbf16, #tpu.memory_space<vmem>>, vector<1x30x128xbf16>,
    return
  }
  func.func @transform_0(%arg0: i32, %arg1: i32) -> (i32, i32, i32, i32) {
    %c0_i32 = arith.constant 0 : i32
    %c0_i32_0 = arith.constant 0 : i32
    %c0_i32_1 = arith.constant 0 : i32
    %c0_i32_2 = arith.constant 0 : i32
    return %arg1, %c0_i32, %c0_i32_0, %c0_i32_1 : i32, i32, i32, i32
  }
  func.func @transform_1(%arg0: i32, %arg1: i32) -> (i32, i32, i32) {
    %c0_i32 = arith.constant 0 : i32
    %c0_i32_0 = arith.constant 0 : i32
    %c0_i32_1 = arith.constant 0 : i32
    return %c0_i32, %c0_i32_0, %arg0 : i32, i32, i32
  }
  func.func @transform_2(%arg0: i32, %arg1: i32) -> (i32, i32) {
    %c0_i32 = arith.constant 0 : i32
    %c0_i32_0 = arith.constant 0 : i32
    return %c0_i32, %arg0 : i32, i32
  }
  func.func @transform_3(%arg0: i32, %arg1: i32) -> (i32, i32, i32) {
    %c0_i32 = arith.constant 0 : i32
    %c0_i32_0 = arith.constant 0 : i32
    return %arg1, %c0_i32, %arg0 : i32, i32, i32
  }
}

module attributes {stable_mosaic.version = 11 : i64} {
  func.func @_conv_in_lrelu_kernel(%arg0: i32, %arg1: i32, %arg2: memref<1x4x20x128xbf16, #tpu.memory_space<vmem>>, %arg3: memref<16x128x128xbf16, #tpu.memory_space<vmem>>, %arg4: memref<1x128xf32, #tpu.memory_space<vmem>>, %arg5: memref<1x12x128xbf16, #tpu.memory_space<vmem>>) attributes {dimension_semantics = [#tpu.dimension_semantics<parallel>, #tpu.dimension_semantics<parallel>], iteration_bounds = array<i64: 1, 2>, scalar_prefetch = 0 : i64, scratch_operands = 0 : i64, tpu.core_type = #tpu.core_type<tc>, window_params = [{transform_indices = @transform_0, window_bounds = array<i64: 1, 4, 20, 128>}, {transform_indices = @transform_1, window_bounds = array<i64: 16, 128, 128>}, {transform_indices = @transform_2, window_bounds = array<i64: 1, 128>}, {transform_indices = @transform_3, window_bounds = array<i64: 1, 12, 128>}]} {
    %c0 = arith.constant 0 : index
    %c0_0 = arith.constant 0 : index
    %c0_1 = arith.constant 0 : index
    %c0_2 = arith.constant 0 : index
    %0 = vector.load %arg2[%c0, %c0_0, %c0_1, %c0_2] : memref<1x4x20x128xbf16, #tpu.memory_space<vmem>>, vector<1x1x12x128xbf16>
    %1 = vector.shape_cast %0 : vector<1x1x12x128xbf16> to vector<12x128xbf16>
    %c0_3 = arith.constant 0 : index
    %c0_4 = arith.constant 0 : index
    %c0_5 = arith.constant 0 : index
    %2 = vector.load %arg3[%c0_3, %c0_4, %c0_5] : memref<16x128x128xbf16, #tpu.memory_space<vmem>>, vector<1x128x128xbf16>
    %3 = vector.shape_cast %2 : vector<1x128x128xbf16> to vector<128x128xbf16>
    %cst = arith.constant dense<0.000000e+00> : vector<12x128xf32>
    %4 = tpu.matmul %1, %3, %cst {dimension_numbers = #tpu.dot_dimension_numbers<[1], [0], [0], [1], [0, 0, 1, 1], [], []>} : vector<12x128xbf16>, vector<128x128xbf16>, vector<12x128xf32> -> vector<12x128xf32>
    %c0_6 = arith.constant 0 : index
    %c1 = arith.constant 1 : index
    %c0_7 = arith.constant 0 : index
    %c0_8 = arith.constant 0 : index
    %5 = vector.load %arg2[%c0_6, %c1, %c0_7, %c0_8] : memref<1x4x20x128xbf16, #tpu.memory_space<vmem>>, vector<1x1x12x128xbf16>
    %6 = vector.shape_cast %5 : vector<1x1x12x128xbf16> to vector<12x128xbf16>
    %c1_9 = arith.constant 1 : index
    %c0_10 = arith.constant 0 : index
    %c0_11 = arith.constant 0 : index
    %7 = vector.load %arg3[%c1_9, %c0_10, %c0_11] : memref<16x128x128xbf16, #tpu.memory_space<vmem>>, vector<1x128x128xbf16>
    %8 = vector.shape_cast %7 : vector<1x128x128xbf16> to vector<128x128xbf16>
    %cst_12 = arith.constant dense<0.000000e+00> : vector<12x128xf32>
    %9 = tpu.matmul %6, %8, %cst_12 {dimension_numbers = #tpu.dot_dimension_numbers<[1], [0], [0], [1], [0, 0, 1, 1], [], []>} : vector<12x128xbf16>, vector<128x128xbf16>, vector<12x128xf32> -> vector<12x128xf32>
    %10 = arith.addf %4, %9 : vector<12x128xf32>
    %c0_13 = arith.constant 0 : index
    %c0_14 = arith.constant 0 : index
    %c1_15 = arith.constant 1 : index
    %c0_16 = arith.constant 0 : index
    %11 = vector.load %arg2[%c0_13, %c0_14, %c1_15, %c0_16] : memref<1x4x20x128xbf16, #tpu.memory_space<vmem>>, vector<1x1x12x128xbf16>
    %12 = vector.shape_cast %11 : vector<1x1x12x128xbf16> to vector<12x128xbf16>
    %c2 = arith.constant 2 : index
    %c0_17 = arith.constant 0 : index
    %c0_18 = arith.constant 0 : index
    %13 = vector.load %arg3[%c2, %c0_17, %c0_18] : memref<16x128x128xbf16, #tpu.memory_space<vmem>>, vector<1x128x128xbf16>
    %14 = vector.shape_cast %13 : vector<1x128x128xbf16> to vector<128x128xbf16>
    %cst_19 = arith.constant dense<0.000000e+00> : vector<12x128xf32>
    %15 = tpu.matmul %12, %14, %cst_19 {dimension_numbers = #tpu.dot_dimension_numbers<[1], [0], [0], [1], [0, 0, 1, 1], [], []>} : vector<12x128xbf16>, vector<128x128xbf16>, vector<12x128xf32> -> vector<12x128xf32>
    %16 = arith.addf %10, %15 : vector<12x128xf32>
    %c0_20 = arith.constant 0 : index
    %c1_21 = arith.constant 1 : index
    %c1_22 = arith.constant 1 : index
    %c0_23 = arith.constant 0 : index
    %17 = vector.load %arg2[%c0_20, %c1_21, %c1_22, %c0_23] : memref<1x4x20x128xbf16, #tpu.memory_space<vmem>>, vector<1x1x12x128xbf16>
    %18 = vector.shape_cast %17 : vector<1x1x12x128xbf16> to vector<12x128xbf16>
    %c3 = arith.constant 3 : index
    %c0_24 = arith.constant 0 : index
    %c0_25 = arith.constant 0 : index
    %19 = vector.load %arg3[%c3, %c0_24, %c0_25] : memref<16x128x128xbf16, #tpu.memory_space<vmem>>, vector<1x128x128xbf16>
    %20 = vector.shape_cast %19 : vector<1x128x128xbf16> to vector<128x128xbf16>
    %cst_26 = arith.constant dense<0.000000e+00> : vector<12x128xf32>
    %21 = tpu.matmul %18, %20, %cst_26 {dimension_numbers = #tpu.dot_dimension_numbers<[1], [0], [0], [1], [0, 0, 1, 1], [], []>} : vector<12x128xbf16>, vector<128x128xbf16>, vector<12x128xf32> -> vector<12x128xf32>
    %22 = arith.addf %16, %21 : vector<12x128xf32>
    %c0_27 = arith.constant 0 : index
    %c2_28 = arith.constant 2 : index
    %c0_29 = arith.constant 0 : index
    %c0_30 = arith.constant 0 : index
    %23 = vector.load %arg2[%c0_27, %c2_28, %c0_29, %c0_30] : memref<1x4x20x128xbf16, #tpu.memory_space<vmem>>, vector<1x1x12x128xbf16>
    %24 = vector.shape_cast %23 : vector<1x1x12x128xbf16> to vector<12x128xbf16>
    %c4 = arith.constant 4 : index
    %c0_31 = arith.constant 0 : index
    %c0_32 = arith.constant 0 : index
    %25 = vector.load %arg3[%c4, %c0_31, %c0_32] : memref<16x128x128xbf16, #tpu.memory_space<vmem>>, vector<1x128x128xbf16>
    %26 = vector.shape_cast %25 : vector<1x128x128xbf16> to vector<128x128xbf16>
    %cst_33 = arith.constant dense<0.000000e+00> : vector<12x128xf32>
    %27 = tpu.matmul %24, %26, %cst_33 {dimension_numbers = #tpu.dot_dimension_numbers<[1], [0], [0], [1], [0, 0, 1, 1], [], []>} : vector<12x128xbf16>, vector<128x128xbf16>, vector<12x128xf32> -> vector<12x128xf32>
    %28 = arith.addf %22, %27 : vector<12x128xf32>
    %c0_34 = arith.constant 0 : index
    %c3_35 = arith.constant 3 : index
    %c0_36 = arith.constant 0 : index
    %c0_37 = arith.constant 0 : index
    %29 = vector.load %arg2[%c0_34, %c3_35, %c0_36, %c0_37] : memref<1x4x20x128xbf16, #tpu.memory_space<vmem>>, vector<1x1x12x128xbf16>
    %30 = vector.shape_cast %29 : vector<1x1x12x128xbf16> to vector<12x128xbf16>
    %c5 = arith.constant 5 : index
    %c0_38 = arith.constant 0 : index
    %c0_39 = arith.constant 0 : index
    %31 = vector.load %arg3[%c5, %c0_38, %c0_39] : memref<16x128x128xbf16, #tpu.memory_space<vmem>>, vector<1x128x128xbf16>
    %32 = vector.shape_cast %31 : vector<1x128x128xbf16> to vector<128x128xbf16>
    %cst_40 = arith.constant dense<0.000000e+00> : vector<12x128xf32>
    %33 = tpu.matmul %30, %32, %cst_40 {dimension_numbers = #tpu.dot_dimension_numbers<[1], [0], [0], [1], [0, 0, 1, 1], [], []>} : vector<12x128xbf16>, vector<128x128xbf16>, vector<12x128xf32> -> vector<12x128xf32>
    %34 = arith.addf %28, %33 : vector<12x128xf32>
    %c0_41 = arith.constant 0 : index
    %c2_42 = arith.constant 2 : index
    %c1_43 = arith.constant 1 : index
    %c0_44 = arith.constant 0 : index
    %35 = vector.load %arg2[%c0_41, %c2_42, %c1_43, %c0_44] : memref<1x4x20x128xbf16, #tpu.memory_space<vmem>>, vector<1x1x12x128xbf16>
    %36 = vector.shape_cast %35 : vector<1x1x12x128xbf16> to vector<12x128xbf16>
    %c6 = arith.constant 6 : index
    %c0_45 = arith.constant 0 : index
    %c0_46 = arith.constant 0 : index
    %37 = vector.load %arg3[%c6, %c0_45, %c0_46] : memref<16x128x128xbf16, #tpu.memory_space<vmem>>, vector<1x128x128xbf16>
    %38 = vector.shape_cast %37 : vector<1x128x128xbf16> to vector<128x128xbf16>
    %cst_47 = arith.constant dense<0.000000e+00> : vector<12x128xf32>
    %39 = tpu.matmul %36, %38, %cst_47 {dimension_numbers = #tpu.dot_dimension_numbers<[1], [0], [0], [1], [0, 0, 1, 1], [], []>} : vector<12x128xbf16>, vector<128x128xbf16>, vector<12x128xf32> -> vector<12x128xf32>
    %40 = arith.addf %34, %39 : vector<12x128xf32>
    %c0_48 = arith.constant 0 : index
    %c3_49 = arith.constant 3 : index
    %c1_50 = arith.constant 1 : index
    %c0_51 = arith.constant 0 : index
    %41 = vector.load %arg2[%c0_48, %c3_49, %c1_50, %c0_51] : memref<1x4x20x128xbf16, #tpu.memory_space<vmem>>, vector<1x1x12x128xbf16>
    %42 = vector.shape_cast %41 : vector<1x1x12x128xbf16> to vector<12x128xbf16>
    %c7 = arith.constant 7 : index
    %c0_52 = arith.constant 0 : index
    %c0_53 = arith.constant 0 : index
    %43 = vector.load %arg3[%c7, %c0_52, %c0_53] : memref<16x128x128xbf16, #tpu.memory_space<vmem>>, vector<1x128x128xbf16>
    %44 = vector.shape_cast %43 : vector<1x128x128xbf16> to vector<128x128xbf16>
    %cst_54 = arith.constant dense<0.000000e+00> : vector<12x128xf32>
    %45 = tpu.matmul %42, %44, %cst_54 {dimension_numbers = #tpu.dot_dimension_numbers<[1], [0], [0], [1], [0, 0, 1, 1], [], []>} : vector<12x128xbf16>, vector<128x128xbf16>, vector<12x128xf32> -> vector<12x128xf32>
    %46 = arith.addf %40, %45 : vector<12x128xf32>
    %c0_55 = arith.constant 0 : index
    %c0_56 = arith.constant 0 : index
    %c4_57 = arith.constant 4 : index
    %c0_58 = arith.constant 0 : index
    %47 = vector.load %arg2[%c0_55, %c0_56, %c4_57, %c0_58] : memref<1x4x20x128xbf16, #tpu.memory_space<vmem>>, vector<1x1x12x128xbf16>
    %48 = vector.shape_cast %47 : vector<1x1x12x128xbf16> to vector<12x128xbf16>
    %c8 = arith.constant 8 : index
    %c0_59 = arith.constant 0 : index
    %c0_60 = arith.constant 0 : index
    %49 = vector.load %arg3[%c8, %c0_59, %c0_60] : memref<16x128x128xbf16, #tpu.memory_space<vmem>>, vector<1x128x128xbf16>
    %50 = vector.shape_cast %49 : vector<1x128x128xbf16> to vector<128x128xbf16>
    %cst_61 = arith.constant dense<0.000000e+00> : vector<12x128xf32>
    %51 = tpu.matmul %48, %50, %cst_61 {dimension_numbers = #tpu.dot_dimension_numbers<[1], [0], [0], [1], [0, 0, 1, 1], [], []>} : vector<12x128xbf16>, vector<128x128xbf16>, vector<12x128xf32> -> vector<12x128xf32>
    %52 = arith.addf %46, %51 : vector<12x128xf32>
    %c0_62 = arith.constant 0 : index
    %c1_63 = arith.constant 1 : index
    %c4_64 = arith.constant 4 : index
    %c0_65 = arith.constant 0 : index
    %53 = vector.load %arg2[%c0_62, %c1_63, %c4_64, %c0_65] : memref<1x4x20x128xbf16, #tpu.memory_space<vmem>>, vector<1x1x12x128xbf16>
    %54 = vector.shape_cast %53 : vector<1x1x12x128xbf16> to vector<12x128xbf16>
    %c9 = arith.constant 9 : index
    %c0_66 = arith.constant 0 : index
    %c0_67 = arith.constant 0 : index
    %55 = vector.load %arg3[%c9, %c0_66, %c0_67] : memref<16x128x128xbf16, #tpu.memory_space<vmem>>, vector<1x128x128xbf16>
    %56 = vector.shape_cast %55 : vector<1x128x128xbf16> to vector<128x128xbf16>
    %cst_68 = arith.constant dense<0.000000e+00> : vector<12x128xf32>
    %57 = tpu.matmul %54, %56, %cst_68 {dimension_numbers = #tpu.dot_dimension_numbers<[1], [0], [0], [1], [0, 0, 1, 1], [], []>} : vector<12x128xbf16>, vector<128x128xbf16>, vector<12x128xf32> -> vector<12x128xf32>
    %58 = arith.addf %52, %57 : vector<12x128xf32>
    %c0_69 = arith.constant 0 : index
    %c0_70 = arith.constant 0 : index
    %c5_71 = arith.constant 5 : index
    %c0_72 = arith.constant 0 : index
    %59 = vector.load %arg2[%c0_69, %c0_70, %c5_71, %c0_72] : memref<1x4x20x128xbf16, #tpu.memory_space<vmem>>, vector<1x1x12x128xbf16>
    %60 = vector.shape_cast %59 : vector<1x1x12x128xbf16> to vector<12x128xbf16>
    %c10 = arith.constant 10 : index
    %c0_73 = arith.constant 0 : index
    %c0_74 = arith.constant 0 : index
    %61 = vector.load %arg3[%c10, %c0_73, %c0_74] : memref<16x128x128xbf16, #tpu.memory_space<vmem>>, vector<1x128x128xbf16>
    %62 = vector.shape_cast %61 : vector<1x128x128xbf16> to vector<128x128xbf16>
    %cst_75 = arith.constant dense<0.000000e+00> : vector<12x128xf32>
    %63 = tpu.matmul %60, %62, %cst_75 {dimension_numbers = #tpu.dot_dimension_numbers<[1], [0], [0], [1], [0, 0, 1, 1], [], []>} : vector<12x128xbf16>, vector<128x128xbf16>, vector<12x128xf32> -> vector<12x128xf32>
    %64 = arith.addf %58, %63 : vector<12x128xf32>
    %c0_76 = arith.constant 0 : index
    %c1_77 = arith.constant 1 : index
    %c5_78 = arith.constant 5 : index
    %c0_79 = arith.constant 0 : index
    %65 = vector.load %arg2[%c0_76, %c1_77, %c5_78, %c0_79] : memref<1x4x20x128xbf16, #tpu.memory_space<vmem>>, vector<1x1x12x128xbf16>
    %66 = vector.shape_cast %65 : vector<1x1x12x128xbf16> to vector<12x128xbf16>
    %c11 = arith.constant 11 : index
    %c0_80 = arith.constant 0 : index
    %c0_81 = arith.constant 0 : index
    %67 = vector.load %arg3[%c11, %c0_80, %c0_81] : memref<16x128x128xbf16, #tpu.memory_space<vmem>>, vector<1x128x128xbf16>
    %68 = vector.shape_cast %67 : vector<1x128x128xbf16> to vector<128x128xbf16>
    %cst_82 = arith.constant dense<0.000000e+00> : vector<12x128xf32>
    %69 = tpu.matmul %66, %68, %cst_82 {dimension_numbers = #tpu.dot_dimension_numbers<[1], [0], [0], [1], [0, 0, 1, 1], [], []>} : vector<12x128xbf16>, vector<128x128xbf16>, vector<12x128xf32> -> vector<12x128xf32>
    %70 = arith.addf %64, %69 : vector<12x128xf32>
    %c0_83 = arith.constant 0 : index
    %c2_84 = arith.constant 2 : index
    %c4_85 = arith.constant 4 : index
    %c0_86 = arith.constant 0 : index
    %71 = vector.load %arg2[%c0_83, %c2_84, %c4_85, %c0_86] : memref<1x4x20x128xbf16, #tpu.memory_space<vmem>>, vector<1x1x12x128xbf16>
    %72 = vector.shape_cast %71 : vector<1x1x12x128xbf16> to vector<12x128xbf16>
    %c12 = arith.constant 12 : index
    %c0_87 = arith.constant 0 : index
    %c0_88 = arith.constant 0 : index
    %73 = vector.load %arg3[%c12, %c0_87, %c0_88] : memref<16x128x128xbf16, #tpu.memory_space<vmem>>, vector<1x128x128xbf16>
    %74 = vector.shape_cast %73 : vector<1x128x128xbf16> to vector<128x128xbf16>
    %cst_89 = arith.constant dense<0.000000e+00> : vector<12x128xf32>
    %75 = tpu.matmul %72, %74, %cst_89 {dimension_numbers = #tpu.dot_dimension_numbers<[1], [0], [0], [1], [0, 0, 1, 1], [], []>} : vector<12x128xbf16>, vector<128x128xbf16>, vector<12x128xf32> -> vector<12x128xf32>
    %76 = arith.addf %70, %75 : vector<12x128xf32>
    %c0_90 = arith.constant 0 : index
    %c3_91 = arith.constant 3 : index
    %c4_92 = arith.constant 4 : index
    %c0_93 = arith.constant 0 : index
    %77 = vector.load %arg2[%c0_90, %c3_91, %c4_92, %c0_93] : memref<1x4x20x128xbf16, #tpu.memory_space<vmem>>, vector<1x1x12x128xbf16>
    %78 = vector.shape_cast %77 : vector<1x1x12x128xbf16> to vector<12x128xbf16>
    %c13 = arith.constant 13 : index
    %c0_94 = arith.constant 0 : index
    %c0_95 = arith.constant 0 : index
    %79 = vector.load %arg3[%c13, %c0_94, %c0_95] : memref<16x128x128xbf16, #tpu.memory_space<vmem>>, vector<1x128x128xbf16>
    %80 = vector.shape_cast %79 : vector<1x128x128xbf16> to vector<128x128xbf16>
    %cst_96 = arith.constant dense<0.000000e+00> : vector<12x128xf32>
    %81 = tpu.matmul %78, %80, %cst_96 {dimension_numbers = #tpu.dot_dimension_numbers<[1], [0], [0], [1], [0, 0, 1, 1], [], []>} : vector<12x128xbf16>, vector<128x128xbf16>, vector<12x128xf32> -> vector<12x128xf32>
    %82 = arith.addf %76, %81 : vector<12x128xf32>
    %c0_97 = arith.constant 0 : index
    %c2_98 = arith.constant 2 : index
    %c5_99 = arith.constant 5 : index
    %c0_100 = arith.constant 0 : index
    %83 = vector.load %arg2[%c0_97, %c2_98, %c5_99, %c0_100] : memref<1x4x20x128xbf16, #tpu.memory_space<vmem>>, vector<1x1x12x128xbf16>
    %84 = vector.shape_cast %83 : vector<1x1x12x128xbf16> to vector<12x128xbf16>
    %c14 = arith.constant 14 : index
    %c0_101 = arith.constant 0 : index
    %c0_102 = arith.constant 0 : index
    %85 = vector.load %arg3[%c14, %c0_101, %c0_102] : memref<16x128x128xbf16, #tpu.memory_space<vmem>>, vector<1x128x128xbf16>
    %86 = vector.shape_cast %85 : vector<1x128x128xbf16> to vector<128x128xbf16>
    %cst_103 = arith.constant dense<0.000000e+00> : vector<12x128xf32>
    %87 = tpu.matmul %84, %86, %cst_103 {dimension_numbers = #tpu.dot_dimension_numbers<[1], [0], [0], [1], [0, 0, 1, 1], [], []>} : vector<12x128xbf16>, vector<128x128xbf16>, vector<12x128xf32> -> vector<12x128xf32>
    %88 = arith.addf %82, %87 : vector<12x128xf32>
    %c0_104 = arith.constant 0 : index
    %c3_105 = arith.constant 3 : index
    %c5_106 = arith.constant 5 : index
    %c0_107 = arith.constant 0 : index
    %89 = vector.load %arg2[%c0_104, %c3_105, %c5_106, %c0_107] : memref<1x4x20x128xbf16, #tpu.memory_space<vmem>>, vector<1x1x12x128xbf16>
    %90 = vector.shape_cast %89 : vector<1x1x12x128xbf16> to vector<12x128xbf16>
    %c15 = arith.constant 15 : index
    %c0_108 = arith.constant 0 : index
    %c0_109 = arith.constant 0 : index
    %91 = vector.load %arg3[%c15, %c0_108, %c0_109] : memref<16x128x128xbf16, #tpu.memory_space<vmem>>, vector<1x128x128xbf16>
    %92 = vector.shape_cast %91 : vector<1x128x128xbf16> to vector<128x128xbf16>
    %cst_110 = arith.constant dense<0.000000e+00> : vector<12x128xf32>
    %93 = tpu.matmul %90, %92, %cst_110 {dimension_numbers = #tpu.dot_dimension_numbers<[1], [0], [0], [1], [0, 0, 1, 1], [], []>} : vector<12x128xbf16>, vector<128x128xbf16>, vector<12x128xf32> -> vector<12x128xf32>
    %94 = arith.addf %88, %93 : vector<12x128xf32>
    %95 = tpu.iota {dimensions = array<i32: 0>} : vector<12x1xi32>
    %c4_i32 = arith.constant 4 : i32
    %c0_i32 = arith.constant 0 : i32
    %96 = arith.cmpi eq, %c4_i32, %c0_i32 : i32
    %c1_i32 = arith.constant 1 : i32
    %97 = arith.select %96, %c1_i32, %c4_i32 : i32
    %98 = vector.broadcast %97 : i32 to vector<12x1xi32>
    %99 = arith.remsi %95, %98 : vector<12x1xi32>
    %c0_i32_111 = arith.constant 0 : i32
    %100 = vector.broadcast %c0_i32_111 : i32 to vector<12x1xi32>
    %101 = arith.cmpi ne, %99, %100 : vector<12x1xi32>
    %c0_i32_112 = arith.constant 0 : i32
    %102 = vector.broadcast %c0_i32_112 : i32 to vector<12x1xi32>
    %103 = arith.cmpi slt, %99, %102 : vector<12x1xi32>
    %c0_i32_113 = arith.constant 0 : i32
    %104 = arith.cmpi slt, %97, %c0_i32_113 : i32
    %105 = vector.broadcast %104 : i1 to vector<12x1xi1>
    %106 = vector.broadcast %105 : vector<12x1xi1> to vector<12x1xi1>
    %107 = arith.xori %103, %106 : vector<12x1xi1>
    %108 = arith.andi %107, %101 : vector<12x1xi1>
    %109 = vector.broadcast %97 : i32 to vector<12x1xi32>
    %110 = arith.addi %99, %109 : vector<12x1xi32>
    %111 = arith.select %108, %110, %99 : vector<12x1xi1>, vector<12x1xi32>
    %c3_i32 = arith.constant 3 : i32
    %112 = vector.broadcast %c3_i32 : i32 to vector<12x1xi32>
    %113 = arith.cmpi slt, %111, %112 : vector<12x1xi32>
    %cst_114 = arith.constant 0.000000e+00 : f32
    %114 = vector.shape_cast %113 : vector<12x1xi1> to vector<12x1xi1>
    %115 = vector.broadcast %114 : vector<12x1xi1> to vector<12x128xi1>
    %116 = vector.broadcast %cst_114 : f32 to vector<12x128xf32>
    %117 = arith.select %115, %94, %116 : vector<12x128xi1>, vector<12x128xf32>
    %cst_115 = arith.constant dense<0.000000e+00> : vector<128xf32>
    %118 = vector.multi_reduction <add>, %117, %cst_115 [0] : vector<12x128xf32> to vector<128xf32>
    %119 = vector.shape_cast %118 : vector<128xf32> to vector<1x128xf32>
    %cst_116 = arith.constant 0.111111112 : f32
    %120 = vector.broadcast %cst_116 : f32 to vector<1x128xf32>
    %121 = arith.mulf %119, %120 : vector<1x128xf32>
    %122 = vector.broadcast %121 : vector<1x128xf32> to vector<12x128xf32>
    %123 = arith.subf %94, %122 : vector<12x128xf32>
    %124 = arith.mulf %123, %123 : vector<12x128xf32>
    %cst_117 = arith.constant 0.000000e+00 : f32
    %125 = vector.shape_cast %113 : vector<12x1xi1> to vector<12x1xi1>
    %126 = vector.broadcast %125 : vector<12x1xi1> to vector<12x128xi1>
    %127 = vector.broadcast %cst_117 : f32 to vector<12x128xf32>
    %128 = arith.select %126, %124, %127 : vector<12x128xi1>, vector<12x128xf32>
    %cst_118 = arith.constant dense<0.000000e+00> : vector<128xf32>
    %129 = vector.multi_reduction <add>, %128, %cst_118 [0] : vector<12x128xf32> to vector<128xf32>
    %130 = vector.shape_cast %129 : vector<128xf32> to vector<1x128xf32>
    %cst_119 = arith.constant 0.111111112 : f32
    %131 = vector.broadcast %cst_119 : f32 to vector<1x128xf32>
    %132 = arith.mulf %130, %131 : vector<1x128xf32>
    %cst_120 = arith.constant 9.99999974E-6 : f32
    %133 = vector.broadcast %cst_120 : f32 to vector<1x128xf32>
    %134 = arith.addf %132, %133 : vector<1x128xf32>
    %135 = math.rsqrt %134 : vector<1x128xf32>
    %136 = vector.broadcast %135 : vector<1x128xf32> to vector<12x128xf32>
    %137 = arith.mulf %123, %136 : vector<12x128xf32>
    %cst_121 = arith.constant 0.000000e+00 : f32
    %138 = vector.broadcast %cst_121 : f32 to vector<12x128xf32>
    %139 = arith.cmpf oge, %137, %138 : vector<12x128xf32>
    %cst_122 = arith.constant 2.000000e-01 : f32
    %140 = vector.broadcast %cst_122 : f32 to vector<12x128xf32>
    %141 = arith.mulf %140, %137 : vector<12x128xf32>
    %142 = arith.select %139, %137, %141 : vector<12x128xi1>, vector<12x128xf32>
    %cst_123 = arith.constant 0.000000e+00 : f32
    %143 = vector.shape_cast %113 : vector<12x1xi1> to vector<12x1xi1>
    %144 = vector.broadcast %143 : vector<12x1xi1> to vector<12x128xi1>
    %145 = vector.broadcast %cst_123 : f32 to vector<12x128xf32>
    %146 = arith.select %144, %142, %145 : vector<12x128xi1>, vector<12x128xf32>
    %147 = arith.truncf %146 : vector<12x128xf32> to vector<12x128xbf16>
    %c0_124 = arith.constant 0 : index
    %c0_125 = arith.constant 0 : index
    %c0_126 = arith.constant 0 : index
    %148 = vector.load %arg5[%c0_124, %c0_125, %c0_126] : memref<1x12x128xbf16, #tpu.memory_space<vmem>>, vector<1x12x128xbf16>
    %149 = vector.shape_cast %148 : vector<1x12x128xbf16> to vector<12x128xbf16>
    %150 = vector.shape_cast %147 : vector<12x128xbf16> to vector<1x12x128xbf16>
    tpu.vector_store %arg5[%c0_124, %c0_125, %c0_126], %150 {strides = array<i32>} : memref<1x12x128xbf16, #tpu.memory_space<vmem>>, vector<1x12x128xbf16>,
    return
  }
  func.func @transform_0(%arg0: i32, %arg1: i32) -> (i32, i32, i32, i32) {
    %c0_i32 = arith.constant 0 : i32
    %c0_i32_0 = arith.constant 0 : i32
    %c0_i32_1 = arith.constant 0 : i32
    %c0_i32_2 = arith.constant 0 : i32
    return %arg1, %c0_i32, %c0_i32_0, %c0_i32_1 : i32, i32, i32, i32
  }
  func.func @transform_1(%arg0: i32, %arg1: i32) -> (i32, i32, i32) {
    %c0_i32 = arith.constant 0 : i32
    %c0_i32_0 = arith.constant 0 : i32
    %c0_i32_1 = arith.constant 0 : i32
    return %c0_i32, %c0_i32_0, %arg0 : i32, i32, i32
  }
  func.func @transform_2(%arg0: i32, %arg1: i32) -> (i32, i32) {
    %c0_i32 = arith.constant 0 : i32
    %c0_i32_0 = arith.constant 0 : i32
    return %c0_i32, %arg0 : i32, i32
  }
  func.func @transform_3(%arg0: i32, %arg1: i32) -> (i32, i32, i32) {
    %c0_i32 = arith.constant 0 : i32
    %c0_i32_0 = arith.constant 0 : i32
    return %arg1, %c0_i32, %arg0 : i32, i32, i32
  }
}

module attributes {stable_mosaic.version = 11 : i64} {
  func.func @_conv_in_lrelu_kernel(%arg0: i32, %arg1: i32, %arg2: memref<1x1x56x128xbf16, #tpu.memory_space<vmem>>, %arg3: memref<16x128x128xbf16, #tpu.memory_space<vmem>>, %arg4: memref<1x128xf32, #tpu.memory_space<vmem>>, %arg5: memref<1x28x128xbf16, #tpu.memory_space<vmem>>) attributes {dimension_semantics = [#tpu.dimension_semantics<parallel>, #tpu.dimension_semantics<parallel>], iteration_bounds = array<i64: 1, 2>, scalar_prefetch = 0 : i64, scratch_operands = 0 : i64, tpu.core_type = #tpu.core_type<tc>, window_params = [{transform_indices = @transform_0, window_bounds = array<i64: 1, 1, 56, 128>}, {transform_indices = @transform_1, window_bounds = array<i64: 16, 128, 128>}, {transform_indices = @transform_2, window_bounds = array<i64: 1, 128>}, {transform_indices = @transform_3, window_bounds = array<i64: 1, 28, 128>}]} {
    %c0 = arith.constant 0 : index
    %c0_0 = arith.constant 0 : index
    %c0_1 = arith.constant 0 : index
    %c0_2 = arith.constant 0 : index
    %0 = vector.load %arg2[%c0, %c0_0, %c0_1, %c0_2] : memref<1x1x56x128xbf16, #tpu.memory_space<vmem>>, vector<1x1x28x128xbf16>
    %1 = vector.shape_cast %0 : vector<1x1x28x128xbf16> to vector<28x128xbf16>
    %c0_3 = arith.constant 0 : index
    %c0_4 = arith.constant 0 : index
    %c0_5 = arith.constant 0 : index
    %2 = vector.load %arg3[%c0_3, %c0_4, %c0_5] : memref<16x128x128xbf16, #tpu.memory_space<vmem>>, vector<1x128x128xbf16>
    %3 = vector.shape_cast %2 : vector<1x128x128xbf16> to vector<128x128xbf16>
    %cst = arith.constant dense<0.000000e+00> : vector<28x128xf32>
    %4 = tpu.matmul %1, %3, %cst {dimension_numbers = #tpu.dot_dimension_numbers<[1], [0], [0], [1], [0, 0, 1, 1], [], []>} : vector<28x128xbf16>, vector<128x128xbf16>, vector<28x128xf32> -> vector<28x128xf32>
    %c0_6 = arith.constant 0 : index
    %c0_7 = arith.constant 0 : index
    %c1 = arith.constant 1 : index
    %c0_8 = arith.constant 0 : index
    %5 = vector.load %arg2[%c0_6, %c0_7, %c1, %c0_8] : memref<1x1x56x128xbf16, #tpu.memory_space<vmem>>, vector<1x1x28x128xbf16>
    %6 = vector.shape_cast %5 : vector<1x1x28x128xbf16> to vector<28x128xbf16>
    %c1_9 = arith.constant 1 : index
    %c0_10 = arith.constant 0 : index
    %c0_11 = arith.constant 0 : index
    %7 = vector.load %arg3[%c1_9, %c0_10, %c0_11] : memref<16x128x128xbf16, #tpu.memory_space<vmem>>, vector<1x128x128xbf16>
    %8 = vector.shape_cast %7 : vector<1x128x128xbf16> to vector<128x128xbf16>
    %cst_12 = arith.constant dense<0.000000e+00> : vector<28x128xf32>
    %9 = tpu.matmul %6, %8, %cst_12 {dimension_numbers = #tpu.dot_dimension_numbers<[1], [0], [0], [1], [0, 0, 1, 1], [], []>} : vector<28x128xbf16>, vector<128x128xbf16>, vector<28x128xf32> -> vector<28x128xf32>
    %10 = arith.addf %4, %9 : vector<28x128xf32>
    %c0_13 = arith.constant 0 : index
    %c0_14 = arith.constant 0 : index
    %c2 = arith.constant 2 : index
    %c0_15 = arith.constant 0 : index
    %11 = vector.load %arg2[%c0_13, %c0_14, %c2, %c0_15] : memref<1x1x56x128xbf16, #tpu.memory_space<vmem>>, vector<1x1x28x128xbf16>
    %12 = vector.shape_cast %11 : vector<1x1x28x128xbf16> to vector<28x128xbf16>
    %c2_16 = arith.constant 2 : index
    %c0_17 = arith.constant 0 : index
    %c0_18 = arith.constant 0 : index
    %13 = vector.load %arg3[%c2_16, %c0_17, %c0_18] : memref<16x128x128xbf16, #tpu.memory_space<vmem>>, vector<1x128x128xbf16>
    %14 = vector.shape_cast %13 : vector<1x128x128xbf16> to vector<128x128xbf16>
    %cst_19 = arith.constant dense<0.000000e+00> : vector<28x128xf32>
    %15 = tpu.matmul %12, %14, %cst_19 {dimension_numbers = #tpu.dot_dimension_numbers<[1], [0], [0], [1], [0, 0, 1, 1], [], []>} : vector<28x128xbf16>, vector<128x128xbf16>, vector<28x128xf32> -> vector<28x128xf32>
    %16 = arith.addf %10, %15 : vector<28x128xf32>
    %c0_20 = arith.constant 0 : index
    %c0_21 = arith.constant 0 : index
    %c3 = arith.constant 3 : index
    %c0_22 = arith.constant 0 : index
    %17 = vector.load %arg2[%c0_20, %c0_21, %c3, %c0_22] : memref<1x1x56x128xbf16, #tpu.memory_space<vmem>>, vector<1x1x28x128xbf16>
    %18 = vector.shape_cast %17 : vector<1x1x28x128xbf16> to vector<28x128xbf16>
    %c3_23 = arith.constant 3 : index
    %c0_24 = arith.constant 0 : index
    %c0_25 = arith.constant 0 : index
    %19 = vector.load %arg3[%c3_23, %c0_24, %c0_25] : memref<16x128x128xbf16, #tpu.memory_space<vmem>>, vector<1x128x128xbf16>
    %20 = vector.shape_cast %19 : vector<1x128x128xbf16> to vector<128x128xbf16>
    %cst_26 = arith.constant dense<0.000000e+00> : vector<28x128xf32>
    %21 = tpu.matmul %18, %20, %cst_26 {dimension_numbers = #tpu.dot_dimension_numbers<[1], [0], [0], [1], [0, 0, 1, 1], [], []>} : vector<28x128xbf16>, vector<128x128xbf16>, vector<28x128xf32> -> vector<28x128xf32>
    %22 = arith.addf %16, %21 : vector<28x128xf32>
    %c0_27 = arith.constant 0 : index
    %c0_28 = arith.constant 0 : index
    %c7 = arith.constant 7 : index
    %c0_29 = arith.constant 0 : index
    %23 = vector.load %arg2[%c0_27, %c0_28, %c7, %c0_29] : memref<1x1x56x128xbf16, #tpu.memory_space<vmem>>, vector<1x1x28x128xbf16>
    %24 = vector.shape_cast %23 : vector<1x1x28x128xbf16> to vector<28x128xbf16>
    %c4 = arith.constant 4 : index
    %c0_30 = arith.constant 0 : index
    %c0_31 = arith.constant 0 : index
    %25 = vector.load %arg3[%c4, %c0_30, %c0_31] : memref<16x128x128xbf16, #tpu.memory_space<vmem>>, vector<1x128x128xbf16>
    %26 = vector.shape_cast %25 : vector<1x128x128xbf16> to vector<128x128xbf16>
    %cst_32 = arith.constant dense<0.000000e+00> : vector<28x128xf32>
    %27 = tpu.matmul %24, %26, %cst_32 {dimension_numbers = #tpu.dot_dimension_numbers<[1], [0], [0], [1], [0, 0, 1, 1], [], []>} : vector<28x128xbf16>, vector<128x128xbf16>, vector<28x128xf32> -> vector<28x128xf32>
    %28 = arith.addf %22, %27 : vector<28x128xf32>
    %c0_33 = arith.constant 0 : index
    %c0_34 = arith.constant 0 : index
    %c8 = arith.constant 8 : index
    %c0_35 = arith.constant 0 : index
    %29 = vector.load %arg2[%c0_33, %c0_34, %c8, %c0_35] : memref<1x1x56x128xbf16, #tpu.memory_space<vmem>>, vector<1x1x28x128xbf16>
    %30 = vector.shape_cast %29 : vector<1x1x28x128xbf16> to vector<28x128xbf16>
    %c5 = arith.constant 5 : index
    %c0_36 = arith.constant 0 : index
    %c0_37 = arith.constant 0 : index
    %31 = vector.load %arg3[%c5, %c0_36, %c0_37] : memref<16x128x128xbf16, #tpu.memory_space<vmem>>, vector<1x128x128xbf16>
    %32 = vector.shape_cast %31 : vector<1x128x128xbf16> to vector<128x128xbf16>
    %cst_38 = arith.constant dense<0.000000e+00> : vector<28x128xf32>
    %33 = tpu.matmul %30, %32, %cst_38 {dimension_numbers = #tpu.dot_dimension_numbers<[1], [0], [0], [1], [0, 0, 1, 1], [], []>} : vector<28x128xbf16>, vector<128x128xbf16>, vector<28x128xf32> -> vector<28x128xf32>
    %34 = arith.addf %28, %33 : vector<28x128xf32>
    %c0_39 = arith.constant 0 : index
    %c0_40 = arith.constant 0 : index
    %c9 = arith.constant 9 : index
    %c0_41 = arith.constant 0 : index
    %35 = vector.load %arg2[%c0_39, %c0_40, %c9, %c0_41] : memref<1x1x56x128xbf16, #tpu.memory_space<vmem>>, vector<1x1x28x128xbf16>
    %36 = vector.shape_cast %35 : vector<1x1x28x128xbf16> to vector<28x128xbf16>
    %c6 = arith.constant 6 : index
    %c0_42 = arith.constant 0 : index
    %c0_43 = arith.constant 0 : index
    %37 = vector.load %arg3[%c6, %c0_42, %c0_43] : memref<16x128x128xbf16, #tpu.memory_space<vmem>>, vector<1x128x128xbf16>
    %38 = vector.shape_cast %37 : vector<1x128x128xbf16> to vector<128x128xbf16>
    %cst_44 = arith.constant dense<0.000000e+00> : vector<28x128xf32>
    %39 = tpu.matmul %36, %38, %cst_44 {dimension_numbers = #tpu.dot_dimension_numbers<[1], [0], [0], [1], [0, 0, 1, 1], [], []>} : vector<28x128xbf16>, vector<128x128xbf16>, vector<28x128xf32> -> vector<28x128xf32>
    %40 = arith.addf %34, %39 : vector<28x128xf32>
    %c0_45 = arith.constant 0 : index
    %c0_46 = arith.constant 0 : index
    %c10 = arith.constant 10 : index
    %c0_47 = arith.constant 0 : index
    %41 = vector.load %arg2[%c0_45, %c0_46, %c10, %c0_47] : memref<1x1x56x128xbf16, #tpu.memory_space<vmem>>, vector<1x1x28x128xbf16>
    %42 = vector.shape_cast %41 : vector<1x1x28x128xbf16> to vector<28x128xbf16>
    %c7_48 = arith.constant 7 : index
    %c0_49 = arith.constant 0 : index
    %c0_50 = arith.constant 0 : index
    %43 = vector.load %arg3[%c7_48, %c0_49, %c0_50] : memref<16x128x128xbf16, #tpu.memory_space<vmem>>, vector<1x128x128xbf16>
    %44 = vector.shape_cast %43 : vector<1x128x128xbf16> to vector<128x128xbf16>
    %cst_51 = arith.constant dense<0.000000e+00> : vector<28x128xf32>
    %45 = tpu.matmul %42, %44, %cst_51 {dimension_numbers = #tpu.dot_dimension_numbers<[1], [0], [0], [1], [0, 0, 1, 1], [], []>} : vector<28x128xbf16>, vector<128x128xbf16>, vector<28x128xf32> -> vector<28x128xf32>
    %46 = arith.addf %40, %45 : vector<28x128xf32>
    %c0_52 = arith.constant 0 : index
    %c0_53 = arith.constant 0 : index
    %c14 = arith.constant 14 : index
    %c0_54 = arith.constant 0 : index
    %47 = vector.load %arg2[%c0_52, %c0_53, %c14, %c0_54] : memref<1x1x56x128xbf16, #tpu.memory_space<vmem>>, vector<1x1x28x128xbf16>
    %48 = vector.shape_cast %47 : vector<1x1x28x128xbf16> to vector<28x128xbf16>
    %c8_55 = arith.constant 8 : index
    %c0_56 = arith.constant 0 : index
    %c0_57 = arith.constant 0 : index
    %49 = vector.load %arg3[%c8_55, %c0_56, %c0_57] : memref<16x128x128xbf16, #tpu.memory_space<vmem>>, vector<1x128x128xbf16>
    %50 = vector.shape_cast %49 : vector<1x128x128xbf16> to vector<128x128xbf16>
    %cst_58 = arith.constant dense<0.000000e+00> : vector<28x128xf32>
    %51 = tpu.matmul %48, %50, %cst_58 {dimension_numbers = #tpu.dot_dimension_numbers<[1], [0], [0], [1], [0, 0, 1, 1], [], []>} : vector<28x128xbf16>, vector<128x128xbf16>, vector<28x128xf32> -> vector<28x128xf32>
    %52 = arith.addf %46, %51 : vector<28x128xf32>
    %c0_59 = arith.constant 0 : index
    %c0_60 = arith.constant 0 : index
    %c15 = arith.constant 15 : index
    %c0_61 = arith.constant 0 : index
    %53 = vector.load %arg2[%c0_59, %c0_60, %c15, %c0_61] : memref<1x1x56x128xbf16, #tpu.memory_space<vmem>>, vector<1x1x28x128xbf16>
    %54 = vector.shape_cast %53 : vector<1x1x28x128xbf16> to vector<28x128xbf16>
    %c9_62 = arith.constant 9 : index
    %c0_63 = arith.constant 0 : index
    %c0_64 = arith.constant 0 : index
    %55 = vector.load %arg3[%c9_62, %c0_63, %c0_64] : memref<16x128x128xbf16, #tpu.memory_space<vmem>>, vector<1x128x128xbf16>
    %56 = vector.shape_cast %55 : vector<1x128x128xbf16> to vector<128x128xbf16>
    %cst_65 = arith.constant dense<0.000000e+00> : vector<28x128xf32>
    %57 = tpu.matmul %54, %56, %cst_65 {dimension_numbers = #tpu.dot_dimension_numbers<[1], [0], [0], [1], [0, 0, 1, 1], [], []>} : vector<28x128xbf16>, vector<128x128xbf16>, vector<28x128xf32> -> vector<28x128xf32>
    %58 = arith.addf %52, %57 : vector<28x128xf32>
    %c0_66 = arith.constant 0 : index
    %c0_67 = arith.constant 0 : index
    %c16 = arith.constant 16 : index
    %c0_68 = arith.constant 0 : index
    %59 = vector.load %arg2[%c0_66, %c0_67, %c16, %c0_68] : memref<1x1x56x128xbf16, #tpu.memory_space<vmem>>, vector<1x1x28x128xbf16>
    %60 = vector.shape_cast %59 : vector<1x1x28x128xbf16> to vector<28x128xbf16>
    %c10_69 = arith.constant 10 : index
    %c0_70 = arith.constant 0 : index
    %c0_71 = arith.constant 0 : index
    %61 = vector.load %arg3[%c10_69, %c0_70, %c0_71] : memref<16x128x128xbf16, #tpu.memory_space<vmem>>, vector<1x128x128xbf16>
    %62 = vector.shape_cast %61 : vector<1x128x128xbf16> to vector<128x128xbf16>
    %cst_72 = arith.constant dense<0.000000e+00> : vector<28x128xf32>
    %63 = tpu.matmul %60, %62, %cst_72 {dimension_numbers = #tpu.dot_dimension_numbers<[1], [0], [0], [1], [0, 0, 1, 1], [], []>} : vector<28x128xbf16>, vector<128x128xbf16>, vector<28x128xf32> -> vector<28x128xf32>
    %64 = arith.addf %58, %63 : vector<28x128xf32>
    %c0_73 = arith.constant 0 : index
    %c0_74 = arith.constant 0 : index
    %c17 = arith.constant 17 : index
    %c0_75 = arith.constant 0 : index
    %65 = vector.load %arg2[%c0_73, %c0_74, %c17, %c0_75] : memref<1x1x56x128xbf16, #tpu.memory_space<vmem>>, vector<1x1x28x128xbf16>
    %66 = vector.shape_cast %65 : vector<1x1x28x128xbf16> to vector<28x128xbf16>
    %c11 = arith.constant 11 : index
    %c0_76 = arith.constant 0 : index
    %c0_77 = arith.constant 0 : index
    %67 = vector.load %arg3[%c11, %c0_76, %c0_77] : memref<16x128x128xbf16, #tpu.memory_space<vmem>>, vector<1x128x128xbf16>
    %68 = vector.shape_cast %67 : vector<1x128x128xbf16> to vector<128x128xbf16>
    %cst_78 = arith.constant dense<0.000000e+00> : vector<28x128xf32>
    %69 = tpu.matmul %66, %68, %cst_78 {dimension_numbers = #tpu.dot_dimension_numbers<[1], [0], [0], [1], [0, 0, 1, 1], [], []>} : vector<28x128xbf16>, vector<128x128xbf16>, vector<28x128xf32> -> vector<28x128xf32>
    %70 = arith.addf %64, %69 : vector<28x128xf32>
    %c0_79 = arith.constant 0 : index
    %c0_80 = arith.constant 0 : index
    %c21 = arith.constant 21 : index
    %c0_81 = arith.constant 0 : index
    %71 = vector.load %arg2[%c0_79, %c0_80, %c21, %c0_81] : memref<1x1x56x128xbf16, #tpu.memory_space<vmem>>, vector<1x1x28x128xbf16>
    %72 = vector.shape_cast %71 : vector<1x1x28x128xbf16> to vector<28x128xbf16>
    %c12 = arith.constant 12 : index
    %c0_82 = arith.constant 0 : index
    %c0_83 = arith.constant 0 : index
    %73 = vector.load %arg3[%c12, %c0_82, %c0_83] : memref<16x128x128xbf16, #tpu.memory_space<vmem>>, vector<1x128x128xbf16>
    %74 = vector.shape_cast %73 : vector<1x128x128xbf16> to vector<128x128xbf16>
    %cst_84 = arith.constant dense<0.000000e+00> : vector<28x128xf32>
    %75 = tpu.matmul %72, %74, %cst_84 {dimension_numbers = #tpu.dot_dimension_numbers<[1], [0], [0], [1], [0, 0, 1, 1], [], []>} : vector<28x128xbf16>, vector<128x128xbf16>, vector<28x128xf32> -> vector<28x128xf32>
    %76 = arith.addf %70, %75 : vector<28x128xf32>
    %c0_85 = arith.constant 0 : index
    %c0_86 = arith.constant 0 : index
    %c22 = arith.constant 22 : index
    %c0_87 = arith.constant 0 : index
    %77 = vector.load %arg2[%c0_85, %c0_86, %c22, %c0_87] : memref<1x1x56x128xbf16, #tpu.memory_space<vmem>>, vector<1x1x28x128xbf16>
    %78 = vector.shape_cast %77 : vector<1x1x28x128xbf16> to vector<28x128xbf16>
    %c13 = arith.constant 13 : index
    %c0_88 = arith.constant 0 : index
    %c0_89 = arith.constant 0 : index
    %79 = vector.load %arg3[%c13, %c0_88, %c0_89] : memref<16x128x128xbf16, #tpu.memory_space<vmem>>, vector<1x128x128xbf16>
    %80 = vector.shape_cast %79 : vector<1x128x128xbf16> to vector<128x128xbf16>
    %cst_90 = arith.constant dense<0.000000e+00> : vector<28x128xf32>
    %81 = tpu.matmul %78, %80, %cst_90 {dimension_numbers = #tpu.dot_dimension_numbers<[1], [0], [0], [1], [0, 0, 1, 1], [], []>} : vector<28x128xbf16>, vector<128x128xbf16>, vector<28x128xf32> -> vector<28x128xf32>
    %82 = arith.addf %76, %81 : vector<28x128xf32>
    %c0_91 = arith.constant 0 : index
    %c0_92 = arith.constant 0 : index
    %c23 = arith.constant 23 : index
    %c0_93 = arith.constant 0 : index
    %83 = vector.load %arg2[%c0_91, %c0_92, %c23, %c0_93] : memref<1x1x56x128xbf16, #tpu.memory_space<vmem>>, vector<1x1x28x128xbf16>
    %84 = vector.shape_cast %83 : vector<1x1x28x128xbf16> to vector<28x128xbf16>
    %c14_94 = arith.constant 14 : index
    %c0_95 = arith.constant 0 : index
    %c0_96 = arith.constant 0 : index
    %85 = vector.load %arg3[%c14_94, %c0_95, %c0_96] : memref<16x128x128xbf16, #tpu.memory_space<vmem>>, vector<1x128x128xbf16>
    %86 = vector.shape_cast %85 : vector<1x128x128xbf16> to vector<128x128xbf16>
    %cst_97 = arith.constant dense<0.000000e+00> : vector<28x128xf32>
    %87 = tpu.matmul %84, %86, %cst_97 {dimension_numbers = #tpu.dot_dimension_numbers<[1], [0], [0], [1], [0, 0, 1, 1], [], []>} : vector<28x128xbf16>, vector<128x128xbf16>, vector<28x128xf32> -> vector<28x128xf32>
    %88 = arith.addf %82, %87 : vector<28x128xf32>
    %c0_98 = arith.constant 0 : index
    %c0_99 = arith.constant 0 : index
    %c24 = arith.constant 24 : index
    %c0_100 = arith.constant 0 : index
    %89 = vector.load %arg2[%c0_98, %c0_99, %c24, %c0_100] : memref<1x1x56x128xbf16, #tpu.memory_space<vmem>>, vector<1x1x28x128xbf16>
    %90 = vector.shape_cast %89 : vector<1x1x28x128xbf16> to vector<28x128xbf16>
    %c15_101 = arith.constant 15 : index
    %c0_102 = arith.constant 0 : index
    %c0_103 = arith.constant 0 : index
    %91 = vector.load %arg3[%c15_101, %c0_102, %c0_103] : memref<16x128x128xbf16, #tpu.memory_space<vmem>>, vector<1x128x128xbf16>
    %92 = vector.shape_cast %91 : vector<1x128x128xbf16> to vector<128x128xbf16>
    %cst_104 = arith.constant dense<0.000000e+00> : vector<28x128xf32>
    %93 = tpu.matmul %90, %92, %cst_104 {dimension_numbers = #tpu.dot_dimension_numbers<[1], [0], [0], [1], [0, 0, 1, 1], [], []>} : vector<28x128xbf16>, vector<128x128xbf16>, vector<28x128xf32> -> vector<28x128xf32>
    %94 = arith.addf %88, %93 : vector<28x128xf32>
    %95 = tpu.iota {dimensions = array<i32: 0>} : vector<28x1xi32>
    %c7_i32 = arith.constant 7 : i32
    %c0_i32 = arith.constant 0 : i32
    %96 = arith.cmpi eq, %c7_i32, %c0_i32 : i32
    %c1_i32 = arith.constant 1 : i32
    %97 = arith.select %96, %c1_i32, %c7_i32 : i32
    %98 = vector.broadcast %97 : i32 to vector<28x1xi32>
    %99 = arith.remsi %95, %98 : vector<28x1xi32>
    %c0_i32_105 = arith.constant 0 : i32
    %100 = vector.broadcast %c0_i32_105 : i32 to vector<28x1xi32>
    %101 = arith.cmpi ne, %99, %100 : vector<28x1xi32>
    %c0_i32_106 = arith.constant 0 : i32
    %102 = vector.broadcast %c0_i32_106 : i32 to vector<28x1xi32>
    %103 = arith.cmpi slt, %99, %102 : vector<28x1xi32>
    %c0_i32_107 = arith.constant 0 : i32
    %104 = arith.cmpi slt, %97, %c0_i32_107 : i32
    %105 = vector.broadcast %104 : i1 to vector<28x1xi1>
    %106 = vector.broadcast %105 : vector<28x1xi1> to vector<28x1xi1>
    %107 = arith.xori %103, %106 : vector<28x1xi1>
    %108 = arith.andi %107, %101 : vector<28x1xi1>
    %109 = vector.broadcast %97 : i32 to vector<28x1xi32>
    %110 = arith.addi %99, %109 : vector<28x1xi32>
    %111 = arith.select %108, %110, %99 : vector<28x1xi1>, vector<28x1xi32>
    %c4_i32 = arith.constant 4 : i32
    %112 = vector.broadcast %c4_i32 : i32 to vector<28x1xi32>
    %113 = arith.cmpi slt, %111, %112 : vector<28x1xi32>
    %cst_108 = arith.constant 0.000000e+00 : f32
    %114 = vector.shape_cast %113 : vector<28x1xi1> to vector<28x1xi1>
    %115 = vector.broadcast %114 : vector<28x1xi1> to vector<28x128xi1>
    %116 = vector.broadcast %cst_108 : f32 to vector<28x128xf32>
    %117 = arith.select %115, %94, %116 : vector<28x128xi1>, vector<28x128xf32>
    %cst_109 = arith.constant dense<0.000000e+00> : vector<128xf32>
    %118 = vector.multi_reduction <add>, %117, %cst_109 [0] : vector<28x128xf32> to vector<128xf32>
    %119 = vector.shape_cast %118 : vector<128xf32> to vector<1x128xf32>
    %cst_110 = arith.constant 6.250000e-02 : f32
    %120 = vector.broadcast %cst_110 : f32 to vector<1x128xf32>
    %121 = arith.mulf %119, %120 : vector<1x128xf32>
    %122 = vector.broadcast %121 : vector<1x128xf32> to vector<28x128xf32>
    %123 = arith.subf %94, %122 : vector<28x128xf32>
    %124 = arith.mulf %123, %123 : vector<28x128xf32>
    %cst_111 = arith.constant 0.000000e+00 : f32
    %125 = vector.shape_cast %113 : vector<28x1xi1> to vector<28x1xi1>
    %126 = vector.broadcast %125 : vector<28x1xi1> to vector<28x128xi1>
    %127 = vector.broadcast %cst_111 : f32 to vector<28x128xf32>
    %128 = arith.select %126, %124, %127 : vector<28x128xi1>, vector<28x128xf32>
    %cst_112 = arith.constant dense<0.000000e+00> : vector<128xf32>
    %129 = vector.multi_reduction <add>, %128, %cst_112 [0] : vector<28x128xf32> to vector<128xf32>
    %130 = vector.shape_cast %129 : vector<128xf32> to vector<1x128xf32>
    %cst_113 = arith.constant 6.250000e-02 : f32
    %131 = vector.broadcast %cst_113 : f32 to vector<1x128xf32>
    %132 = arith.mulf %130, %131 : vector<1x128xf32>
    %cst_114 = arith.constant 9.99999974E-6 : f32
    %133 = vector.broadcast %cst_114 : f32 to vector<1x128xf32>
    %134 = arith.addf %132, %133 : vector<1x128xf32>
    %135 = math.rsqrt %134 : vector<1x128xf32>
    %136 = vector.broadcast %135 : vector<1x128xf32> to vector<28x128xf32>
    %137 = arith.mulf %123, %136 : vector<28x128xf32>
    %cst_115 = arith.constant 0.000000e+00 : f32
    %138 = vector.broadcast %cst_115 : f32 to vector<28x128xf32>
    %139 = arith.cmpf oge, %137, %138 : vector<28x128xf32>
    %cst_116 = arith.constant 2.000000e-01 : f32
    %140 = vector.broadcast %cst_116 : f32 to vector<28x128xf32>
    %141 = arith.mulf %140, %137 : vector<28x128xf32>
    %142 = arith.select %139, %137, %141 : vector<28x128xi1>, vector<28x128xf32>
    %cst_117 = arith.constant 0.000000e+00 : f32
    %143 = vector.shape_cast %113 : vector<28x1xi1> to vector<28x1xi1>
    %144 = vector.broadcast %143 : vector<28x1xi1> to vector<28x128xi1>
    %145 = vector.broadcast %cst_117 : f32 to vector<28x128xf32>
    %146 = arith.select %144, %142, %145 : vector<28x128xi1>, vector<28x128xf32>
    %147 = arith.truncf %146 : vector<28x128xf32> to vector<28x128xbf16>
    %c0_118 = arith.constant 0 : index
    %c0_119 = arith.constant 0 : index
    %c0_120 = arith.constant 0 : index
    %148 = vector.load %arg5[%c0_118, %c0_119, %c0_120] : memref<1x28x128xbf16, #tpu.memory_space<vmem>>, vector<1x28x128xbf16>
    %149 = vector.shape_cast %148 : vector<1x28x128xbf16> to vector<28x128xbf16>
    %150 = vector.shape_cast %147 : vector<28x128xbf16> to vector<1x28x128xbf16>
    tpu.vector_store %arg5[%c0_118, %c0_119, %c0_120], %150 {strides = array<i32>} : memref<1x28x128xbf16, #tpu.memory_space<vmem>>, vector<1x28x128xbf16>,
    return
  }
  func.func @transform_0(%arg0: i32, %arg1: i32) -> (i32, i32, i32, i32) {
    %c0_i32 = arith.constant 0 : i32
    %c0_i32_0 = arith.constant 0 : i32
    %c0_i32_1 = arith.constant 0 : i32
    %c0_i32_2 = arith.constant 0 : i32
    return %arg1, %c0_i32, %c0_i32_0, %c0_i32_1 : i32, i32, i32, i32
  }
  func.func @transform_1(%arg0: i32, %arg1: i32) -> (i32, i32, i32) {
    %c0_i32 = arith.constant 0 : i32
    %c0_i32_0 = arith.constant 0 : i32
    %c0_i32_1 = arith.constant 0 : i32
    return %c0_i32, %c0_i32_0, %arg0 : i32, i32, i32
  }
  func.func @transform_2(%arg0: i32, %arg1: i32) -> (i32, i32) {
    %c0_i32 = arith.constant 0 : i32
    %c0_i32_0 = arith.constant 0 : i32
    return %c0_i32, %arg0 : i32, i32
  }
  func.func @transform_3(%arg0: i32, %arg1: i32) -> (i32, i32, i32) {
    %c0_i32 = arith.constant 0 : i32
    %c0_i32_0 = arith.constant 0 : i32
    return %arg1, %c0_i32, %arg0 : i32, i32, i32
  }
}

module attributes {stable_mosaic.version = 11 : i64} {
  func.func @_conv_in_lrelu_kernel(%arg0: i32, %arg1: i32, %arg2: memref<1x1x72x128xbf16, #tpu.memory_space<vmem>>, %arg3: memref<16x128x128xbf16, #tpu.memory_space<vmem>>, %arg4: memref<1x128xf32, #tpu.memory_space<vmem>>, %arg5: memref<1x40x128xbf16, #tpu.memory_space<vmem>>) attributes {dimension_semantics = [#tpu.dimension_semantics<parallel>, #tpu.dimension_semantics<parallel>], iteration_bounds = array<i64: 1, 2>, scalar_prefetch = 0 : i64, scratch_operands = 0 : i64, tpu.core_type = #tpu.core_type<tc>, window_params = [{transform_indices = @transform_0, window_bounds = array<i64: 1, 1, 72, 128>}, {transform_indices = @transform_1, window_bounds = array<i64: 16, 128, 128>}, {transform_indices = @transform_2, window_bounds = array<i64: 1, 128>}, {transform_indices = @transform_3, window_bounds = array<i64: 1, 40, 128>}]} {
    %c0 = arith.constant 0 : index
    %c0_0 = arith.constant 0 : index
    %c0_1 = arith.constant 0 : index
    %c0_2 = arith.constant 0 : index
    %0 = vector.load %arg2[%c0, %c0_0, %c0_1, %c0_2] : memref<1x1x72x128xbf16, #tpu.memory_space<vmem>>, vector<1x1x40x128xbf16>
    %1 = vector.shape_cast %0 : vector<1x1x40x128xbf16> to vector<40x128xbf16>
    %c0_3 = arith.constant 0 : index
    %c0_4 = arith.constant 0 : index
    %c0_5 = arith.constant 0 : index
    %2 = vector.load %arg3[%c0_3, %c0_4, %c0_5] : memref<16x128x128xbf16, #tpu.memory_space<vmem>>, vector<1x128x128xbf16>
    %3 = vector.shape_cast %2 : vector<1x128x128xbf16> to vector<128x128xbf16>
    %cst = arith.constant dense<0.000000e+00> : vector<40x128xf32>
    %4 = tpu.matmul %1, %3, %cst {dimension_numbers = #tpu.dot_dimension_numbers<[1], [0], [0], [1], [0, 0, 1, 1], [], []>} : vector<40x128xbf16>, vector<128x128xbf16>, vector<40x128xf32> -> vector<40x128xf32>
    %c0_6 = arith.constant 0 : index
    %c0_7 = arith.constant 0 : index
    %c1 = arith.constant 1 : index
    %c0_8 = arith.constant 0 : index
    %5 = vector.load %arg2[%c0_6, %c0_7, %c1, %c0_8] : memref<1x1x72x128xbf16, #tpu.memory_space<vmem>>, vector<1x1x40x128xbf16>
    %6 = vector.shape_cast %5 : vector<1x1x40x128xbf16> to vector<40x128xbf16>
    %c1_9 = arith.constant 1 : index
    %c0_10 = arith.constant 0 : index
    %c0_11 = arith.constant 0 : index
    %7 = vector.load %arg3[%c1_9, %c0_10, %c0_11] : memref<16x128x128xbf16, #tpu.memory_space<vmem>>, vector<1x128x128xbf16>
    %8 = vector.shape_cast %7 : vector<1x128x128xbf16> to vector<128x128xbf16>
    %cst_12 = arith.constant dense<0.000000e+00> : vector<40x128xf32>
    %9 = tpu.matmul %6, %8, %cst_12 {dimension_numbers = #tpu.dot_dimension_numbers<[1], [0], [0], [1], [0, 0, 1, 1], [], []>} : vector<40x128xbf16>, vector<128x128xbf16>, vector<40x128xf32> -> vector<40x128xf32>
    %10 = arith.addf %4, %9 : vector<40x128xf32>
    %c0_13 = arith.constant 0 : index
    %c0_14 = arith.constant 0 : index
    %c2 = arith.constant 2 : index
    %c0_15 = arith.constant 0 : index
    %11 = vector.load %arg2[%c0_13, %c0_14, %c2, %c0_15] : memref<1x1x72x128xbf16, #tpu.memory_space<vmem>>, vector<1x1x40x128xbf16>
    %12 = vector.shape_cast %11 : vector<1x1x40x128xbf16> to vector<40x128xbf16>
    %c2_16 = arith.constant 2 : index
    %c0_17 = arith.constant 0 : index
    %c0_18 = arith.constant 0 : index
    %13 = vector.load %arg3[%c2_16, %c0_17, %c0_18] : memref<16x128x128xbf16, #tpu.memory_space<vmem>>, vector<1x128x128xbf16>
    %14 = vector.shape_cast %13 : vector<1x128x128xbf16> to vector<128x128xbf16>
    %cst_19 = arith.constant dense<0.000000e+00> : vector<40x128xf32>
    %15 = tpu.matmul %12, %14, %cst_19 {dimension_numbers = #tpu.dot_dimension_numbers<[1], [0], [0], [1], [0, 0, 1, 1], [], []>} : vector<40x128xbf16>, vector<128x128xbf16>, vector<40x128xf32> -> vector<40x128xf32>
    %16 = arith.addf %10, %15 : vector<40x128xf32>
    %c0_20 = arith.constant 0 : index
    %c0_21 = arith.constant 0 : index
    %c3 = arith.constant 3 : index
    %c0_22 = arith.constant 0 : index
    %17 = vector.load %arg2[%c0_20, %c0_21, %c3, %c0_22] : memref<1x1x72x128xbf16, #tpu.memory_space<vmem>>, vector<1x1x40x128xbf16>
    %18 = vector.shape_cast %17 : vector<1x1x40x128xbf16> to vector<40x128xbf16>
    %c3_23 = arith.constant 3 : index
    %c0_24 = arith.constant 0 : index
    %c0_25 = arith.constant 0 : index
    %19 = vector.load %arg3[%c3_23, %c0_24, %c0_25] : memref<16x128x128xbf16, #tpu.memory_space<vmem>>, vector<1x128x128xbf16>
    %20 = vector.shape_cast %19 : vector<1x128x128xbf16> to vector<128x128xbf16>
    %cst_26 = arith.constant dense<0.000000e+00> : vector<40x128xf32>
    %21 = tpu.matmul %18, %20, %cst_26 {dimension_numbers = #tpu.dot_dimension_numbers<[1], [0], [0], [1], [0, 0, 1, 1], [], []>} : vector<40x128xbf16>, vector<128x128xbf16>, vector<40x128xf32> -> vector<40x128xf32>
    %22 = arith.addf %16, %21 : vector<40x128xf32>
    %c0_27 = arith.constant 0 : index
    %c0_28 = arith.constant 0 : index
    %c8 = arith.constant 8 : index
    %c0_29 = arith.constant 0 : index
    %23 = vector.load %arg2[%c0_27, %c0_28, %c8, %c0_29] : memref<1x1x72x128xbf16, #tpu.memory_space<vmem>>, vector<1x1x40x128xbf16>
    %24 = vector.shape_cast %23 : vector<1x1x40x128xbf16> to vector<40x128xbf16>
    %c4 = arith.constant 4 : index
    %c0_30 = arith.constant 0 : index
    %c0_31 = arith.constant 0 : index
    %25 = vector.load %arg3[%c4, %c0_30, %c0_31] : memref<16x128x128xbf16, #tpu.memory_space<vmem>>, vector<1x128x128xbf16>
    %26 = vector.shape_cast %25 : vector<1x128x128xbf16> to vector<128x128xbf16>
    %cst_32 = arith.constant dense<0.000000e+00> : vector<40x128xf32>
    %27 = tpu.matmul %24, %26, %cst_32 {dimension_numbers = #tpu.dot_dimension_numbers<[1], [0], [0], [1], [0, 0, 1, 1], [], []>} : vector<40x128xbf16>, vector<128x128xbf16>, vector<40x128xf32> -> vector<40x128xf32>
    %28 = arith.addf %22, %27 : vector<40x128xf32>
    %c0_33 = arith.constant 0 : index
    %c0_34 = arith.constant 0 : index
    %c9 = arith.constant 9 : index
    %c0_35 = arith.constant 0 : index
    %29 = vector.load %arg2[%c0_33, %c0_34, %c9, %c0_35] : memref<1x1x72x128xbf16, #tpu.memory_space<vmem>>, vector<1x1x40x128xbf16>
    %30 = vector.shape_cast %29 : vector<1x1x40x128xbf16> to vector<40x128xbf16>
    %c5 = arith.constant 5 : index
    %c0_36 = arith.constant 0 : index
    %c0_37 = arith.constant 0 : index
    %31 = vector.load %arg3[%c5, %c0_36, %c0_37] : memref<16x128x128xbf16, #tpu.memory_space<vmem>>, vector<1x128x128xbf16>
    %32 = vector.shape_cast %31 : vector<1x128x128xbf16> to vector<128x128xbf16>
    %cst_38 = arith.constant dense<0.000000e+00> : vector<40x128xf32>
    %33 = tpu.matmul %30, %32, %cst_38 {dimension_numbers = #tpu.dot_dimension_numbers<[1], [0], [0], [1], [0, 0, 1, 1], [], []>} : vector<40x128xbf16>, vector<128x128xbf16>, vector<40x128xf32> -> vector<40x128xf32>
    %34 = arith.addf %28, %33 : vector<40x128xf32>
    %c0_39 = arith.constant 0 : index
    %c0_40 = arith.constant 0 : index
    %c10 = arith.constant 10 : index
    %c0_41 = arith.constant 0 : index
    %35 = vector.load %arg2[%c0_39, %c0_40, %c10, %c0_41] : memref<1x1x72x128xbf16, #tpu.memory_space<vmem>>, vector<1x1x40x128xbf16>
    %36 = vector.shape_cast %35 : vector<1x1x40x128xbf16> to vector<40x128xbf16>
    %c6 = arith.constant 6 : index
    %c0_42 = arith.constant 0 : index
    %c0_43 = arith.constant 0 : index
    %37 = vector.load %arg3[%c6, %c0_42, %c0_43] : memref<16x128x128xbf16, #tpu.memory_space<vmem>>, vector<1x128x128xbf16>
    %38 = vector.shape_cast %37 : vector<1x128x128xbf16> to vector<128x128xbf16>
    %cst_44 = arith.constant dense<0.000000e+00> : vector<40x128xf32>
    %39 = tpu.matmul %36, %38, %cst_44 {dimension_numbers = #tpu.dot_dimension_numbers<[1], [0], [0], [1], [0, 0, 1, 1], [], []>} : vector<40x128xbf16>, vector<128x128xbf16>, vector<40x128xf32> -> vector<40x128xf32>
    %40 = arith.addf %34, %39 : vector<40x128xf32>
    %c0_45 = arith.constant 0 : index
    %c0_46 = arith.constant 0 : index
    %c11 = arith.constant 11 : index
    %c0_47 = arith.constant 0 : index
    %41 = vector.load %arg2[%c0_45, %c0_46, %c11, %c0_47] : memref<1x1x72x128xbf16, #tpu.memory_space<vmem>>, vector<1x1x40x128xbf16>
    %42 = vector.shape_cast %41 : vector<1x1x40x128xbf16> to vector<40x128xbf16>
    %c7 = arith.constant 7 : index
    %c0_48 = arith.constant 0 : index
    %c0_49 = arith.constant 0 : index
    %43 = vector.load %arg3[%c7, %c0_48, %c0_49] : memref<16x128x128xbf16, #tpu.memory_space<vmem>>, vector<1x128x128xbf16>
    %44 = vector.shape_cast %43 : vector<1x128x128xbf16> to vector<128x128xbf16>
    %cst_50 = arith.constant dense<0.000000e+00> : vector<40x128xf32>
    %45 = tpu.matmul %42, %44, %cst_50 {dimension_numbers = #tpu.dot_dimension_numbers<[1], [0], [0], [1], [0, 0, 1, 1], [], []>} : vector<40x128xbf16>, vector<128x128xbf16>, vector<40x128xf32> -> vector<40x128xf32>
    %46 = arith.addf %40, %45 : vector<40x128xf32>
    %c0_51 = arith.constant 0 : index
    %c0_52 = arith.constant 0 : index
    %c16 = arith.constant 16 : index
    %c0_53 = arith.constant 0 : index
    %47 = vector.load %arg2[%c0_51, %c0_52, %c16, %c0_53] : memref<1x1x72x128xbf16, #tpu.memory_space<vmem>>, vector<1x1x40x128xbf16>
    %48 = vector.shape_cast %47 : vector<1x1x40x128xbf16> to vector<40x128xbf16>
    %c8_54 = arith.constant 8 : index
    %c0_55 = arith.constant 0 : index
    %c0_56 = arith.constant 0 : index
    %49 = vector.load %arg3[%c8_54, %c0_55, %c0_56] : memref<16x128x128xbf16, #tpu.memory_space<vmem>>, vector<1x128x128xbf16>
    %50 = vector.shape_cast %49 : vector<1x128x128xbf16> to vector<128x128xbf16>
    %cst_57 = arith.constant dense<0.000000e+00> : vector<40x128xf32>
    %51 = tpu.matmul %48, %50, %cst_57 {dimension_numbers = #tpu.dot_dimension_numbers<[1], [0], [0], [1], [0, 0, 1, 1], [], []>} : vector<40x128xbf16>, vector<128x128xbf16>, vector<40x128xf32> -> vector<40x128xf32>
    %52 = arith.addf %46, %51 : vector<40x128xf32>
    %c0_58 = arith.constant 0 : index
    %c0_59 = arith.constant 0 : index
    %c17 = arith.constant 17 : index
    %c0_60 = arith.constant 0 : index
    %53 = vector.load %arg2[%c0_58, %c0_59, %c17, %c0_60] : memref<1x1x72x128xbf16, #tpu.memory_space<vmem>>, vector<1x1x40x128xbf16>
    %54 = vector.shape_cast %53 : vector<1x1x40x128xbf16> to vector<40x128xbf16>
    %c9_61 = arith.constant 9 : index
    %c0_62 = arith.constant 0 : index
    %c0_63 = arith.constant 0 : index
    %55 = vector.load %arg3[%c9_61, %c0_62, %c0_63] : memref<16x128x128xbf16, #tpu.memory_space<vmem>>, vector<1x128x128xbf16>
    %56 = vector.shape_cast %55 : vector<1x128x128xbf16> to vector<128x128xbf16>
    %cst_64 = arith.constant dense<0.000000e+00> : vector<40x128xf32>
    %57 = tpu.matmul %54, %56, %cst_64 {dimension_numbers = #tpu.dot_dimension_numbers<[1], [0], [0], [1], [0, 0, 1, 1], [], []>} : vector<40x128xbf16>, vector<128x128xbf16>, vector<40x128xf32> -> vector<40x128xf32>
    %58 = arith.addf %52, %57 : vector<40x128xf32>
    %c0_65 = arith.constant 0 : index
    %c0_66 = arith.constant 0 : index
    %c18 = arith.constant 18 : index
    %c0_67 = arith.constant 0 : index
    %59 = vector.load %arg2[%c0_65, %c0_66, %c18, %c0_67] : memref<1x1x72x128xbf16, #tpu.memory_space<vmem>>, vector<1x1x40x128xbf16>
    %60 = vector.shape_cast %59 : vector<1x1x40x128xbf16> to vector<40x128xbf16>
    %c10_68 = arith.constant 10 : index
    %c0_69 = arith.constant 0 : index
    %c0_70 = arith.constant 0 : index
    %61 = vector.load %arg3[%c10_68, %c0_69, %c0_70] : memref<16x128x128xbf16, #tpu.memory_space<vmem>>, vector<1x128x128xbf16>
    %62 = vector.shape_cast %61 : vector<1x128x128xbf16> to vector<128x128xbf16>
    %cst_71 = arith.constant dense<0.000000e+00> : vector<40x128xf32>
    %63 = tpu.matmul %60, %62, %cst_71 {dimension_numbers = #tpu.dot_dimension_numbers<[1], [0], [0], [1], [0, 0, 1, 1], [], []>} : vector<40x128xbf16>, vector<128x128xbf16>, vector<40x128xf32> -> vector<40x128xf32>
    %64 = arith.addf %58, %63 : vector<40x128xf32>
    %c0_72 = arith.constant 0 : index
    %c0_73 = arith.constant 0 : index
    %c19 = arith.constant 19 : index
    %c0_74 = arith.constant 0 : index
    %65 = vector.load %arg2[%c0_72, %c0_73, %c19, %c0_74] : memref<1x1x72x128xbf16, #tpu.memory_space<vmem>>, vector<1x1x40x128xbf16>
    %66 = vector.shape_cast %65 : vector<1x1x40x128xbf16> to vector<40x128xbf16>
    %c11_75 = arith.constant 11 : index
    %c0_76 = arith.constant 0 : index
    %c0_77 = arith.constant 0 : index
    %67 = vector.load %arg3[%c11_75, %c0_76, %c0_77] : memref<16x128x128xbf16, #tpu.memory_space<vmem>>, vector<1x128x128xbf16>
    %68 = vector.shape_cast %67 : vector<1x128x128xbf16> to vector<128x128xbf16>
    %cst_78 = arith.constant dense<0.000000e+00> : vector<40x128xf32>
    %69 = tpu.matmul %66, %68, %cst_78 {dimension_numbers = #tpu.dot_dimension_numbers<[1], [0], [0], [1], [0, 0, 1, 1], [], []>} : vector<40x128xbf16>, vector<128x128xbf16>, vector<40x128xf32> -> vector<40x128xf32>
    %70 = arith.addf %64, %69 : vector<40x128xf32>
    %c0_79 = arith.constant 0 : index
    %c0_80 = arith.constant 0 : index
    %c24 = arith.constant 24 : index
    %c0_81 = arith.constant 0 : index
    %71 = vector.load %arg2[%c0_79, %c0_80, %c24, %c0_81] : memref<1x1x72x128xbf16, #tpu.memory_space<vmem>>, vector<1x1x40x128xbf16>
    %72 = vector.shape_cast %71 : vector<1x1x40x128xbf16> to vector<40x128xbf16>
    %c12 = arith.constant 12 : index
    %c0_82 = arith.constant 0 : index
    %c0_83 = arith.constant 0 : index
    %73 = vector.load %arg3[%c12, %c0_82, %c0_83] : memref<16x128x128xbf16, #tpu.memory_space<vmem>>, vector<1x128x128xbf16>
    %74 = vector.shape_cast %73 : vector<1x128x128xbf16> to vector<128x128xbf16>
    %cst_84 = arith.constant dense<0.000000e+00> : vector<40x128xf32>
    %75 = tpu.matmul %72, %74, %cst_84 {dimension_numbers = #tpu.dot_dimension_numbers<[1], [0], [0], [1], [0, 0, 1, 1], [], []>} : vector<40x128xbf16>, vector<128x128xbf16>, vector<40x128xf32> -> vector<40x128xf32>
    %76 = arith.addf %70, %75 : vector<40x128xf32>
    %c0_85 = arith.constant 0 : index
    %c0_86 = arith.constant 0 : index
    %c25 = arith.constant 25 : index
    %c0_87 = arith.constant 0 : index
    %77 = vector.load %arg2[%c0_85, %c0_86, %c25, %c0_87] : memref<1x1x72x128xbf16, #tpu.memory_space<vmem>>, vector<1x1x40x128xbf16>
    %78 = vector.shape_cast %77 : vector<1x1x40x128xbf16> to vector<40x128xbf16>
    %c13 = arith.constant 13 : index
    %c0_88 = arith.constant 0 : index
    %c0_89 = arith.constant 0 : index
    %79 = vector.load %arg3[%c13, %c0_88, %c0_89] : memref<16x128x128xbf16, #tpu.memory_space<vmem>>, vector<1x128x128xbf16>
    %80 = vector.shape_cast %79 : vector<1x128x128xbf16> to vector<128x128xbf16>
    %cst_90 = arith.constant dense<0.000000e+00> : vector<40x128xf32>
    %81 = tpu.matmul %78, %80, %cst_90 {dimension_numbers = #tpu.dot_dimension_numbers<[1], [0], [0], [1], [0, 0, 1, 1], [], []>} : vector<40x128xbf16>, vector<128x128xbf16>, vector<40x128xf32> -> vector<40x128xf32>
    %82 = arith.addf %76, %81 : vector<40x128xf32>
    %c0_91 = arith.constant 0 : index
    %c0_92 = arith.constant 0 : index
    %c26 = arith.constant 26 : index
    %c0_93 = arith.constant 0 : index
    %83 = vector.load %arg2[%c0_91, %c0_92, %c26, %c0_93] : memref<1x1x72x128xbf16, #tpu.memory_space<vmem>>, vector<1x1x40x128xbf16>
    %84 = vector.shape_cast %83 : vector<1x1x40x128xbf16> to vector<40x128xbf16>
    %c14 = arith.constant 14 : index
    %c0_94 = arith.constant 0 : index
    %c0_95 = arith.constant 0 : index
    %85 = vector.load %arg3[%c14, %c0_94, %c0_95] : memref<16x128x128xbf16, #tpu.memory_space<vmem>>, vector<1x128x128xbf16>
    %86 = vector.shape_cast %85 : vector<1x128x128xbf16> to vector<128x128xbf16>
    %cst_96 = arith.constant dense<0.000000e+00> : vector<40x128xf32>
    %87 = tpu.matmul %84, %86, %cst_96 {dimension_numbers = #tpu.dot_dimension_numbers<[1], [0], [0], [1], [0, 0, 1, 1], [], []>} : vector<40x128xbf16>, vector<128x128xbf16>, vector<40x128xf32> -> vector<40x128xf32>
    %88 = arith.addf %82, %87 : vector<40x128xf32>
    %c0_97 = arith.constant 0 : index
    %c0_98 = arith.constant 0 : index
    %c27 = arith.constant 27 : index
    %c0_99 = arith.constant 0 : index
    %89 = vector.load %arg2[%c0_97, %c0_98, %c27, %c0_99] : memref<1x1x72x128xbf16, #tpu.memory_space<vmem>>, vector<1x1x40x128xbf16>
    %90 = vector.shape_cast %89 : vector<1x1x40x128xbf16> to vector<40x128xbf16>
    %c15 = arith.constant 15 : index
    %c0_100 = arith.constant 0 : index
    %c0_101 = arith.constant 0 : index
    %91 = vector.load %arg3[%c15, %c0_100, %c0_101] : memref<16x128x128xbf16, #tpu.memory_space<vmem>>, vector<1x128x128xbf16>
    %92 = vector.shape_cast %91 : vector<1x128x128xbf16> to vector<128x128xbf16>
    %cst_102 = arith.constant dense<0.000000e+00> : vector<40x128xf32>
    %93 = tpu.matmul %90, %92, %cst_102 {dimension_numbers = #tpu.dot_dimension_numbers<[1], [0], [0], [1], [0, 0, 1, 1], [], []>} : vector<40x128xbf16>, vector<128x128xbf16>, vector<40x128xf32> -> vector<40x128xf32>
    %94 = arith.addf %88, %93 : vector<40x128xf32>
    %95 = tpu.iota {dimensions = array<i32: 0>} : vector<40x1xi32>
    %c8_i32 = arith.constant 8 : i32
    %c0_i32 = arith.constant 0 : i32
    %96 = arith.cmpi eq, %c8_i32, %c0_i32 : i32
    %c1_i32 = arith.constant 1 : i32
    %97 = arith.select %96, %c1_i32, %c8_i32 : i32
    %98 = vector.broadcast %97 : i32 to vector<40x1xi32>
    %99 = arith.remsi %95, %98 : vector<40x1xi32>
    %c0_i32_103 = arith.constant 0 : i32
    %100 = vector.broadcast %c0_i32_103 : i32 to vector<40x1xi32>
    %101 = arith.cmpi ne, %99, %100 : vector<40x1xi32>
    %c0_i32_104 = arith.constant 0 : i32
    %102 = vector.broadcast %c0_i32_104 : i32 to vector<40x1xi32>
    %103 = arith.cmpi slt, %99, %102 : vector<40x1xi32>
    %c0_i32_105 = arith.constant 0 : i32
    %104 = arith.cmpi slt, %97, %c0_i32_105 : i32
    %105 = vector.broadcast %104 : i1 to vector<40x1xi1>
    %106 = vector.broadcast %105 : vector<40x1xi1> to vector<40x1xi1>
    %107 = arith.xori %103, %106 : vector<40x1xi1>
    %108 = arith.andi %107, %101 : vector<40x1xi1>
    %109 = vector.broadcast %97 : i32 to vector<40x1xi32>
    %110 = arith.addi %99, %109 : vector<40x1xi32>
    %111 = arith.select %108, %110, %99 : vector<40x1xi1>, vector<40x1xi32>
    %c5_i32 = arith.constant 5 : i32
    %112 = vector.broadcast %c5_i32 : i32 to vector<40x1xi32>
    %113 = arith.cmpi slt, %111, %112 : vector<40x1xi32>
    %c0_106 = arith.constant 0 : index
    %c0_107 = arith.constant 0 : index
    %114 = vector.load %arg4[%c0_106, %c0_107] : memref<1x128xf32, #tpu.memory_space<vmem>>, vector<1x128xf32>
    %115 = vector.broadcast %114 : vector<1x128xf32> to vector<40x128xf32>
    %116 = arith.addf %94, %115 : vector<40x128xf32>
    %cst_108 = arith.constant 0.000000e+00 : f32
    %117 = vector.shape_cast %113 : vector<40x1xi1> to vector<40x1xi1>
    %118 = vector.broadcast %117 : vector<40x1xi1> to vector<40x128xi1>
    %119 = vector.broadcast %cst_108 : f32 to vector<40x128xf32>
    %120 = arith.select %118, %116, %119 : vector<40x128xi1>, vector<40x128xf32>
    %121 = arith.truncf %120 : vector<40x128xf32> to vector<40x128xbf16>
    %c0_109 = arith.constant 0 : index
    %c0_110 = arith.constant 0 : index
    %c0_111 = arith.constant 0 : index
    %122 = vector.load %arg5[%c0_109, %c0_110, %c0_111] : memref<1x40x128xbf16, #tpu.memory_space<vmem>>, vector<1x40x128xbf16>
    %123 = vector.shape_cast %122 : vector<1x40x128xbf16> to vector<40x128xbf16>
    %124 = vector.shape_cast %121 : vector<40x128xbf16> to vector<1x40x128xbf16>
    tpu.vector_store %arg5[%c0_109, %c0_110, %c0_111], %124 {strides = array<i32>} : memref<1x40x128xbf16, #tpu.memory_space<vmem>>, vector<1x40x128xbf16>,
    return
  }
  func.func @transform_0(%arg0: i32, %arg1: i32) -> (i32, i32, i32, i32) {
    %c0_i32 = arith.constant 0 : i32
    %c0_i32_0 = arith.constant 0 : i32
    %c0_i32_1 = arith.constant 0 : i32
    %c0_i32_2 = arith.constant 0 : i32
    return %arg1, %c0_i32, %c0_i32_0, %c0_i32_1 : i32, i32, i32, i32
  }
  func.func @transform_1(%arg0: i32, %arg1: i32) -> (i32, i32, i32) {
    %c0_i32 = arith.constant 0 : i32
    %c0_i32_0 = arith.constant 0 : i32
    %c0_i32_1 = arith.constant 0 : i32
    return %c0_i32, %c0_i32_0, %arg0 : i32, i32, i32
  }
  func.func @transform_2(%arg0: i32, %arg1: i32) -> (i32, i32) {
    %c0_i32 = arith.constant 0 : i32
    %c0_i32_0 = arith.constant 0 : i32
    return %c0_i32, %arg0 : i32, i32
  }
  func.func @transform_3(%arg0: i32, %arg1: i32) -> (i32, i32, i32) {
    %c0_i32 = arith.constant 0 : i32
    %c0_i32_0 = arith.constant 0 : i32
    return %arg1, %c0_i32, %arg0 : i32, i32, i32
  }
}

</mosaic_0001>

<bundles_post_ra>
// kernel: _lambda_.5
= control target key start
LH: loop header
LB: loop body
LE: loop exit
PB: predicated region body
PF: predicated region fallthrough
CT: control target
= control target key end

     0   :  { %s1121_s12 = smov 0   ;;  %s1123_s13 = smov 0   ;;  %s1542_s0 = inlined_call_operand.vmem [shape: bf16[2,1,90,128], index: 0, kind: input, shape index: {}]   ;;  %s1543_s1 = inlined_call_operand.vmem [shape: bf16[1,128,128], index: 1, kind: input, shape index: {}]   ;;  %s1544_s2 = inlined_call_operand.vmem [shape: f32[1,128], index: 2, kind: input, shape index: {}]   ;;  %s1545_s3 = inlined_call_operand.vmem [shape: bf16[2,90,128], index: 3, kind: output, shape index: {}]  }
   0x1   :  { %s1125_s14 = smov 0  }
   0x2 LB: > { %s22_s15 = sadd.s32 1, %s1095_s13  ;;  %p883_p0 = scmp.ge.s32.totalorder %s1099_s14, 1  ;;  %s1099_s14 = sphi %s1125_s14, %s13_s14   ;;  %s1095_s13 = sphi %s1123_s13, %s1595_s13   ;;  %s1091_s12 = sphi %s1121_s12, %s1594_s12  }
   0x3   : > { %p23_p1 = scmp.ge.s32.totalorder %s22_s15, 2  ;;  %p168_p2 = scmp.lt.s32.totalorder %s1099_s14, 3 }
   0x5   : > { %s1597_s15 = smov (%p23_p1, %s22_s15), 0  ;;  %p169_p3 = pnand %p883_p0, %p168_p2 }
   0x6   : > { %v1063_v0 = vld [vmem:[%s1543_s1] sm:$0xff] (!%p169_p3)   ;;  %p202_p4 = scmp.lt.s32.totalorder (!%p169_p3), %s1091_s12, 1  ;;  %v1064_v1 = vld [vmem:[%s1543_s1 + $0x8] sm:$0xff] (!%p169_p3)   ;;  %v1065_v2 = vld [vmem:[%s1543_s1 + $0x10] sm:$0xff] (!%p169_p3)   ;;  %v251_v14 = vlaneseq (!%p169_p3) }
   0x7   : > { %172 = sbr.rel (%p169_p3) target bundleno = 274 (0x112), region = 32  ;;  %998 = vmatprep.subr.bf16.mxu1 (!%p169_p3), %v1063_v0  ;;  %970 = vmatprep.subr.bf16.mxu0 (!%p169_p3), %v1063_v0  ;;  %v1066_v3 = vld [vmem:[%s1543_s1 + $0x18] sm:$0xff] (!%p169_p3)   ;;  %v1067_v6 = vld [vmem:[%s1543_s1 + $0x20] sm:$0xff] (!%p169_p3)   ;;  %v1068_v7 = vld [vmem:[%s1543_s1 + $0x28] sm:$0xff] (!%p169_p3)  }
   0x8   : > { %1006 = vmatpush3.bf16.msra.mxu1 (!%p169_p3), %v1063_v0  ;;  %971 = vmatpush3.bf16.msra.mxu0 (!%p169_p3), %v1063_v0  ;;  %v1069_v8 = vld [vmem:[%s1543_s1 + $0x30] sm:$0xff] (!%p169_p3)   ;;  %v1070_v9 = vld [vmem:[%s1543_s1 + $0x38] sm:$0xff] (!%p169_p3)   ;;  %v1179_v15 = vshrl.u32 (!%p169_p3), %v251_v14, 7 }
   0x9   : > { %999 = vmatprep.subr.bf16.mxu1 (!%p169_p3), %v1064_v1  ;;  %972 = vmatprep.subr.bf16.mxu0 (!%p169_p3), %v1064_v1 }
   0xa   : > { %v258_v16 = vadd.s32 (!%p169_p3), 48, %v1179_v15  ;;  %v256_v17 = vadd.s32 (!%p169_p3), 32, %v1179_v15  ;;  %v259_v18 = vadd.s32 (!%p169_p3), 56, %v1179_v15  ;;  %v257_v21 = vadd.s32 (!%p169_p3), 40, %v1179_v15 }
   0xb   : > { %v254_v24 = vadd.s32 (!%p169_p3), 16, %v1179_v15  ;;  %v255_v27 = vadd.s32 (!%p169_p3), 24, %v1179_v15  ;;  %v1200_v30 = vadd.s32 (!%p169_p3), 8, %v1179_v15  ;;  %v1206_v33 = vadd.s32 (!%p169_p3), 80, %v1179_v15 }
   0xc   : > { %1007 = vmatpush3.bf16.msra.mxu1 (!%p169_p3), %v1064_v1  ;;  %973 = vmatpush3.bf16.msra.mxu0 (!%p169_p3), %v1064_v1  ;;  %v1184_v19 = vmul.u32.u64.low (!%p169_p3), 3435973837, %v258_v16  ;;  %v1185_v20 = vmul.u32.u64.high 3435973837, %v258_v16, %v1184_v19  ;;  %v1188_v22 = vmul.u32.u64.low (!%p169_p3), 3435973837, %v256_v17  ;;  %v1189_v23 = vmul.u32.u64.high 3435973837, %v256_v17, %v1188_v22 }
   0xd   : > { %1000 = vmatprep.subr.bf16.mxu1 (!%p169_p3), %v1065_v2  ;;  %974 = vmatprep.subr.bf16.mxu0 (!%p169_p3), %v1065_v2  ;;  %v1192_v25 = vmul.u32.u64.low (!%p169_p3), 3435973837, %v259_v18  ;;  %v1193_v26 = vmul.u32.u64.high 3435973837, %v259_v18, %v1192_v25  ;;  %v1196_v28 = vmul.u32.u64.low (!%p169_p3), 3435973837, %v257_v21  ;;  %v1197_v29 = vmul.u32.u64.high 3435973837, %v257_v21, %v1196_v28 }
   0xe   : > { %s1599_s12 = smov (!%p202_p4, %s1091_s12), 1  ;;  %v1202_v31 = vmul.u32.u64.low 3435973837, %v254_v24  ;;  %v1203_v32 = vmul.u32.u64.high 3435973837, %v254_v24, %v1202_v31  ;;  %v1209_v34 = vmul.u32.u64.low 3435973837, %v1179_v15  ;;  %v1210_v35 = vmul.u32.u64.high 3435973837, %v1179_v15, %v1209_v34 }
   0xf   : > { %s1014_s22 = smul.u32 48, %s1599_s12  ;;  %v1213_v36 = vadd.s32 64, %v1179_v15  ;;  %v1215_v37 = vmul.u32.u64.low 3435973837, %v255_v27  ;;  %v1216_v38 = vmul.u32.u64.high 3435973837, %v255_v27, %v1215_v37  ;;  %v1219_v39 = vadd.s32 88, %v1179_v15 }
  0x10   : > { %1008 = vmatpush3.bf16.msra.mxu1 %v1065_v2  ;;  %975 = vmatpush3.bf16.msra.mxu0 %v1065_v2  ;;  %v336_v40 = vshrl.u32 %v1185_v20, 3  ;;  %v1223_v41 = vmul.u32.u64.low 3435973837, %v1200_v30  ;;  %v1224_v42 = vmul.u32.u64.high 3435973837, %v1200_v30, %v1223_v41  ;;  %v314_v43 = vshrl.u32 %v1189_v23, 3 }
  0x11   : > { %s1156_s25 = scalar_lea.vmem %s1542_s0, %s1014_s22  ;;  %1001 = vmatprep.subr.bf16.mxu1 %v1066_v3  ;;  %976 = vmatprep.subr.bf16.mxu0 %v1066_v3  ;;  %v1228_v44 = vmul.u32.u64.low 3435973837, %v1206_v33  ;;  %v1229_v45 = vmul.u32.u64.high 3435973837, %v1206_v33, %v1228_v44  ;;  %v1232_v46 = vmul.u32.u64.low 3435973837, %v1213_v36  ;;  %v1233_v47 = vmul.u32.u64.high 3435973837, %v1213_v36, %v1232_v46  ;;  %s1484_s17 = scalar_lea.vmem %s1545_s3, %s1014_s22 }
  0x12   : > { %v1071_v4 = vld [vmem:[%s1156_s25 + $0x10] sm:$0xff]   ;;  %v1073_v5 = vld [vmem:[%s1156_s25] sm:$0xff]   ;;  %v1072_v10 = vld [vmem:[%s1156_s25 + $0x18] sm:$0xff]   ;;  %v1236_v48 = vadd.s32 72, %v1179_v15  ;;  %v347_v49 = vshrl.u32 %v1193_v26, 3  ;;  %v337_v52 = vmul.u32 10, %v336_v40 }
  0x13   : > { %990 = vmatprep.mubr.bf16.mxu1 %v1071_v4  ;;  %986 = vmatprep.mubr.bf16.mxu0 %v1073_v5  ;;  %v1074_v11 = vld [vmem:[%s1156_s25 + $0x8] sm:$0xff]   ;;  %v1075_v12 = vld [vmem:[%s1156_s25 + $0x20] sm:$0xff]   ;;  %v1240_v50 = vmul.u32.u64.low 3435973837, %v1219_v39  ;;  %v1241_v51 = vmul.u32.u64.high 3435973837, %v1219_v39, %v1240_v50  ;;  %v325_v53 = vshrl.u32 %v1197_v29, 3  ;;  %v315_v54 = vmul.u32 10, %v314_v43 }
  0x14   : > { %1009 = vmatpush3.bf16.msra.mxu1 %v1066_v3  ;;  %977 = vmatpush3.bf16.msra.mxu0 %v1066_v3  ;;  %v1076_v13 = vld [vmem:[%s1156_s25 + $0x28] sm:$0x1f]   ;;  %v292_v55 = vshrl.u32 %v1203_v32, 3  ;;  %v270_v56 = vshrl.u32 %v1210_v35, 3  ;;  %v1247_v57 = vmul.u32.u64.low 3435973837, %v1236_v48  ;;  %v1248_v58 = vmul.u32.u64.high 3435973837, %v1236_v48, %v1247_v57 }
  0x15   : > { %1002 = vmatprep.subr.bf16.mxu1 %v1067_v6  ;;  %978 = vmatprep.subr.bf16.mxu0 %v1067_v6  ;;  %v348_v59 = vmul.u32 10, %v347_v49  ;;  %v303_v60 = vshrl.u32 %v1216_v38, 3  ;;  %v1251_v61 = vsub.s32 %v258_v16, %v337_v52  ;;  %v326_v62 = vmul.u32 10, %v325_v53 }
  0x16   : > { %v281_v63 = vshrl.u32 %v1224_v42, 3  ;;  %v1254_v0 = vsub.s32 %v256_v17, %v315_v54  ;;  %v293_v1 = vmul.u32 10, %v292_v55  ;;  %v380_v2 = vshrl.u32 %v1229_v45, 3 }
  0x17   : > { %v271_v3 = vmul.u32 10, %v270_v56  ;;  %v358_v4 = vshrl.u32 %v1233_v47, 3  ;;  %v1258_v5 = vsub.s32 %v259_v18, %v348_v59  ;;  %vm402_vm0 = vcmp.ne.s32.totalorder %v1251_v61, 0 }
  0x18   : > { %1010 = vmatpush3.bf16.msra.mxu1 %v1067_v6  ;;  %979 = vmatpush3.bf16.msra.mxu0 %v1067_v6  ;;  %v304_v6 = vmul.u32 10, %v303_v60  ;;  %vm414_vm1 = vcmp.lt.s32.totalorder %v1251_v61, 0  ;;  %vm400_vm2 = vcmp.ne.s32.totalorder %v1254_v0, 0  ;;  %vm412_vm3 = vcmp.lt.s32.totalorder %v1254_v0, 0 }
  0x19   : > { %1003 = vmatprep.subr.bf16.mxu1 %v1068_v7  ;;  %980 = vmatprep.subr.bf16.mxu0 %v1068_v7  ;;  %v359_v14 = vmul.u32 10, %v358_v4  ;;  %v369_v16 = vshrl.u32 %v1248_v58, 3  ;;  %vm403_vm4 = vcmp.ne.s32.totalorder %v1258_v5, 0  ;;  %vm415_vm5 = vcmp.lt.s32.totalorder %v1258_v5, 0  ;;  %vm1282_vm6 = vmand %vm414_vm1, %vm402_vm0 }
  0x1a   : > { %v1276_v17 = vsub.s32 %v255_v27, %v304_v6  ;;  %vm1294_vm9 = vmand %vm412_vm3, %vm400_vm2  ;;  %v439_v22 = vadd.s32 10, %v1258_v5 }
  0x1b   : > { %vm1304_vm12 = vmand %vm415_vm5, %vm403_vm4  ;;  %v1311_v25 = vsub.s32 %v1213_v36, %v359_v14  ;;  %v370_v26 = vmul.u32 10, %v369_v16 }
  0x1c   : > { %1011 = vmatpush3.bf16.msra.mxu1 %v1068_v7  ;;  %981 = vmatpush3.bf16.msra.mxu0 %v1068_v7  ;;  %v391_v7 = vshrl.u32 %v1241_v51, 3  ;;  %vm399_vm0 = vcmp.ne.s32.totalorder %v1276_v17, 0  ;;  %vm411_vm1 = vcmp.lt.s32.totalorder %v1276_v17, 0  ;;  %v435_v37 = vadd.s32 10, %v1276_v17 }
  0x1d   : > { %1004 = vmatprep.subr.bf16.mxu1 %v1069_v8  ;;  %982 = vmatprep.subr.bf16.mxu0 %v1069_v8  ;;  %v1355_v38 = vsub.s32 %v1236_v48, %v370_v26  ;;  %v1390_v48 = vld [vmem:[%s1544_s2] ss:$0 sm:$0xff]  ;;  %v440_v51 = vadd.s32 10, %v1311_v25 }
  0x1e   : > { %v392_v18 = vmul.u32 10, %v391_v7 }
  0x20   : > { %1012 = vmatpush3.bf16.msra.mxu1 %v1069_v8  ;;  %983 = vmatpush3.bf16.msra.mxu0 %v1069_v8  ;;  %v1263_v8 = vsub.s32 %v257_v21, %v326_v62  ;;  %v1321_v29 = vsub.s32 %v1219_v39, %v392_v18  ;;  %v451_v39 = vsel %vm1304_vm12, %v439_v22, %v1258_v5 }
  0x21   : > { %1005 = vmatprep.subr.bf16.mxu1 %v1070_v9  ;;  %984 = vmatprep.subr.bf16.mxu0 %v1070_v9 }
  0x22   : > { %vm401_vm7 = vcmp.ne.s32.totalorder %v1263_v8, 0  ;;  %vm413_vm8 = vcmp.lt.s32.totalorder %v1263_v8, 0  ;;  %v437_v28 = vadd.s32 10, %v1263_v8  ;;  %v443_v52 = vadd.s32 10, %v1321_v29 }
  0x23   : > { %vm1313_vm15 = vmand %vm413_vm8, %vm401_vm7 }
  0x24   : > { %1013 = vmatpush3.bf16.msra.mxu1 %v1070_v9  ;;  %985 = vmatpush3.bf16.msra.mxu0 %v1070_v9  ;;  %v282_v9 = vmul.u32 10, %v281_v63  ;;  %v449_v43 = vsel %vm1313_vm15, %v437_v28, %v1263_v8 }
  0x26   : > { %v1290_v20 = vsub.s32 %v1200_v30, %v282_v9 }
  0x27   : > { %991 = vmatmul.mubr.bf16.vlgmr.msra.gmra.mrb[0].mxu1 %v1072_v10  ;;  %987 = vmatmul.mubr.bf16.vlgmr.msra.gmra.mrb[0].mxu0 %v1074_v11  ;;  %v438_v10 = vadd.s32 10, %v1251_v61  ;;  %v1267_v11 = vsub.s32 %v254_v24, %v293_v1 }
  0x28   : > { %994 = vmatprep.mubr.bf16.mxu1 %v1075_v12  ;;  %v381_v12 = vmul.u32 10, %v380_v2  ;;  %vm397_vm3 = vcmp.ne.s32.totalorder %v1290_v20, 0  ;;  %vm409_vm4 = vcmp.lt.s32.totalorder %v1290_v20, 0  ;;  %v433_v41 = vadd.s32 10, %v1290_v20 }
  0x29   : > { %vm398_vm10 = vcmp.ne.s32.totalorder %v1267_v11, 0  ;;  %vm410_vm11 = vcmp.lt.s32.totalorder %v1267_v11, 0  ;;  %v434_v31 = vadd.s32 10, %v1267_v11 }
  0x2a   : > { %v1302_v23 = vsub.s32 %v1206_v33, %v381_v12  ;;  %vm1323_vm2 = vmand %vm410_vm11, %vm398_vm10  ;;  %v450_v33 = vsel %vm1282_vm6, %v438_v10, %v1251_v61  ;;  %vm404_vm6 = vcmp.ne.s32.totalorder %v1311_v25, 0 }
  0x2b   : > { %vm1347_vm10 = vmand %vm411_vm1, %vm399_vm0  ;;  %v446_v42 = vsel %vm1323_vm2, %v434_v31, %v1267_v11  ;;  %vm1383_vm0 = vcmp.lt.s32.totalorder %v450_v33, 9  ;;  %vm1406_vm2 = vcmp.lt.s32.totalorder %v451_v39, 9 }
  0x2c   : > { %vm406_vm7 = vcmp.ne.s32.totalorder %v1302_v23, 0  ;;  %vm418_vm8 = vcmp.lt.s32.totalorder %v1302_v23, 0  ;;  %vm1360_vm11 = vmand %vm409_vm4, %vm397_vm3  ;;  %v442_v46 = vadd.s32 10, %v1302_v23  ;;  %v447_v54 = vsel %vm1347_vm10, %v435_v37, %v1276_v17 }
  0x2d   : > { %vm1378_vm12 = vmand %vm418_vm8, %vm406_vm7  ;;  %vm405_vm4 = vcmp.ne.s32.totalorder %v1355_v38, 0  ;;  %vm1421_vm7 = vcmp.lt.s32.totalorder %v446_v42, 9  ;;  %vm1425_vm8 = vcmp.lt.s32.totalorder %v449_v43, 9  ;;  %v445_v61 = vsel %vm1360_vm11, %v433_v41, %v1290_v20 }
  0x2e   : > { %v454_v2 = vsel %vm1378_vm12, %v442_v46, %v1302_v23 }
  0x2f   : > { %995 = vmatmul.mubr.bf16.gmra.mrb[4].mxu1 %v1076_v13  ;;  %v1271_v13 = vsub.s32 %v1179_v15, %v271_v3  ;;  %v436_v15 = vadd.s32 10, %v1254_v0  ;;  %v441_v3 = vadd.s32 10, %v1355_v38 }
  0x31   : > { %vm396_vm13 = vcmp.ne.s32.totalorder %v1271_v13, 0  ;;  %vm408_vm14 = vcmp.lt.s32.totalorder %v1271_v13, 0  ;;  %v432_v32 = vadd.s32 10, %v1271_v13  ;;  %v448_v34 = vsel %vm1294_vm9, %v436_v15, %v1254_v0 }
  0x32   : > { %vm1341_vm5 = vmand %vm408_vm14, %vm396_vm13  ;;  %vm416_vm9 = vcmp.lt.s32.totalorder %v1311_v25, 0  ;;  %vm407_vm13 = vcmp.ne.s32.totalorder %v1321_v29, 0  ;;  %vm419_vm14 = vcmp.lt.s32.totalorder %v1321_v29, 0  ;;  %vm1392_vm15 = vcmp.lt.s32.totalorder %v448_v34, 9 }
  0x33   : > { %v444_v44 = vsel %vm1341_vm5, %v432_v32, %v1271_v13  ;;  %vm1400_vm1 = vmand %vm416_vm9, %vm404_vm6  ;;  %vm417_vm5 = vcmp.lt.s32.totalorder %v1355_v38, 0  ;;  %vm1444_vm6 = vcmp.lt.s32.totalorder %v447_v54, 9 }
  0x34   : > { %vm1415_vm3 = vmand %vm419_vm14, %vm407_vm13  ;;  %vm1429_vm10 = vcmp.lt.s32.totalorder %v444_v44, 9  ;;  %v452_v9 = vsel %vm1400_vm1, %v440_v51, %v1311_v25  ;;  %vm1463_vm14 = vcmp.lt.s32.totalorder %v445_v61, 9  ;;  %vm1468_vm1 = vcmp.lt.s32.totalorder %v454_v2, 9 }
  0x35   : > { %v455_v10 = vsel %vm1415_vm3, %v443_v52, %v1321_v29  ;;  %vm1458_vm9 = vmand %vm417_vm5, %vm405_vm4 }
  0x36   : > { %v453_v23 = vsel %vm1458_vm9, %v441_v3, %v1355_v38 }
  0x37   : > { %vm1498_vm9 = vcmp.lt.s32.totalorder %v453_v23, 9 }
  0xfa   : > { %v992_v56 = vpop.f32.mrb[0].mxu1  ;;  %v988_v58 = vpop.f32.mrb[0].mxu0 }
  0xfb   : > { %v618_v62 = vadd.f32 %v992_v56, %v1390_v48  ;;  %v609_v63 = vpop.f32.mrb[1].mxu1  ;;  %v602_v0 = vadd.f32 %v988_v58, %v1390_v48  ;;  %v593_v1 = vpop.f32.mrb[1].mxu0 }
  0xfc   : > { %v610_v4 = vadd.f32 %v1390_v48, %v609_v63  ;;  %v993_v5 = vpop.f32.mrb[2].mxu1  ;;  %v594_v6 = vadd.f32 %v1390_v48, %v593_v1  ;;  %v989_v8 = vpop.f32.mrb[2].mxu0 }
  0xfd   : > { %vm646_vm11 = vcmp.ge.f32.partialorder %v618_v62, 0.0  ;;  %v658_v12 = vmul.f32 0.2, %v618_v62  ;;  %v621_v13 = vadd.f32 %v993_v5, %v1390_v48  ;;  %vm642_vm13 = vcmp.ge.f32.partialorder %v602_v0, 0.0  ;;  %v612_v14 = vpop.f32.mrb[3].mxu1  ;;  %v596_v17 = vpop.f32.mrb[3].mxu0 }
  0xfe   : > { %vm644_vm12 = vcmp.ge.f32.partialorder %v610_v4, 0.0  ;;  %v656_v18 = vmul.f32 0.2, %v610_v4  ;;  %v654_v19 = vmul.f32 0.2, %v602_v0  ;;  %v613_v15 = vadd.f32 %v1390_v48, %v612_v14 }
  0xff   : > { %v670_v21 = vsel %vm646_vm11, %v618_v62, %v658_v12  ;;  %vm647_vm3 = vcmp.ge.f32.partialorder %v621_v13, 0.0  ;;  %v659_v22 = vmul.f32 0.2, %v621_v13  ;;  %vm640_vm5 = vcmp.ge.f32.partialorder %v594_v6, 0.0 }
 0x100   : > { %v668_v24 = vsel %vm644_vm12, %v610_v4, %v656_v18  ;;  %v666_v25 = vsel %vm642_vm13, %v602_v0, %v654_v19  ;;  %vm645_vm4 = vcmp.ge.f32.partialorder %v613_v15, 0.0  ;;  %v706_v26 = vsel %vm1383_vm0, %v670_v21, 0.0 }
 0x101   : > { %v704_v27 = vsel %vm1392_vm15, %v668_v24, 0.0  ;;  %v671_v28 = vsel %vm647_vm3, %v621_v13, %v659_v22  ;;  %v657_v29 = vmul.f32 0.2, %v613_v15  ;;  %v652_v31 = vmul.f32 0.2, %v594_v6 }
 0x102   : > { %v707_v30 = vsel %vm1406_vm2, %v671_v28, 0.0  ;;  %v605_v32 = vadd.f32 %v989_v8, %v1390_v48  ;;  %v597_v33 = vadd.f32 %v1390_v48, %v596_v17  ;;  %v996_v34 = vpop.f32.mrb[4].mxu1  ;;  %vm1490_vm0 = vcmp.lt.s32.totalorder %v452_v9, 9 }
 0x103   : > { %vm1494_vm15 = vcmp.lt.s32.totalorder %v455_v10, 9  ;;  %v945_v38 = vpack.c.bf16 %v707_v30, %v706_v26  ;;  %v702_v39 = vsel %vm1421_vm7, %v666_v25, 0.0  ;;  %v669_v40 = vsel %vm645_vm4, %v613_v15, %v657_v29  ;;  %v625_v42 = vpop.f32.mrb[5].mxu1 }
 0x104   : > { %v634_v41 = vadd.f32 %v996_v34, %v1390_v48  ;;  %v705_v43 = vsel %vm1425_vm8, %v669_v40, 0.0  ;;  %v664_v44 = vsel %vm640_vm5, %v594_v6, %v652_v31  ;;  %vm643_vm2 = vcmp.ge.f32.partialorder %v605_v32, 0.0  ;;  %v997_v46 = vpop.f32.mrb[6].mxu1 }
 0x105   : > { %v655_v45 = vmul.f32 0.2, %v605_v32  ;;  %954 = vst [vmem:[%s1484_s17 + $0x18] sm:$0xff] %v945_v38   ;;  %v940_v47 = vpack.c.bf16 %v705_v43, %v704_v27  ;;  %v700_v49 = vsel %vm1429_vm10, %v664_v44, 0.0  ;;  %vm641_vm7 = vcmp.ge.f32.partialorder %v597_v33, 0.0  ;;  %v628_v51 = vpop.f32.mrb[7].mxu1 }
 0x106   : > { %v653_v50 = vmul.f32 0.2, %v597_v33  ;;  %vm650_vm11 = vcmp.ge.f32.partialorder %v634_v41, 0.0  ;;  %v662_v53 = vmul.f32 0.2, %v634_v41  ;;  %v626_v54 = vadd.f32 %v1390_v48, %v625_v42 }
 0x107   : > { %v667_v52 = vsel %vm643_vm2, %v605_v32, %v655_v45  ;;  %953 = vst [vmem:[%s1484_s17 + $0x10] sm:$0xff] %v940_v47   ;;  %v637_v57 = vadd.f32 %v997_v46, %v1390_v48  ;;  %v629_v58 = vadd.f32 %v1390_v48, %v628_v51 }
 0x108   : > { %v703_v55 = vsel %vm1444_vm6, %v667_v52, 0.0  ;;  %v665_v56 = vsel %vm641_vm7, %v597_v33, %v653_v50  ;;  %v674_v61 = vsel %vm650_vm11, %v634_v41, %v662_v53  ;;  %vm648_vm8 = vcmp.ge.f32.partialorder %v626_v54, 0.0 }
 0x109   : > { %v935_v59 = vpack.c.bf16 %v703_v55, %v702_v39  ;;  %v701_v60 = vsel %vm1463_vm14, %v665_v56, 0.0  ;;  %v710_v63 = vsel %vm1468_vm1, %v674_v61, 0.0  ;;  %v660_v0 = vmul.f32 0.2, %v626_v54 }
 0x10a   : > { %v930_v62 = vpack.c.bf16 %v701_v60, %v700_v49  ;;  %vm651_vm10 = vcmp.ge.f32.partialorder %v637_v57, 0.0  ;;  %v925_v1 = vpack.c.bf16 %v710_v63, %v710_v63  ;;  %v663_v2 = vmul.f32 0.2, %v637_v57 }
 0x10b   : > { %952 = vst [vmem:[%s1484_s17 + $0x8] sm:$0xff] %v935_v59   ;;  %vm649_vm6 = vcmp.ge.f32.partialorder %v629_v58, 0.0  ;;  %v661_v48 = vmul.f32 0.2, %v629_v58  ;;  %v672_v3 = vsel %vm648_vm8, %v626_v54, %v660_v0 }
 0x10c   : > { %931 = vst [vmem:[%s1484_s17] sm:$0xff] %v930_v62   ;;  %770 = vst [vmem:[%s1484_s17 + $0x28] sm:$0xf] %v925_v1  ;;  %v675_v4 = vsel %vm651_vm10, %v637_v57, %v663_v2  ;;  %v708_v6 = vsel %vm1490_vm0, %v672_v3, 0.0 }
 0x10d   : > { %v673_v5 = vsel %vm649_vm6, %v629_v58, %v661_v48  ;;  %v711_v7 = vsel %vm1494_vm15, %v675_v4, 0.0 }
 0x10e   : > { %v709_v8 = vsel %vm1498_vm9, %v673_v5, 0.0  ;;  %v926_v9 = vpack.c.bf16 %v711_v7, %v711_v7 }
 0x10f   : > { %v950_v10 = vpack.c.bf16 %v709_v8, %v708_v6 }
 0x110   : > { %771 = vst [vmem:[%s1484_s17 + $0x2c] sm:$0x1] %v926_v9 }
 0x111   : > { %955 = vst [vmem:[%s1484_s17 + $0x20] sm:$0xff] %v950_v10  }
 0x112 PF: > { %s13_s14 = sadd.s32 1, %s1099_s14   ;;  %s1594_s12 = smov %s1095_s13 }
 0x113   : > { %p10_p5 = scmp.ge.s32.totalorder %s13_s14, 4   ;;  %s1595_s13 = smov %s1597_s15 }
 0x115   :  { %12 = sbr.rel (!%p10_p5) target bundleno = 2 (0x2), region = 68 }

// kernel: _lambda_.6
= control target key start
LH: loop header
LB: loop body
LE: loop exit
PB: predicated region body
PF: predicated region fallthrough
CT: control target
= control target key end

     0   :  { %s3981_s12 = smov 0   ;;  %s3983_s13 = smov 0   ;;  %s4666_s0 = inlined_call_operand.vmem [shape: bf16[2,4,42,128], index: 0, kind: input, shape index: {}]   ;;  %s4667_s1 = inlined_call_operand.vmem [shape: bf16[16,128,128], index: 1, kind: input, shape index: {}]   ;;  %s4668_s2 = inlined_call_operand.vmem [shape: f32[1,128], index: 2, kind: input, shape index: {}]   ;;  %s4669_s3 = inlined_call_operand.vmem [shape: bf16[2,30,128], index: 3, kind: output, shape index: {}]  }
   0x1   :  { %s3985_s14 = smov 0  }
   0x2 LB: > { %s22_s2 = sadd.s32 1, %s3955_s13  ;;  %p2757_p0 = scmp.ge.s32.totalorder %s3959_s14, 1  ;;  %s3959_s14 = sphi %s3985_s14, %s13_s14   ;;  %s3955_s13 = sphi %s3983_s13, %s4687_s13   ;;  %s3951_s12 = sphi %s3981_s12, %s4686_s12  }
   0x3   : > { %p23_p1 = scmp.ge.s32.totalorder %s22_s2, 2  ;;  %p168_p2 = scmp.lt.s32.totalorder %s3959_s14, 3 }
   0x5   : > { %s4689_s2 = smov (%p23_p1, %s22_s2), 0  ;;  %p169_p3 = pnand %p2757_p0, %p168_p2 }
   0x6   : > { %v3779_v0 = vld [vmem:[%s4667_s1 + $0x40] sm:$0xff] (!%p169_p3)   ;;  %v3781_v2 = vld [vmem:[%s4667_s1 + $0x48] sm:$0xff] (!%p169_p3)   ;;  %p202_p4 = scmp.lt.s32.totalorder (!%p169_p3), %s3951_s12, 1  ;;  %v3783_v4 = vld [vmem:[%s4667_s1 + $0x50] sm:$0xff] (!%p169_p3)   ;;  %vm1345_vm0 = vcmask (!%p169_p3), 1044480  }
   0x7   : > { %172 = sbr.rel (%p169_p3) target bundleno = 551 (0x227), region = 32  ;;  %v3780_v1 = vld [vmem:[%s4667_s1 + $0x200] sm:$0xff] (!%p169_p3)   ;;  %3366 = vmatprep.subr.bf16.mxu1 (!%p169_p3), %v3779_v0  ;;  %v3782_v3 = vld [vmem:[%s4667_s1 + $0x208] sm:$0xff] (!%p169_p3)   ;;  %v3784_v5 = vld [vmem:[%s4667_s1 + $0x210] sm:$0xff] (!%p169_p3)   ;;  %vm504_vm1 = vsmask.f32 (!%p169_p3), 7424 }
   0x8   : > { %3526 = vmatprep.subr.bf16.mxu0 (!%p169_p3), %v3780_v1  ;;  %3367 = vmatpush3.bf16.msra.mxu1 (!%p169_p3), %v3779_v0  ;;  %v3785_v6 = vld [vmem:[%s4667_s1 + $0x58] sm:$0xff] (!%p169_p3)   ;;  %v3787_v8 = vld [vmem:[%s4667_s1 + $0x60] sm:$0xff] (!%p169_p3)   ;;  %v3789_v10 = vld [vmem:[%s4667_s1 + $0x68] sm:$0xff] (!%p169_p3)   ;;  %vm1618_vm2 = vsmask.f32 (!%p169_p3), 4352 }
   0x9   : > { %3527 = vmatpush3.bf16.msra.mxu0 (!%p169_p3), %v3780_v1  ;;  %3368 = vmatprep.subr.bf16.mxu1 (!%p169_p3), %v3781_v2  ;;  %v3786_v7 = vld [vmem:[%s4667_s1 + $0x218] sm:$0xff] (!%p169_p3)   ;;  %v3788_v9 = vld [vmem:[%s4667_s1 + $0x220] sm:$0xff] (!%p169_p3)   ;;  %v3790_v12 = vld [vmem:[%s4667_s1 + $0x228] sm:$0xff] (!%p169_p3)  }
   0xa   : > { %3528 = vmatprep.subr.bf16.mxu0 (!%p169_p3), %v3782_v3  ;;  %v3791_v15 = vld [vmem:[%s4667_s1 + $0x70] sm:$0xff] (!%p169_p3)   ;;  %v3793_v19 = vld [vmem:[%s4667_s1 + $0x78] sm:$0xff] (!%p169_p3)   ;;  %v3796_v25 = vld [vmem:[%s4667_s1] sm:$0xff] (!%p169_p3)  }
   0xb   : > { %v3792_v17 = vld [vmem:[%s4667_s1 + $0x230] sm:$0xff] (!%p169_p3)   ;;  %v3794_v22 = vld [vmem:[%s4667_s1 + $0x238] sm:$0xff] (!%p169_p3)   ;;  %v3799_v27 = vld [vmem:[%s4667_s1 + $0x240] sm:$0xff] (!%p169_p3)  }
   0xc   : > { %3369 = vmatpush3.bf16.msra.mxu1 (!%p169_p3), %v3781_v2  ;;  %v3803_v30 = vld [vmem:[%s4667_s1 + $0x8] sm:$0xff] (!%p169_p3)   ;;  %v3805_v32 = vld [vmem:[%s4667_s1 + $0x10] sm:$0xff] (!%p169_p3)   ;;  %v3807_v35 = vld [vmem:[%s4667_s1 + $0x18] sm:$0xff] (!%p169_p3)  }
   0xd   : > { %3529 = vmatpush3.bf16.msra.mxu0 (!%p169_p3), %v3782_v3  ;;  %3370 = vmatprep.subr.bf16.mxu1 (!%p169_p3), %v3783_v4  ;;  %v3804_v31 = vld [vmem:[%s4667_s1 + $0x248] sm:$0xff] (!%p169_p3)   ;;  %v3806_v33 = vld [vmem:[%s4667_s1 + $0x250] sm:$0xff] (!%p169_p3)   ;;  %v3808_v38 = vld [vmem:[%s4667_s1 + $0x258] sm:$0xff] (!%p169_p3)  }
   0xe   : > { %s4691_s12 = smov (!%p202_p4, %s3951_s12), 1  ;;  %3530 = vmatprep.subr.bf16.mxu0 %v3784_v5  ;;  %v3809_v41 = vld [vmem:[%s4667_s1 + $0x20] sm:$0xff]   ;;  %v3811_v44 = vld [vmem:[%s4667_s1 + $0x28] sm:$0xff]   ;;  %v3813_v49 = vld [vmem:[%s4667_s1 + $0x30] sm:$0xff]  }
   0xf   : > { %s3746_s4 = smul.u32 96, %s4691_s12  ;;  %v3810_v43 = vld [vmem:[%s4667_s1 + $0x260] sm:$0xff]   ;;  %v3812_v45 = vld [vmem:[%s4667_s1 + $0x268] sm:$0xff]   ;;  %v3814_v51 = vld [vmem:[%s4667_s1 + $0x270] sm:$0xff]   ;;  %s3196_s20 = sshll.u32 %s4691_s12, 4 }
  0x10   : > { %3371 = vmatpush3.bf16.msra.mxu1 %v3783_v4  ;;  %v3815_v56 = vld [vmem:[%s4667_s1 + $0x38] sm:$0xff]   ;;  %v3818_v2 = vld [vmem:[%s4667_s1 + $0x80] sm:$0xff]   ;;  %s221_s23 = scalar_lea.vmem %s4669_s3, %s3196_s20 }
  0x11   : > { %3531 = vmatpush3.bf16.msra.mxu0 %v3784_v5  ;;  %3372 = vmatprep.subr.bf16.mxu1 %v3785_v6  ;;  %s4038_s16 = scalar_lea.vmem %s4666_s0, %s3746_s4  ;;  %v3816_v58 = vld [vmem:[%s4667_s1 + $0x278] sm:$0xff]   ;;  %v3821_v3 = vld [vmem:[%s4667_s1 + $0x280] sm:$0xff]  }
  0x12   : > { %3532 = vmatprep.subr.bf16.mxu0 %v3786_v7  ;;  %v4041_v11 = vld [vmem:[%s4038_s16 + $0x18] sm:$0xff]   ;;  %v4048_v13 = vld [vmem:[%s4038_s16 + $0x8] sm:$0xff]   ;;  %v4051_v14 = vld [vmem:[%s4038_s16] sm:$0xf8]  }
  0x13   : > { %3382 = vmatprep.mubr.bf16.mxu1 %v4041_v11  ;;  %v1347_v16 = vrot.slane %v4048_v13, 3  ;;  %v1346_v18 = vrot.slane %v4051_v14, 3  ;;  %v3802_v21 = vld [vmem:[%s4038_s16 + $0x10] ss:$0 sps:$4 sm:$0x33]   ;;  %v4094_v34 = vld [vmem:[%s4038_s16] sm:$0xff]  }
  0x14   : > { %3373 = vmatpush3.bf16.msra.mxu1 %v3785_v6  ;;  %v4070_v23 = vld [vmem:[%s4038_s16 + $0x20] sm:$0xf]  ;;  %v2764_v24 = vld [vmem:[%s4038_s16 + $0x24] sm:$0x7]  ;;  %v1349_v26 = vrot.slane %v3802_v21, 3  ;;  %v1620_v46 = vshrl.u32 %v4051_v14, 16 }
  0x15   : > { %3533 = vmatpush3.bf16.msra.mxu0 %v3786_v7  ;;  %3374 = vmatprep.subr.bf16.mxu1 %v3787_v8  ;;  %v1348_v20 = vsel %vm1345_vm0, %v1346_v18, %v1347_v16  ;;  %v2782_v28 = vcombine.low %v4070_v23, %v2764_v24  ;;  %v4101_v36 = vld [vmem:[%s4038_s16 + $0x20] sm:$0xff]   ;;  %v4104_v37 = vld [vmem:[%s4038_s16 + $0x18] sm:$0xf8]   ;;  %v1623_v47 = vshll.u32 %v4051_v14, 16  ;;  %v1628_v48 = vshrl.u32 %v4048_v13, 16  ;;  %v3824_v7 = vld [vmem:[%s4667_s1 + $0x88] sm:$0xff]  }
  0x16   : > { %3534 = vmatprep.subr.bf16.mxu0 %v3788_v9  ;;  %3542 = vmatprep.mubr.bf16.mxu0 %v1348_v20  ;;  %v1350_v29 = vsel %vm1345_vm0, %v1347_v16, %v1349_v26  ;;  %v1490_v39 = vrot.slane %v4101_v36, 3  ;;  %v1489_v40 = vrot.slane %v4104_v37, 3  ;;  %v1631_v50 = vshll.u32 %v4048_v13, 16  ;;  %v3823_v54 = vld [vmem:[%s4038_s16 + $0x28] ss:$0 sps:$4 sm:$0x33]  }
  0x17   : > { %v1622_v52 = vrot.slane %v1620_v46, 3  ;;  %v508_v53 = vshll.u32 %v4094_v34, 16  ;;  %v1625_v55 = vrot.slane %v1623_v47, 4  ;;  %v1630_v57 = vrot.slane %v1628_v48, 3  ;;  %v225_v60 = vld [vmem:[%s4038_s16 + $0x8] sm:$0xf] }
  0x18   : > { %3375 = vmatpush3.bf16.msra.mxu1 %v3787_v8  ;;  %v1491_v42 = vsel %vm1345_vm0, %v1489_v40, %v1490_v39  ;;  %v1633_v59 = vrot.slane %v1631_v50, 4  ;;  %v483_v61 = vld [vmem:[%s4038_s16 + $0xc] sm:$0xf]  ;;  %v506_v0 = vshrl.u32 %v4094_v34, 16  ;;  %v1492_v4 = vrot.slane %v3823_v54, 3  ;;  %v3827_v18 = vld [vmem:[%s4667_s1 + $0x290] sm:$0xff]  }
  0x19   : > { %3535 = vmatpush3.bf16.msra.mxu0 %v3788_v9  ;;  %3376 = vmatprep.subr.bf16.mxu1 %v3789_v10  ;;  %v226_v62 = vld [vmem:[%s4038_s16 + $0xc] sm:$0x7]  ;;  %v4147_v63 = vcombine.low %v225_v60, %v483_v61  ;;  %v510_v1 = vrot.slane %v508_v53, 1  ;;  %v3829_v20 = vld [vmem:[%s4667_s1 + $0x298] sm:$0xff]   ;;  %v2826_v21 = vld [vmem:[%s4038_s16 + $0x24] sm:$0xf] }
  0x1a   : > { %3536 = vmatprep.subr.bf16.mxu0 %v3790_v12  ;;  %v2792_v6 = vcombine.low %v225_v60, %v226_v62  ;;  %v1493_v13 = vsel %vm1345_vm0, %v1490_v39, %v1492_v4  ;;  %v3825_v14 = vld [vmem:[%s4667_s1 + $0x288] sm:$0xff]   ;;  %v647_v24 = vshll.u32 %v4041_v11, 16  ;;  %v3841_v26 = vld [vmem:[%s4038_s16 + $0x10] ss:$0 sps:$4 sm:$0x77]   ;;  %v1778_v39 = vshrl.u32 %v4101_v36, 16 }
  0x1b   : > { %v513_v5 = vshll.u32 %v4147_v63, 16  ;;  %v511_v8 = vor.u32 %v510_v1, %v506_v0  ;;  %v3836_v40 = vld [vmem:[%s4667_s1 + $0xb8] sm:$0xff]   ;;  %v3840_v50 = vld [vmem:[%s4667_s1 + $0x2c0] sm:$0xff]   ;;  %v3844_v61 = vld [vmem:[%s4667_s1 + $0xd0] sm:$0xff]  }
  0x1c   : > { %3377 = vmatpush3.bf16.msra.mxu1 %v3789_v10  ;;  %v1626_v10 = vor.u32 %v1625_v55, %v1622_v52  ;;  %v1780_v47 = vrot.slane %v1778_v39, 3  ;;  %v3845_v62 = vld [vmem:[%s4667_s1 + $0x2d0] sm:$0xff]   ;;  %v3847_v0 = vld [vmem:[%s4667_s1 + $0x2d8] sm:$0xff]   ;;  %v3848_v1 = vld [vmem:[%s4667_s1 + $0xe0] sm:$0xff]  }
  0x1d   : > { %3537 = vmatpush3.bf16.msra.mxu0 %v3790_v12  ;;  %3378 = vmatprep.subr.bf16.mxu1 %v3791_v15  ;;  %v4160_v9 = vrot.slane %v513_v5, 1  ;;  %v4162_v12 = vor.u32 %v1633_v59, %v1630_v57  ;;  %v3842_v57 = vld [vmem:[%s4667_s1 + $0xc8] sm:$0xff]   ;;  %v3870_v39 = vld [vmem:[%s4667_s1 + $0x330] sm:$0xff]  }
  0x1e   : > { %3538 = vmatprep.subr.bf16.mxu0 %v3792_v17  ;;  %v3850_v4 = vld [vmem:[%s4667_s1 + $0xe8] sm:$0xff]  }
  0x1f   : > { %v1635_v16 = vsel %vm1618_vm2, %v1626_v10, %v4162_v12  ;;  %v3851_v5 = vld [vmem:[%s4667_s1 + $0x2e8] sm:$0xff]   ;;  %v3854_v10 = vld [vmem:[%s4667_s1 + $0xf8] sm:$0xff]  }
  0x20   : > { %3379 = vmatpush3.bf16.msra.mxu1 %v3791_v15  ;;  %v516_v15 = vsel %vm504_vm1, %v511_v8, %v4160_v9  ;;  %v3852_v8 = vld [vmem:[%s4667_s1 + $0xf0] sm:$0xff]  }
  0x21   : > { %3539 = vmatpush3.bf16.msra.mxu0 %v3792_v17  ;;  %3380 = vmatprep.subr.bf16.mxu1 %v3793_v19  ;;  %v3826_v17 = vld [vmem:[%s4667_s1 + $0x90] sm:$0xff]  }
  0x22   : > { %3540 = vmatprep.subr.bf16.mxu0 %v3794_v22 }
  0x24   : > { %3381 = vmatpush3.bf16.msra.mxu1 %v3793_v19  ;;  %v3828_v19 = vld [vmem:[%s4667_s1 + $0x98] sm:$0xff]  }
  0x25   : > { %3541 = vmatpush3.bf16.msra.mxu0 %v3794_v22  ;;  %3386 = vmatprep.subr.bf16.mxu1 %v3796_v25  ;;  %v3830_v22 = vld [vmem:[%s4667_s1 + $0xa0] sm:$0xff]  }
  0x26   : > { %3546 = vmatprep.subr.bf16.mxu0 %v3799_v27 }
  0x27   : > { %3383 = vmatmul.mubr.bf16.vlgmr.msra.gmra.mrb[0].mxu1 %v2782_v28  ;;  %v3832_v28 = vld [vmem:[%s4667_s1 + $0xa8] sm:$0xff]  }
  0x28   : > { %3387 = vmatpush3.bf16.msra.mxu1 %v3796_v25  ;;  %3543 = vmatmul.mubr.bf16.vlgmr.msra.gmra.mrb[0].mxu0 %v1350_v29  ;;  %v3831_v25 = vld [vmem:[%s4667_s1 + $0x2a0] sm:$0xff]   ;;  %v3833_v29 = vld [vmem:[%s4667_s1 + $0x2a8] sm:$0xff]  }
  0x29   : > { %3547 = vmatpush3.bf16.msra.mxu0 %v3799_v27  ;;  %3388 = vmatprep.subr.bf16.mxu1 %v3803_v30  ;;  %v4196_v27 = vcombine.low %v4070_v23, %v2826_v21  ;;  %v3834_v23 = vld [vmem:[%s4667_s1 + $0xb0] sm:$0xff]  }
  0x2a   : > { %3548 = vmatprep.subr.bf16.mxu0 %v3804_v31  ;;  %3402 = vmatprep.mubr.bf16.mxu1 %v4094_v34  ;;  %v1640_v34 = vshll.u32 %v3841_v26, 16 }
  0x2b   : > { %3562 = vmatprep.mubr.bf16.mxu0 %v1491_v42 }
  0x2c   : > { %3389 = vmatpush3.bf16.msra.mxu1 %v3803_v30  ;;  %v645_v30 = vshrl.u32 %v4041_v11, 16  ;;  %v1773_v11 = vshll.u32 %v4104_v37, 16 }
  0x2d   : > { %3549 = vmatpush3.bf16.msra.mxu0 %v3804_v31  ;;  %3390 = vmatprep.subr.bf16.mxu1 %v3805_v32  ;;  %v649_v31 = vrot.slane %v647_v24, 1 }
  0x2e   : > { %3550 = vmatprep.subr.bf16.mxu0 %v3806_v33  ;;  %v1775_v46 = vrot.slane %v1773_v11, 4  ;;  %v3869_v11 = vld [vmem:[%s4667_s1 + $0x130] sm:$0xff]  }
  0x2f   : > { %v650_v52 = vor.u32 %v649_v31, %v645_v30  ;;  %v3861_v30 = vld [vmem:[%s4667_s1 + $0x110] sm:$0xff]  }
  0x30   : > { %3391 = vmatpush3.bf16.msra.mxu1 %v3805_v32  ;;  %v652_v32 = vshll.u32 %v4196_v27, 16  ;;  %v3862_v31 = vld [vmem:[%s4667_s1 + $0x310] sm:$0xff]  }
  0x31   : > { %3551 = vmatpush3.bf16.msra.mxu0 %v3806_v33  ;;  %3392 = vmatprep.subr.bf16.mxu1 %v3807_v35  ;;  %v1637_v33 = vshrl.u32 %v3841_v26, 16 }
  0x32   : > { %3552 = vmatprep.subr.bf16.mxu0 %v3808_v38  ;;  %v4230_v53 = vrot.slane %v652_v32, 1  ;;  %v3864_v32 = vld [vmem:[%s4667_s1 + $0x318] sm:$0xff]  }
  0x33   : > { %v1639_v42 = vrot.slane %v1637_v33, 3  ;;  %v3865_v33 = vld [vmem:[%s4667_s1 + $0x120] sm:$0xff]  }
  0x34   : > { %3393 = vmatpush3.bf16.msra.mxu1 %v3807_v35  ;;  %v3835_v35 = vld [vmem:[%s4667_s1 + $0x2b0] sm:$0xff]   ;;  %v655_v59 = vsel %vm504_vm1, %v650_v52, %v4230_v53  ;;  %v3880_v52 = vld [vmem:[%s4667_s1 + $0x148] sm:$0xff]  }
  0x35   : > { %3553 = vmatpush3.bf16.msra.mxu0 %v3808_v38  ;;  %3394 = vmatprep.subr.bf16.mxu1 %v3809_v41  ;;  %v1770_v38 = vshrl.u32 %v4104_v37, 16  ;;  %v517_v37 = vshrl.u32 %v4147_v63, 16  ;;  %v3846_v63 = vld [vmem:[%s4667_s1 + $0xd8] sm:$0xff]  }
  0x36   : > { %3554 = vmatprep.subr.bf16.mxu0 %v3810_v43 }
  0x38   : > { %3395 = vmatpush3.bf16.msra.mxu1 %v3809_v41  ;;  %v1781_v41 = vshll.u32 %v4101_v36, 16  ;;  %v3839_v36 = vld [vmem:[%s4667_s1 + $0xc0] sm:$0xff]  }
  0x39   : > { %3555 = vmatpush3.bf16.msra.mxu0 %v3810_v43  ;;  %3396 = vmatprep.subr.bf16.mxu1 %v3811_v44  ;;  %v1642_v43 = vrot.slane %v1640_v34, 4  ;;  %v3866_v34 = vld [vmem:[%s4667_s1 + $0x320] sm:$0xff]  }
  0x3a   : > { %3556 = vmatprep.subr.bf16.mxu0 %v3812_v45  ;;  %v1783_v48 = vrot.slane %v1781_v41, 4  ;;  %v3879_v41 = vld [vmem:[%s4038_s16 + $0x40] ss:$0 sps:$4 sm:$0x33]  }
  0x3c   : > { %3397 = vmatpush3.bf16.msra.mxu1 %v3811_v44  ;;  %v3837_v44 = vld [vmem:[%s4667_s1 + $0x2b8] sm:$0xff]   ;;  %v4232_v55 = vor.u32 %v1783_v48, %v1780_v47  ;;  %v1936_v47 = vrot.slane %v3879_v41, 3  ;;  %v3877_v48 = vld [vmem:[%s4667_s1 + $0x340] sm:$0xff]  }
  0x3d   : > { %3557 = vmatpush3.bf16.msra.mxu0 %v3812_v45  ;;  %3398 = vmatprep.subr.bf16.mxu1 %v3813_v49  ;;  %v1772_v45 = vrot.slane %v1770_v38, 3  ;;  %v3868_v38 = vld [vmem:[%s4667_s1 + $0x328] sm:$0xff]   ;;  %v3908_v41 = vld [vmem:[%s4667_s1 + $0x3a0] sm:$0xff]  }
  0x3e   : > { %3558 = vmatprep.subr.bf16.mxu0 %v3814_v51 }
  0x3f   : > { %v1776_v54 = vor.u32 %v1775_v46, %v1772_v45  ;;  %v4354_v45 = vld [vmem:[%s4038_s16 + $0x48] sm:$0xf8]   ;;  %v3874_v46 = vld [vmem:[%s4667_s1 + $0x140] sm:$0xff]  }
  0x40   : > { %3399 = vmatpush3.bf16.msra.mxu1 %v3813_v49  ;;  %v1643_v49 = vor.u32 %v1642_v43, %v1639_v42  ;;  %v3872_v42 = vld [vmem:[%s4667_s1 + $0x338] sm:$0xff]  }
  0x41   : > { %3559 = vmatpush3.bf16.msra.mxu0 %v3814_v51  ;;  %3400 = vmatprep.subr.bf16.mxu1 %v3815_v56  ;;  %v519_v51 = vor.u32 %v517_v37, %v4160_v9  ;;  %v1785_v60 = vsel %vm1618_vm2, %v1776_v54, %v4232_v55  ;;  %v3853_v9 = vld [vmem:[%s4667_s1 + $0x2f0] sm:$0xff]   ;;  %v2854_v43 = vld [vmem:[%s4038_s16 + $0x38] sm:$0xf]  ;;  %v4377_v54 = vld [vmem:[%s4038_s16 + $0x48] sm:$0xff]  }
  0x42   : > { %3560 = vmatprep.subr.bf16.mxu0 %v3816_v58  ;;  %v4357_v37 = vld [vmem:[%s4038_s16 + $0x50] sm:$0xff]  }
  0x44   : > { %3401 = vmatpush3.bf16.msra.mxu1 %v3815_v56  ;;  %v1644_v56 = vsel %vm1618_vm2, %v4162_v12, %v1643_v49  ;;  %v3855_v12 = vld [vmem:[%s4667_s1 + $0x2f8] sm:$0xff]   ;;  %v2076_v49 = vrot.slane %v4354_v45, 3 }
  0x45   : > { %3561 = vmatpush3.bf16.msra.mxu0 %v3816_v58  ;;  %3406 = vmatprep.subr.bf16.mxu1 %v3818_v2  ;;  %v3843_v58 = vld [vmem:[%s4667_s1 + $0x2c8] sm:$0xff]  }
  0x46   : > { %3566 = vmatprep.subr.bf16.mxu0 %v3821_v3 }
  0x47   : > { %3403 = vmatmul.mubr.bf16.vlgmr.msra.gmra.mrb[0].mxu1 %v2792_v6 }
  0x48   : > { %3407 = vmatpush3.bf16.msra.mxu1 %v3818_v2  ;;  %3563 = vmatmul.mubr.bf16.vlgmr.msra.gmra.mrb[0].mxu0 %v1493_v13  ;;  %v3849_v2 = vld [vmem:[%s4667_s1 + $0x2e0] sm:$0xff]  }
  0x49   : > { %3567 = vmatpush3.bf16.msra.mxu0 %v3821_v3  ;;  %3408 = vmatprep.subr.bf16.mxu1 %v3824_v7  ;;  %v3858_v3 = vld [vmem:[%s4038_s16 + $0x28] ss:$0 sps:$4 sm:$0x77]  }
  0x4a   : > { %3568 = vmatprep.subr.bf16.mxu0 %v3825_v14  ;;  %3422 = vmatprep.mubr.bf16.mxu1 %v516_v15  ;;  %v1787_v6 = vshrl.u32 %v3858_v3, 16  ;;  %v656_v15 = vshrl.u32 %v4196_v27, 16  ;;  %v3860_v27 = vld [vmem:[%s4667_s1 + $0x308] sm:$0xff]  }
  0x4b   : > { %3582 = vmatprep.mubr.bf16.mxu0 %v1635_v16  ;;  %v4285_v16 = vld [vmem:[%s4038_s16 + $0x38] sm:$0xff]  }
  0x4c   : > { %3409 = vmatpush3.bf16.msra.mxu1 %v3824_v7  ;;  %v1790_v7 = vshll.u32 %v3858_v3, 16  ;;  %v1789_v13 = vrot.slane %v1787_v6, 3  ;;  %v658_v21 = vor.u32 %v656_v15, %v4230_v53  ;;  %v3881_v53 = vld [vmem:[%s4667_s1 + $0x348] sm:$0xff]  }
  0x4d   : > { %3569 = vmatpush3.bf16.msra.mxu0 %v3825_v14  ;;  %3410 = vmatprep.subr.bf16.mxu1 %v3826_v17 }
  0x4e   : > { %3570 = vmatprep.subr.bf16.mxu0 %v3827_v18  ;;  %v1792_v14 = vrot.slane %v1790_v7, 4  ;;  %v2214_v7 = vshrl.u32 %v4285_v16, 16 }
  0x50   : > { %3411 = vmatpush3.bf16.msra.mxu1 %v3826_v17  ;;  %v4288_v17 = vld [vmem:[%s4038_s16 + $0x30] sm:$0xf8]  }
  0x51   : > { %3571 = vmatpush3.bf16.msra.mxu0 %v3827_v18  ;;  %3412 = vmatprep.subr.bf16.mxu1 %v3828_v19  ;;  %v3856_v18 = vld [vmem:[%s4667_s1 + $0x100] sm:$0xff]   ;;  %v1933_v24 = vrot.slane %v4288_v17, 3  ;;  %v2209_v6 = vshll.u32 %v4288_v17, 16 }
  0x52   : > { %3572 = vmatprep.subr.bf16.mxu0 %v3829_v20 }
  0x54   : > { %3413 = vmatpush3.bf16.msra.mxu1 %v3828_v19  ;;  %v1793_v19 = vor.u32 %v1792_v14, %v1789_v13 }
  0x55   : > { %3573 = vmatpush3.bf16.msra.mxu0 %v3829_v20  ;;  %3414 = vmatprep.subr.bf16.mxu1 %v3830_v22  ;;  %v3857_v20 = vld [vmem:[%s4667_s1 + $0x300] sm:$0xff]  }
  0x56   : > { %3574 = vmatprep.subr.bf16.mxu0 %v3831_v25  ;;  %v1794_v26 = vsel %vm1618_vm2, %v4232_v55, %v1793_v19  ;;  %v2885_v19 = vld [vmem:[%s4038_s16 + $0x54] sm:$0x7] }
  0x58   : > { %3415 = vmatpush3.bf16.msra.mxu1 %v3830_v22  ;;  %v3859_v22 = vld [vmem:[%s4667_s1 + $0x108] sm:$0xff]  }
  0x59   : > { %3575 = vmatpush3.bf16.msra.mxu0 %v3831_v25  ;;  %3416 = vmatprep.subr.bf16.mxu1 %v3832_v28  ;;  %v1934_v25 = vrot.slane %v4285_v16, 3 }
  0x5a   : > { %3576 = vmatprep.subr.bf16.mxu0 %v3833_v29 }
  0x5c   : > { %3417 = vmatpush3.bf16.msra.mxu1 %v3832_v28  ;;  %v4308_v28 = vld [vmem:[%s4038_s16 + $0x30] sm:$0xff]  }
  0x5d   : > { %3577 = vmatpush3.bf16.msra.mxu0 %v3833_v29  ;;  %3418 = vmatprep.subr.bf16.mxu1 %v3834_v23  ;;  %v1935_v29 = vsel %vm1345_vm0, %v1933_v24, %v1934_v25  ;;  %v1056_v3 = vshll.u32 %v4308_v28, 16  ;;  %v1054_v13 = vshrl.u32 %v4308_v28, 16 }
  0x5e   : > { %3578 = vmatprep.subr.bf16.mxu0 %v3835_v35 }
  0x5f   : > { %v1058_v14 = vrot.slane %v1056_v3, 1  ;;  %v3916_v3 = vld [vmem:[%s4667_s1 + $0x1c0] sm:$0xff]  }
  0x60   : > { %3419 = vmatpush3.bf16.msra.mxu1 %v3834_v23  ;;  %v3863_v23 = vld [vmem:[%s4667_s1 + $0x118] sm:$0xff]  }
  0x61   : > { %3579 = vmatpush3.bf16.msra.mxu0 %v3835_v35  ;;  %3420 = vmatprep.subr.bf16.mxu1 %v3836_v40  ;;  %v3867_v35 = vld [vmem:[%s4667_s1 + $0x128] sm:$0xff]  }
  0x62   : > { %3580 = vmatprep.subr.bf16.mxu0 %v3837_v44 }
  0x64   : > { %3421 = vmatpush3.bf16.msra.mxu1 %v3836_v40  ;;  %v3871_v40 = vld [vmem:[%s4667_s1 + $0x138] sm:$0xff]  }
  0x65   : > { %3581 = vmatpush3.bf16.msra.mxu0 %v3837_v44  ;;  %3426 = vmatprep.subr.bf16.mxu1 %v3839_v36  ;;  %v2855_v44 = vld [vmem:[%s4038_s16 + $0x3c] sm:$0x7] }
  0x66   : > { %3586 = vmatprep.subr.bf16.mxu0 %v3840_v50 }
  0x67   : > { %3423 = vmatmul.mubr.bf16.vlgmr.msra.gmra.mrb[0].mxu1 %v519_v51  ;;  %v1937_v51 = vsel %vm1345_vm0, %v1934_v25, %v1936_v47  ;;  %v3898_v25 = vld [vmem:[%s4667_s1 + $0x380] sm:$0xff]   ;;  %v3911_v47 = vld [vmem:[%s4667_s1 + $0x1b0] sm:$0xff]  }
  0x68   : > { %3427 = vmatpush3.bf16.msra.mxu1 %v3839_v36  ;;  %3583 = vmatmul.mubr.bf16.vlgmr.msra.gmra.mrb[0].mxu0 %v1644_v56  ;;  %v2873_v36 = vcombine.low %v2854_v43, %v2855_v44  ;;  %v3882_v56 = vld [vmem:[%s4667_s1 + $0x150] sm:$0xff]   ;;  %v3910_v44 = vld [vmem:[%s4667_s1 + $0x3a8] sm:$0xff]  }
  0x69   : > { %3587 = vmatpush3.bf16.msra.mxu0 %v3840_v50  ;;  %3428 = vmatprep.subr.bf16.mxu1 %v3842_v57  ;;  %v2077_v50 = vrot.slane %v4357_v37, 3 }
  0x6a   : > { %3588 = vmatprep.subr.bf16.mxu0 %v3843_v58  ;;  %3442 = vmatprep.mubr.bf16.mxu1 %v655_v59  ;;  %v3885_v59 = vld [vmem:[%s4667_s1 + $0x358] sm:$0xff]  }
  0x6b   : > { %3602 = vmatprep.mubr.bf16.mxu0 %v1785_v60  ;;  %v2078_v55 = vsel %vm1345_vm0, %v2076_v49, %v2077_v50  ;;  %v3886_v60 = vld [vmem:[%s4667_s1 + $0x160] sm:$0xff]   ;;  %v3912_v49 = vld [vmem:[%s4667_s1 + $0x3b0] sm:$0xff]  }
  0x6c   : > { %3429 = vmatpush3.bf16.msra.mxu1 %v3842_v57  ;;  %v3883_v57 = vld [vmem:[%s4667_s1 + $0x350] sm:$0xff]  }
  0x6d   : > { %3589 = vmatpush3.bf16.msra.mxu0 %v3843_v58  ;;  %3430 = vmatprep.subr.bf16.mxu1 %v3844_v61  ;;  %v3884_v58 = vld [vmem:[%s4667_s1 + $0x158] sm:$0xff]  }
  0x6e   : > { %3590 = vmatprep.subr.bf16.mxu0 %v3845_v62 }
  0x70   : > { %3431 = vmatpush3.bf16.msra.mxu1 %v3844_v61  ;;  %v3887_v61 = vld [vmem:[%s4667_s1 + $0x360] sm:$0xff]  }
  0x71   : > { %3591 = vmatpush3.bf16.msra.mxu0 %v3845_v62  ;;  %3432 = vmatprep.subr.bf16.mxu1 %v3846_v63  ;;  %v3888_v62 = vld [vmem:[%s4667_s1 + $0x168] sm:$0xff]  }
  0x72   : > { %3592 = vmatprep.subr.bf16.mxu0 %v3847_v0 }
  0x74   : > { %3433 = vmatpush3.bf16.msra.mxu1 %v3846_v63  ;;  %v3889_v63 = vld [vmem:[%s4667_s1 + $0x368] sm:$0xff]  }
  0x75   : > { %3593 = vmatpush3.bf16.msra.mxu0 %v3847_v0  ;;  %3434 = vmatprep.subr.bf16.mxu1 %v3848_v1  ;;  %v2912_v0 = vld [vmem:[%s4038_s16 + $0x3c] sm:$0xf] }
  0x76   : > { %3594 = vmatprep.subr.bf16.mxu0 %v3849_v2 }
  0x78   : > { %3435 = vmatpush3.bf16.msra.mxu1 %v3848_v1  ;;  %v3890_v1 = vld [vmem:[%s4667_s1 + $0x170] sm:$0xff]  }
  0x79   : > { %3595 = vmatpush3.bf16.msra.mxu0 %v3849_v2  ;;  %3436 = vmatprep.subr.bf16.mxu1 %v3850_v4  ;;  %v3891_v2 = vld [vmem:[%s4667_s1 + $0x370] sm:$0xff]  }
  0x7a   : > { %3596 = vmatprep.subr.bf16.mxu0 %v3851_v5 }
  0x7c   : > { %3437 = vmatpush3.bf16.msra.mxu1 %v3850_v4  ;;  %v4415_v4 = vcombine.low %v2854_v43, %v2912_v0  ;;  %v3918_v43 = vld [vmem:[%s4038_s16 + $0x40] ss:$0 sps:$4 sm:$0x77]  }
  0x7d   : > { %3597 = vmatpush3.bf16.msra.mxu0 %v3851_v5  ;;  %3438 = vmatprep.subr.bf16.mxu1 %v3852_v8  ;;  %v2206_v5 = vshrl.u32 %v4288_v17, 16 }
  0x7e   : > { %3598 = vmatprep.subr.bf16.mxu0 %v3853_v9  ;;  %v1061_v15 = vshll.u32 %v4415_v4, 16 }
  0x7f   : > { %v2208_v17 = vrot.slane %v2206_v5, 3 }
  0x80   : > { %3439 = vmatpush3.bf16.msra.mxu1 %v3852_v8  ;;  %v2217_v8 = vshll.u32 %v4285_v16, 16  ;;  %v4431_v16 = vld [vmem:[%s4038_s16 + $0x50] sm:$0xf] }
  0x81   : > { %3599 = vmatpush3.bf16.msra.mxu0 %v3853_v9  ;;  %3440 = vmatprep.subr.bf16.mxu1 %v3854_v10  ;;  %v3892_v9 = vld [vmem:[%s4667_s1 + $0x178] sm:$0xff]  }
  0x82   : > { %3600 = vmatprep.subr.bf16.mxu0 %v3855_v12 }
  0x84   : > { %3441 = vmatpush3.bf16.msra.mxu1 %v3854_v10  ;;  %v3900_v10 = vld [vmem:[%s4038_s16 + $0x58] ss:$0 sps:$4 sm:$0x33]  }
  0x85   : > { %3601 = vmatpush3.bf16.msra.mxu0 %v3855_v12  ;;  %3446 = vmatprep.subr.bf16.mxu1 %v3856_v18  ;;  %v3893_v12 = vld [vmem:[%s4667_s1 + $0x378] sm:$0xff]   ;;  %v2079_v24 = vrot.slane %v3900_v10, 3 }
  0x86   : > { %3606 = vmatprep.subr.bf16.mxu0 %v3857_v20 }
  0x87   : > { %3443 = vmatmul.mubr.bf16.vlgmr.msra.gmra.mrb[0].mxu1 %v658_v21  ;;  %v2219_v21 = vrot.slane %v2217_v8, 4 }
  0x88   : > { %3447 = vmatpush3.bf16.msra.mxu1 %v3856_v18  ;;  %3603 = vmatmul.mubr.bf16.vlgmr.msra.gmra.mrb[0].mxu0 %v1794_v26  ;;  %v2211_v18 = vrot.slane %v2209_v6, 4  ;;  %v2903_v26 = vcombine.low %v4431_v16, %v2885_v19  ;;  %v3924_v19 = vld [vmem:[%s4667_s1 + $0x3d8] sm:$0xff]  }
  0x89   : > { %3607 = vmatpush3.bf16.msra.mxu0 %v3857_v20  ;;  %3448 = vmatprep.subr.bf16.mxu1 %v3859_v22  ;;  %v2216_v20 = vrot.slane %v2214_v7, 3 }
  0x8a   : > { %3608 = vmatprep.subr.bf16.mxu0 %v3860_v27  ;;  %3462 = vmatprep.mubr.bf16.mxu1 %v4308_v28  ;;  %v4441_v28 = vrot.slane %v1061_v15, 1 }
  0x8b   : > { %3622 = vmatprep.mubr.bf16.mxu0 %v1935_v29  ;;  %v2212_v29 = vor.u32 %v2211_v18, %v2208_v17  ;;  %v3921_v17 = vld [vmem:[%s4667_s1 + $0x1d0] sm:$0xff]  }
  0x8c   : > { %3449 = vmatpush3.bf16.msra.mxu1 %v3859_v22  ;;  %v3895_v22 = vld [vmem:[%s4667_s1 + $0x180] sm:$0xff]   ;;  %v3922_v18 = vld [vmem:[%s4667_s1 + $0x3d0] sm:$0xff]  }
  0x8d   : > { %3609 = vmatpush3.bf16.msra.mxu0 %v3860_v27  ;;  %3450 = vmatprep.subr.bf16.mxu1 %v3861_v30  ;;  %v1059_v27 = vor.u32 %v1058_v14, %v1054_v13  ;;  %v3920_v13 = vld [vmem:[%s4667_s1 + $0x3c8] sm:$0xff]  }
  0x8e   : > { %3610 = vmatprep.subr.bf16.mxu0 %v3862_v31 }
  0x90   : > { %3451 = vmatpush3.bf16.msra.mxu1 %v3861_v30  ;;  %v4443_v30 = vor.u32 %v2219_v21, %v2216_v20  ;;  %v3925_v20 = vld [vmem:[%s4667_s1 + $0x1e0] sm:$0xff]  }
  0x91   : > { %3611 = vmatpush3.bf16.msra.mxu0 %v3862_v31  ;;  %3452 = vmatprep.subr.bf16.mxu1 %v3863_v23  ;;  %v2080_v31 = vsel %vm1345_vm0, %v2077_v50, %v2079_v24  ;;  %v1195_v50 = vshll.u32 %v4377_v54, 16  ;;  %v3926_v21 = vld [vmem:[%s4667_s1 + $0x3e0] sm:$0xff]   ;;  %v3934_v24 = vld [vmem:[%s4038_s16 + $0x58] ss:$0 sps:$4 sm:$0x77]  }
  0x92   : > { %3612 = vmatprep.subr.bf16.mxu0 %v3864_v32 }
  0x94   : > { %3453 = vmatpush3.bf16.msra.mxu1 %v3863_v23  ;;  %v3901_v23 = vld [vmem:[%s4667_s1 + $0x188] sm:$0xff]  }
  0x95   : > { %3613 = vmatpush3.bf16.msra.mxu0 %v3864_v32  ;;  %3454 = vmatprep.subr.bf16.mxu1 %v3865_v33  ;;  %v3902_v32 = vld [vmem:[%s4667_s1 + $0x388] sm:$0xff]  }
  0x96   : > { %3614 = vmatprep.subr.bf16.mxu0 %v3866_v34 }
  0x98   : > { %3455 = vmatpush3.bf16.msra.mxu1 %v3865_v33  ;;  %v1064_v33 = vsel %vm504_vm1, %v1059_v27, %v4441_v28  ;;  %v2373_v27 = vshrl.u32 %v3934_v24, 16 }
  0x99   : > { %3615 = vmatpush3.bf16.msra.mxu0 %v3866_v34  ;;  %3456 = vmatprep.subr.bf16.mxu1 %v3867_v35  ;;  %v2221_v34 = vsel %vm1618_vm2, %v2212_v29, %v4443_v30  ;;  %v3930_v29 = vld [vmem:[%s4667_s1 + $0x3f0] sm:$0xff]  }
  0x9a   : > { %3616 = vmatprep.subr.bf16.mxu0 %v3868_v38 }
  0x9c   : > { %3457 = vmatpush3.bf16.msra.mxu1 %v3867_v35  ;;  %v3903_v35 = vld [vmem:[%s4667_s1 + $0x190] sm:$0xff]  }
  0x9d   : > { %3617 = vmatpush3.bf16.msra.mxu0 %v3868_v38  ;;  %3458 = vmatprep.subr.bf16.mxu1 %v3869_v11  ;;  %v3904_v38 = vld [vmem:[%s4667_s1 + $0x390] sm:$0xff]  }
  0x9e   : > { %3618 = vmatprep.subr.bf16.mxu0 %v3870_v39 }
  0xa0   : > { %3459 = vmatpush3.bf16.msra.mxu1 %v3869_v11  ;;  %v3905_v11 = vld [vmem:[%s4667_s1 + $0x198] sm:$0xff]  }
  0xa1   : > { %3619 = vmatpush3.bf16.msra.mxu0 %v3870_v39  ;;  %3460 = vmatprep.subr.bf16.mxu1 %v3871_v40  ;;  %v3906_v39 = vld [vmem:[%s4667_s1 + $0x398] sm:$0xff]  }
  0xa2   : > { %3620 = vmatprep.subr.bf16.mxu0 %v3872_v42 }
  0xa4   : > { %3461 = vmatpush3.bf16.msra.mxu1 %v3871_v40  ;;  %v3907_v40 = vld [vmem:[%s4667_s1 + $0x1a0] sm:$0xff]  }
  0xa5   : > { %3621 = vmatpush3.bf16.msra.mxu0 %v3872_v42  ;;  %3466 = vmatprep.subr.bf16.mxu1 %v3874_v46  ;;  %v3909_v42 = vld [vmem:[%s4667_s1 + $0x1a8] sm:$0xff]  }
  0xa6   : > { %3626 = vmatprep.subr.bf16.mxu0 %v3877_v48 }
  0xa7   : > { %3463 = vmatmul.mubr.bf16.vlgmr.msra.gmra.mrb[0].mxu1 %v2873_v36  ;;  %v2226_v36 = vshll.u32 %v3918_v43, 16 }
  0xa8   : > { %3467 = vmatpush3.bf16.msra.mxu1 %v3874_v46  ;;  %3623 = vmatmul.mubr.bf16.vlgmr.msra.gmra.mrb[0].mxu0 %v1937_v51  ;;  %v2938_v46 = vld [vmem:[%s4038_s16 + $0x54] sm:$0xf] }
  0xa9   : > { %3627 = vmatpush3.bf16.msra.mxu0 %v3877_v48  ;;  %3468 = vmatprep.subr.bf16.mxu1 %v3880_v52  ;;  %v2223_v48 = vshrl.u32 %v3918_v43, 16  ;;  %v4492_v51 = vcombine.low %v4431_v16, %v2938_v46  ;;  %v3923_v16 = vld [vmem:[%s4667_s1 + $0x1d8] sm:$0xff]  }
  0xaa   : > { %3628 = vmatprep.subr.bf16.mxu0 %v3881_v53  ;;  %3482 = vmatprep.mubr.bf16.mxu1 %v4377_v54 }
  0xab   : > { %3642 = vmatprep.mubr.bf16.mxu0 %v2078_v55  ;;  %v2364_v55 = vshrl.u32 %v4357_v37, 16 }
  0xac   : > { %3469 = vmatpush3.bf16.msra.mxu1 %v3880_v52  ;;  %v2356_v52 = vshrl.u32 %v4354_v45, 16 }
  0xad   : > { %3629 = vmatpush3.bf16.msra.mxu0 %v3881_v53  ;;  %3470 = vmatprep.subr.bf16.mxu1 %v3882_v56  ;;  %v2359_v53 = vshll.u32 %v4354_v45, 16  ;;  %v1193_v45 = vshrl.u32 %v4377_v54, 16  ;;  %v3917_v54 = vld [vmem:[%s4667_s1 + $0x3c0] sm:$0xff]  }
  0xae   : > { %3630 = vmatprep.subr.bf16.mxu0 %v3883_v57 }
  0xaf   : > { %v2361_v0 = vrot.slane %v2359_v53, 4 }
  0xb0   : > { %3471 = vmatpush3.bf16.msra.mxu1 %v3882_v56  ;;  %v2367_v56 = vshll.u32 %v4357_v37, 16  ;;  %v1200_v37 = vshll.u32 %v4492_v51, 16 }
  0xb1   : > { %3631 = vmatpush3.bf16.msra.mxu0 %v3883_v57  ;;  %3472 = vmatprep.subr.bf16.mxu1 %v3884_v58  ;;  %v3913_v57 = vld [vmem:[%s4667_s1 + $0x1b8] sm:$0xff]  }
  0xb2   : > { %3632 = vmatprep.subr.bf16.mxu0 %v3885_v59  ;;  %v4514_v7 = vrot.slane %v1200_v37, 1 }
  0xb4   : > { %3473 = vmatpush3.bf16.msra.mxu1 %v3884_v58  ;;  %v2225_v58 = vrot.slane %v2223_v48, 3 }
  0xb5   : > { %3633 = vmatpush3.bf16.msra.mxu0 %v3885_v59  ;;  %3474 = vmatprep.subr.bf16.mxu1 %v3886_v60  ;;  %v2228_v59 = vrot.slane %v2226_v36, 4 }
  0xb6   : > { %3634 = vmatprep.subr.bf16.mxu0 %v3887_v61 }
  0xb7   : > { %v2229_v5 = vor.u32 %v2228_v59, %v2225_v58 }
  0xb8   : > { %3475 = vmatpush3.bf16.msra.mxu1 %v3886_v60  ;;  %v3914_v60 = vld [vmem:[%s4667_s1 + $0x3b8] sm:$0xff]  }
  0xb9   : > { %3635 = vmatpush3.bf16.msra.mxu0 %v3887_v61  ;;  %3476 = vmatprep.subr.bf16.mxu1 %v3888_v62  ;;  %v1065_v61 = vshrl.u32 %v4415_v4, 16  ;;  %v2230_v10 = vsel %vm1618_vm2, %v4443_v30, %v2229_v5  ;;  %v3931_v30 = vld [vmem:[%s4667_s1 + $0x1f8] sm:$0xff]  }
  0xba   : > { %3636 = vmatprep.subr.bf16.mxu0 %v3889_v63 }
  0xbb   : > { %v1067_v4 = vor.u32 %v1065_v61, %v4441_v28  ;;  %v2376_v28 = vshll.u32 %v3934_v24, 16 }
  0xbc   : > { %3477 = vmatpush3.bf16.msra.mxu1 %v3888_v62  ;;  %v1197_v62 = vrot.slane %v1195_v50, 1 }
  0xbd   : > { %3637 = vmatpush3.bf16.msra.mxu0 %v3889_v63  ;;  %3478 = vmatprep.subr.bf16.mxu1 %v3890_v1  ;;  %v2358_v63 = vrot.slane %v2356_v52, 3 }
  0xbe   : > { %3638 = vmatprep.subr.bf16.mxu0 %v3891_v2  ;;  %v1198_v6 = vor.u32 %v1197_v62, %v1193_v45 }
  0xbf   : > { %v2362_v8 = vor.u32 %v2361_v0, %v2358_v63 }
  0xc0   : > { %3479 = vmatpush3.bf16.msra.mxu1 %v3890_v1  ;;  %v2366_v1 = vrot.slane %v2364_v55, 3  ;;  %v1203_v14 = vsel %vm504_vm1, %v1198_v6, %v4514_v7 }
  0xc1   : > { %3639 = vmatpush3.bf16.msra.mxu0 %v3891_v2  ;;  %3480 = vmatprep.subr.bf16.mxu1 %v3892_v9  ;;  %v2369_v2 = vrot.slane %v2367_v56, 4 }
  0xc2   : > { %3640 = vmatprep.subr.bf16.mxu0 %v3893_v12 }
  0xc4   : > { %3481 = vmatpush3.bf16.msra.mxu1 %v3892_v9  ;;  %v4516_v9 = vor.u32 %v2369_v2, %v2366_v1 }
  0xc5   : > { %3641 = vmatpush3.bf16.msra.mxu0 %v3893_v12  ;;  %3486 = vmatprep.subr.bf16.mxu1 %v3895_v22  ;;  %v3919_v12 = vld [vmem:[%s4667_s1 + $0x1c8] sm:$0xff]  }
  0xc6   : > { %3646 = vmatprep.subr.bf16.mxu0 %v3898_v25  ;;  %v2371_v15 = vsel %vm1618_vm2, %v2362_v8, %v4516_v9 }
  0xc7   : > { %3483 = vmatmul.mubr.bf16.vlgmr.msra.gmra.mrb[0].mxu1 %v2903_v26  ;;  %v3929_v26 = vld [vmem:[%s4667_s1 + $0x1f0] sm:$0xff]  }
  0xc8   : > { %3487 = vmatpush3.bf16.msra.mxu1 %v3895_v22  ;;  %3643 = vmatmul.mubr.bf16.vlgmr.msra.gmra.mrb[0].mxu0 %v2080_v31  ;;  %v3927_v22 = vld [vmem:[%s4667_s1 + $0x1e8] sm:$0xff]   ;;  %v2375_v31 = vrot.slane %v2373_v27, 3 }
  0xc9   : > { %3647 = vmatpush3.bf16.msra.mxu0 %v3898_v25  ;;  %3488 = vmatprep.subr.bf16.mxu1 %v3901_v23  ;;  %v3928_v25 = vld [vmem:[%s4667_s1 + $0x3e8] sm:$0xff]  }
  0xca   : > { %3648 = vmatprep.subr.bf16.mxu0 %v3902_v32  ;;  %3502 = vmatprep.mubr.bf16.mxu1 %v1064_v33  ;;  %v1204_v33 = vshrl.u32 %v4492_v51, 16 }
  0xcb   : > { %3662 = vmatprep.mubr.bf16.mxu0 %v2221_v34 }
  0xcc   : > { %3489 = vmatpush3.bf16.msra.mxu1 %v3901_v23  ;;  %v2378_v23 = vrot.slane %v2376_v28, 4 }
  0xcd   : > { %3649 = vmatpush3.bf16.msra.mxu0 %v3902_v32  ;;  %3490 = vmatprep.subr.bf16.mxu1 %v3903_v35  ;;  %v3932_v32 = vld [vmem:[%s4667_s1 + $0x3f8] sm:$0xff]  }
  0xce   : > { %3650 = vmatprep.subr.bf16.mxu0 %v3904_v38  ;;  %v2379_v34 = vor.u32 %v2378_v23, %v2375_v31 }
  0xd0   : > { %3491 = vmatpush3.bf16.msra.mxu1 %v3903_v35  ;;  %v1206_v35 = vor.u32 %v1204_v33, %v4514_v7 }
  0xd1   : > { %3651 = vmatpush3.bf16.msra.mxu0 %v3904_v38  ;;  %3492 = vmatprep.subr.bf16.mxu1 %v3905_v11  ;;  %v2380_v38 = vsel %vm1618_vm2, %v4516_v9, %v2379_v34 }
  0xd2   : > { %3652 = vmatprep.subr.bf16.mxu0 %v3906_v39 }
  0xd4   : > { %3493 = vmatpush3.bf16.msra.mxu1 %v3905_v11  ;;  %v2484_v11 = vlaneseq }
  0xd5   : > { %3653 = vmatpush3.bf16.msra.mxu0 %v3906_v39  ;;  %3494 = vmatprep.subr.bf16.mxu1 %v3907_v40 }
  0xd6   : > { %3654 = vmatprep.subr.bf16.mxu0 %v3908_v41  ;;  %v2485_v39 = vshrl.u32 %v2484_v11, 7 }
  0xd8   : > { %3495 = vmatpush3.bf16.msra.mxu1 %v3907_v40  ;;  %v2486_v40 = vadd.s32 8, %v2485_v39 }
  0xd9   : > { %3655 = vmatpush3.bf16.msra.mxu0 %v3908_v41  ;;  %3496 = vmatprep.subr.bf16.mxu1 %v3909_v42  ;;  %v2488_v41 = vadd.s32 24, %v2485_v39 }
  0xda   : > { %3656 = vmatprep.subr.bf16.mxu0 %v3910_v44 }
  0xdb   : > { %v4577_v48 = vmul.u32.u64.low 2863311531, %v2488_v41  ;;  %v4578_v36 = vmul.u32.u64.high 2863311531, %v2488_v41, %v4577_v48 }
  0xdc   : > { %3497 = vmatpush3.bf16.msra.mxu1 %v3909_v42  ;;  %v2487_v42 = vadd.s32 16, %v2485_v39 }
  0xdd   : > { %3657 = vmatpush3.bf16.msra.mxu0 %v3910_v44  ;;  %3498 = vmatprep.subr.bf16.mxu1 %v3911_v47  ;;  %v4571_v43 = vmul.u32.u64.low 2863311531, %v2485_v39  ;;  %v4572_v44 = vmul.u32.u64.high 2863311531, %v2485_v39, %v4571_v43  ;;  %v2528_v53 = vshrl.u32 %v4578_v36, 2 }
  0xde   : > { %3658 = vmatprep.subr.bf16.mxu0 %v3912_v49 }
  0xdf   : > { %v2495_v51 = vshrl.u32 %v4572_v44, 2  ;;  %v2529_v58 = vmul.u32 6, %v2528_v53 }
  0xe0   : > { %3499 = vmatpush3.bf16.msra.mxu1 %v3911_v47  ;;  %v4574_v46 = vmul.u32.u64.low 2863311531, %v2486_v40  ;;  %v4575_v47 = vmul.u32.u64.high 2863311531, %v2486_v40, %v4574_v46 }
  0xe1   : > { %3659 = vmatpush3.bf16.msra.mxu0 %v3912_v49  ;;  %3500 = vmatprep.subr.bf16.mxu1 %v3913_v57  ;;  %v4580_v49 = vmul.u32.u64.low 2863311531, %v2487_v42  ;;  %v4581_v50 = vmul.u32.u64.high 2863311531, %v2487_v42, %v4580_v49  ;;  %v2496_v56 = vmul.u32 6, %v2495_v51  ;;  %v2530_v45 = vsub.s32 %v2488_v41, %v2529_v58 }
  0xe2   : > { %3660 = vmatprep.subr.bf16.mxu0 %v3914_v60  ;;  %v2506_v52 = vshrl.u32 %v4575_v47, 2 }
  0xe3   : > { %v2517_v55 = vshrl.u32 %v4581_v50, 2  ;;  %vm2536_vm7 = vcmp.ne.s32.totalorder %v2530_v45, 0  ;;  %vm2540_vm8 = vcmp.lt.s32.totalorder %v2530_v45, 0  ;;  %v2548_v1 = vadd.s32 6, %v2530_v45 }
  0xe4   : > { %3501 = vmatpush3.bf16.msra.mxu1 %v3913_v57  ;;  %v2507_v57 = vmul.u32 6, %v2506_v52  ;;  %vm4595_vm13 = vmand %vm2540_vm8, %vm2536_vm7 }
  0xe5   : > { %3661 = vmatpush3.bf16.msra.mxu0 %v3914_v60  ;;  %3506 = vmatprep.subr.bf16.mxu1 %v3916_v3  ;;  %v2518_v59 = vmul.u32 6, %v2517_v55  ;;  %v2497_v60 = vsub.s32 %v2485_v39, %v2496_v56 }
  0xe6   : > { %3666 = vmatprep.subr.bf16.mxu0 %v3917_v54  ;;  %v2508_v61 = vsub.s32 %v2486_v40, %v2507_v57 }
  0xe7   : > { %3503 = vmatmul.mubr.bf16.vlgmr.msra.gmra.mrb[0].mxu1 %v1067_v4  ;;  %v2519_v62 = vsub.s32 %v2487_v42, %v2518_v59  ;;  %vm2533_vm3 = vcmp.ne.s32.totalorder %v2497_v60, 0  ;;  %vm2537_vm4 = vcmp.lt.s32.totalorder %v2497_v60, 0  ;;  %v2545_v63 = vadd.s32 6, %v2497_v60 }
  0xe8   : > { %3507 = vmatpush3.bf16.msra.mxu1 %v3916_v3  ;;  %3663 = vmatmul.mubr.bf16.vlgmr.msra.gmra.mrb[0].mxu0 %v2230_v10  ;;  %vm2534_vm5 = vcmp.ne.s32.totalorder %v2508_v61, 0  ;;  %vm2538_vm6 = vcmp.lt.s32.totalorder %v2508_v61, 0  ;;  %vm4587_vm11 = vmand %vm2537_vm4, %vm2533_vm3  ;;  %v2546_v0 = vadd.s32 6, %v2508_v61  ;;  %vm2571_vm3 = vcmask 1045504  }
  0xe9   : > { %3667 = vmatpush3.bf16.msra.mxu0 %v3917_v54  ;;  %3508 = vmatprep.subr.bf16.mxu1 %v3919_v12  ;;  %vm2535_vm9 = vcmp.ne.s32.totalorder %v2519_v62, 0  ;;  %vm2539_vm10 = vcmp.lt.s32.totalorder %v2519_v62, 0  ;;  %vm4591_vm12 = vmand %vm2538_vm6, %vm2534_vm5  ;;  %v2547_v3 = vadd.s32 6, %v2519_v62  ;;  %v2549_v8 = vsel %vm4587_vm11, %v2545_v63, %v2497_v60 }
  0xea   : > { %3668 = vmatprep.subr.bf16.mxu0 %v3920_v13  ;;  %3522 = vmatprep.mubr.bf16.mxu1 %v1203_v14  ;;  %vm4599_vm14 = vmand %vm2539_vm10, %vm2535_vm9  ;;  %v2550_v9 = vsel %vm4591_vm12, %v2546_v0, %v2508_v61  ;;  %v2552_v14 = vsel %vm4595_vm13, %v2548_v1, %v2530_v45  ;;  %vm4611_vm15 = vcmp.lt.s32.totalorder %v2549_v8, 5 }
  0xeb   : > { %3682 = vmatprep.mubr.bf16.mxu0 %v2371_v15  ;;  %v2551_v15 = vsel %vm4599_vm14, %v2547_v3, %v2519_v62  ;;  %vm4615_vm0 = vcmp.lt.s32.totalorder %v2550_v9, 5  ;;  %vm4619_vm1 = vcmp.lt.s32.totalorder %v2552_v14, 5 }
  0xec   : > { %3509 = vmatpush3.bf16.msra.mxu1 %v3919_v12  ;;  %vm4623_vm2 = vcmp.lt.s32.totalorder %v2551_v15, 5 }
  0xed   : > { %3669 = vmatpush3.bf16.msra.mxu0 %v3920_v13  ;;  %3510 = vmatprep.subr.bf16.mxu1 %v3921_v17 }
  0xee   : > { %3670 = vmatprep.subr.bf16.mxu0 %v3922_v18 }
  0xf0   : > { %3511 = vmatpush3.bf16.msra.mxu1 %v3921_v17 }
  0xf1   : > { %3671 = vmatpush3.bf16.msra.mxu0 %v3922_v18  ;;  %3512 = vmatprep.subr.bf16.mxu1 %v3923_v16 }
  0xf2   : > { %3672 = vmatprep.subr.bf16.mxu0 %v3924_v19 }
  0xf4   : > { %3513 = vmatpush3.bf16.msra.mxu1 %v3923_v16 }
  0xf5   : > { %3673 = vmatpush3.bf16.msra.mxu0 %v3924_v19  ;;  %3514 = vmatprep.subr.bf16.mxu1 %v3925_v20 }
  0xf6   : > { %3674 = vmatprep.subr.bf16.mxu0 %v3926_v21 }
  0xf8   : > { %3515 = vmatpush3.bf16.msra.mxu1 %v3925_v20 }
  0xf9   : > { %3675 = vmatpush3.bf16.msra.mxu0 %v3926_v21  ;;  %3516 = vmatprep.subr.bf16.mxu1 %v3927_v22 }
  0xfa   : > { %3676 = vmatprep.subr.bf16.mxu0 %v3928_v25 }
  0xfc   : > { %3517 = vmatpush3.bf16.msra.mxu1 %v3927_v22 }
  0xfd   : > { %3677 = vmatpush3.bf16.msra.mxu0 %v3928_v25  ;;  %3518 = vmatprep.subr.bf16.mxu1 %v3929_v26 }
  0xfe   : > { %3678 = vmatprep.subr.bf16.mxu0 %v3930_v29 }
 0x100   : > { %3519 = vmatpush3.bf16.msra.mxu1 %v3929_v26 }
 0x101   : > { %3679 = vmatpush3.bf16.msra.mxu0 %v3930_v29  ;;  %3520 = vmatprep.subr.bf16.mxu1 %v3931_v30 }
 0x102   : > { %3680 = vmatprep.subr.bf16.mxu0 %v3932_v32 }
 0x104   : > { %3521 = vmatpush3.bf16.msra.mxu1 %v3931_v30 }
 0x105   : > { %3681 = vmatpush3.bf16.msra.mxu0 %v3932_v32 }
 0x107   : > { %3523 = vmatmul.mubr.bf16.vlgmr.msra.gmra.mrb[0].mxu1 %v1206_v35 }
 0x108   : > { %3683 = vmatmul.mubr.bf16.vlgmr.msra.gmra.mrb[0].mxu0 %v2380_v38 }
 0x1da   : > { %v3524_v54 = vpop.f32.mrb[0].mxu1 }
 0x1db   : > { %v3684_v6 = vpop.f32.mrb[0].mxu0  ;;  %v1291_v7 = vpop.f32.mrb[1].mxu1 }
 0x1dc   : > { %v3686_v10 = vadd.f32 %v3684_v6, %v3524_v54  ;;  %v2465_v12 = vpop.f32.mrb[1].mxu0  ;;  %v3525_v13 = vpop.f32.mrb[2].mxu1 }
 0x1dd   : > { %v3687_v17 = vadd.f32 %v2465_v12, %v1291_v7  ;;  %v3685_v18 = vpop.f32.mrb[2].mxu0  ;;  %v1294_v16 = vpop.f32.mrb[3].mxu1 }
 0x1de   : > { %v3688_v20 = vadd.f32 %v3685_v18, %v3525_v13  ;;  %v2468_v21 = vpop.f32.mrb[3].mxu0  ;;  %v2567_v31 = vsel %vm4623_vm2, %v3686_v10, 0.0 }
 0x1df   : > { %v3689_v25 = vadd.f32 %v2468_v21, %v1294_v16  ;;  %v2565_v27 = vsel %vm4611_vm15, %v3687_v17, 0.0 }
 0x1e0   : > { %v2568_v29 = vsel %vm4619_vm1, %v3688_v20, 0.0 }
 0x1e1   : > { %v2566_v28 = vsel %vm4615_vm0, %v3689_v25, 0.0  ;;  %v2572_v32 = vsel %vm2571_vm3, %v2568_v29, 0.0 }
 0x1e2   : > { %v2569_v30 = vadd.f32 %v2566_v28, %v2565_v27 }
 0x1e4   : > { %v2570_v23 = vadd.f32 %v2569_v30, %v2567_v31 }
 0x1e6   : > { %v2573_v33 = vadd.f32 %v2572_v32, %v2570_v23 }
 0x1e8   : > { %v2574_v34 = vrot.slane %v2573_v33, 4 }
 0x1ea   : > { %v2575_v35 = vadd.f32 %v2574_v34, %v2573_v33 }
 0x1ec   : > { %v2576_v38 = vrot.slane %v2575_v35, 2 }
 0x1ee   : > { %v2577_v11 = vadd.f32 %v2576_v38, %v2575_v35 }
 0x1f0   : > { %v2578_v39 = vrot.slane %v2577_v11, 1 }
 0x1f2   : > { %v2579_v40 = vadd.f32 %v2578_v39, %v2577_v11 }
 0x1f4   : > { %v2580_v41 = vmul.f32 0.04, %v2579_v40 }
 0x1f6   : > { %v2581_v42 = vsub.f32 %v3687_v17, %v2580_v41  ;;  %v2582_v43 = vsub.f32 %v3689_v25, %v2580_v41  ;;  %v2583_v44 = vsub.f32 %v3686_v10, %v2580_v41  ;;  %v2584_v46 = vsub.f32 %v3688_v20, %v2580_v41 }
 0x1f8   : > { %v2585_v47 = vmul.f32 %v2581_v42, %v2581_v42  ;;  %v2586_v48 = vmul.f32 %v2582_v43, %v2582_v43  ;;  %v2587_v36 = vmul.f32 %v2583_v44, %v2583_v44  ;;  %v2588_v49 = vmul.f32 %v2584_v46, %v2584_v46 }
 0x1fa   : > { %v2589_v50 = vsel %vm4611_vm15, %v2585_v47, 0.0  ;;  %v2590_v51 = vsel %vm4615_vm0, %v2586_v48, 0.0  ;;  %v2592_v52 = vsel %vm4619_vm1, %v2588_v49, 0.0  ;;  %v2591_v55 = vsel %vm4623_vm2, %v2587_v36, 0.0 }
 0x1fb   : > { %v2593_v53 = vadd.f32 %v2590_v51, %v2589_v50  ;;  %v2595_v57 = vsel %vm2571_vm3, %v2592_v52, 0.0 }
 0x1fd   : > { %v2594_v56 = vadd.f32 %v2593_v53, %v2591_v55 }
 0x1ff   : > { %v2596_v58 = vadd.f32 %v2595_v57, %v2594_v56 }
 0x201   : > { %v2597_v59 = vrot.slane %v2596_v58, 4 }
 0x203   : > { %v2598_v60 = vadd.f32 %v2597_v59, %v2596_v58 }
 0x205   : > { %v2599_v61 = vrot.slane %v2598_v60, 2 }
 0x207   : > { %v2600_v45 = vadd.f32 %v2599_v61, %v2598_v60 }
 0x209   : > { %v2601_v62 = vrot.slane %v2600_v45, 1 }
 0x20b   : > { %v2602_v37 = vadd.f32 %v2601_v62, %v2600_v45 }
 0x20d   : > { %v2603_v63 = vmul.f32 0.04, %v2602_v37 }
 0x20f   : > { %v2604_v0 = vadd.f32 1e-05, %v2603_v63 }
 0x211   : > { %3935 = vrsqrt.f32 %v2604_v0 }
 0x21b   : > { %v3936_v1 = vpop.eup %3935 }
 0x21c   : > { %v2606_v2 = vmul.f32 %v3936_v1, %v2581_v42  ;;  %v2607_v3 = vmul.f32 %v3936_v1, %v2582_v43  ;;  %v2608_v5 = vmul.f32 %v3936_v1, %v2583_v44  ;;  %v2609_v54 = vmul.f32 %v3936_v1, %v2584_v46 }
 0x21e   : > { %vm2610_vm4 = vcmp.ge.f32.partialorder %v2606_v2, 0.0  ;;  %vm2611_vm5 = vcmp.ge.f32.partialorder %v2607_v3, 0.0  ;;  %vm2612_vm6 = vcmp.ge.f32.partialorder %v2608_v5, 0.0  ;;  %vm2613_vm7 = vcmp.ge.f32.partialorder %v2609_v54, 0.0 }
 0x21f   : > { %v2614_v4 = vmul.f32 0.2, %v2606_v2  ;;  %v2615_v6 = vmul.f32 0.2, %v2607_v3  ;;  %v2616_v7 = vmul.f32 0.2, %v2608_v5 }
 0x220   : > { %v2617_v8 = vmul.f32 0.2, %v2609_v54 }
 0x221   : > { %v2618_v9 = vsel %vm2610_vm4, %v2606_v2, %v2614_v4  ;;  %v2619_v10 = vsel %vm2611_vm5, %v2607_v3, %v2615_v6  ;;  %v2620_v12 = vsel %vm2612_vm6, %v2608_v5, %v2616_v7 }
 0x222   : > { %v2621_v13 = vsel %vm2613_vm7, %v2609_v54, %v2617_v8  ;;  %v2622_v14 = vsel %vm4611_vm15, %v2618_v9, 0.0  ;;  %v2623_v15 = vsel %vm4615_vm0, %v2619_v10, 0.0  ;;  %v2624_v17 = vsel %vm4623_vm2, %v2620_v12, 0.0 }
 0x223   : > { %v2625_v18 = vsel %vm4619_vm1, %v2621_v13, 0.0  ;;  %v3199_v16 = vpack.c.bf16 %v2624_v17, %v2624_v17  ;;  %v3204_v20 = vpack.c.bf16 %v2623_v15, %v2622_v14 }
 0x224   : > { %v3200_v21 = vpack.c.bf16 %v2625_v18, %v2625_v18 }
 0x225   : > { %3205 = vst [vmem:[%s221_s23] sm:$0xff] %v3204_v20   ;;  %2644 = vst [vmem:[%s221_s23 + $0x8] sm:$0xf] %v3199_v16 }
 0x226   : > { %2645 = vst [vmem:[%s221_s23 + $0xc] sm:$0x7] %v3200_v21 }
 0x227 PF: > { %s13_s14 = sadd.s32 1, %s3959_s14   ;;  %s4686_s12 = smov %s3955_s13 }
 0x228   : > { %p10_p5 = scmp.ge.s32.totalorder %s13_s14, 4   ;;  %s4687_s13 = smov %s4689_s2 }
 0x22a   :  { %12 = sbr.rel (!%p10_p5) target bundleno = 2 (0x2), region = 86 }

// kernel: _lambda_.7
= control target key start
LH: loop header
LB: loop body
LE: loop exit
PB: predicated region body
PF: predicated region fallthrough
CT: control target
= control target key end

     0   :  { %s3527_s12 = smov 0   ;;  %s3529_s13 = smov 0   ;;  %s4176_s0 = inlined_call_operand.vmem [shape: bf16[2,4,20,128], index: 0, kind: input, shape index: {}]   ;;  %s4177_s1 = inlined_call_operand.vmem [shape: bf16[16,128,128], index: 1, kind: input, shape index: {}]   ;;  %s4178_s2 = inlined_call_operand.vmem [shape: f32[1,128], index: 2, kind: input, shape index: {}]   ;;  %s4179_s3 = inlined_call_operand.vmem [shape: bf16[2,12,128], index: 3, kind: output, shape index: {}]  }
   0x1   :  { %s3531_s14 = smov 0  }
   0x2 LB: > { %s22_s2 = sadd.s32 1, %s3499_s13  ;;  %p2359_p0 = scmp.ge.s32.totalorder %s3503_s14, 1  ;;  %s3503_s14 = sphi %s3531_s14, %s13_s14   ;;  %s3499_s13 = sphi %s3529_s13, %s4185_s13   ;;  %s3495_s12 = sphi %s3527_s12, %s4184_s12  }
   0x3   : > { %p23_p1 = scmp.ge.s32.totalorder %s22_s2, 2  ;;  %p168_p2 = scmp.lt.s32.totalorder %s3503_s14, 3 }
   0x5   : > { %s4187_s2 = smov (%p23_p1, %s22_s2), 0  ;;  %p169_p3 = pnand %p2359_p0, %p168_p2 }
   0x6   : > { %v3331_v0 = vld [vmem:[%s4177_s1 + $0x40] sm:$0xff] (!%p169_p3)   ;;  %v3505_v1 = vmov (!%p169_p3), 0.0   ;;  %v3333_v3 = vld [vmem:[%s4177_s1 + $0x48] sm:$0xff] (!%p169_p3)   ;;  %vm3506_vm0 = vmmov (!%p169_p3), 0   ;;  %p202_p4 = scmp.lt.s32.totalorder (!%p169_p3), %s3495_s12, 1  ;;  %v3335_v5 = vld [vmem:[%s4177_s1 + $0x50] sm:$0xff] (!%p169_p3)  }
   0x7   : > { %172 = sbr.rel (%p169_p3) target bundleno = 542 (0x21e), region = 32  ;;  %2926 = vmatprep.subr.bf16.mxu1 (!%p169_p3), %v3505_v1  ;;  %3086 = vmatprep.subr.bf16.mxu0 (!%p169_p3), %v3505_v1  ;;  %v3332_v2 = vld [vmem:[%s4177_s1 + $0x200] sm:$0xff] (!%p169_p3)   ;;  %v3334_v4 = vld [vmem:[%s4177_s1 + $0x208] sm:$0xff] (!%p169_p3)   ;;  %v3336_v6 = vld [vmem:[%s4177_s1 + $0x210] sm:$0xff] (!%p169_p3)   ;;  %vm1427_vm1 = vsmask.f32 (!%p169_p3), 5376 }
   0x8   : > { %2927 = vmatpush3.bf16.msra.mxu1 (!%p169_p3), %v3331_v0  ;;  %2942 = vmatprep.mubr.msk.bf16.mxu1 (!%p169_p3), %vm3506_vm0, %v3505_v1  ;;  %v3337_v7 = vld [vmem:[%s4177_s1 + $0x58] sm:$0xff] (!%p169_p3)   ;;  %v3339_v9 = vld [vmem:[%s4177_s1 + $0x60] sm:$0xff] (!%p169_p3)   ;;  %v3341_v11 = vld [vmem:[%s4177_s1 + $0x68] sm:$0xff] (!%p169_p3)   ;;  %vm2201_vm4 = vcmask (!%p169_p3), 1043456  }
   0x9   : > { %3087 = vmatpush3.bf16.msra.mxu0 (!%p169_p3), %v3332_v2  ;;  %2928 = vmatprep.subr.bf16.mxu1 (!%p169_p3), %v3505_v1  ;;  %v3338_v8 = vld [vmem:[%s4177_s1 + $0x218] sm:$0xff] (!%p169_p3)   ;;  %v3340_v10 = vld [vmem:[%s4177_s1 + $0x220] sm:$0xff] (!%p169_p3)   ;;  %v3342_v12 = vld [vmem:[%s4177_s1 + $0x228] sm:$0xff] (!%p169_p3)  }
   0xa   : > { %3088 = vmatprep.subr.bf16.mxu0 (!%p169_p3), %v3505_v1  ;;  %3102 = vmatprep.mubr.msk.bf16.mxu0 (!%p169_p3), %vm3506_vm0, %v3505_v1  ;;  %v3343_v13 = vld [vmem:[%s4177_s1 + $0x70] sm:$0xff] (!%p169_p3)   ;;  %v3345_v15 = vld [vmem:[%s4177_s1 + $0x78] sm:$0xff] (!%p169_p3)   ;;  %v3349_v21 = vld [vmem:[%s4177_s1] sm:$0xff] (!%p169_p3)  }
   0xb   : > { %v3344_v14 = vld [vmem:[%s4177_s1 + $0x230] sm:$0xff] (!%p169_p3)   ;;  %v3346_v19 = vld [vmem:[%s4177_s1 + $0x238] sm:$0xff] (!%p169_p3)   ;;  %v3351_v23 = vld [vmem:[%s4177_s1 + $0x240] sm:$0xff] (!%p169_p3)  }
   0xc   : > { %2929 = vmatpush3.bf16.msra.mxu1 (!%p169_p3), %v3333_v3  ;;  %v3352_v24 = vld [vmem:[%s4177_s1 + $0x8] sm:$0xff] (!%p169_p3)   ;;  %v3354_v26 = vld [vmem:[%s4177_s1 + $0x10] sm:$0xff] (!%p169_p3)   ;;  %v3356_v28 = vld [vmem:[%s4177_s1 + $0x18] sm:$0xff] (!%p169_p3)  }
   0xd   : > { %3089 = vmatpush3.bf16.msra.mxu0 (!%p169_p3), %v3334_v4  ;;  %2930 = vmatprep.subr.bf16.mxu1 (!%p169_p3), %v3505_v1  ;;  %v3353_v25 = vld [vmem:[%s4177_s1 + $0x248] sm:$0xff] (!%p169_p3)   ;;  %v3355_v27 = vld [vmem:[%s4177_s1 + $0x250] sm:$0xff] (!%p169_p3)   ;;  %v3357_v29 = vld [vmem:[%s4177_s1 + $0x258] sm:$0xff] (!%p169_p3)  }
   0xe   : > { %3090 = vmatprep.subr.bf16.mxu0 %v3505_v1  ;;  %s4189_s12 = smov (!%p202_p4, %s3495_s12), 1  ;;  %v3358_v30 = vld [vmem:[%s4177_s1 + $0x20] sm:$0xff]   ;;  %v3360_v32 = vld [vmem:[%s4177_s1 + $0x28] sm:$0xff]   ;;  %v3362_v34 = vld [vmem:[%s4177_s1 + $0x30] sm:$0xff]  }
   0xf   : > { %s3304_s4 = smul.u32 48, %s4189_s12  ;;  %v3359_v31 = vld [vmem:[%s4177_s1 + $0x260] sm:$0xff]   ;;  %v3361_v33 = vld [vmem:[%s4177_s1 + $0x268] sm:$0xff]   ;;  %v3363_v35 = vld [vmem:[%s4177_s1 + $0x270] sm:$0xff]   ;;  %s2779_s20 = sshll.u32 %s4189_s12, 3 }
  0x10   : > { %2931 = vmatpush3.bf16.msra.mxu1 %v3335_v5  ;;  %v3364_v36 = vld [vmem:[%s4177_s1 + $0x38] sm:$0xff]   ;;  %v3368_v42 = vld [vmem:[%s4177_s1 + $0x80] sm:$0xff]   ;;  %v3371_v45 = vld [vmem:[%s4177_s1 + $0x88] sm:$0xff]   ;;  %s221_s23 = scalar_lea.vmem %s4179_s3, %s2779_s20 }
  0x11   : > { %3091 = vmatpush3.bf16.msra.mxu0 %v3336_v6  ;;  %2932 = vmatprep.subr.bf16.mxu1 %v3505_v1  ;;  %s3599_s11 = scalar_lea.vmem %s4176_s0, %s3304_s4  ;;  %v3365_v40 = vld [vmem:[%s4177_s1 + $0x278] sm:$0xff]   ;;  %v3370_v44 = vld [vmem:[%s4177_s1 + $0x280] sm:$0xff]   ;;  %v3372_v46 = vld [vmem:[%s4177_s1 + $0x288] sm:$0xff]  }
  0x12   : > { %3092 = vmatprep.subr.bf16.mxu0 %v3505_v1  ;;  %v3621_v16 = vld [vmem:[%s3599_s11 + $0xc] sm:$0xf]  ;;  %v2364_v17 = vld [vmem:[%s3599_s11 + $0x10] sm:$0x3]  ;;  %v3350_v18 = vld [vmem:[%s3599_s11] sm:$0xfc]  }
  0x13   : > { %v2381_v20 = vcombine.low %v3621_v16, %v2364_v17  ;;  %v1189_v22 = vrot.slane %v3350_v18, 2  ;;  %v223_v37 = vld [vmem:[%s3599_s11] sm:$0xf]  ;;  %v224_v38 = vld [vmem:[%s3599_s11 + $0x4] sm:$0x3]  ;;  %v3373_v47 = vld [vmem:[%s4177_s1 + $0x90] sm:$0xff]  }
  0x14   : > { %2933 = vmatpush3.bf16.msra.mxu1 %v3337_v7  ;;  %v3369_v39 = vld [vmem:[%s3599_s11 + $0xc] sm:$0xfc]   ;;  %v2390_v41 = vcombine.low %v223_v37, %v224_v38  ;;  %v3375_v49 = vld [vmem:[%s4177_s1 + $0x98] sm:$0xff]   ;;  %v451_v51 = vld [vmem:[%s3599_s11 + $0x4] sm:$0x7] }
  0x15   : > { %3093 = vmatpush3.bf16.msra.mxu0 %v3338_v8  ;;  %2934 = vmatprep.subr.bf16.mxu1 %v3505_v1  ;;  %v1306_v43 = vrot.slane %v3369_v39, 2  ;;  %v3374_v48 = vld [vmem:[%s4177_s1 + $0x290] sm:$0xff]   ;;  %v3376_v50 = vld [vmem:[%s4177_s1 + $0x298] sm:$0xff]   ;;  %v3377_v52 = vld [vmem:[%s4177_s1 + $0xa0] sm:$0xff]   ;;  %v2415_v56 = vcombine.low %v223_v37, %v451_v51 }
  0x16   : > { %3094 = vmatprep.subr.bf16.mxu0 %v3505_v1  ;;  %v3378_v53 = vld [vmem:[%s4177_s1 + $0x2a0] sm:$0xff]   ;;  %v3387_v55 = vld [vmem:[%s3599_s11 + $0x8] ss:$0 sps:$4 sm:$0x11]   ;;  %v3381_v61 = vld [vmem:[%s4177_s1 + $0xb0] sm:$0xff]  }
  0x17   : > { %v3386_v54 = vld [vmem:[%s3599_s11] sm:$0xfc]   ;;  %v3379_v57 = vld [vmem:[%s4177_s1 + $0xa8] sm:$0xff]   ;;  %v475_v62 = vshll.u32 %v2415_v56, 16  ;;  %v3382_v63 = vld [vmem:[%s4177_s1 + $0x2b0] sm:$0xff]   ;;  %v1437_v0 = vshll.u32 %v3387_v55, 16 }
  0x18   : > { %2935 = vmatpush3.bf16.msra.mxu1 %v3339_v9  ;;  %v3380_v58 = vld [vmem:[%s4177_s1 + $0x2a8] sm:$0xff]   ;;  %v1429_v59 = vshrl.u32 %v3386_v54, 16  ;;  %v1432_v60 = vshll.u32 %v3386_v54, 16  ;;  %v473_v4 = vshrl.u32 %v2415_v56, 16  ;;  %v3383_v6 = vld [vmem:[%s4177_s1 + $0xb8] sm:$0xff]   ;;  %v3391_v17 = vld [vmem:[%s4177_s1 + $0xd0] sm:$0xff]  }
  0x19   : > { %3095 = vmatpush3.bf16.msra.mxu0 %v3340_v10  ;;  %2936 = vmatprep.subr.bf16.mxu1 %v3505_v1  ;;  %v477_v5 = vrot.slane %v475_v62, 1  ;;  %v3384_v7 = vld [vmem:[%s4177_s1 + $0x2b8] sm:$0xff]   ;;  %v1439_v9 = vrot.slane %v1437_v0, 3  ;;  %v3392_v18 = vld [vmem:[%s4177_s1 + $0x2d0] sm:$0xff]   ;;  %v3415_v54 = vld [vmem:[%s4177_s1 + $0x128] sm:$0xff]  }
  0x1a   : > { %3096 = vmatprep.subr.bf16.mxu0 %v3505_v1  ;;  %v1431_v2 = vrot.slane %v1429_v59, 2  ;;  %v1434_v3 = vrot.slane %v1432_v60, 3  ;;  %v3401_v38 = vld [vmem:[%s4177_s1 + $0xf8] sm:$0xff]   ;;  %v3416_v55 = vld [vmem:[%s4177_s1 + $0x328] sm:$0xff]   ;;  %v3417_v56 = vld [vmem:[%s4177_s1 + $0x130] sm:$0xff]  }
  0x1b   : > { %v478_v10 = vor.u32 %v477_v5, %v473_v4  ;;  %v3402_v39 = vld [vmem:[%s4177_s1 + $0x2f8] sm:$0xff]   ;;  %v3423_v0 = vld [vmem:[%s4177_s1 + $0x140] sm:$0xff]   ;;  %v3426_v4 = vld [vmem:[%s4177_s1 + $0x148] sm:$0xff]  }
  0x1c   : > { %2937 = vmatpush3.bf16.msra.mxu1 %v3341_v11  ;;  %v1435_v8 = vor.u32 %v1434_v3, %v1431_v2  ;;  %v3385_v11 = vld [vmem:[%s4177_s1 + $0xc0] sm:$0xff]   ;;  %v3412_v51 = vld [vmem:[%s4177_s1 + $0x318] sm:$0xff]   ;;  %v3427_v5 = vld [vmem:[%s4177_s1 + $0x348] sm:$0xff]  }
  0x1d   : > { %3097 = vmatpush3.bf16.msra.mxu0 %v3342_v12  ;;  %2938 = vmatprep.subr.bf16.mxu1 %v3505_v1  ;;  %v3911_v59 = vld [vmem:[%s3599_s11 + $0x18] sm:$0xf]  ;;  %v2451_v60 = vld [vmem:[%s3599_s11 + $0x1c] sm:$0x3]  ;;  %v3425_v3 = vld [vmem:[%s4177_s1 + $0x340] sm:$0xff]  }
  0x1e   : > { %3098 = vmatprep.subr.bf16.mxu0 %v3505_v1  ;;  %v1440_v12 = vsel %vm1427_vm1, %v1435_v8, %v1439_v9  ;;  %v3420_v62 = vld [vmem:[%s4177_s1 + $0x338] sm:$0xff]  }
  0x1f   : > { %v3430_v8 = vld [vmem:[%s4177_s1 + $0x158] sm:$0xff]  }
  0x20   : > { %2939 = vmatpush3.bf16.msra.mxu1 %v3343_v13  ;;  %v3388_v13 = vld [vmem:[%s4177_s1 + $0x2c0] sm:$0xff]   ;;  %v3431_v9 = vld [vmem:[%s4177_s1 + $0x358] sm:$0xff]  }
  0x21   : > { %3099 = vmatpush3.bf16.msra.mxu0 %v3344_v14  ;;  %2940 = vmatprep.subr.bf16.mxu1 %v3505_v1  ;;  %v3389_v14 = vld [vmem:[%s4177_s1 + $0xc8] sm:$0xff]  }
  0x22   : > { %3100 = vmatprep.subr.bf16.mxu0 %v3505_v1 }
  0x24   : > { %2941 = vmatpush3.bf16.msra.mxu1 %v3345_v15  ;;  %v3390_v15 = vld [vmem:[%s4177_s1 + $0x2c8] sm:$0xff]  }
  0x25   : > { %3101 = vmatpush3.bf16.msra.mxu0 %v3346_v19  ;;  %2946 = vmatprep.subr.bf16.mxu1 %v3505_v1  ;;  %v3393_v19 = vld [vmem:[%s4177_s1 + $0xd8] sm:$0xff]  }
  0x26   : > { %3106 = vmatprep.subr.bf16.mxu0 %v3505_v1 }
  0x27   : > { %2943 = vmatmul.mubr.bf16.vlgmr.msra.gmra.mrb[0].mxu1 %v2381_v20  ;;  %v3394_v20 = vld [vmem:[%s4177_s1 + $0x2d8] sm:$0xff]  }
  0x28   : > { %2947 = vmatpush3.bf16.msra.mxu1 %v3349_v21  ;;  %3103 = vmatmul.mubr.bf16.vlgmr.msra.gmra.mrb[0].mxu0 %v1189_v22  ;;  %v2424_v21 = vld [vmem:[%s3599_s11 + $0x10] sm:$0x7]  ;;  %v3395_v22 = vld [vmem:[%s4177_s1 + $0xe0] sm:$0xff]  }
  0x29   : > { %3107 = vmatpush3.bf16.msra.mxu0 %v3351_v23  ;;  %2948 = vmatprep.subr.bf16.mxu1 %v3505_v1  ;;  %v3396_v23 = vld [vmem:[%s4177_s1 + $0x2e0] sm:$0xff]  }
  0x2a   : > { %3108 = vmatprep.subr.bf16.mxu0 %v3505_v1  ;;  %2962 = vmatprep.mubr.msk.bf16.mxu1 %vm3506_vm0, %v3505_v1 }
  0x2b   : > { %3122 = vmatprep.mubr.msk.bf16.mxu0 %vm3506_vm0, %v3505_v1 }
  0x2c   : > { %2949 = vmatpush3.bf16.msra.mxu1 %v3352_v24  ;;  %v3404_v24 = vld [vmem:[%s3599_s11 + $0xc] sm:$0xfc]  }
  0x2d   : > { %3109 = vmatpush3.bf16.msra.mxu0 %v3353_v25  ;;  %2950 = vmatprep.subr.bf16.mxu1 %v3505_v1  ;;  %v3405_v25 = vld [vmem:[%s3599_s11 + $0x14] ss:$0 sps:$4 sm:$0x11]  }
  0x2e   : > { %3110 = vmatprep.subr.bf16.mxu0 %v3505_v1 }
  0x30   : > { %2951 = vmatpush3.bf16.msra.mxu1 %v3354_v26  ;;  %v2441_v26 = vcombine.low %v3621_v16, %v2424_v21  ;;  %v3399_v16 = vld [vmem:[%s4177_s1 + $0xf0] sm:$0xff]   ;;  %v3439_v21 = vld [vmem:[%s4177_s1 + $0x378] sm:$0xff]  }
  0x31   : > { %3111 = vmatpush3.bf16.msra.mxu0 %v3355_v27  ;;  %2952 = vmatprep.subr.bf16.mxu1 %v3505_v1  ;;  %v3397_v27 = vld [vmem:[%s4177_s1 + $0xe8] sm:$0xff]  }
  0x32   : > { %3112 = vmatprep.subr.bf16.mxu0 %v3505_v1 }
  0x34   : > { %2953 = vmatpush3.bf16.msra.mxu1 %v3356_v28  ;;  %v3398_v28 = vld [vmem:[%s4177_s1 + $0x2e8] sm:$0xff]  }
  0x35   : > { %3113 = vmatpush3.bf16.msra.mxu0 %v3357_v29  ;;  %2954 = vmatprep.subr.bf16.mxu1 %v3505_v1  ;;  %v1562_v29 = vshrl.u32 %v3404_v24, 16 }
  0x36   : > { %3114 = vmatprep.subr.bf16.mxu0 %v3505_v1 }
  0x38   : > { %2955 = vmatpush3.bf16.msra.mxu1 %v3358_v30  ;;  %v1565_v30 = vshll.u32 %v3404_v24, 16 }
  0x39   : > { %3115 = vmatpush3.bf16.msra.mxu0 %v3359_v31  ;;  %2956 = vmatprep.subr.bf16.mxu1 %v3505_v1  ;;  %v595_v31 = vshll.u32 %v2441_v26, 16 }
  0x3a   : > { %3116 = vmatprep.subr.bf16.mxu0 %v3505_v1 }
  0x3b   : > { %v597_v37 = vrot.slane %v595_v31, 1  ;;  %v3450_v31 = vld [vmem:[%s4177_s1 + $0x398] sm:$0xff]  }
  0x3c   : > { %2957 = vmatpush3.bf16.msra.mxu1 %v3360_v32  ;;  %v3400_v32 = vld [vmem:[%s4177_s1 + $0x2f0] sm:$0xff]  }
  0x3d   : > { %3117 = vmatpush3.bf16.msra.mxu0 %v3361_v33  ;;  %2958 = vmatprep.subr.bf16.mxu1 %v3505_v1  ;;  %v1570_v33 = vshll.u32 %v3405_v25, 16  ;;  %v3444_v25 = vld [vmem:[%s4177_s1 + $0x380] sm:$0xff]  }
  0x3e   : > { %3118 = vmatprep.subr.bf16.mxu0 %v3505_v1 }
  0x40   : > { %2959 = vmatpush3.bf16.msra.mxu1 %v3362_v34  ;;  %v1564_v34 = vrot.slane %v1562_v29, 2  ;;  %v3448_v29 = vld [vmem:[%s4177_s1 + $0x390] sm:$0xff]  }
  0x41   : > { %3119 = vmatpush3.bf16.msra.mxu0 %v3363_v35  ;;  %2960 = vmatprep.subr.bf16.mxu1 %v3505_v1  ;;  %v1567_v35 = vrot.slane %v1565_v30, 3  ;;  %v3449_v30 = vld [vmem:[%s4177_s1 + $0x198] sm:$0xff]  }
  0x42   : > { %3120 = vmatprep.subr.bf16.mxu0 %v3505_v1 }
  0x44   : > { %2961 = vmatpush3.bf16.msra.mxu1 %v3364_v36  ;;  %v593_v36 = vshrl.u32 %v2441_v26, 16  ;;  %v3445_v26 = vld [vmem:[%s4177_s1 + $0x188] sm:$0xff]  }
  0x45   : > { %3121 = vmatpush3.bf16.msra.mxu0 %v3365_v40  ;;  %2966 = vmatprep.subr.bf16.mxu1 %v3505_v1  ;;  %v1568_v40 = vor.u32 %v1567_v35, %v1564_v34  ;;  %v3460_v34 = vld [vmem:[%s3599_s11 + $0x18] sm:$0xfc]  }
  0x46   : > { %3126 = vmatprep.subr.bf16.mxu0 %v3505_v1 }
  0x47   : > { %2963 = vmatmul.mubr.bf16.vlgmr.msra.gmra.mrb[0].mxu1 %v2390_v41  ;;  %v1572_v41 = vrot.slane %v1570_v33, 3  ;;  %v3452_v33 = vld [vmem:[%s4177_s1 + $0x3a0] sm:$0xff]  }
  0x48   : > { %2967 = vmatpush3.bf16.msra.mxu1 %v3368_v42  ;;  %3123 = vmatmul.mubr.bf16.vlgmr.msra.gmra.mrb[0].mxu0 %v1306_v43  ;;  %v598_v42 = vor.u32 %v597_v37, %v593_v36  ;;  %v3403_v43 = vld [vmem:[%s4177_s1 + $0x100] sm:$0xff]   ;;  %v3453_v36 = vld [vmem:[%s4177_s1 + $0x1a8] sm:$0xff]  }
  0x49   : > { %3127 = vmatpush3.bf16.msra.mxu0 %v3370_v44  ;;  %2968 = vmatprep.subr.bf16.mxu1 %v3505_v1  ;;  %v1573_v44 = vsel %vm1427_vm1, %v1568_v40, %v1572_v41  ;;  %v3454_v37 = vld [vmem:[%s4177_s1 + $0x3a8] sm:$0xff]   ;;  %v1932_v40 = vshll.u32 %v3460_v34, 16 }
  0x4a   : > { %3128 = vmatprep.subr.bf16.mxu0 %v3505_v1  ;;  %2982 = vmatprep.mubr.msk.bf16.mxu1 %vm3506_vm0, %v3505_v1 }
  0x4b   : > { %3142 = vmatprep.mubr.msk.bf16.mxu0 %vm3506_vm0, %v3505_v1 }
  0x4c   : > { %2969 = vmatpush3.bf16.msra.mxu1 %v3371_v45  ;;  %v3406_v45 = vld [vmem:[%s4177_s1 + $0x300] sm:$0xff]  }
  0x4d   : > { %3129 = vmatpush3.bf16.msra.mxu0 %v3372_v46  ;;  %2970 = vmatprep.subr.bf16.mxu1 %v3505_v1  ;;  %v3407_v46 = vld [vmem:[%s4177_s1 + $0x108] sm:$0xff]  }
  0x4e   : > { %3130 = vmatprep.subr.bf16.mxu0 %v3505_v1 }
  0x50   : > { %2971 = vmatpush3.bf16.msra.mxu1 %v3373_v47  ;;  %v3408_v47 = vld [vmem:[%s4177_s1 + $0x308] sm:$0xff]  }
  0x51   : > { %3131 = vmatpush3.bf16.msra.mxu0 %v3374_v48  ;;  %2972 = vmatprep.subr.bf16.mxu1 %v3505_v1  ;;  %v3409_v48 = vld [vmem:[%s4177_s1 + $0x110] sm:$0xff]  }
  0x52   : > { %3132 = vmatprep.subr.bf16.mxu0 %v3505_v1 }
  0x54   : > { %2973 = vmatpush3.bf16.msra.mxu1 %v3375_v49  ;;  %v3410_v49 = vld [vmem:[%s4177_s1 + $0x310] sm:$0xff]  }
  0x55   : > { %3133 = vmatpush3.bf16.msra.mxu0 %v3376_v50  ;;  %2974 = vmatprep.subr.bf16.mxu1 %v3505_v1  ;;  %v3411_v50 = vld [vmem:[%s4177_s1 + $0x118] sm:$0xff]  }
  0x56   : > { %3134 = vmatprep.subr.bf16.mxu0 %v3505_v1 }
  0x58   : > { %2975 = vmatpush3.bf16.msra.mxu1 %v3377_v52  ;;  %v3413_v52 = vld [vmem:[%s4177_s1 + $0x120] sm:$0xff]  }
  0x59   : > { %3135 = vmatpush3.bf16.msra.mxu0 %v3378_v53  ;;  %2976 = vmatprep.subr.bf16.mxu1 %v3505_v1  ;;  %v3414_v53 = vld [vmem:[%s4177_s1 + $0x320] sm:$0xff]  }
  0x5a   : > { %3136 = vmatprep.subr.bf16.mxu0 %v3505_v1 }
  0x5c   : > { %2977 = vmatpush3.bf16.msra.mxu1 %v3379_v57  ;;  %v3418_v57 = vld [vmem:[%s4177_s1 + $0x330] sm:$0xff]  }
  0x5d   : > { %3137 = vmatpush3.bf16.msra.mxu0 %v3380_v58  ;;  %2978 = vmatprep.subr.bf16.mxu1 %v3505_v1  ;;  %v3419_v58 = vld [vmem:[%s4177_s1 + $0x138] sm:$0xff]  }
  0x5e   : > { %3138 = vmatprep.subr.bf16.mxu0 %v3505_v1 }
  0x60   : > { %2979 = vmatpush3.bf16.msra.mxu1 %v3381_v61  ;;  %v3424_v61 = vld [vmem:[%s3599_s11 + $0x18] sm:$0xfc]  }
  0x61   : > { %3139 = vmatpush3.bf16.msra.mxu0 %v3382_v63  ;;  %2980 = vmatprep.subr.bf16.mxu1 %v3505_v1  ;;  %v2468_v63 = vcombine.low %v3911_v59, %v2451_v60  ;;  %v1690_v2 = vrot.slane %v3424_v61, 2  ;;  %v3466_v60 = vld [vmem:[%s4177_s1 + $0x3d0] sm:$0xff]   ;;  %v3467_v61 = vld [vmem:[%s4177_s1 + $0x1d8] sm:$0xff]  }
  0x62   : > { %3140 = vmatprep.subr.bf16.mxu0 %v3505_v1 }
  0x64   : > { %2981 = vmatpush3.bf16.msra.mxu1 %v3383_v6  ;;  %v3428_v6 = vld [vmem:[%s4177_s1 + $0x150] sm:$0xff]  }
  0x65   : > { %3141 = vmatpush3.bf16.msra.mxu0 %v3384_v7  ;;  %2986 = vmatprep.subr.bf16.mxu1 %v3505_v1  ;;  %v3429_v7 = vld [vmem:[%s4177_s1 + $0x350] sm:$0xff]  }
  0x66   : > { %3146 = vmatprep.subr.bf16.mxu0 %v3505_v1 }
  0x67   : > { %2983 = vmatmul.mubr.bf16.vlgmr.msra.gmra.mrb[0].mxu1 %v478_v10  ;;  %v3432_v10 = vld [vmem:[%s4177_s1 + $0x160] sm:$0xff]  }
  0x68   : > { %2987 = vmatpush3.bf16.msra.mxu1 %v3385_v11  ;;  %3143 = vmatmul.mubr.bf16.vlgmr.msra.gmra.mrb[0].mxu0 %v1440_v12  ;;  %v3433_v11 = vld [vmem:[%s4177_s1 + $0x360] sm:$0xff]   ;;  %v3434_v12 = vld [vmem:[%s4177_s1 + $0x168] sm:$0xff]  }
  0x69   : > { %3147 = vmatpush3.bf16.msra.mxu0 %v3388_v13  ;;  %2988 = vmatprep.subr.bf16.mxu1 %v3505_v1  ;;  %v3435_v13 = vld [vmem:[%s4177_s1 + $0x368] sm:$0xff]  }
  0x6a   : > { %3148 = vmatprep.subr.bf16.mxu0 %v3505_v1  ;;  %3002 = vmatprep.mubr.msk.bf16.mxu1 %vm3506_vm0, %v3505_v1 }
  0x6b   : > { %3162 = vmatprep.mubr.msk.bf16.mxu0 %vm3506_vm0, %v3505_v1 }
  0x6c   : > { %2989 = vmatpush3.bf16.msra.mxu1 %v3389_v14  ;;  %v3436_v14 = vld [vmem:[%s4177_s1 + $0x170] sm:$0xff]  }
  0x6d   : > { %3149 = vmatpush3.bf16.msra.mxu0 %v3390_v15  ;;  %2990 = vmatprep.subr.bf16.mxu1 %v3505_v1  ;;  %v3437_v15 = vld [vmem:[%s4177_s1 + $0x370] sm:$0xff]  }
  0x6e   : > { %3150 = vmatprep.subr.bf16.mxu0 %v3505_v1 }
  0x70   : > { %2991 = vmatpush3.bf16.msra.mxu1 %v3391_v17  ;;  %v3438_v17 = vld [vmem:[%s4177_s1 + $0x178] sm:$0xff]  }
  0x71   : > { %3151 = vmatpush3.bf16.msra.mxu0 %v3392_v18  ;;  %2992 = vmatprep.subr.bf16.mxu1 %v3505_v1  ;;  %v3985_v18 = vld [vmem:[%s3599_s11 + $0x24] sm:$0xf] }
  0x72   : > { %3152 = vmatprep.subr.bf16.mxu0 %v3505_v1 }
  0x74   : > { %2993 = vmatpush3.bf16.msra.mxu1 %v3393_v19  ;;  %v2478_v19 = vld [vmem:[%s3599_s11 + $0x28] sm:$0x3] }
  0x75   : > { %3153 = vmatpush3.bf16.msra.mxu0 %v3394_v20  ;;  %2994 = vmatprep.subr.bf16.mxu1 %v3505_v1  ;;  %v3443_v20 = vld [vmem:[%s3599_s11 + $0x24] sm:$0xfc]  }
  0x76   : > { %3154 = vmatprep.subr.bf16.mxu0 %v3505_v1  ;;  %v1807_v24 = vrot.slane %v3443_v20, 2  ;;  %v3476_v20 = vld [vmem:[%s4177_s1 + $0x3f8] sm:$0xff]  }
  0x78   : > { %2995 = vmatpush3.bf16.msra.mxu1 %v3395_v22  ;;  %v2495_v22 = vcombine.low %v3985_v18, %v2478_v19  ;;  %v3475_v19 = vld [vmem:[%s4177_s1 + $0x1f8] sm:$0xff]  }
  0x79   : > { %3155 = vmatpush3.bf16.msra.mxu0 %v3396_v23  ;;  %2996 = vmatprep.subr.bf16.mxu1 %v3505_v1  ;;  %v3442_v23 = vld [vmem:[%s4177_s1 + $0x180] sm:$0xff]  }
  0x7a   : > { %3156 = vmatprep.subr.bf16.mxu0 %v3505_v1 }
  0x7c   : > { %2997 = vmatpush3.bf16.msra.mxu1 %v3397_v27  ;;  %v3446_v27 = vld [vmem:[%s4177_s1 + $0x388] sm:$0xff]  }
  0x7d   : > { %3157 = vmatpush3.bf16.msra.mxu0 %v3398_v28  ;;  %2998 = vmatprep.subr.bf16.mxu1 %v3505_v1  ;;  %v3447_v28 = vld [vmem:[%s4177_s1 + $0x190] sm:$0xff]  }
  0x7e   : > { %3158 = vmatprep.subr.bf16.mxu0 %v3505_v1 }
  0x80   : > { %2999 = vmatpush3.bf16.msra.mxu1 %v3399_v16  ;;  %v2504_v16 = vld [vmem:[%s3599_s11 + $0x1c] sm:$0x7] }
  0x81   : > { %3159 = vmatpush3.bf16.msra.mxu0 %v3400_v32  ;;  %3000 = vmatprep.subr.bf16.mxu1 %v3505_v1  ;;  %v3451_v32 = vld [vmem:[%s4177_s1 + $0x1a0] sm:$0xff]   ;;  %v2521_v35 = vcombine.low %v3911_v59, %v2504_v16  ;;  %v3465_v59 = vld [vmem:[%s4177_s1 + $0x1d0] sm:$0xff]  }
  0x82   : > { %3160 = vmatprep.subr.bf16.mxu0 %v3505_v1 }
  0x83   : > { %v949_v41 = vshll.u32 %v2521_v35, 16 }
  0x84   : > { %3001 = vmatpush3.bf16.msra.mxu1 %v3401_v38  ;;  %v3461_v38 = vld [vmem:[%s3599_s11 + $0x20] ss:$0 sps:$4 sm:$0x11]  }
  0x85   : > { %3161 = vmatpush3.bf16.msra.mxu0 %v3402_v39  ;;  %3006 = vmatprep.subr.bf16.mxu1 %v3505_v1  ;;  %v1929_v39 = vshrl.u32 %v3460_v34, 16 }
  0x86   : > { %3166 = vmatprep.subr.bf16.mxu0 %v3505_v1 }
  0x87   : > { %3003 = vmatmul.mubr.bf16.vlgmr.msra.gmra.mrb[0].mxu1 %v598_v42  ;;  %v3455_v42 = vld [vmem:[%s4177_s1 + $0x1b0] sm:$0xff]  }
  0x88   : > { %3007 = vmatpush3.bf16.msra.mxu1 %v3403_v43  ;;  %3163 = vmatmul.mubr.bf16.vlgmr.msra.gmra.mrb[0].mxu0 %v1573_v44  ;;  %v3456_v43 = vld [vmem:[%s4177_s1 + $0x3b0] sm:$0xff]   ;;  %v1931_v44 = vrot.slane %v1929_v39, 2 }
  0x89   : > { %3167 = vmatpush3.bf16.msra.mxu0 %v3406_v45  ;;  %3008 = vmatprep.subr.bf16.mxu1 %v3505_v1  ;;  %v1934_v45 = vrot.slane %v1932_v40, 3 }
  0x8a   : > { %3168 = vmatprep.subr.bf16.mxu0 %v3505_v1  ;;  %3022 = vmatprep.mubr.msk.bf16.mxu1 %vm3506_vm0, %v3505_v1 }
  0x8b   : > { %3182 = vmatprep.mubr.msk.bf16.mxu0 %vm3506_vm0, %v3505_v1 }
  0x8c   : > { %3009 = vmatpush3.bf16.msra.mxu1 %v3407_v46  ;;  %v1937_v46 = vshll.u32 %v3461_v38, 16 }
  0x8d   : > { %3169 = vmatpush3.bf16.msra.mxu0 %v3408_v47  ;;  %3010 = vmatprep.subr.bf16.mxu1 %v3505_v1  ;;  %v947_v47 = vshrl.u32 %v2521_v35, 16 }
  0x8e   : > { %3170 = vmatprep.subr.bf16.mxu0 %v3505_v1 }
  0x90   : > { %3011 = vmatpush3.bf16.msra.mxu1 %v3409_v48  ;;  %v951_v48 = vrot.slane %v949_v41, 1 }
  0x91   : > { %3171 = vmatpush3.bf16.msra.mxu0 %v3410_v49  ;;  %3012 = vmatprep.subr.bf16.mxu1 %v3505_v1  ;;  %v3457_v49 = vld [vmem:[%s4177_s1 + $0x1b8] sm:$0xff]  }
  0x92   : > { %3172 = vmatprep.subr.bf16.mxu0 %v3505_v1 }
  0x94   : > { %3013 = vmatpush3.bf16.msra.mxu1 %v3411_v50  ;;  %v3458_v50 = vld [vmem:[%s4177_s1 + $0x3b8] sm:$0xff]  }
  0x95   : > { %3173 = vmatpush3.bf16.msra.mxu0 %v3412_v51  ;;  %3014 = vmatprep.subr.bf16.mxu1 %v3505_v1  ;;  %v1935_v51 = vor.u32 %v1934_v45, %v1931_v44 }
  0x96   : > { %3174 = vmatprep.subr.bf16.mxu0 %v3505_v1 }
  0x98   : > { %3015 = vmatpush3.bf16.msra.mxu1 %v3413_v52  ;;  %v1939_v52 = vrot.slane %v1937_v46, 3 }
  0x99   : > { %3175 = vmatpush3.bf16.msra.mxu0 %v3414_v53  ;;  %3016 = vmatprep.subr.bf16.mxu1 %v3505_v1  ;;  %v952_v53 = vor.u32 %v951_v48, %v947_v47 }
  0x9a   : > { %3176 = vmatprep.subr.bf16.mxu0 %v3505_v1 }
  0x9c   : > { %3017 = vmatpush3.bf16.msra.mxu1 %v3415_v54  ;;  %v3459_v54 = vld [vmem:[%s4177_s1 + $0x1c0] sm:$0xff]  }
  0x9d   : > { %3177 = vmatpush3.bf16.msra.mxu0 %v3416_v55  ;;  %3018 = vmatprep.subr.bf16.mxu1 %v3505_v1  ;;  %v1940_v55 = vsel %vm1427_vm1, %v1935_v51, %v1939_v52 }
  0x9e   : > { %3178 = vmatprep.subr.bf16.mxu0 %v3505_v1 }
  0xa0   : > { %3019 = vmatpush3.bf16.msra.mxu1 %v3417_v56  ;;  %v3462_v56 = vld [vmem:[%s4177_s1 + $0x3c0] sm:$0xff]  }
  0xa1   : > { %3179 = vmatpush3.bf16.msra.mxu0 %v3418_v57  ;;  %3020 = vmatprep.subr.bf16.mxu1 %v3505_v1  ;;  %v3463_v57 = vld [vmem:[%s4177_s1 + $0x1c8] sm:$0xff]  }
  0xa2   : > { %3180 = vmatprep.subr.bf16.mxu0 %v3505_v1 }
  0xa4   : > { %3021 = vmatpush3.bf16.msra.mxu1 %v3419_v58  ;;  %v3464_v58 = vld [vmem:[%s4177_s1 + $0x3c8] sm:$0xff]  }
  0xa5   : > { %3181 = vmatpush3.bf16.msra.mxu0 %v3420_v62  ;;  %3026 = vmatprep.subr.bf16.mxu1 %v3505_v1  ;;  %v3468_v62 = vld [vmem:[%s4177_s1 + $0x3d8] sm:$0xff]  }
  0xa6   : > { %3186 = vmatprep.subr.bf16.mxu0 %v3505_v1 }
  0xa7   : > { %3023 = vmatmul.mubr.bf16.vlgmr.msra.gmra.mrb[0].mxu1 %v2468_v63  ;;  %v2530_v63 = vld [vmem:[%s3599_s11 + $0x28] sm:$0x7] }
  0xa8   : > { %3027 = vmatpush3.bf16.msra.mxu1 %v3423_v0  ;;  %3183 = vmatmul.mubr.bf16.vlgmr.msra.gmra.mrb[0].mxu0 %v1690_v2  ;;  %v3469_v0 = vld [vmem:[%s4177_s1 + $0x1e0] sm:$0xff]  }
  0xa9   : > { %3187 = vmatpush3.bf16.msra.mxu0 %v3425_v3  ;;  %3028 = vmatprep.subr.bf16.mxu1 %v3505_v1  ;;  %v3470_v2 = vld [vmem:[%s4177_s1 + $0x3e0] sm:$0xff]  }
  0xaa   : > { %3188 = vmatprep.subr.bf16.mxu0 %v3505_v1  ;;  %3042 = vmatprep.mubr.msk.bf16.mxu1 %vm3506_vm0, %v3505_v1  ;;  %v3477_v3 = vld [vmem:[%s3599_s11 + $0x24] sm:$0xfc]  }
  0xab   : > { %3202 = vmatprep.mubr.msk.bf16.mxu0 %vm3506_vm0, %v3505_v1 }
  0xac   : > { %3029 = vmatpush3.bf16.msra.mxu1 %v3426_v4  ;;  %v2547_v4 = vcombine.low %v3985_v18, %v2530_v63 }
  0xad   : > { %3189 = vmatpush3.bf16.msra.mxu0 %v3427_v5  ;;  %3030 = vmatprep.subr.bf16.mxu1 %v3505_v1  ;;  %v3471_v5 = vld [vmem:[%s4177_s1 + $0x1e8] sm:$0xff]  }
  0xae   : > { %3190 = vmatprep.subr.bf16.mxu0 %v3505_v1 }
  0xb0   : > { %3031 = vmatpush3.bf16.msra.mxu1 %v3428_v6  ;;  %v3472_v6 = vld [vmem:[%s4177_s1 + $0x3e8] sm:$0xff]  }
  0xb1   : > { %3191 = vmatpush3.bf16.msra.mxu0 %v3429_v7  ;;  %3032 = vmatprep.subr.bf16.mxu1 %v3505_v1  ;;  %v3478_v7 = vld [vmem:[%s3599_s11 + $0x2c] ss:$0 sps:$4 sm:$0x11]  }
  0xb2   : > { %3192 = vmatprep.subr.bf16.mxu0 %v3505_v1 }
  0xb4   : > { %3033 = vmatpush3.bf16.msra.mxu1 %v3430_v8  ;;  %v2062_v8 = vshrl.u32 %v3477_v3, 16 }
  0xb5   : > { %3193 = vmatpush3.bf16.msra.mxu0 %v3431_v9  ;;  %3034 = vmatprep.subr.bf16.mxu1 %v3505_v1  ;;  %v2065_v9 = vshll.u32 %v3477_v3, 16 }
  0xb6   : > { %3194 = vmatprep.subr.bf16.mxu0 %v3505_v1 }
  0xb8   : > { %3035 = vmatpush3.bf16.msra.mxu1 %v3432_v10  ;;  %v1069_v10 = vshll.u32 %v2547_v4, 16 }
  0xb9   : > { %3195 = vmatpush3.bf16.msra.mxu0 %v3433_v11  ;;  %3036 = vmatprep.subr.bf16.mxu1 %v3505_v1  ;;  %v3473_v11 = vld [vmem:[%s4177_s1 + $0x1f0] sm:$0xff]  }
  0xba   : > { %3196 = vmatprep.subr.bf16.mxu0 %v3505_v1  ;;  %v1071_v18 = vrot.slane %v1069_v10, 1 }
  0xbc   : > { %3037 = vmatpush3.bf16.msra.mxu1 %v3434_v12  ;;  %v3474_v12 = vld [vmem:[%s4177_s1 + $0x3f0] sm:$0xff]  }
  0xbd   : > { %3197 = vmatpush3.bf16.msra.mxu0 %v3435_v13  ;;  %3038 = vmatprep.subr.bf16.mxu1 %v3505_v1  ;;  %v2064_v13 = vrot.slane %v2062_v8, 2 }
  0xbe   : > { %3198 = vmatprep.subr.bf16.mxu0 %v3505_v1 }
  0xc0   : > { %3039 = vmatpush3.bf16.msra.mxu1 %v3436_v14  ;;  %v2067_v14 = vrot.slane %v2065_v9, 3 }
  0xc1   : > { %3199 = vmatpush3.bf16.msra.mxu0 %v3437_v15  ;;  %3040 = vmatprep.subr.bf16.mxu1 %v3505_v1  ;;  %v2070_v15 = vshll.u32 %v3478_v7, 16 }
  0xc2   : > { %3200 = vmatprep.subr.bf16.mxu0 %v3505_v1 }
  0xc4   : > { %3041 = vmatpush3.bf16.msra.mxu1 %v3438_v17  ;;  %v1067_v17 = vshrl.u32 %v2547_v4, 16 }
  0xc5   : > { %3201 = vmatpush3.bf16.msra.mxu0 %v3439_v21  ;;  %3046 = vmatprep.subr.bf16.mxu1 %v3505_v1  ;;  %v2068_v21 = vor.u32 %v2067_v14, %v2064_v13 }
  0xc6   : > { %3206 = vmatprep.subr.bf16.mxu0 %v3505_v1 }
  0xc7   : > { %3043 = vmatmul.mubr.bf16.vlgmr.msra.gmra.mrb[0].mxu1 %v2495_v22  ;;  %v2072_v22 = vrot.slane %v2070_v15, 3 }
  0xc8   : > { %3047 = vmatpush3.bf16.msra.mxu1 %v3442_v23  ;;  %3203 = vmatmul.mubr.bf16.vlgmr.msra.gmra.mrb[0].mxu0 %v1807_v24  ;;  %v1072_v23 = vor.u32 %v1071_v18, %v1067_v17 }
  0xc9   : > { %3207 = vmatpush3.bf16.msra.mxu0 %v3444_v25  ;;  %3048 = vmatprep.subr.bf16.mxu1 %v3505_v1  ;;  %v2073_v24 = vsel %vm1427_vm1, %v2068_v21, %v2072_v22  ;;  %v2166_v25 = vlaneseq }
  0xca   : > { %3208 = vmatprep.subr.bf16.mxu0 %v3505_v1  ;;  %3062 = vmatprep.mubr.msk.bf16.mxu1 %vm3506_vm0, %v3505_v1 }
  0xcb   : > { %3222 = vmatprep.mubr.msk.bf16.mxu0 %vm3506_vm0, %v3505_v1 }
  0xcc   : > { %3049 = vmatpush3.bf16.msra.mxu1 %v3445_v26  ;;  %v2167_v26 = vshrl.u32 %v2166_v25, 7 }
  0xcd   : > { %3209 = vmatpush3.bf16.msra.mxu0 %v3446_v27  ;;  %3050 = vmatprep.subr.bf16.mxu1 %v3505_v1 }
  0xce   : > { %3210 = vmatprep.subr.bf16.mxu0 %v3505_v1  ;;  %v2168_v27 = vadd.s32 8, %v2167_v26 }
  0xd0   : > { %3051 = vmatpush3.bf16.msra.mxu1 %v3447_v28  ;;  %v2180_v28 = vand.u32 3, %v2168_v27 }
  0xd1   : > { %3211 = vmatpush3.bf16.msra.mxu0 %v3448_v29  ;;  %3052 = vmatprep.subr.bf16.mxu1 %v3505_v1 }
  0xd2   : > { %3212 = vmatprep.subr.bf16.mxu0 %v3505_v1  ;;  %vm4141_vm2 = vcmp.lt.s32.totalorder %v2180_v28, 3 }
  0xd4   : > { %3053 = vmatpush3.bf16.msra.mxu1 %v3449_v30  ;;  %v2173_v30 = vand.u32 3, %v2167_v26 }
  0xd5   : > { %3213 = vmatpush3.bf16.msra.mxu0 %v3450_v31  ;;  %3054 = vmatprep.subr.bf16.mxu1 %v3505_v1 }
  0xd6   : > { %3214 = vmatprep.subr.bf16.mxu0 %v3505_v1  ;;  %vm4145_vm3 = vcmp.lt.s32.totalorder %v2173_v30, 3 }
  0xd8   : > { %3055 = vmatpush3.bf16.msra.mxu1 %v3451_v32 }
  0xd9   : > { %3215 = vmatpush3.bf16.msra.mxu0 %v3452_v33  ;;  %3056 = vmatprep.subr.bf16.mxu1 %v3505_v1 }
  0xda   : > { %3216 = vmatprep.subr.bf16.mxu0 %v3505_v1 }
  0xdc   : > { %3057 = vmatpush3.bf16.msra.mxu1 %v3453_v36 }
  0xdd   : > { %3217 = vmatpush3.bf16.msra.mxu0 %v3454_v37  ;;  %3058 = vmatprep.subr.bf16.mxu1 %v3505_v1 }
  0xde   : > { %3218 = vmatprep.subr.bf16.mxu0 %v3505_v1 }
  0xe0   : > { %3059 = vmatpush3.bf16.msra.mxu1 %v3455_v42 }
  0xe1   : > { %3219 = vmatpush3.bf16.msra.mxu0 %v3456_v43  ;;  %3060 = vmatprep.subr.bf16.mxu1 %v3505_v1 }
  0xe2   : > { %3220 = vmatprep.subr.bf16.mxu0 %v3505_v1 }
  0xe4   : > { %3061 = vmatpush3.bf16.msra.mxu1 %v3457_v49 }
  0xe5   : > { %3221 = vmatpush3.bf16.msra.mxu0 %v3458_v50  ;;  %3066 = vmatprep.subr.bf16.mxu1 %v3505_v1 }
  0xe6   : > { %3226 = vmatprep.subr.bf16.mxu0 %v3505_v1 }
  0xe7   : > { %3063 = vmatmul.mubr.bf16.vlgmr.msra.gmra.mrb[0].mxu1 %v952_v53 }
  0xe8   : > { %3067 = vmatpush3.bf16.msra.mxu1 %v3459_v54  ;;  %3223 = vmatmul.mubr.bf16.vlgmr.msra.gmra.mrb[0].mxu0 %v1940_v55 }
  0xe9   : > { %3227 = vmatpush3.bf16.msra.mxu0 %v3462_v56  ;;  %3068 = vmatprep.subr.bf16.mxu1 %v3505_v1 }
  0xea   : > { %3228 = vmatprep.subr.bf16.mxu0 %v3505_v1  ;;  %3082 = vmatprep.mubr.msk.bf16.mxu1 %vm3506_vm0, %v3505_v1 }
  0xeb   : > { %3242 = vmatprep.mubr.msk.bf16.mxu0 %vm3506_vm0, %v3505_v1 }
  0xec   : > { %3069 = vmatpush3.bf16.msra.mxu1 %v3463_v57 }
  0xed   : > { %3229 = vmatpush3.bf16.msra.mxu0 %v3464_v58  ;;  %3070 = vmatprep.subr.bf16.mxu1 %v3505_v1 }
  0xee   : > { %3230 = vmatprep.subr.bf16.mxu0 %v3505_v1 }
  0xf0   : > { %3071 = vmatpush3.bf16.msra.mxu1 %v3465_v59 }
  0xf1   : > { %3231 = vmatpush3.bf16.msra.mxu0 %v3466_v60  ;;  %3072 = vmatprep.subr.bf16.mxu1 %v3505_v1 }
  0xf2   : > { %3232 = vmatprep.subr.bf16.mxu0 %v3505_v1 }
  0xf4   : > { %3073 = vmatpush3.bf16.msra.mxu1 %v3467_v61 }
  0xf5   : > { %3233 = vmatpush3.bf16.msra.mxu0 %v3468_v62  ;;  %3074 = vmatprep.subr.bf16.mxu1 %v3505_v1 }
  0xf6   : > { %3234 = vmatprep.subr.bf16.mxu0 %v3505_v1 }
  0xf8   : > { %3075 = vmatpush3.bf16.msra.mxu1 %v3469_v0 }
  0xf9   : > { %3235 = vmatpush3.bf16.msra.mxu0 %v3470_v2  ;;  %3076 = vmatprep.subr.bf16.mxu1 %v3505_v1 }
  0xfa   : > { %3236 = vmatprep.subr.bf16.mxu0 %v3505_v1 }
  0xfc   : > { %3077 = vmatpush3.bf16.msra.mxu1 %v3471_v5 }
  0xfd   : > { %3237 = vmatpush3.bf16.msra.mxu0 %v3472_v6  ;;  %3078 = vmatprep.subr.bf16.mxu1 %v3505_v1 }
  0xfe   : > { %3238 = vmatprep.subr.bf16.mxu0 %v3505_v1 }
 0x100   : > { %3079 = vmatpush3.bf16.msra.mxu1 %v3473_v11 }
 0x101   : > { %3239 = vmatpush3.bf16.msra.mxu0 %v3474_v12  ;;  %3080 = vmatprep.subr.bf16.mxu1 %v3505_v1 }
 0x102   : > { %3240 = vmatprep.subr.bf16.mxu0 %v3505_v1 }
 0x104   : > { %3081 = vmatpush3.bf16.msra.mxu1 %v3475_v19 }
 0x105   : > { %3241 = vmatpush3.bf16.msra.mxu0 %v3476_v20 }
 0x107   : > { %3083 = vmatmul.mubr.bf16.vlgmr.msra.gmra.mrb[0].mxu1 %v1072_v23 }
 0x108   : > { %3243 = vmatmul.mubr.bf16.vlgmr.msra.gmra.mrb[0].mxu0 %v2073_v24 }
 0x1da   : > { %v1156_v29 = vpop.f32.mrb[0].mxu1 }
 0x1db   : > { %v2157_v31 = vpop.f32.mrb[0].mxu0  ;;  %v3084_v16 = vpop.f32.mrb[1].mxu1 }
 0x1dc   : > { %v3246_v32 = vadd.f32 %v2157_v31, %v1156_v29  ;;  %v3244_v33 = vpop.f32.mrb[1].mxu0  ;;  %v1159_v34 = vpop.f32.mrb[2].mxu1 }
 0x1dd   : > { %v2160_v35 = vpop.f32.mrb[2].mxu0  ;;  %v3085_v36 = vpop.f32.mrb[3].mxu1 }
 0x1de   : > { %v3247_v38 = vadd.f32 %v2160_v35, %v1159_v34  ;;  %v3245_v39 = vpop.f32.mrb[3].mxu0  ;;  %v2199_v41 = vsel %vm4145_vm3, %v3246_v32, 0.0 }
 0x1e0   : > { %v2200_v40 = vsel %vm4141_vm2, %v3247_v38, 0.0 }
 0x1e1   : > { %v2202_v42 = vsel %vm2201_vm4, %v2200_v40, 0.0 }
 0x1e2   : > { %v2203_v43 = vadd.f32 %v2202_v42, %v2199_v41 }
 0x1e4   : > { %v2204_v44 = vrot.slane %v2203_v43, 4 }
 0x1e6   : > { %v2205_v45 = vadd.f32 %v2204_v44, %v2203_v43 }
 0x1e8   : > { %v2206_v46 = vrot.slane %v2205_v45, 2 }
 0x1ea   : > { %v2207_v47 = vadd.f32 %v2206_v46, %v2205_v45 }
 0x1ec   : > { %v2208_v48 = vrot.slane %v2207_v47, 1 }
 0x1ee   : > { %v2209_v49 = vadd.f32 %v2208_v48, %v2207_v47 }
 0x1f0   : > { %v2210_v50 = vmul.f32 0.11111111, %v2209_v49 }
 0x1f2   : > { %v2211_v51 = vsub.f32 %v3246_v32, %v2210_v50  ;;  %v2212_v52 = vsub.f32 %v3247_v38, %v2210_v50 }
 0x1f4   : > { %v2213_v53 = vmul.f32 %v2211_v51, %v2211_v51  ;;  %v2214_v54 = vmul.f32 %v2212_v52, %v2212_v52 }
 0x1f6   : > { %v2215_v55 = vsel %vm4145_vm3, %v2213_v53, 0.0  ;;  %v2216_v56 = vsel %vm4141_vm2, %v2214_v54, 0.0 }
 0x1f7   : > { %v2217_v57 = vsel %vm2201_vm4, %v2216_v56, 0.0 }
 0x1f8   : > { %v2218_v58 = vadd.f32 %v2217_v57, %v2215_v55 }
 0x1fa   : > { %v2219_v59 = vrot.slane %v2218_v58, 4 }
 0x1fc   : > { %v2220_v60 = vadd.f32 %v2219_v59, %v2218_v58 }
 0x1fe   : > { %v2221_v61 = vrot.slane %v2220_v60, 2 }
 0x200   : > { %v2222_v62 = vadd.f32 %v2221_v61, %v2220_v60 }
 0x202   : > { %v2223_v63 = vrot.slane %v2222_v62, 1 }
 0x204   : > { %v2224_v0 = vadd.f32 %v2223_v63, %v2222_v62 }
 0x206   : > { %v2225_v2 = vmul.f32 0.11111111, %v2224_v0 }
 0x208   : > { %v2226_v3 = vadd.f32 1e-05, %v2225_v2 }
 0x20a   : > { %3479 = vrsqrt.f32 %v2226_v3 }
 0x214   : > { %v3480_v4 = vpop.eup %3479 }
 0x215   : > { %v2228_v5 = vmul.f32 %v3480_v4, %v2211_v51  ;;  %v2229_v6 = vmul.f32 %v3480_v4, %v2212_v52 }
 0x217   : > { %vm2230_vm5 = vcmp.ge.f32.partialorder %v2228_v5, 0.0  ;;  %vm2231_vm6 = vcmp.ge.f32.partialorder %v2229_v6, 0.0  ;;  %v2232_v7 = vmul.f32 0.2, %v2228_v5  ;;  %v2233_v8 = vmul.f32 0.2, %v2229_v6 }
 0x219   : > { %v2234_v9 = vsel %vm2230_vm5, %v2228_v5, %v2232_v7  ;;  %v2235_v10 = vsel %vm2231_vm6, %v2229_v6, %v2233_v8 }
 0x21a   : > { %v2236_v11 = vsel %vm4145_vm3, %v2234_v9, 0.0  ;;  %v2237_v12 = vsel %vm4141_vm2, %v2235_v10, 0.0 }
 0x21b   : > { %v2780_v13 = vpack.c.bf16 %v2236_v11, %v2236_v11  ;;  %v2781_v14 = vpack.c.bf16 %v2237_v12, %v2237_v12 }
 0x21d   : > { %2246 = vst [vmem:[%s221_s23] sm:$0xf] %v2780_v13  ;;  %2247 = vst [vmem:[%s221_s23 + $0x4] sm:$0x3] %v2781_v14 }
 0x21e PF: > { %s13_s14 = sadd.s32 1, %s3503_s14   ;;  %s4184_s12 = smov %s3499_s13 }
 0x21f   : > { %p10_p5 = scmp.ge.s32.totalorder %s13_s14, 4   ;;  %s4185_s13 = smov %s4187_s2 }
 0x221   :  { %12 = sbr.rel (!%p10_p5) target bundleno = 2 (0x2), region = 86 }

// kernel: _lambda_.8
= control target key start
LH: loop header
LB: loop body
LE: loop exit
PB: predicated region body
PF: predicated region fallthrough
CT: control target
= control target key end

     0   :  { %s3897_s12 = smov 0   ;;  %s3899_s13 = smov 0   ;;  %s4600_s0 = inlined_call_operand.vmem [shape: bf16[2,1,56,128], index: 0, kind: input, shape index: {}]   ;;  %s4601_s1 = inlined_call_operand.vmem [shape: bf16[16,128,128], index: 1, kind: input, shape index: {}]   ;;  %s4602_s2 = inlined_call_operand.vmem [shape: f32[1,128], index: 2, kind: input, shape index: {}]   ;;  %s4603_s3 = inlined_call_operand.vmem [shape: bf16[2,28,128], index: 3, kind: output, shape index: {}]  }
   0x1   :  { %s3901_s14 = smov 0  }
   0x2 LB: > { %s22_s2 = sadd.s32 1, %s3870_s13  ;;  %p2708_p0 = scmp.ge.s32.totalorder %s3874_s14, 1  ;;  %s3874_s14 = sphi %s3901_s14, %s13_s14   ;;  %s3870_s13 = sphi %s3899_s13, %s4621_s13   ;;  %s3866_s12 = sphi %s3897_s12, %s4620_s12  }
   0x3   : > { %p23_p1 = scmp.ge.s32.totalorder %s22_s2, 2  ;;  %p168_p2 = scmp.lt.s32.totalorder %s3874_s14, 3 }
   0x5   : > { %s4623_s2 = smov (%p23_p1, %s22_s2), 0  ;;  %p169_p3 = pnand %p2708_p0, %p168_p2 }
   0x6   : > { %v3696_v0 = vld [vmem:[%s4601_s1 + $0x40] sm:$0xff] (!%p169_p3)   ;;  %p202_p4 = scmp.lt.s32.totalorder (!%p169_p3), %s3866_s12, 1  ;;  %v3698_v2 = vld [vmem:[%s4601_s1 + $0x48] sm:$0xff] (!%p169_p3)   ;;  %v3700_v4 = vld [vmem:[%s4601_s1 + $0x50] sm:$0xff] (!%p169_p3)   ;;  %vm271_vm0 = vsmask.f32 (!%p169_p3), 7424 }
   0x7   : > { %172 = sbr.rel (%p169_p3) target bundleno = 551 (0x227), region = 32  ;;  %v3697_v1 = vld [vmem:[%s4601_s1 + $0x200] sm:$0xff] (!%p169_p3)   ;;  %3282 = vmatprep.subr.bf16.mxu1 (!%p169_p3), %v3696_v0  ;;  %v3699_v3 = vld [vmem:[%s4601_s1 + $0x208] sm:$0xff] (!%p169_p3)   ;;  %v3701_v5 = vld [vmem:[%s4601_s1 + $0x210] sm:$0xff] (!%p169_p3)   ;;  %vm1346_vm1 = vcmask (!%p169_p3), 1044480   ;;  %vm509_vm3 = vcmask (!%p169_p3), 1046528  }
   0x8   : > { %3442 = vmatprep.subr.bf16.mxu0 (!%p169_p3), %v3697_v1  ;;  %3283 = vmatpush3.bf16.msra.mxu1 (!%p169_p3), %v3696_v0  ;;  %v3702_v6 = vld [vmem:[%s4601_s1 + $0x58] sm:$0xff] (!%p169_p3)   ;;  %v3704_v8 = vld [vmem:[%s4601_s1 + $0x60] sm:$0xff] (!%p169_p3)   ;;  %v3706_v10 = vld [vmem:[%s4601_s1 + $0x68] sm:$0xff] (!%p169_p3)   ;;  %vm793_vm2 = vsmask.f32 (!%p169_p3), 4352 }
   0x9   : > { %3443 = vmatpush3.bf16.msra.mxu0 (!%p169_p3), %v3697_v1  ;;  %3284 = vmatprep.subr.bf16.mxu1 (!%p169_p3), %v3698_v2  ;;  %v3703_v7 = vld [vmem:[%s4601_s1 + $0x218] sm:$0xff] (!%p169_p3)   ;;  %v3705_v9 = vld [vmem:[%s4601_s1 + $0x220] sm:$0xff] (!%p169_p3)   ;;  %v3707_v14 = vld [vmem:[%s4601_s1 + $0x228] sm:$0xff] (!%p169_p3)   ;;  %vm637_vm4 = vsmask.f32 (!%p169_p3), 6400 }
   0xa   : > { %3444 = vmatprep.subr.bf16.mxu0 (!%p169_p3), %v3699_v3  ;;  %v3708_v23 = vld [vmem:[%s4601_s1 + $0x70] sm:$0xff] (!%p169_p3)   ;;  %v3710_v33 = vld [vmem:[%s4601_s1 + $0x78] sm:$0xff] (!%p169_p3)   ;;  %v3714_v42 = vld [vmem:[%s4601_s1] sm:$0xff] (!%p169_p3)   ;;  %vm1901_vm5 = vsmask.f32 (!%p169_p3), 5376 }
   0xb   : > { %v3709_v27 = vld [vmem:[%s4601_s1 + $0x230] sm:$0xff] (!%p169_p3)   ;;  %v3711_v36 = vld [vmem:[%s4601_s1 + $0x238] sm:$0xff] (!%p169_p3)   ;;  %v3717_v44 = vld [vmem:[%s4601_s1 + $0x240] sm:$0xff] (!%p169_p3)  }
   0xc   : > { %3285 = vmatpush3.bf16.msra.mxu1 (!%p169_p3), %v3698_v2  ;;  %v3719_v51 = vld [vmem:[%s4601_s1 + $0x8] sm:$0xff] (!%p169_p3)   ;;  %v3721_v57 = vld [vmem:[%s4601_s1 + $0x10] sm:$0xff] (!%p169_p3)   ;;  %v3723_v60 = vld [vmem:[%s4601_s1 + $0x18] sm:$0xff] (!%p169_p3)  }
   0xd   : > { %3445 = vmatpush3.bf16.msra.mxu0 (!%p169_p3), %v3699_v3  ;;  %3286 = vmatprep.subr.bf16.mxu1 (!%p169_p3), %v3700_v4  ;;  %v3720_v53 = vld [vmem:[%s4601_s1 + $0x248] sm:$0xff] (!%p169_p3)   ;;  %v3722_v58 = vld [vmem:[%s4601_s1 + $0x250] sm:$0xff] (!%p169_p3)   ;;  %v3724_v61 = vld [vmem:[%s4601_s1 + $0x258] sm:$0xff] (!%p169_p3)  }
   0xe   : > { %s4625_s12 = smov (!%p202_p4, %s3866_s12), 1  ;;  %3446 = vmatprep.subr.bf16.mxu0 %v3701_v5  ;;  %v3725_v62 = vld [vmem:[%s4601_s1 + $0x20] sm:$0xff]   ;;  %v3727_v1 = vld [vmem:[%s4601_s1 + $0x28] sm:$0xff]  }
   0xf   : > { %s3662_s4 = smul.u32 28, %s4625_s12  ;;  %v3726_v63 = vld [vmem:[%s4601_s1 + $0x260] sm:$0xff]   ;;  %v3728_v3 = vld [vmem:[%s4601_s1 + $0x268] sm:$0xff]   ;;  %s3112_s19 = sshll.u32 %s4625_s12, 4 }
  0x10   : > { %3287 = vmatpush3.bf16.msra.mxu1 %v3700_v4  ;;  %v3729_v4 = vld [vmem:[%s4601_s1 + $0x30] sm:$0xff]   ;;  %s221_s22 = scalar_lea.vmem %s4603_s3, %s3112_s19 }
  0x11   : > { %3447 = vmatpush3.bf16.msra.mxu0 %v3701_v5  ;;  %3288 = vmatprep.subr.bf16.mxu1 %v3702_v6  ;;  %s3951_s11 = scalar_lea.vmem %s4600_s0, %s3662_s4 }
  0x12   : > { %3448 = vmatprep.subr.bf16.mxu0 %v3703_v7  ;;  %v223_v11 = vld [vmem:[%s3951_s11] sm:$0xf]  ;;  %v3958_v12 = vld [vmem:[%s3951_s11 + $0x4] sm:$0xf]  ;;  %v3961_v13 = vld [vmem:[%s3951_s11 + $0x8] sm:$0xf] }
  0x13   : > { %v243_v15 = vld [vmem:[%s3951_s11 + $0xc] sm:$0x7]  ;;  %v3968_v16 = vcombine.low %v223_v11, %v3958_v12  ;;  %v1311_v18 = vld [vmem:[%s3951_s11 + $0x4] sm:$0x8]  ;;  %v3977_v21 = vld [vmem:[%s3951_s11 + $0x8] sm:$0xf] }
  0x14   : > { %3289 = vmatpush3.bf16.msra.mxu1 %v3702_v6  ;;  %v3971_v17 = vcombine.low %v3961_v13, %v243_v15  ;;  %v3980_v22 = vld [vmem:[%s3951_s11 + $0xc] sm:$0xf]  ;;  %v3987_v25 = vld [vmem:[%s3951_s11 + $0x10] sm:$0xf]  ;;  %v2916_v26 = vcombine.low %v1311_v18, %v3977_v21  ;;  %v4042_v0 = vld [vmem:[%s3951_s11 + $0x14] sm:$0x3] }
  0x15   : > { %3449 = vmatpush3.bf16.msra.mxu0 %v3703_v7  ;;  %3290 = vmatprep.subr.bf16.mxu1 %v3704_v8  ;;  %v273_v19 = vshrl.u32 %v3968_v16, 16  ;;  %v275_v20 = vshll.u32 %v3968_v16, 16  ;;  %v2917_v29 = vcombine.low %v3980_v22, %v3987_v25  ;;  %v3718_v32 = vld [vmem:[%s3951_s11 + $0x14] ss:$0 sps:$4 sm:$0x11]   ;;  %v2943_v2 = vcombine.low %v4042_v0, %v4042_v0  ;;  %v3733_v18 = vld [vmem:[%s4601_s1 + $0x80] sm:$0xff]  }
  0x16   : > { %3450 = vmatprep.subr.bf16.mxu0 %v3705_v9  ;;  %v280_v24 = vshll.u32 %v3971_v17, 16  ;;  %v1347_v31 = vrot.slane %v2916_v26, 3  ;;  %v284_v39 = vshrl.u32 %v3971_v17, 16  ;;  %v1477_v40 = vshrl.u32 %v2916_v26, 16  ;;  %v3730_v7 = vld [vmem:[%s4601_s1 + $0x270] sm:$0xff]  }
  0x17   : > { %v277_v28 = vrot.slane %v275_v20, 1  ;;  %v1348_v35 = vrot.slane %v2917_v29, 3  ;;  %v1480_v41 = vshll.u32 %v2916_v26, 16  ;;  %v1350_v43 = vrot.slane %v3718_v32, 3  ;;  %v3734_v20 = vld [vmem:[%s4601_s1 + $0x280] sm:$0xff]   ;;  %v3740_v32 = vld [vmem:[%s4601_s1 + $0x290] sm:$0xff]  }
  0x18   : > { %3291 = vmatpush3.bf16.msra.mxu1 %v3704_v8  ;;  %v282_v30 = vrot.slane %v280_v24, 1  ;;  %v1479_v45 = vrot.slane %v1477_v40, 3  ;;  %v1485_v48 = vshrl.u32 %v2917_v29, 16  ;;  %v1488_v49 = vshll.u32 %v2917_v29, 16  ;;  %v3731_v8 = vld [vmem:[%s4601_s1 + $0x38] sm:$0xff]   ;;  %v3748_v40 = vld [vmem:[%s4601_s1 + $0x2b0] sm:$0xff]  }
  0x19   : > { %3451 = vmatpush3.bf16.msra.mxu0 %v3705_v9  ;;  %3292 = vmatprep.subr.bf16.mxu1 %v3706_v10  ;;  %v278_v34 = vor.u32 %v277_v28, %v273_v19  ;;  %v1349_v38 = vsel %vm1346_vm1, %v1347_v31, %v1348_v35  ;;  %v1482_v47 = vrot.slane %v1480_v41, 4  ;;  %v1351_v50 = vsel %vm1346_vm1, %v1348_v35, %v1350_v43  ;;  %v488_v9 = vld [vmem:[%s3951_s11] sm:$0xe]  ;;  %v3738_v28 = vld [vmem:[%s4601_s1 + $0x288] sm:$0xff]   ;;  %v3739_v31 = vld [vmem:[%s4601_s1 + $0x90] sm:$0xff]  }
  0x1a   : > { %3452 = vmatprep.subr.bf16.mxu0 %v3707_v14  ;;  %3458 = vmatprep.mubr.bf16.mxu0 %v1349_v38  ;;  %v286_v46 = vor.u32 %v284_v39, %v282_v30  ;;  %v1487_v52 = vrot.slane %v1485_v48, 3  ;;  %v1490_v54 = vrot.slane %v1488_v49, 4  ;;  %v1494_v5 = vshrl.u32 %v2943_v2, 16  ;;  %v616_v35 = vld [vmem:[%s3951_s11 + $0xc] sm:$0xf]  ;;  %v3747_v38 = vld [vmem:[%s4601_s1 + $0xb0] sm:$0xff]  }
  0x1b   : > { %v283_v37 = vsel %vm271_vm0, %v278_v34, %v282_v30  ;;  %v1483_v55 = vor.u32 %v1482_v47, %v1479_v45  ;;  %v1497_v6 = vshll.u32 %v2943_v2, 16  ;;  %v4066_v15 = vcombine.low %v488_v9, %v3958_v12  ;;  %v3744_v34 = vld [vmem:[%s4601_s1 + $0x2a0] sm:$0xff]   ;;  %v1727_v41 = vld [vmem:[%s3951_s11 + $0x14] sm:$0x7]  ;;  %v3749_v47 = vld [vmem:[%s4601_s1 + $0xb8] sm:$0xff]  }
  0x1c   : > { %3293 = vmatpush3.bf16.msra.mxu1 %v3706_v10  ;;  %3298 = vmatprep.mubr.bf16.mxu1 %v283_v37  ;;  %v4018_v56 = vor.u32 %v1490_v54, %v1487_v52  ;;  %v1496_v10 = vrot.slane %v1494_v5, 3  ;;  %v511_v12 = vrot.slane %v3971_v17, 1  ;;  %v4091_v30 = vcombine.low %v3977_v21, %v3980_v22  ;;  %v3741_v21 = vld [vmem:[%s4601_s1 + $0x98] sm:$0xff]   ;;  %v3746_v37 = vld [vmem:[%s4601_s1 + $0x2a8] sm:$0xff]   ;;  %v4160_v2 = vld [vmem:[%s3951_s11 + $0x10] sm:$0xf] }
  0x1d   : > { %3453 = vmatpush3.bf16.msra.mxu0 %v3707_v14  ;;  %3294 = vmatprep.subr.bf16.mxu1 %v3708_v23  ;;  %v1499_v11 = vrot.slane %v1497_v6, 4  ;;  %v3732_v14 = vld [vmem:[%s4601_s1 + $0x278] sm:$0xff]   ;;  %v510_v24 = vrot.slane %v4066_v15, 1  ;;  %v2788_v39 = vcombine.low %v3961_v13, %v616_v35  ;;  %v642_v43 = vshll.u32 %v4066_v15, 16  ;;  %v3759_v17 = vld [vmem:[%s4601_s1 + $0x2d0] sm:$0xff]  }
  0x1e   : > { %3454 = vmatprep.subr.bf16.mxu0 %v3709_v27  ;;  %v1492_v59 = vsel %vm793_vm2, %v1483_v55, %v4018_v56  ;;  %v3742_v22 = vld [vmem:[%s4601_s1 + $0x298] sm:$0xff]  }
  0x1f   : > { %v1500_v19 = vor.u32 %v1499_v11, %v1496_v10  ;;  %v512_v29 = vsel %vm509_vm3, %v510_v24, %v511_v12  ;;  %v650_v45 = vshll.u32 %v2788_v39, 16  ;;  %v3750_v48 = vld [vmem:[%s4601_s1 + $0x2b8] sm:$0xff]   ;;  %v3762_v10 = vld [vmem:[%s4601_s1 + $0xe0] sm:$0xff]   ;;  %v1866_v24 = vld [vmem:[%s3951_s11 + $0x8] sm:$0xc] }
  0x20   : > { %3295 = vmatpush3.bf16.msra.mxu1 %v3708_v23  ;;  %v3760_v6 = vld [vmem:[%s4601_s1 + $0xd8] sm:$0xff]  }
  0x21   : > { %3455 = vmatpush3.bf16.msra.mxu0 %v3709_v27  ;;  %3296 = vmatprep.subr.bf16.mxu1 %v3710_v33  ;;  %v1501_v26 = vsel %vm793_vm2, %v4018_v56, %v1500_v19  ;;  %v3737_v27 = vld [vmem:[%s4601_s1 + $0x88] sm:$0xff]   ;;  %v652_v52 = vrot.slane %v650_v45, 2  ;;  %v3752_v56 = vld [vmem:[%s4601_s1 + $0xc0] sm:$0xff]   ;;  %v3768_v35 = vld [vmem:[%s4601_s1 + $0xf8] sm:$0xff]  }
  0x22   : > { %3456 = vmatprep.subr.bf16.mxu0 %v3711_v36  ;;  %v4199_v19 = vld [vmem:[%s3951_s11 + $0x8] sm:$0xf] }
  0x24   : > { %3297 = vmatpush3.bf16.msra.mxu1 %v3710_v33  ;;  %v3743_v33 = vld [vmem:[%s4601_s1 + $0xa0] sm:$0xff]  }
  0x25   : > { %3457 = vmatpush3.bf16.msra.mxu0 %v3711_v36  ;;  %3302 = vmatprep.subr.bf16.mxu1 %v3714_v42  ;;  %v3745_v36 = vld [vmem:[%s4601_s1 + $0xa8] sm:$0xff]  }
  0x26   : > { %3462 = vmatprep.subr.bf16.mxu0 %v3717_v44 }
  0x27   : > { %3299 = vmatmul.mubr.bf16.vlgmr.msra.gmra.mrb[0].mxu1 %v286_v46  ;;  %v1751_v46 = vshll.u32 %v4091_v30, 16 }
  0x28   : > { %3303 = vmatpush3.bf16.msra.mxu1 %v3714_v42  ;;  %3459 = vmatmul.mubr.bf16.vlgmr.msra.gmra.mrb[0].mxu0 %v1351_v50  ;;  %v639_v42 = vshrl.u32 %v4066_v15, 16  ;;  %v644_v50 = vrot.slane %v642_v43, 2  ;;  %v758_v15 = vld [vmem:[%s3951_s11] sm:$0x8] }
  0x29   : > { %3463 = vmatpush3.bf16.msra.mxu0 %v3717_v44  ;;  %3304 = vmatprep.subr.bf16.mxu1 %v3719_v51  ;;  %v647_v44 = vshrl.u32 %v2788_v39, 16  ;;  %v1753_v54 = vrot.slane %v1751_v46, 1 }
  0x2a   : > { %3464 = vmatprep.subr.bf16.mxu0 %v3720_v53  ;;  %3318 = vmatprep.mubr.bf16.mxu1 %v3968_v16  ;;  %v226_v16 = vld [vmem:[%s3951_s11 + $0xc] sm:$0x3]  ;;  %v641_v49 = vrot.slane %v639_v42, 1 }
  0x2b   : > { %3478 = vmatprep.mubr.bf16.mxu0 %v1492_v59  ;;  %v2738_v23 = vcombine.low %v3961_v13, %v226_v16  ;;  %v4131_v13 = vcombine.low %v3987_v25, %v1727_v41 }
  0x2c   : > { %3305 = vmatpush3.bf16.msra.mxu1 %v3719_v51  ;;  %v649_v51 = vrot.slane %v647_v44, 1 }
  0x2d   : > { %3465 = vmatpush3.bf16.msra.mxu0 %v3720_v53  ;;  %3306 = vmatprep.subr.bf16.mxu1 %v3721_v57  ;;  %v1749_v53 = vshrl.u32 %v4091_v30, 16  ;;  %v1756_v55 = vshll.u32 %v4131_v13, 16  ;;  %v1760_v39 = vshrl.u32 %v4131_v13, 16  ;;  %v3773_v13 = vld [vmem:[%s4601_s1 + $0x300] sm:$0xff]  }
  0x2e   : > { %3466 = vmatprep.subr.bf16.mxu0 %v3722_v58  ;;  %v4147_v59 = vor.u32 %v652_v52, %v649_v51  ;;  %v3774_v52 = vld [vmem:[%s4601_s1 + $0x108] sm:$0xff]  }
  0x30   : > { %3307 = vmatpush3.bf16.msra.mxu1 %v3721_v57  ;;  %v3754_v57 = vld [vmem:[%s4601_s1 + $0x2c0] sm:$0xff]  }
  0x31   : > { %3467 = vmatpush3.bf16.msra.mxu0 %v3722_v58  ;;  %3308 = vmatprep.subr.bf16.mxu1 %v3723_v60  ;;  %v645_v58 = vor.u32 %v644_v50, %v641_v49 }
  0x32   : > { %3468 = vmatprep.subr.bf16.mxu0 %v3724_v61 }
  0x34   : > { %3309 = vmatpush3.bf16.msra.mxu1 %v3723_v60  ;;  %v2969_v60 = vcombine.low %v3987_v25, %v4042_v0  ;;  %v654_v25 = vsel %vm637_vm4, %v645_v58, %v4147_v59 }
  0x35   : > { %3469 = vmatpush3.bf16.msra.mxu0 %v3724_v61  ;;  %3310 = vmatprep.subr.bf16.mxu1 %v3725_v62  ;;  %v3756_v61 = vld [vmem:[%s4601_s1 + $0xc8] sm:$0xff]  }
  0x36   : > { %3470 = vmatprep.subr.bf16.mxu0 %v3726_v63 }
  0x38   : > { %3311 = vmatpush3.bf16.msra.mxu1 %v3725_v62  ;;  %v3757_v62 = vld [vmem:[%s4601_s1 + $0x2c8] sm:$0xff]  }
  0x39   : > { %3471 = vmatpush3.bf16.msra.mxu0 %v3726_v63  ;;  %3312 = vmatprep.subr.bf16.mxu1 %v3727_v1  ;;  %v1754_v63 = vor.u32 %v1753_v54, %v1749_v53 }
  0x3a   : > { %3472 = vmatprep.subr.bf16.mxu0 %v3728_v3 }
  0x3c   : > { %3313 = vmatpush3.bf16.msra.mxu1 %v3727_v1  ;;  %v4157_v1 = vrot.slane %v1756_v55, 1 }
  0x3d   : > { %3473 = vmatpush3.bf16.msra.mxu0 %v3728_v3  ;;  %3314 = vmatprep.subr.bf16.mxu1 %v3729_v4  ;;  %v4163_v3 = vld [vmem:[%s3951_s11 + $0x14] sm:$0xf] }
  0x3e   : > { %3474 = vmatprep.subr.bf16.mxu0 %v3730_v7  ;;  %v1759_v0 = vsel %vm271_vm0, %v1754_v63, %v4157_v1  ;;  %v4175_v5 = vcombine.low %v4160_v2, %v4163_v3  ;;  %v1762_v51 = vor.u32 %v1760_v39, %v4157_v1  ;;  %v3780_v63 = vld [vmem:[%s4601_s1 + $0x120] sm:$0xff]   ;;  %v1045_v1 = vld [vmem:[%s3951_s11 + $0x10] sm:$0x7] }
  0x40   : > { %3315 = vmatpush3.bf16.msra.mxu1 %v3729_v4  ;;  %v3758_v4 = vld [vmem:[%s4601_s1 + $0xd0] sm:$0xff]   ;;  %v1914_v9 = vshll.u32 %v4175_v5, 16  ;;  %v2049_v39 = vrot.slane %v4175_v5, 3 }
  0x41   : > { %3475 = vmatpush3.bf16.msra.mxu0 %v3730_v7  ;;  %3316 = vmatprep.subr.bf16.mxu1 %v3731_v8  ;;  %v1911_v7 = vshrl.u32 %v4175_v5, 16 }
  0x42   : > { %3476 = vmatprep.subr.bf16.mxu0 %v3732_v14  ;;  %v2186_v16 = vrot.slane %v1914_v9, 4 }
  0x43   : > { %v2185_v11 = vrot.slane %v1911_v7, 3  ;;  %v1913_v46 = vrot.slane %v1911_v7, 2  ;;  %v3782_v7 = vld [vmem:[%s4601_s1 + $0x128] sm:$0xff]  }
  0x44   : > { %3317 = vmatpush3.bf16.msra.mxu1 %v3731_v8  ;;  %v3761_v8 = vld [vmem:[%s4601_s1 + $0x2d8] sm:$0xff]  }
  0x45   : > { %3477 = vmatpush3.bf16.msra.mxu0 %v3732_v14  ;;  %3322 = vmatprep.subr.bf16.mxu1 %v3733_v18  ;;  %v3763_v14 = vld [vmem:[%s4601_s1 + $0x2e0] sm:$0xff]  }
  0x46   : > { %3482 = vmatprep.subr.bf16.mxu0 %v3734_v20 }
  0x47   : > { %3319 = vmatmul.mubr.bf16.vlgmr.msra.gmra.mrb[0].mxu1 %v2738_v23  ;;  %v4204_v23 = vld [vmem:[%s3951_s11 + $0xc] sm:$0xf] }
  0x48   : > { %3323 = vmatpush3.bf16.msra.mxu1 %v3733_v18  ;;  %3479 = vmatmul.mubr.bf16.vlgmr.msra.gmra.mrb[0].mxu0 %v1501_v26  ;;  %v4196_v18 = vld [vmem:[%s3951_s11 + $0x4] sm:$0xf]  ;;  %v3764_v26 = vld [vmem:[%s4601_s1 + $0xe8] sm:$0xff]  }
  0x49   : > { %3483 = vmatpush3.bf16.msra.mxu0 %v3734_v20  ;;  %3324 = vmatprep.subr.bf16.mxu1 %v3737_v27  ;;  %v4201_v20 = vor.u32 %v2186_v16, %v2185_v11  ;;  %v3784_v16 = vld [vmem:[%s4601_s1 + $0x130] sm:$0xff]  }
  0x4a   : > { %3484 = vmatprep.subr.bf16.mxu0 %v3738_v28  ;;  %3338 = vmatprep.mubr.bf16.mxu1 %v512_v29  ;;  %v2814_v29 = vcombine.low %v4199_v19, %v4204_v23 }
  0x4b   : > { %3498 = vmatprep.mubr.bf16.mxu0 %v4091_v30  ;;  %v3766_v30 = vld [vmem:[%s4601_s1 + $0xf0] sm:$0xff]  }
  0x4c   : > { %3325 = vmatpush3.bf16.msra.mxu1 %v3737_v27  ;;  %v2813_v27 = vcombine.low %v758_v15, %v4196_v18 }
  0x4d   : > { %3485 = vmatpush3.bf16.msra.mxu0 %v3738_v28  ;;  %3326 = vmatprep.subr.bf16.mxu1 %v3739_v31  ;;  %v3765_v28 = vld [vmem:[%s4601_s1 + $0x2e8] sm:$0xff]  }
  0x4e   : > { %3486 = vmatprep.subr.bf16.mxu0 %v3740_v32 }
  0x50   : > { %3327 = vmatpush3.bf16.msra.mxu1 %v3739_v31 }
  0x51   : > { %3487 = vmatpush3.bf16.msra.mxu0 %v3740_v32  ;;  %3328 = vmatprep.subr.bf16.mxu1 %v3741_v21  ;;  %v3767_v32 = vld [vmem:[%s4601_s1 + $0x2f0] sm:$0xff]  }
  0x52   : > { %3488 = vmatprep.subr.bf16.mxu0 %v3742_v22 }
  0x54   : > { %3329 = vmatpush3.bf16.msra.mxu1 %v3741_v21  ;;  %v795_v21 = vshrl.u32 %v2813_v27, 16 }
  0x55   : > { %3489 = vmatpush3.bf16.msra.mxu0 %v3742_v22  ;;  %3330 = vmatprep.subr.bf16.mxu1 %v3743_v33  ;;  %v798_v22 = vshll.u32 %v2813_v27, 16  ;;  %v3785_v27 = vld [vmem:[%s4601_s1 + $0x330] sm:$0xff]  }
  0x56   : > { %3490 = vmatprep.subr.bf16.mxu0 %v3744_v34 }
  0x57   : > { %v800_v41 = vrot.slane %v798_v22, 4 }
  0x58   : > { %3331 = vmatpush3.bf16.msra.mxu1 %v3743_v33  ;;  %v803_v33 = vshrl.u32 %v2814_v29, 16 }
  0x59   : > { %3491 = vmatpush3.bf16.msra.mxu0 %v3744_v34  ;;  %3332 = vmatprep.subr.bf16.mxu1 %v3745_v36  ;;  %v806_v34 = vshll.u32 %v2814_v29, 16 }
  0x5a   : > { %3492 = vmatprep.subr.bf16.mxu0 %v3746_v37  ;;  %v805_v42 = vrot.slane %v803_v33, 3 }
  0x5b   : > { %v808_v43 = vrot.slane %v806_v34, 4  ;;  %v3790_v34 = vld [vmem:[%s4601_s1 + $0x140] sm:$0xff]  }
  0x5c   : > { %3333 = vmatpush3.bf16.msra.mxu1 %v3745_v36 }
  0x5d   : > { %3493 = vmatpush3.bf16.msra.mxu0 %v3746_v37  ;;  %3334 = vmatprep.subr.bf16.mxu1 %v3747_v38  ;;  %v4239_v50 = vor.u32 %v808_v43, %v805_v42  ;;  %v3797_v42 = vld [vmem:[%s4601_s1 + $0x348] sm:$0xff]   ;;  %v2840_v43 = vcombine.low %v4196_v18, %v4199_v19  ;;  %v3800_v18 = vld [vmem:[%s4601_s1 + $0x158] sm:$0xff]  }
  0x5e   : > { %3494 = vmatprep.subr.bf16.mxu0 %v3748_v40 }
  0x60   : > { %3335 = vmatpush3.bf16.msra.mxu1 %v3747_v38  ;;  %v3769_v38 = vld [vmem:[%s4601_s1 + $0x2f8] sm:$0xff]  }
  0x61   : > { %3495 = vmatpush3.bf16.msra.mxu0 %v3748_v40  ;;  %3336 = vmatprep.subr.bf16.mxu1 %v3749_v47  ;;  %v797_v40 = vrot.slane %v795_v21, 3  ;;  %v3787_v21 = vld [vmem:[%s4601_s1 + $0x338] sm:$0xff]  }
  0x62   : > { %3496 = vmatprep.subr.bf16.mxu0 %v3750_v48 }
  0x63   : > { %v801_v49 = vor.u32 %v800_v41, %v797_v40  ;;  %v3796_v41 = vld [vmem:[%s4601_s1 + $0x148] sm:$0xff]  }
  0x64   : > { %3337 = vmatpush3.bf16.msra.mxu1 %v3749_v47  ;;  %v1916_v47 = vrot.slane %v1914_v9, 3 }
  0x65   : > { %3497 = vmatpush3.bf16.msra.mxu0 %v3750_v48  ;;  %3342 = vmatprep.subr.bf16.mxu1 %v3752_v56  ;;  %v3771_v48 = vld [vmem:[%s4601_s1 + $0x100] sm:$0xff]  }
  0x66   : > { %3502 = vmatprep.subr.bf16.mxu0 %v3754_v57  ;;  %v4245_v54 = vor.u32 %v1916_v47, %v1913_v46  ;;  %v3799_v46 = vld [vmem:[%s4601_s1 + $0x350] sm:$0xff]   ;;  %v3802_v47 = vld [vmem:[%s4601_s1 + $0x160] sm:$0xff]  }
  0x67   : > { %3339 = vmatmul.mubr.bf16.vlgmr.msra.gmra.mrb[0].mxu1 %v511_v12  ;;  %v4208_v12 = vld [vmem:[%s3951_s11 + $0xc] sm:$0xf] }
  0x68   : > { %3343 = vmatpush3.bf16.msra.mxu1 %v3752_v56  ;;  %3499 = vmatmul.mubr.bf16.vlgmr.msra.gmra.mrb[0].mxu0 %v2969_v60  ;;  %v3019_v31 = vcombine.low %v1866_v24, %v4208_v12  ;;  %v3096_v55 = vcombine.low %v4208_v12, %v4160_v2  ;;  %v3775_v56 = vld [vmem:[%s4601_s1 + $0x308] sm:$0xff]   ;;  %v3776_v60 = vld [vmem:[%s4601_s1 + $0x110] sm:$0xff]   ;;  %v4297_v24 = vld [vmem:[%s3951_s11 + $0x18] ss:$0 sps:$4 sm:$0x11]  }
  0x69   : > { %3503 = vmatpush3.bf16.msra.mxu0 %v3754_v57  ;;  %3344 = vmatprep.subr.bf16.mxu1 %v3756_v61  ;;  %v810_v57 = vsel %vm793_vm2, %v801_v49, %v4239_v50  ;;  %v3805_v49 = vld [vmem:[%s4601_s1 + $0x368] sm:$0xff]   ;;  %v3839_v2 = vld [vmem:[%s4601_s1 + $0x1e0] sm:$0xff]  }
  0x6a   : > { %3504 = vmatprep.subr.bf16.mxu0 %v3757_v62  ;;  %3358 = vmatprep.mubr.bf16.mxu1 %v654_v25  ;;  %v1903_v36 = vshrl.u32 %v3019_v31, 16  ;;  %v1906_v37 = vshll.u32 %v3019_v31, 16  ;;  %v4274_v25 = vld [vmem:[%s3951_s11 + $0x10] sm:$0x3]  ;;  %v1920_v31 = vshll.u32 %v4297_v24, 16 }
  0x6b   : > { %3518 = vmatprep.mubr.bf16.mxu0 %v1759_v0  ;;  %v3781_v0 = vld [vmem:[%s4601_s1 + $0x320] sm:$0xff]  }
  0x6c   : > { %3345 = vmatpush3.bf16.msra.mxu1 %v3756_v61  ;;  %v1905_v44 = vrot.slane %v1903_v36, 2  ;;  %v1908_v45 = vrot.slane %v1906_v37, 3  ;;  %v3778_v61 = vld [vmem:[%s4601_s1 + $0x118] sm:$0xff]   ;;  %v3793_v36 = vld [vmem:[%s4601_s1 + $0x340] sm:$0xff]  }
  0x6d   : > { %3505 = vmatpush3.bf16.msra.mxu0 %v3757_v62  ;;  %3346 = vmatprep.subr.bf16.mxu1 %v3758_v4  ;;  %v3779_v62 = vld [vmem:[%s4601_s1 + $0x318] sm:$0xff]  }
  0x6e   : > { %3506 = vmatprep.subr.bf16.mxu0 %v3759_v17  ;;  %v1909_v53 = vor.u32 %v1908_v45, %v1905_v44  ;;  %v3798_v45 = vld [vmem:[%s4601_s1 + $0x150] sm:$0xff]  }
  0x70   : > { %3347 = vmatpush3.bf16.msra.mxu1 %v3758_v4  ;;  %v1918_v58 = vsel %vm1901_vm5, %v1909_v53, %v4245_v54  ;;  %v4280_v4 = vcombine.low %v4204_v23, %v1045_v1  ;;  %v2051_v1 = vrot.slane %v4297_v24, 3  ;;  %v3820_v24 = vld [vmem:[%s4601_s1 + $0x398] sm:$0xff]  }
  0x71   : > { %3507 = vmatpush3.bf16.msra.mxu0 %v3759_v17  ;;  %3348 = vmatprep.subr.bf16.mxu1 %v3760_v6  ;;  %v2815_v17 = vcombine.low %v4274_v25, %v4274_v25 }
  0x72   : > { %3508 = vmatprep.subr.bf16.mxu0 %v3761_v8  ;;  %v1206_v9 = vrot.slane %v4280_v4, 1 }
  0x73   : > { %v815_v15 = vshll.u32 %v2815_v17, 16 }
  0x74   : > { %3349 = vmatpush3.bf16.msra.mxu1 %v3760_v6  ;;  %v1184_v6 = vld [vmem:[%s3951_s11 + $0x4] sm:$0xe] }
  0x75   : > { %3509 = vmatpush3.bf16.msra.mxu0 %v3761_v8  ;;  %3350 = vmatprep.subr.bf16.mxu1 %v3762_v10  ;;  %v2891_v8 = vcombine.low %v1184_v6, %v4199_v19  ;;  %v817_v29 = vrot.slane %v815_v15, 4  ;;  %v3801_v19 = vld [vmem:[%s4601_s1 + $0x358] sm:$0xff]   ;;  %v3818_v15 = vld [vmem:[%s4601_s1 + $0x390] sm:$0xff]  }
  0x76   : > { %3510 = vmatprep.subr.bf16.mxu0 %v3763_v14 }
  0x77   : > { %v1205_v11 = vrot.slane %v2891_v8, 1 }
  0x78   : > { %3351 = vmatpush3.bf16.msra.mxu1 %v3762_v10  ;;  %v3783_v10 = vld [vmem:[%s4601_s1 + $0x328] sm:$0xff]  }
  0x79   : > { %3511 = vmatpush3.bf16.msra.mxu0 %v3763_v14  ;;  %3352 = vmatprep.subr.bf16.mxu1 %v3764_v26  ;;  %v812_v14 = vshrl.u32 %v2815_v17, 16  ;;  %v2841_v17 = vcombine.low %v4204_v23, %v4274_v25  ;;  %v3816_v23 = vld [vmem:[%s4601_s1 + $0x388] sm:$0xff]  }
  0x7a   : > { %3512 = vmatprep.subr.bf16.mxu0 %v3765_v28 }
  0x7c   : > { %3353 = vmatpush3.bf16.msra.mxu1 %v3764_v26  ;;  %v4302_v26 = vsel %vm509_vm3, %v1205_v11, %v1206_v9  ;;  %v3815_v11 = vld [vmem:[%s4601_s1 + $0x188] sm:$0xff]  }
  0x7d   : > { %3513 = vmatpush3.bf16.msra.mxu0 %v3765_v28  ;;  %3354 = vmatprep.subr.bf16.mxu1 %v3766_v30  ;;  %v814_v28 = vrot.slane %v812_v14, 3  ;;  %v3817_v14 = vld [vmem:[%s4601_s1 + $0x190] sm:$0xff]  }
  0x7e   : > { %3514 = vmatprep.subr.bf16.mxu0 %v3767_v32 }
  0x7f   : > { %v818_v22 = vor.u32 %v817_v29, %v814_v28  ;;  %v3822_v28 = vld [vmem:[%s4601_s1 + $0x3a0] sm:$0xff]   ;;  %v4423_v29 = vld [vmem:[%s3951_s11 + $0x18] sm:$0x3] }
  0x80   : > { %3355 = vmatpush3.bf16.msra.mxu1 %v3766_v30  ;;  %v3786_v30 = vld [vmem:[%s4601_s1 + $0x138] sm:$0xff]  }
  0x81   : > { %3515 = vmatpush3.bf16.msra.mxu0 %v3767_v32  ;;  %3356 = vmatprep.subr.bf16.mxu1 %v3768_v35  ;;  %v2027_v32 = vld [vmem:[%s3951_s11 + $0x8] sm:$0x8]  ;;  %v819_v37 = vsel %vm793_vm2, %v4239_v50, %v818_v22  ;;  %v3806_v50 = vld [vmem:[%s4601_s1 + $0x170] sm:$0xff]  }
  0x82   : > { %3516 = vmatprep.subr.bf16.mxu0 %v3769_v38  ;;  %v4316_v33 = vcombine.low %v2027_v32, %v4208_v12  ;;  %v3824_v32 = vld [vmem:[%s4601_s1 + $0x3a8] sm:$0xff]   ;;  %v3840_v12 = vld [vmem:[%s4601_s1 + $0x3e0] sm:$0xff]  }
  0x84   : > { %3357 = vmatpush3.bf16.msra.mxu1 %v3768_v35  ;;  %v1922_v35 = vrot.slane %v1920_v31, 3  ;;  %v2178_v53 = vshrl.u32 %v4316_v33, 16  ;;  %v3071_v31 = vcombine.low %v4423_v29, %v4423_v29 }
  0x85   : > { %3517 = vmatpush3.bf16.msra.mxu0 %v3769_v38  ;;  %3362 = vmatprep.subr.bf16.mxu1 %v3771_v48  ;;  %v2048_v38 = vrot.slane %v4316_v33, 3 }
  0x86   : > { %3522 = vmatprep.subr.bf16.mxu0 %v3773_v13  ;;  %v1923_v40 = vsel %vm1901_vm5, %v4245_v54, %v1922_v35  ;;  %v2181_v54 = vshll.u32 %v4316_v33, 16  ;;  %v2190_v22 = vshrl.u32 %v3071_v31, 16  ;;  %v2193_v33 = vshll.u32 %v3071_v31, 16  ;;  %v3827_v35 = vld [vmem:[%s4601_s1 + $0x1b8] sm:$0xff]  }
  0x87   : > { %3359 = vmatmul.mubr.bf16.vlgmr.msra.gmra.mrb[0].mxu1 %v4147_v59  ;;  %v3777_v59 = vld [vmem:[%s4601_s1 + $0x310] sm:$0xff]   ;;  %v2050_v44 = vsel %vm1346_vm1, %v2048_v38, %v2049_v39  ;;  %v3828_v38 = vld [vmem:[%s4601_s1 + $0x3b8] sm:$0xff]  }
  0x88   : > { %3363 = vmatpush3.bf16.msra.mxu1 %v3771_v48  ;;  %3519 = vmatmul.mubr.bf16.vlgmr.msra.gmra.mrb[0].mxu0 %v1762_v51  ;;  %v3803_v48 = vld [vmem:[%s4601_s1 + $0x360] sm:$0xff]   ;;  %v3807_v51 = vld [vmem:[%s4601_s1 + $0x370] sm:$0xff]  }
  0x89   : > { %3523 = vmatpush3.bf16.msra.mxu0 %v3773_v13  ;;  %3364 = vmatprep.subr.bf16.mxu1 %v3774_v52  ;;  %v3804_v13 = vld [vmem:[%s4601_s1 + $0x168] sm:$0xff]  }
  0x8a   : > { %3524 = vmatprep.subr.bf16.mxu0 %v3775_v56  ;;  %3378 = vmatprep.mubr.bf16.mxu1 %v810_v57  ;;  %v3809_v57 = vld [vmem:[%s4601_s1 + $0x378] sm:$0xff]  }
  0x8b   : > { %3538 = vmatprep.mubr.bf16.mxu0 %v1918_v58  ;;  %v1067_v58 = vshrl.u32 %v2840_v43, 16 }
  0x8c   : > { %3365 = vmatpush3.bf16.msra.mxu1 %v3774_v52  ;;  %v1069_v52 = vshll.u32 %v2840_v43, 16 }
  0x8d   : > { %3525 = vmatpush3.bf16.msra.mxu0 %v3775_v56  ;;  %3366 = vmatprep.subr.bf16.mxu1 %v3776_v60  ;;  %v3808_v56 = vld [vmem:[%s4601_s1 + $0x178] sm:$0xff]  }
  0x8e   : > { %3526 = vmatprep.subr.bf16.mxu0 %v3777_v59 }
  0x90   : > { %3367 = vmatpush3.bf16.msra.mxu1 %v3776_v60  ;;  %v1071_v60 = vrot.slane %v1069_v52, 1  ;;  %v2423_v52 = vlaneseq }
  0x91   : > { %3527 = vmatpush3.bf16.msra.mxu0 %v3777_v59  ;;  %3368 = vmatprep.subr.bf16.mxu1 %v3778_v61  ;;  %v1074_v59 = vshll.u32 %v4280_v4, 16 }
  0x92   : > { %3528 = vmatprep.subr.bf16.mxu0 %v3779_v62  ;;  %v1072_v6 = vor.u32 %v1071_v60, %v1067_v58 }
  0x94   : > { %3369 = vmatpush3.bf16.msra.mxu1 %v3778_v61  ;;  %v2180_v61 = vrot.slane %v2178_v53, 3  ;;  %v2424_v53 = vshrl.u32 %v2423_v52, 7 }
  0x95   : > { %3529 = vmatpush3.bf16.msra.mxu0 %v3779_v62  ;;  %3370 = vmatprep.subr.bf16.mxu1 %v3780_v63  ;;  %v2183_v62 = vrot.slane %v2181_v54, 4 }
  0x96   : > { %3530 = vmatprep.subr.bf16.mxu0 %v3781_v0  ;;  %v2425_v54 = vadd.s32 8, %v2424_v53  ;;  %v4505_v58 = vmul.u32.u64.low 2454267026, %v2424_v53  ;;  %v4506_v60 = vmul.u32.u64.high 2454267026, %v2424_v53, %v4505_v58 }
  0x97   : > { %v2184_v8 = vor.u32 %v2183_v62, %v2180_v61 }
  0x98   : > { %3371 = vmatpush3.bf16.msra.mxu1 %v3780_v63  ;;  %v3811_v63 = vld [vmem:[%s4601_s1 + $0x180] sm:$0xff]   ;;  %vm2434_vm6 = vc.u32 %v4505_v58, 2454267026 }
  0x99   : > { %3531 = vmatpush3.bf16.msra.mxu0 %v3781_v0  ;;  %3372 = vmatprep.subr.bf16.mxu1 %v3782_v7  ;;  %v3813_v0 = vld [vmem:[%s4601_s1 + $0x380] sm:$0xff]   ;;  %v2188_v5 = vsel %vm793_vm2, %v2184_v8, %v4201_v20 }
  0x9a   : > { %3532 = vmatprep.subr.bf16.mxu0 %v3783_v10 }
  0x9c   : > { %3373 = vmatpush3.bf16.msra.mxu1 %v3782_v7  ;;  %v4389_v7 = vrot.slane %v1074_v59, 1  ;;  %v4508_v59 = vmul.u32.u64.low 2454267026, %v2425_v54  ;;  %v4509_v61 = vmul.u32.u64.high 2454267026, %v2425_v54, %v4508_v59 }
  0x9d   : > { %3533 = vmatpush3.bf16.msra.mxu0 %v3783_v10  ;;  %3374 = vmatprep.subr.bf16.mxu1 %v3784_v16  ;;  %v2052_v10 = vsel %vm1346_vm1, %v2049_v39, %v2051_v1  ;;  %v1078_v39 = vshrl.u32 %v4280_v4, 16  ;;  %v3876_v4 = vmov 0  }
  0x9e   : > { %3534 = vmatprep.subr.bf16.mxu0 %v3785_v27  ;;  %v1077_v25 = vsel %vm271_vm0, %v1072_v6, %v4389_v7  ;;  %vm2448_vm7 = vc.u32 %v4508_v59, 2454267026 }
  0xa0   : > { %3375 = vmatpush3.bf16.msra.mxu1 %v3784_v16  ;;  %v3819_v16 = vld [vmem:[%s4601_s1 + $0x198] sm:$0xff]  }
  0xa1   : > { %3535 = vmatpush3.bf16.msra.mxu0 %v3785_v27  ;;  %3376 = vmatprep.subr.bf16.mxu1 %v3786_v30  ;;  %v3821_v27 = vld [vmem:[%s4601_s1 + $0x1a0] sm:$0xff]  }
  0xa2   : > { %3536 = vmatprep.subr.bf16.mxu0 %v3787_v21 }
  0xa4   : > { %3377 = vmatpush3.bf16.msra.mxu1 %v3786_v30  ;;  %v3823_v30 = vld [vmem:[%s4601_s1 + $0x1a8] sm:$0xff]  }
  0xa5   : > { %3537 = vmatpush3.bf16.msra.mxu0 %v3787_v21  ;;  %3382 = vmatprep.subr.bf16.mxu1 %v3790_v34  ;;  %v3825_v21 = vld [vmem:[%s4601_s1 + $0x1b0] sm:$0xff]  }
  0xa6   : > { %3542 = vmatprep.subr.bf16.mxu0 %v3793_v36 }
  0xa7   : > { %3379 = vmatmul.mubr.bf16.vlgmr.msra.gmra.mrb[0].mxu1 %v819_v37  ;;  %v2195_v37 = vrot.slane %v2193_v33, 4 }
  0xa8   : > { %3383 = vmatpush3.bf16.msra.mxu1 %v3790_v34  ;;  %3539 = vmatmul.mubr.bf16.vlgmr.msra.gmra.mrb[0].mxu0 %v1923_v40  ;;  %v3826_v34 = vld [vmem:[%s4601_s1 + $0x3b0] sm:$0xff]   ;;  %v3830_v40 = vld [vmem:[%s4601_s1 + $0x1c0] sm:$0xff]  }
  0xa9   : > { %3543 = vmatpush3.bf16.msra.mxu0 %v3793_v36  ;;  %3384 = vmatprep.subr.bf16.mxu1 %v3796_v41  ;;  %v2192_v36 = vrot.slane %v2190_v22, 3 }
  0xaa   : > { %3544 = vmatprep.subr.bf16.mxu0 %v3797_v42  ;;  %3398 = vmatprep.mubr.bf16.mxu1 %v2840_v43  ;;  %v1080_v43 = vor.u32 %v1078_v39, %v4389_v7 }
  0xab   : > { %3558 = vmatprep.mubr.bf16.mxu0 %v2050_v44 }
  0xac   : > { %3385 = vmatpush3.bf16.msra.mxu1 %v3796_v41  ;;  %v2196_v41 = vor.u32 %v2195_v37, %v2192_v36 }
  0xad   : > { %3545 = vmatpush3.bf16.msra.mxu0 %v3797_v42  ;;  %3386 = vmatprep.subr.bf16.mxu1 %v3798_v45  ;;  %v3831_v42 = vld [vmem:[%s4601_s1 + $0x3c0] sm:$0xff]  }
  0xae   : > { %3546 = vmatprep.subr.bf16.mxu0 %v3799_v46  ;;  %v2197_v44 = vsel %vm793_vm2, %v4201_v20, %v2196_v41  ;;  %v3836_v20 = vld [vmem:[%s4601_s1 + $0x3d0] sm:$0xff]  }
  0xb0   : > { %3387 = vmatpush3.bf16.msra.mxu1 %v3798_v45  ;;  %v3833_v45 = vld [vmem:[%s4601_s1 + $0x1c8] sm:$0xff]  }
  0xb1   : > { %3547 = vmatpush3.bf16.msra.mxu0 %v3799_v46  ;;  %3388 = vmatprep.subr.bf16.mxu1 %v3800_v18  ;;  %v3834_v46 = vld [vmem:[%s4601_s1 + $0x3c8] sm:$0xff]  }
  0xb2   : > { %3548 = vmatprep.subr.bf16.mxu0 %v3801_v19 }
  0xb4   : > { %3389 = vmatpush3.bf16.msra.mxu1 %v3800_v18  ;;  %v3835_v18 = vld [vmem:[%s4601_s1 + $0x1d0] sm:$0xff]  }
  0xb5   : > { %3549 = vmatpush3.bf16.msra.mxu0 %v3801_v19  ;;  %3390 = vmatprep.subr.bf16.mxu1 %v3802_v47  ;;  %v3837_v19 = vld [vmem:[%s4601_s1 + $0x1d8] sm:$0xff]  }
  0xb6   : > { %3550 = vmatprep.subr.bf16.mxu0 %v3803_v48 }
  0xb8   : > { %3391 = vmatpush3.bf16.msra.mxu1 %v3802_v47  ;;  %v3838_v47 = vld [vmem:[%s4601_s1 + $0x3d8] sm:$0xff]  }
  0xb9   : > { %3551 = vmatpush3.bf16.msra.mxu0 %v3803_v48  ;;  %3392 = vmatprep.subr.bf16.mxu1 %v3804_v13  ;;  %v3843_v48 = vld [vmem:[%s4601_s1 + $0x1f0] sm:$0xff]  }
  0xba   : > { %3552 = vmatprep.subr.bf16.mxu0 %v3805_v49 }
  0xbc   : > { %3393 = vmatpush3.bf16.msra.mxu1 %v3804_v13  ;;  %v3844_v13 = vld [vmem:[%s4601_s1 + $0x3f0] sm:$0xff]  }
  0xbd   : > { %3553 = vmatpush3.bf16.msra.mxu0 %v3805_v49  ;;  %3394 = vmatprep.subr.bf16.mxu1 %v3806_v50  ;;  %v3845_v49 = vld [vmem:[%s4601_s1 + $0x1f8] sm:$0xff]  }
  0xbe   : > { %3554 = vmatprep.subr.bf16.mxu0 %v3807_v51 }
  0xc0   : > { %3395 = vmatpush3.bf16.msra.mxu1 %v3806_v50  ;;  %v3846_v50 = vld [vmem:[%s4601_s1 + $0x3f8] sm:$0xff]  }
  0xc1   : > { %3555 = vmatpush3.bf16.msra.mxu0 %v3807_v51  ;;  %3396 = vmatprep.subr.bf16.mxu1 %v3808_v56  ;;  %v3097_v51 = vcombine.low %v4163_v3, %v4423_v29 }
  0xc2   : > { %3556 = vmatprep.subr.bf16.mxu0 %v3809_v57 }
  0xc4   : > { %3397 = vmatpush3.bf16.msra.mxu1 %v3808_v56  ;;  %v2427_v56 = vadd.s32 24, %v2424_v53 }
  0xc5   : > { %3557 = vmatpush3.bf16.msra.mxu0 %v3809_v57  ;;  %3402 = vmatprep.subr.bf16.mxu1 %v3811_v63  ;;  %v2426_v57 = vadd.s32 16, %v2424_v53 }
  0xc6   : > { %3562 = vmatprep.subr.bf16.mxu0 %v3813_v0 }
  0xc7   : > { %3399 = vmatmul.mubr.bf16.vlgmr.msra.gmra.mrb[0].mxu1 %v2841_v17  ;;  %v4514_v3 = vmul.u32.u64.low 2454267026, %v2426_v57  ;;  %v4515_v1 = vmul.u32.u64.high 2454267026, %v2426_v57, %v4514_v3 }
  0xc8   : > { %3403 = vmatpush3.bf16.msra.mxu1 %v3811_v63  ;;  %3559 = vmatmul.mubr.bf16.vlgmr.msra.gmra.mrb[0].mxu0 %v2052_v10  ;;  %v4511_v62 = vmul.u32.u64.low 2454267026, %v2427_v56  ;;  %v4512_v63 = vmul.u32.u64.high 2454267026, %v2427_v56, %v4511_v62 }
  0xc9   : > { %3563 = vmatpush3.bf16.msra.mxu0 %v3813_v0  ;;  %3404 = vmatprep.subr.bf16.mxu1 %v3815_v11  ;;  %vm2462_vm9 = vc.u32 %v4514_v3, 2454267026  ;;  %v2449_v0 = vsel %vm2448_vm7, 1, %v3876_v4 }
  0xca   : > { %3564 = vmatprep.subr.bf16.mxu0 %v3816_v23  ;;  %3418 = vmatprep.mubr.bf16.mxu1 %v1077_v25  ;;  %vm2476_vm8 = vc.u32 %v4511_v62, 2454267026  ;;  %v2463_v6 = vsel %vm2462_vm9, 1, %v3876_v4  ;;  %v2450_v8 = vadd.s32 %v4509_v61, %v2449_v0 }
  0xcb   : > { %3578 = vmatprep.mubr.bf16.mxu0 %v2188_v5  ;;  %v2477_v17 = vsel %vm2476_vm8, 1, %v3876_v4 }
  0xcc   : > { %3405 = vmatpush3.bf16.msra.mxu1 %v3815_v11  ;;  %v2478_v10 = vadd.s32 %v4512_v63, %v2477_v17  ;;  %v2464_v11 = vadd.s32 %v4515_v1, %v2463_v6  ;;  %v2451_v25 = vshrl.u32 %v2450_v8, 2 }
  0xcd   : > { %3565 = vmatpush3.bf16.msra.mxu0 %v3816_v23  ;;  %3406 = vmatprep.subr.bf16.mxu1 %v3817_v14 }
  0xce   : > { %3566 = vmatprep.subr.bf16.mxu0 %v3818_v15  ;;  %v2479_v5 = vshrl.u32 %v2478_v10, 2 }
  0xd0   : > { %3407 = vmatpush3.bf16.msra.mxu1 %v3817_v14  ;;  %v2465_v14 = vshrl.u32 %v2464_v11, 2 }
  0xd1   : > { %3567 = vmatpush3.bf16.msra.mxu0 %v3818_v15  ;;  %3408 = vmatprep.subr.bf16.mxu1 %v3819_v16 }
  0xd2   : > { %3568 = vmatprep.subr.bf16.mxu0 %v3820_v24 }
  0xd4   : > { %3409 = vmatpush3.bf16.msra.mxu1 %v3819_v16  ;;  %v2452_v16 = vmul.u32 7, %v2451_v25 }
  0xd5   : > { %3569 = vmatpush3.bf16.msra.mxu0 %v3820_v24  ;;  %3410 = vmatprep.subr.bf16.mxu1 %v3821_v27  ;;  %v2480_v24 = vmul.u32 7, %v2479_v5 }
  0xd6   : > { %3570 = vmatprep.subr.bf16.mxu0 %v3822_v28  ;;  %v2453_v29 = vsub.s32 %v2425_v54, %v2452_v16 }
  0xd8   : > { %3411 = vmatpush3.bf16.msra.mxu1 %v3821_v27  ;;  %v2466_v27 = vmul.u32 7, %v2465_v14  ;;  %vm2485_vm12 = vcmp.ne.s32.totalorder %v2453_v29, 0  ;;  %vm2489_vm13 = vcmp.lt.s32.totalorder %v2453_v29, 0  ;;  %v2497_v22 = vadd.s32 7, %v2453_v29 }
  0xd9   : > { %3571 = vmatpush3.bf16.msra.mxu0 %v3822_v28  ;;  %3412 = vmatprep.subr.bf16.mxu1 %v3823_v30  ;;  %vm4525_vm3 = vmand %vm2489_vm13, %vm2485_vm12 }
  0xda   : > { %3572 = vmatprep.subr.bf16.mxu0 %v3824_v32  ;;  %v2467_v31 = vsub.s32 %v2426_v57, %v2466_v27 }
  0xdc   : > { %3413 = vmatpush3.bf16.msra.mxu1 %v3823_v30  ;;  %v2481_v30 = vsub.s32 %v2427_v56, %v2480_v24  ;;  %vm2486_vm0 = vcmp.ne.s32.totalorder %v2467_v31, 0  ;;  %vm2490_vm1 = vcmp.lt.s32.totalorder %v2467_v31, 0 }
  0xdd   : > { %3573 = vmatpush3.bf16.msra.mxu0 %v3824_v32  ;;  %3414 = vmatprep.subr.bf16.mxu1 %v3825_v21  ;;  %vm4533_vm5 = vmand %vm2490_vm1, %vm2486_vm0 }
  0xde   : > { %3574 = vmatprep.subr.bf16.mxu0 %v3826_v34  ;;  %vm2487_vm14 = vcmp.ne.s32.totalorder %v2481_v30, 0  ;;  %vm2491_vm15 = vcmp.lt.s32.totalorder %v2481_v30, 0  ;;  %v2499_v33 = vadd.s32 7, %v2481_v30 }
  0xdf   : > { %vm4529_vm4 = vmand %vm2491_vm15, %vm2487_vm14 }
  0xe0   : > { %3415 = vmatpush3.bf16.msra.mxu1 %v3825_v21 }
  0xe1   : > { %3575 = vmatpush3.bf16.msra.mxu0 %v3826_v34  ;;  %3416 = vmatprep.subr.bf16.mxu1 %v3827_v35 }
  0xe2   : > { %3576 = vmatprep.subr.bf16.mxu0 %v3828_v38 }
  0xe4   : > { %3417 = vmatpush3.bf16.msra.mxu1 %v3827_v35  ;;  %v2498_v35 = vadd.s32 7, %v2467_v31 }
  0xe5   : > { %3577 = vmatpush3.bf16.msra.mxu0 %v3828_v38  ;;  %3422 = vmatprep.subr.bf16.mxu1 %v3830_v40 }
  0xe6   : > { %3582 = vmatprep.subr.bf16.mxu0 %v3831_v42 }
  0xe7   : > { %3419 = vmatmul.mubr.bf16.vlgmr.msra.gmra.mrb[0].mxu1 %v1080_v43 }
  0xe8   : > { %3423 = vmatpush3.bf16.msra.mxu1 %v3830_v40  ;;  %3579 = vmatmul.mubr.bf16.vlgmr.msra.gmra.mrb[0].mxu0 %v2197_v44 }
  0xe9   : > { %3583 = vmatpush3.bf16.msra.mxu0 %v3831_v42  ;;  %3424 = vmatprep.subr.bf16.mxu1 %v3833_v45  ;;  %v2501_v42 = vsel %vm4525_vm3, %v2497_v22, %v2453_v29 }
  0xea   : > { %3584 = vmatprep.subr.bf16.mxu0 %v3834_v46  ;;  %3438 = vmatprep.mubr.bf16.mxu1 %v4302_v26  ;;  %v3842_v26 = vld [vmem:[%s4601_s1 + $0x3e8] sm:$0xff]   ;;  %vm4549_vm7 = vcmp.lt.s32.totalorder %v2501_v42, 4 }
  0xeb   : > { %3598 = vmatprep.mubr.bf16.mxu0 %v3096_v55  ;;  %v3841_v55 = vld [vmem:[%s4601_s1 + $0x1e8] sm:$0xff]  }
  0xec   : > { %3425 = vmatpush3.bf16.msra.mxu1 %v3833_v45 }
  0xed   : > { %3585 = vmatpush3.bf16.msra.mxu0 %v3834_v46  ;;  %3426 = vmatprep.subr.bf16.mxu1 %v3835_v18  ;;  %v2503_v46 = vsel %vm4529_vm4, %v2499_v33, %v2481_v30 }
  0xee   : > { %3586 = vmatprep.subr.bf16.mxu0 %v3836_v20  ;;  %vm4553_vm8 = vcmp.lt.s32.totalorder %v2503_v46, 4 }
  0xf0   : > { %3427 = vmatpush3.bf16.msra.mxu1 %v3835_v18  ;;  %v2502_v18 = vsel %vm4533_vm5, %v2498_v35, %v2467_v31 }
  0xf1   : > { %3587 = vmatpush3.bf16.msra.mxu0 %v3836_v20  ;;  %3428 = vmatprep.subr.bf16.mxu1 %v3837_v19  ;;  %vm4557_vm9 = vcmp.lt.s32.totalorder %v2502_v18, 4 }
  0xf2   : > { %3588 = vmatprep.subr.bf16.mxu0 %v3838_v47 }
  0xf4   : > { %3429 = vmatpush3.bf16.msra.mxu1 %v3837_v19 }
  0xf5   : > { %3589 = vmatpush3.bf16.msra.mxu0 %v3838_v47  ;;  %3430 = vmatprep.subr.bf16.mxu1 %v3839_v2 }
  0xf6   : > { %3590 = vmatprep.subr.bf16.mxu0 %v3840_v12 }
  0xf8   : > { %3431 = vmatpush3.bf16.msra.mxu1 %v3839_v2 }
  0xf9   : > { %3591 = vmatpush3.bf16.msra.mxu0 %v3840_v12  ;;  %3432 = vmatprep.subr.bf16.mxu1 %v3841_v55 }
  0xfa   : > { %3592 = vmatprep.subr.bf16.mxu0 %v3842_v26 }
  0xfc   : > { %3433 = vmatpush3.bf16.msra.mxu1 %v3841_v55 }
  0xfd   : > { %3593 = vmatpush3.bf16.msra.mxu0 %v3842_v26  ;;  %3434 = vmatprep.subr.bf16.mxu1 %v3843_v48 }
  0xfe   : > { %3594 = vmatprep.subr.bf16.mxu0 %v3844_v13 }
 0x100   : > { %3435 = vmatpush3.bf16.msra.mxu1 %v3843_v48 }
 0x101   : > { %3595 = vmatpush3.bf16.msra.mxu0 %v3844_v13  ;;  %3436 = vmatprep.subr.bf16.mxu1 %v3845_v49 }
 0x102   : > { %3596 = vmatprep.subr.bf16.mxu0 %v3846_v50 }
 0x104   : > { %3437 = vmatpush3.bf16.msra.mxu1 %v3845_v49 }
 0x105   : > { %3597 = vmatpush3.bf16.msra.mxu0 %v3846_v50 }
 0x107   : > { %3439 = vmatmul.mubr.bf16.vlgmr.msra.gmra.mrb[0].mxu1 %v1206_v9  ;;  %v2435_v9 = vsel %vm2434_vm6, 1, %v3876_v4 }
 0x108   : > { %3599 = vmatmul.mubr.bf16.vlgmr.msra.gmra.mrb[0].mxu0 %v3097_v51  ;;  %v2436_v7 = vadd.s32 %v4506_v60, %v2435_v9 }
 0x10a   : > { %v2437_v23 = vshrl.u32 %v2436_v7, 2 }
 0x10c   : > { %v2438_v15 = vmul.u32 7, %v2437_v23 }
 0x10e   : > { %v2439_v28 = vsub.s32 %v2424_v53, %v2438_v15 }
 0x110   : > { %vm2484_vm10 = vcmp.ne.s32.totalorder %v2439_v28, 0  ;;  %vm2488_vm11 = vcmp.lt.s32.totalorder %v2439_v28, 0  ;;  %v2496_v21 = vadd.s32 7, %v2439_v28 }
 0x111   : > { %vm4521_vm2 = vmand %vm2488_vm11, %vm2484_vm10  ;;  %vm2522_vm10 = vcmask 1043456  }
 0x112   : > { %v2500_v41 = vsel %vm4521_vm2, %v2496_v21, %v2439_v28 }
 0x113   : > { %vm4545_vm6 = vcmp.lt.s32.totalorder %v2500_v41, 4 }
 0x1da   : > { %v3440_v37 = vpop.f32.mrb[0].mxu1 }
 0x1db   : > { %v3600_v39 = vpop.f32.mrb[0].mxu0  ;;  %v1292_v40 = vpop.f32.mrb[1].mxu1 }
 0x1dc   : > { %v3602_v43 = vadd.f32 %v3600_v39, %v3440_v37  ;;  %v2404_v44 = vpop.f32.mrb[1].mxu0  ;;  %v3441_v45 = vpop.f32.mrb[2].mxu1 }
 0x1dd   : > { %v3603_v20 = vadd.f32 %v2404_v44, %v1292_v40  ;;  %v3601_v19 = vpop.f32.mrb[2].mxu0  ;;  %v1295_v47 = vpop.f32.mrb[3].mxu1 }
 0x1de   : > { %v3604_v12 = vadd.f32 %v3601_v19, %v3441_v45  ;;  %v2407_v55 = vpop.f32.mrb[3].mxu0  ;;  %v2518_v54 = vsel %vm4557_vm9, %v3602_v43, 0.0 }
 0x1df   : > { %v3605_v13 = vadd.f32 %v2407_v55, %v1295_v47  ;;  %v2516_v50 = vsel %vm4545_vm6, %v3603_v20, 0.0 }
 0x1e0   : > { %v2519_v52 = vsel %vm4553_vm8, %v3604_v12, 0.0 }
 0x1e1   : > { %v2517_v51 = vsel %vm4549_vm7, %v3605_v13, 0.0  ;;  %v2523_v57 = vsel %vm2522_vm10, %v2519_v52, 0.0 }
 0x1e2   : > { %v2520_v53 = vadd.f32 %v2517_v51, %v2516_v50 }
 0x1e4   : > { %v2521_v56 = vadd.f32 %v2520_v53, %v2518_v54 }
 0x1e6   : > { %v2524_v58 = vadd.f32 %v2523_v57, %v2521_v56 }
 0x1e8   : > { %v2525_v60 = vrot.slane %v2524_v58, 4 }
 0x1ea   : > { %v2526_v59 = vadd.f32 %v2525_v60, %v2524_v58 }
 0x1ec   : > { %v2527_v61 = vrot.slane %v2526_v59, 2 }
 0x1ee   : > { %v2528_v62 = vadd.f32 %v2527_v61, %v2526_v59 }
 0x1f0   : > { %v2529_v63 = vrot.slane %v2528_v62, 1 }
 0x1f2   : > { %v2530_v3 = vadd.f32 %v2529_v63, %v2528_v62 }
 0x1f4   : > { %v2531_v1 = vmul.f32 0.0625, %v2530_v3 }
 0x1f6   : > { %v2532_v4 = vsub.f32 %v3603_v20, %v2531_v1  ;;  %v2533_v9 = vsub.f32 %v3605_v13, %v2531_v1  ;;  %v2534_v0 = vsub.f32 %v3602_v43, %v2531_v1  ;;  %v2535_v17 = vsub.f32 %v3604_v12, %v2531_v1 }
 0x1f8   : > { %v2536_v6 = vmul.f32 %v2532_v4, %v2532_v4  ;;  %v2537_v7 = vmul.f32 %v2533_v9, %v2533_v9  ;;  %v2538_v8 = vmul.f32 %v2534_v0, %v2534_v0  ;;  %v2539_v10 = vmul.f32 %v2535_v17, %v2535_v17 }
 0x1fa   : > { %v2540_v11 = vsel %vm4545_vm6, %v2536_v6, 0.0  ;;  %v2541_v23 = vsel %vm4549_vm7, %v2537_v7, 0.0  ;;  %v2543_v25 = vsel %vm4553_vm8, %v2539_v10, 0.0  ;;  %v2542_v14 = vsel %vm4557_vm9, %v2538_v8, 0.0 }
 0x1fb   : > { %v2544_v5 = vadd.f32 %v2541_v23, %v2540_v11  ;;  %v2546_v16 = vsel %vm2522_vm10, %v2543_v25, 0.0 }
 0x1fd   : > { %v2545_v15 = vadd.f32 %v2544_v5, %v2542_v14 }
 0x1ff   : > { %v2547_v24 = vadd.f32 %v2546_v16, %v2545_v15 }
 0x201   : > { %v2548_v27 = vrot.slane %v2547_v24, 4 }
 0x203   : > { %v2549_v28 = vadd.f32 %v2548_v27, %v2547_v24 }
 0x205   : > { %v2550_v29 = vrot.slane %v2549_v28, 2 }
 0x207   : > { %v2551_v30 = vadd.f32 %v2550_v29, %v2549_v28 }
 0x209   : > { %v2552_v31 = vrot.slane %v2551_v30, 1 }
 0x20b   : > { %v2553_v32 = vadd.f32 %v2552_v31, %v2551_v30 }
 0x20d   : > { %v2554_v21 = vmul.f32 0.0625, %v2553_v32 }
 0x20f   : > { %v2555_v22 = vadd.f32 1e-05, %v2554_v21 }
 0x211   : > { %3850 = vrsqrt.f32 %v2555_v22 }
 0x21b   : > { %v3851_v33 = vpop.eup %3850 }
 0x21c   : > { %v2557_v34 = vmul.f32 %v3851_v33, %v2532_v4  ;;  %v2558_v35 = vmul.f32 %v3851_v33, %v2533_v9  ;;  %v2559_v36 = vmul.f32 %v3851_v33, %v2534_v0  ;;  %v2560_v37 = vmul.f32 %v3851_v33, %v2535_v17 }
 0x21e   : > { %vm2561_vm11 = vcmp.ge.f32.partialorder %v2557_v34, 0.0  ;;  %vm2562_vm12 = vcmp.ge.f32.partialorder %v2558_v35, 0.0  ;;  %vm2563_vm13 = vcmp.ge.f32.partialorder %v2559_v36, 0.0  ;;  %vm2564_vm14 = vcmp.ge.f32.partialorder %v2560_v37, 0.0 }
 0x21f   : > { %v2565_v38 = vmul.f32 0.2, %v2557_v34  ;;  %v2566_v39 = vmul.f32 0.2, %v2558_v35  ;;  %v2567_v40 = vmul.f32 0.2, %v2559_v36 }
 0x220   : > { %v2568_v41 = vmul.f32 0.2, %v2560_v37 }
 0x221   : > { %v2569_v42 = vsel %vm2561_vm11, %v2557_v34, %v2565_v38  ;;  %v2570_v43 = vsel %vm2562_vm12, %v2558_v35, %v2566_v39  ;;  %v2571_v44 = vsel %vm2563_vm13, %v2559_v36, %v2567_v40 }
 0x222   : > { %v2572_v45 = vsel %vm2564_vm14, %v2560_v37, %v2568_v41  ;;  %v2573_v46 = vsel %vm4545_vm6, %v2569_v42, 0.0  ;;  %v2574_v18 = vsel %vm4549_vm7, %v2570_v43, 0.0  ;;  %v2575_v20 = vsel %vm4557_vm9, %v2571_v44, 0.0 }
 0x223   : > { %v2576_v19 = vsel %vm4553_vm8, %v2572_v45, 0.0  ;;  %v3115_v47 = vpack.c.bf16 %v2575_v20, %v2575_v20  ;;  %v3120_v12 = vpack.c.bf16 %v2574_v18, %v2573_v46 }
 0x224   : > { %v3116_v55 = vpack.c.bf16 %v2576_v19, %v2576_v19 }
 0x225   : > { %3121 = vst [vmem:[%s221_s22] sm:$0xff] %v3120_v12   ;;  %2595 = vst [vmem:[%s221_s22 + $0x8] sm:$0xf] %v3115_v47 }
 0x226   : > { %2596 = vst [vmem:[%s221_s22 + $0xc] sm:$0x3] %v3116_v55 }
 0x227 PF: > { %s13_s14 = sadd.s32 1, %s3874_s14   ;;  %s4620_s12 = smov %s3870_s13 }
 0x228   : > { %p10_p5 = scmp.ge.s32.totalorder %s13_s14, 4   ;;  %s4621_s13 = smov %s4623_s2 }
 0x22a   :  { %12 = sbr.rel (!%p10_p5) target bundleno = 2 (0x2), region = 83 }

// kernel: _lambda_.9
= control target key start
LH: loop header
LB: loop body
LE: loop exit
PB: predicated region body
PF: predicated region fallthrough
CT: control target
= control target key end

     0   :  { %s4126_s12 = smov 0   ;;  %s4128_s13 = smov 0   ;;  %s4985_s0 = inlined_call_operand.vmem [shape: bf16[2,1,72,128], index: 0, kind: input, shape index: {}]   ;;  %s4986_s1 = inlined_call_operand.vmem [shape: bf16[16,128,128], index: 1, kind: input, shape index: {}]   ;;  %s4987_s2 = inlined_call_operand.vmem [shape: f32[1,128], index: 2, kind: input, shape index: {}]   ;;  %s4988_s3 = inlined_call_operand.vmem [shape: bf16[2,40,128], index: 3, kind: output, shape index: {}]  }
   0x1   :  { %s4130_s14 = smov 0  }
   0x2 LB: > { %s22_s15 = sadd.s32 1, %s4098_s13  ;;  %p2845_p0 = scmp.ge.s32.totalorder %s4102_s14, 1  ;;  %s4102_s14 = sphi %s4130_s14, %s13_s14   ;;  %s4098_s13 = sphi %s4128_s13, %s4990_s13   ;;  %s4094_s12 = sphi %s4126_s12, %s4989_s12  }
   0x3   : > { %p23_p1 = scmp.ge.s32.totalorder %s22_s15, 2  ;;  %p168_p2 = scmp.lt.s32.totalorder %s4102_s14, 3 }
   0x5   : > { %s4992_s15 = smov (%p23_p1, %s22_s15), 0  ;;  %p169_p3 = pnand %p2845_p0, %p168_p2 }
   0x6   : > { %v3922_v0 = vld [vmem:[%s4986_s1 + $0x40] sm:$0xff] (!%p169_p3)   ;;  %v4104_v1 = vmov (!%p169_p3), 0.0   ;;  %v3924_v3 = vld [vmem:[%s4986_s1 + $0x48] sm:$0xff] (!%p169_p3)   ;;  %vm4105_vm0 = vmmov (!%p169_p3), 0   ;;  %p202_p4 = scmp.lt.s32.totalorder (!%p169_p3), %s4094_s12, 1  ;;  %v3926_v5 = vld [vmem:[%s4986_s1 + $0x50] sm:$0xff] (!%p169_p3)  }
   0x7   : > { %172 = sbr.rel (%p169_p3) target bundleno = 501 (0x1f5), region = 32  ;;  %3446 = vmatprep.subr.bf16.mxu0 (!%p169_p3), %v4104_v1  ;;  %3474 = vmatprep.subr.bf16.mxu1 (!%p169_p3), %v4104_v1  ;;  %v3923_v2 = vld [vmem:[%s4986_s1] sm:$0xff] (!%p169_p3)   ;;  %v3925_v4 = vld [vmem:[%s4986_s1 + $0x8] sm:$0xff] (!%p169_p3)   ;;  %v3927_v6 = vld [vmem:[%s4986_s1 + $0x10] sm:$0xff] (!%p169_p3)   ;;  %vm277_vm1 = vsmask.f32 (!%p169_p3), 7424 }
   0x8   : > { %3447 = vmatpush3.bf16.msra.mxu0 (!%p169_p3), %v3922_v0  ;;  %3462 = vmatprep.mubr.msk.bf16.mxu0 (!%p169_p3), %vm4105_vm0, %v4104_v1  ;;  %v3928_v7 = vld [vmem:[%s4986_s1 + $0x58] sm:$0xff] (!%p169_p3)   ;;  %v3930_v9 = vld [vmem:[%s4986_s1 + $0x60] sm:$0xff] (!%p169_p3)   ;;  %v3932_v17 = vld [vmem:[%s4986_s1 + $0x68] sm:$0xff] (!%p169_p3)   ;;  %vm537_vm2 = vcmask (!%p169_p3), 1046528   ;;  %vm676_vm3 = vsmask.f32 (!%p169_p3), 6400 }
   0x9   : > { %3475 = vmatpush3.bf16.msra.mxu1 (!%p169_p3), %v3923_v2  ;;  %3448 = vmatprep.subr.bf16.mxu0 (!%p169_p3), %v4104_v1  ;;  %v3929_v8 = vld [vmem:[%s4986_s1 + $0x18] sm:$0xff] (!%p169_p3)   ;;  %v3931_v10 = vld [vmem:[%s4986_s1 + $0x20] sm:$0xff] (!%p169_p3)   ;;  %v3933_v19 = vld [vmem:[%s4986_s1 + $0x28] sm:$0xff] (!%p169_p3)  }
   0xa   : > { %3476 = vmatprep.subr.bf16.mxu1 (!%p169_p3), %v4104_v1  ;;  %3490 = vmatprep.mubr.msk.bf16.mxu1 (!%p169_p3), %vm4105_vm0, %v4104_v1  ;;  %v3934_v21 = vld [vmem:[%s4986_s1 + $0x70] sm:$0xff] (!%p169_p3)   ;;  %v3936_v26 = vld [vmem:[%s4986_s1 + $0x78] sm:$0xff] (!%p169_p3)   ;;  %v3940_v34 = vld [vmem:[%s4986_s1 + $0x80] sm:$0xff] (!%p169_p3)  }
   0xb   : > { %v3935_v25 = vld [vmem:[%s4986_s1 + $0x30] sm:$0xff] (!%p169_p3)   ;;  %v3937_v27 = vld [vmem:[%s4986_s1 + $0x38] sm:$0xff] (!%p169_p3)   ;;  %v3941_v38 = vld [vmem:[%s4986_s1 + $0xc0] sm:$0xff] (!%p169_p3)  }
   0xc   : > { %3449 = vmatpush3.bf16.msra.mxu0 (!%p169_p3), %v3924_v3  ;;  %v3942_v39 = vld [vmem:[%s4986_s1 + $0x88] sm:$0xff] (!%p169_p3)   ;;  %v3944_v43 = vld [vmem:[%s4986_s1 + $0x90] sm:$0xff] (!%p169_p3)   ;;  %v3946_v47 = vld [vmem:[%s4986_s1 + $0x98] sm:$0xff] (!%p169_p3)  }
   0xd   : > { %3477 = vmatpush3.bf16.msra.mxu1 (!%p169_p3), %v3925_v4  ;;  %3450 = vmatprep.subr.bf16.mxu0 (!%p169_p3), %v4104_v1  ;;  %v3943_v42 = vld [vmem:[%s4986_s1 + $0xc8] sm:$0xff] (!%p169_p3)   ;;  %v3945_v45 = vld [vmem:[%s4986_s1 + $0xd0] sm:$0xff] (!%p169_p3)   ;;  %v3947_v48 = vld [vmem:[%s4986_s1 + $0xd8] sm:$0xff] (!%p169_p3)  }
   0xe   : > { %s4994_s12 = smov (!%p202_p4, %s4094_s12), 1  ;;  %3478 = vmatprep.subr.bf16.mxu1 %v4104_v1  ;;  %v3949_v51 = vld [vmem:[%s4986_s1 + $0xa0] sm:$0xff]   ;;  %v3951_v55 = vld [vmem:[%s4986_s1 + $0xa8] sm:$0xff]   ;;  %v3954_v0 = vld [vmem:[%s4986_s1 + $0xb0] sm:$0xff]  }
   0xf   : > { %s3894_s28 = smul.u32 36, %s4994_s12  ;;  %v3950_v52 = vld [vmem:[%s4986_s1 + $0xe0] sm:$0xff]   ;;  %v3952_v56 = vld [vmem:[%s4986_s1 + $0xe8] sm:$0xff]  }
  0x10   : > { %3451 = vmatpush3.bf16.msra.mxu0 %v3926_v5  ;;  %v3955_v5 = vld [vmem:[%s4986_s1 + $0xf0] sm:$0xff]   ;;  %s3895_s7 = smul.u32 20, %s4994_s12 }
  0x11   : > { %3479 = vmatpush3.bf16.msra.mxu1 %v3927_v6  ;;  %3452 = vmatprep.subr.bf16.mxu0 %v4104_v1  ;;  %s4186_s8 = scalar_lea.vmem %s4985_s0, %s3894_s28 }
  0x12   : > { %3480 = vmatprep.subr.bf16.mxu1 %v4104_v1  ;;  %v223_v11 = vld [vmem:[%s4186_s8] sm:$0xf]  ;;  %v4198_v12 = vld [vmem:[%s4186_s8 + $0x4] sm:$0xf]  ;;  %v4201_v13 = vld [vmem:[%s4186_s8 + $0x8] sm:$0xf]  ;;  %s4971_s11 = scalar_lea.vmem %s4988_s3, %s3895_s7 }
  0x13   : > { %v4204_v14 = vld [vmem:[%s4186_s8 + $0xc] sm:$0xf]  ;;  %v2864_v15 = vcombine.low %v223_v11, %v4198_v12  ;;  %v2950_v16 = vcombine.low %v4198_v12, %v4201_v13  ;;  %v4239_v30 = vld [vmem:[%s4186_s8 + $0x10] sm:$0xf]  ;;  %v244_v31 = vld [vmem:[%s4186_s8 + $0x14] sm:$0x1] }
  0x14   : > { %3453 = vmatpush3.bf16.msra.mxu0 %v3928_v7  ;;  %v4214_v18 = vcombine.low %v4201_v13, %v4204_v14  ;;  %v4244_v32 = vcombine.low %v4239_v30, %v244_v31  ;;  %v2951_v33 = vcombine.low %v4204_v14, %v4239_v30  ;;  %v516_v49 = vld [vmem:[%s4186_s8] sm:$0xe]  ;;  %v2875_v53 = vcombine.low %v4239_v30, %v4239_v30  ;;  %v655_v57 = vld [vmem:[%s4186_s8 + $0x14] sm:$0x3]  ;;  %v4326_v62 = vld [vmem:[%s4186_s8 + $0x8] sm:$0xf] }
  0x15   : > { %3481 = vmatpush3.bf16.msra.mxu1 %v3929_v8  ;;  %3454 = vmatprep.subr.bf16.mxu0 %v4104_v1  ;;  %v281_v20 = vshll.u32 %v2864_v15, 16  ;;  %v279_v23 = vshrl.u32 %v2864_v15, 16  ;;  %v2900_v54 = vcombine.low %v516_v49, %v4198_v12  ;;  %v2925_v61 = vcombine.low %v4239_v30, %v655_v57  ;;  %v4329_v63 = vld [vmem:[%s4186_s8 + $0xc] sm:$0xf]  ;;  %v3956_v8 = vld [vmem:[%s4986_s1 + $0xb8] sm:$0xff]   ;;  %v3973_v49 = vld [vmem:[%s4986_s1 + $0x170] sm:$0xff]  }
  0x16   : > { %3482 = vmatprep.subr.bf16.mxu1 %v4104_v1  ;;  %v286_v22 = vshll.u32 %v4214_v18, 16  ;;  %v290_v36 = vshrl.u32 %v4214_v18, 16  ;;  %v294_v37 = vshll.u32 %v4244_v32, 16  ;;  %v298_v46 = vshrl.u32 %v4244_v32, 16  ;;  %v3962_v31 = vld [vmem:[%s4986_s1 + $0x148] sm:$0xff]   ;;  %v3984_v12 = vld [vmem:[%s4986_s1 + $0x190] sm:$0xff]  }
  0x17   : > { %v283_v24 = vrot.slane %v281_v20, 1  ;;  %v678_v58 = vshrl.u32 %v2900_v54, 16  ;;  %v681_v59 = vshll.u32 %v2900_v54, 16  ;;  %v539_v2 = vrot.slane %v4214_v18, 1  ;;  %v4355_v20 = vld [vmem:[%s4186_s8 + $0x14] sm:$0xf] }
  0x18   : > { %3455 = vmatpush3.bf16.msra.mxu0 %v3930_v9  ;;  %v288_v28 = vrot.slane %v286_v22, 1  ;;  %v296_v41 = vrot.slane %v294_v37, 1  ;;  %v686_v60 = vrot.slane %v286_v22, 2  ;;  %v3054_v3 = vcombine.low %v4326_v62, %v4329_v63  ;;  %v4492_v13 = vld [vmem:[%s4186_s8 + $0x14] sm:$0xf]  ;;  %v3990_v30 = vld [vmem:[%s4986_s1 + $0x1a0] sm:$0xff]  }
  0x19   : > { %3483 = vmatpush3.bf16.msra.mxu1 %v3931_v10  ;;  %3456 = vmatprep.subr.bf16.mxu0 %v4104_v1  ;;  %v284_v29 = vor.u32 %v283_v24, %v279_v23  ;;  %v685_v4 = vrot.slane %v290_v36, 1  ;;  %v680_v6 = vrot.slane %v678_v58, 1  ;;  %v683_v7 = vrot.slane %v681_v59, 2  ;;  %v3957_v10 = vld [vmem:[%s4986_s1 + $0xf8] sm:$0xff]   ;;  %v3959_v23 = vld [vmem:[%s4986_s1 + $0x100] sm:$0xff]  }
  0x1a   : > { %3484 = vmatprep.subr.bf16.mxu1 %v4104_v1  ;;  %v292_v40 = vor.u32 %v290_v36, %v288_v28  ;;  %v300_v50 = vor.u32 %v298_v46, %v296_v41  ;;  %v538_v9 = vrot.slane %v2900_v54, 1  ;;  %v690_v11 = vshrl.u32 %v2925_v61, 16  ;;  %v3960_v24 = vld [vmem:[%s4986_s1 + $0x140] sm:$0xff]   ;;  %v3964_v36 = vld [vmem:[%s4986_s1 + $0x150] sm:$0xff]   ;;  %v3974_v54 = vld [vmem:[%s4986_s1 + $0x138] sm:$0xff]  }
  0x1b   : > { %v289_v35 = vsel %vm277_vm1, %v284_v29, %v288_v28  ;;  %v3961_v28 = vld [vmem:[%s4986_s1 + $0x108] sm:$0xff]   ;;  %v541_v29 = vrot.slane %v4244_v32, 1  ;;  %v3979_v59 = vld [vmem:[%s4986_s1 + $0x180] sm:$0xff]   ;;  %v3989_v14 = vld [vmem:[%s4186_s8 + $0x14] ss:$0 sps:$4 sm:$0xff]  }
  0x1c   : > { %3457 = vmatpush3.bf16.msra.mxu0 %v3932_v17  ;;  %v297_v44 = vsel %vm277_vm1, %v292_v40, %v296_v41  ;;  %v4351_v17 = vld [vmem:[%s4186_s8 + $0x10] sm:$0xf]  ;;  %v540_v22 = vsel %vm537_vm2, %v538_v9, %v539_v2  ;;  %v945_v40 = vld [vmem:[%s4186_s8 + $0x4] sm:$0xf] }
  0x1d   : > { %3485 = vmatpush3.bf16.msra.mxu1 %v3933_v19  ;;  %3458 = vmatprep.subr.bf16.mxu0 %v4104_v1  ;;  %v687_v19 = vor.u32 %v686_v60, %v685_v4  ;;  %v542_v32 = vsel %vm537_vm2, %v539_v2, %v541_v29  ;;  %v3968_v41 = vld [vmem:[%s4986_s1 + $0x120] sm:$0xff]  }
  0x1e   : > { %3486 = vmatprep.subr.bf16.mxu1 %v4104_v1  ;;  %v3980_v60 = vld [vmem:[%s4986_s1 + $0x1c0] sm:$0xff]  }
  0x20   : > { %3459 = vmatpush3.bf16.msra.mxu0 %v3934_v21  ;;  %v3055_v21 = vcombine.low %v4351_v17, %v4355_v20 }
  0x21   : > { %3487 = vmatpush3.bf16.msra.mxu1 %v3935_v25  ;;  %3460 = vmatprep.subr.bf16.mxu0 %v4104_v1 }
  0x22   : > { %3488 = vmatprep.subr.bf16.mxu1 %v4104_v1 }
  0x24   : > { %3461 = vmatpush3.bf16.msra.mxu0 %v3936_v26  ;;  %v692_v26 = vrot.slane %v690_v11, 1  ;;  %v3985_v11 = vld [vmem:[%s4986_s1 + $0x1d0] sm:$0xff]  }
  0x25   : > { %3489 = vmatpush3.bf16.msra.mxu1 %v3937_v27  ;;  %3502 = vmatprep.subr.bf16.mxu0 %v4104_v1 }
  0x26   : > { %3530 = vmatprep.subr.bf16.mxu1 %v4104_v1 }
  0x27   : > { %3463 = vmatmul.mubr.bf16.vlgmr.msra.gmra.mrb[0].mxu0 %v289_v35  ;;  %v3963_v35 = vld [vmem:[%s4986_s1 + $0x110] sm:$0xff]  }
  0x28   : > { %3491 = vmatmul.mubr.bf16.vlgmr.msra.gmra.mrb[0].mxu1 %v2864_v15  ;;  %3503 = vmatpush3.bf16.msra.mxu0 %v3940_v34  ;;  %v693_v15 = vshll.u32 %v2925_v61, 16  ;;  %v4461_v61 = vld [vmem:[%s4186_s8 + $0xc] sm:$0xf] }
  0x29   : > { %3531 = vmatpush3.bf16.msra.mxu1 %v3941_v38  ;;  %3504 = vmatprep.subr.bf16.mxu0 %v4104_v1  ;;  %v3966_v38 = vld [vmem:[%s4986_s1 + $0x118] sm:$0xff]  }
  0x2a   : > { %3532 = vmatprep.subr.bf16.mxu1 %v4104_v1  ;;  %3466 = vmatprep.mubr.msk.bf16.mxu0 %vm4105_vm0, %v4104_v1  ;;  %v695_v27 = vrot.slane %v693_v15, 2 }
  0x2b   : > { %3494 = vmatprep.mubr.msk.bf16.mxu1 %vm4105_vm0, %v4104_v1 }
  0x2c   : > { %3505 = vmatpush3.bf16.msra.mxu0 %v3942_v39  ;;  %v696_v34 = vor.u32 %v695_v27, %v692_v26  ;;  %v3967_v39 = vld [vmem:[%s4986_s1 + $0x158] sm:$0xff]   ;;  %v3991_v26 = vld [vmem:[%s4986_s1 + $0x1e0] sm:$0xff]   ;;  %v3992_v27 = vld [vmem:[%s4986_s1 + $0x1a8] sm:$0xff]  }
  0x2d   : > { %3533 = vmatpush3.bf16.msra.mxu1 %v3943_v42  ;;  %3506 = vmatprep.subr.bf16.mxu0 %v4104_v1  ;;  %v2977_v42 = vcombine.low %v945_v40, %v4326_v62 }
  0x2e   : > { %3534 = vmatprep.subr.bf16.mxu1 %v4104_v1  ;;  %v697_v37 = vsel %vm676_vm3, %v687_v19, %v696_v34 }
  0x2f   : > { %3467 = vmatmul.mubr.bf16.gmra.mrb[4].mxu0 %v297_v44  ;;  %v3970_v44 = vld [vmem:[%s4986_s1 + $0x128] sm:$0xff]   ;;  %v986_v46 = vshll.u32 %v2977_v42, 16 }
  0x30   : > { %3507 = vmatpush3.bf16.msra.mxu0 %v3944_v43  ;;  %3495 = vmatmul.mubr.bf16.gmra.mrb[4].mxu1 %v4214_v18  ;;  %v684_v18 = vor.u32 %v683_v7, %v680_v6  ;;  %v3969_v43 = vld [vmem:[%s4986_s1 + $0x160] sm:$0xff]   ;;  %v3981_v7 = vld [vmem:[%s4986_s1 + $0x188] sm:$0xff]  }
  0x31   : > { %3535 = vmatpush3.bf16.msra.mxu1 %v3945_v45  ;;  %3508 = vmatprep.subr.bf16.mxu0 %v4104_v1  ;;  %v3971_v45 = vld [vmem:[%s4986_s1 + $0x168] sm:$0xff]  }
  0x32   : > { %3536 = vmatprep.subr.bf16.mxu1 %v4104_v1  ;;  %3470 = vmatprep.mubr.msk.bf16.mxu0 %vm4105_vm0, %v4104_v1  ;;  %v688_v25 = vsel %vm676_vm3, %v684_v18, %v687_v19  ;;  %v3987_v19 = vld [vmem:[%s4986_s1 + $0x198] sm:$0xff]  }
  0x33   : > { %3498 = vmatprep.mubr.msk.bf16.mxu1 %vm4105_vm0, %v4104_v1 }
  0x34   : > { %3509 = vmatpush3.bf16.msra.mxu0 %v3946_v47  ;;  %v4424_v47 = vcombine.low %v4329_v63, %v4351_v17  ;;  %v4025_v63 = vld [vmem:[%s4986_s1 + $0x2d0] sm:$0xff]   ;;  %v1718_v17 = vld [vmem:[%s4186_s8 + $0x8] sm:$0xe] }
  0x35   : > { %3537 = vmatpush3.bf16.msra.mxu1 %v3947_v48  ;;  %3510 = vmatprep.subr.bf16.mxu0 %v4104_v1  ;;  %v3972_v48 = vld [vmem:[%s4986_s1 + $0x130] sm:$0xff]  }
  0x36   : > { %3538 = vmatprep.subr.bf16.mxu1 %v4104_v1  ;;  %v995_v4 = vshrl.u32 %v4424_v47, 16 }
  0x37   : > { %3471 = vmatmul.mubr.bf16.gmra.mrb[8].mxu0 %v300_v50  ;;  %v984_v50 = vshrl.u32 %v2977_v42, 16  ;;  %v1140_v42 = vrot.slane %v4424_v47, 1 }
  0x38   : > { %3511 = vmatpush3.bf16.msra.mxu0 %v3949_v51  ;;  %3499 = vmatmul.mubr.bf16.gmra.mrb[8].mxu1 %v2875_v53  ;;  %v988_v51 = vrot.slane %v986_v46, 1  ;;  %v950_v53 = vld [vmem:[%s4186_s8 + $0x18] sm:$0x1] }
  0x39   : > { %3539 = vmatpush3.bf16.msra.mxu1 %v3950_v52  ;;  %3512 = vmatprep.subr.bf16.mxu0 %v4104_v1  ;;  %v991_v52 = vshll.u32 %v4424_v47, 16  ;;  %v4451_v58 = vcombine.low %v4355_v20, %v950_v53  ;;  %v3999_v47 = vld [vmem:[%s4986_s1 + $0x200] sm:$0xff]  }
  0x3a   : > { %3540 = vmatprep.subr.bf16.mxu1 %v4104_v1  ;;  %3518 = vmatprep.mubr.msk.bf16.mxu0 %vm4105_vm0, %v4104_v1 }
  0x3b   : > { %3546 = vmatprep.mubr.msk.bf16.mxu1 %vm4105_vm0, %v4104_v1  ;;  %v993_v57 = vrot.slane %v991_v52, 1 }
  0x3c   : > { %3513 = vmatpush3.bf16.msra.mxu0 %v3951_v55  ;;  %v3975_v55 = vld [vmem:[%s4986_s1 + $0x178] sm:$0xff]  }
  0x3d   : > { %3541 = vmatpush3.bf16.msra.mxu1 %v3952_v56  ;;  %3514 = vmatprep.subr.bf16.mxu0 %v4104_v1  ;;  %v989_v56 = vor.u32 %v988_v51, %v984_v50  ;;  %v997_v9 = vor.u32 %v995_v4, %v993_v57 }
  0x3e   : > { %3542 = vmatprep.subr.bf16.mxu1 %v4104_v1 }
  0x3f   : > { %v994_v2 = vsel %vm277_vm1, %v989_v56, %v993_v57  ;;  %v1142_v56 = vrot.slane %v4451_v58, 1  ;;  %v4002_v57 = vld [vmem:[%s4986_s1 + $0x248] sm:$0xff]  }
  0x40   : > { %3515 = vmatpush3.bf16.msra.mxu0 %v3954_v0  ;;  %v4464_v0 = vld [vmem:[%s4186_s8 + $0x10] sm:$0xf] }
  0x41   : > { %3543 = vmatpush3.bf16.msra.mxu1 %v3955_v5  ;;  %3516 = vmatprep.subr.bf16.mxu0 %v4104_v1  ;;  %v999_v5 = vshll.u32 %v4451_v58, 16  ;;  %v3158_v6 = vcombine.low %v4461_v61, %v4464_v0 }
  0x42   : > { %3544 = vmatprep.subr.bf16.mxu1 %v4104_v1 }
  0x44   : > { %3517 = vmatpush3.bf16.msra.mxu0 %v3956_v8  ;;  %v3982_v8 = vld [vmem:[%s4986_s1 + $0x1c8] sm:$0xff]  }
  0x45   : > { %3545 = vmatpush3.bf16.msra.mxu1 %v3957_v10  ;;  %3558 = vmatprep.subr.bf16.mxu0 %v4104_v1  ;;  %v1001_v10 = vrot.slane %v999_v5, 1  ;;  %v4006_v5 = vld [vmem:[%s4986_s1 + $0x218] sm:$0xff]  }
  0x46   : > { %3586 = vmatprep.subr.bf16.mxu1 %v4104_v1 }
  0x47   : > { %3519 = vmatmul.mubr.bf16.vlgmr.msra.gmra.mrb[12].mxu0 %v540_v22  ;;  %v1002_v15 = vsel %vm277_vm1, %v997_v9, %v1001_v10  ;;  %v3988_v22 = vld [vmem:[%s4986_s1 + $0x1d8] sm:$0xff]   ;;  %v4008_v9 = vld [vmem:[%s4986_s1 + $0x220] sm:$0xff]  }
  0x48   : > { %3547 = vmatmul.mubr.bf16.vlgmr.msra.gmra.mrb[12].mxu1 %v688_v25  ;;  %3559 = vmatpush3.bf16.msra.mxu0 %v3959_v23  ;;  %v1003_v23 = vshrl.u32 %v4451_v58, 16  ;;  %v1143_v58 = vsel %vm537_vm2, %v1140_v42, %v1142_v56 }
  0x49   : > { %3587 = vmatpush3.bf16.msra.mxu1 %v3960_v24  ;;  %3560 = vmatprep.subr.bf16.mxu0 %v4104_v1  ;;  %v1118_v24 = vld [vmem:[%s4186_s8 + $0x4] sm:$0xe] }
  0x4a   : > { %3588 = vmatprep.subr.bf16.mxu1 %v4104_v1  ;;  %3522 = vmatprep.mubr.msk.bf16.mxu0 %vm4105_vm0, %v4104_v1  ;;  %v3004_v25 = vcombine.low %v1118_v24, %v4326_v62  ;;  %v4013_v24 = vld [vmem:[%s4986_s1 + $0x270] sm:$0xff]  }
  0x4b   : > { %3550 = vmatprep.mubr.msk.bf16.mxu1 %vm4105_vm0, %v4104_v1  ;;  %v4024_v62 = vld [vmem:[%s4986_s1 + $0x290] sm:$0xff]  }
  0x4c   : > { %3561 = vmatpush3.bf16.msra.mxu0 %v3961_v28  ;;  %v1278_v28 = vshrl.u32 %v3004_v25, 16 }
  0x4d   : > { %3589 = vmatpush3.bf16.msra.mxu1 %v3962_v31  ;;  %3562 = vmatprep.subr.bf16.mxu0 %v4104_v1  ;;  %v3993_v31 = vld [vmem:[%s4986_s1 + $0x1e8] sm:$0xff]  }
  0x4e   : > { %3590 = vmatprep.subr.bf16.mxu1 %v4104_v1 }
  0x4f   : > { %3523 = vmatmul.mubr.bf16.gmra.mrb[16].mxu0 %v542_v32  ;;  %v1285_v32 = vrot.slane %v995_v4, 1 }
  0x50   : > { %3563 = vmatpush3.bf16.msra.mxu0 %v3963_v35  ;;  %3551 = vmatmul.mubr.bf16.gmra.mrb[16].mxu1 %v697_v37  ;;  %v3994_v35 = vld [vmem:[%s4986_s1 + $0x1b0] sm:$0xff]   ;;  %v1280_v37 = vrot.slane %v1278_v28, 1 }
  0x51   : > { %3591 = vmatpush3.bf16.msra.mxu1 %v3964_v36  ;;  %3564 = vmatprep.subr.bf16.mxu0 %v4104_v1  ;;  %v3995_v36 = vld [vmem:[%s4986_s1 + $0x1f0] sm:$0xff]  }
  0x52   : > { %3592 = vmatprep.subr.bf16.mxu1 %v4104_v1  ;;  %3526 = vmatprep.mubr.msk.bf16.mxu0 %vm4105_vm0, %v4104_v1 }
  0x53   : > { %3554 = vmatprep.mubr.msk.bf16.mxu1 %vm4105_vm0, %v4104_v1 }
  0x54   : > { %3565 = vmatpush3.bf16.msra.mxu0 %v3966_v38 }
  0x55   : > { %3593 = vmatpush3.bf16.msra.mxu1 %v3967_v39  ;;  %3566 = vmatprep.subr.bf16.mxu0 %v4104_v1  ;;  %v1286_v39 = vrot.slane %v991_v52, 2  ;;  %v4000_v52 = vld [vmem:[%s4986_s1 + $0x240] sm:$0xff]  }
  0x56   : > { %3594 = vmatprep.subr.bf16.mxu1 %v4104_v1 }
  0x57   : > { %3527 = vmatmul.mubr.bf16.gmra.mrb[20].mxu0 %v541_v29  ;;  %v1281_v29 = vshll.u32 %v3004_v25, 16  ;;  %v1287_v46 = vor.u32 %v1286_v39, %v1285_v32  ;;  %v4022_v39 = vld [vmem:[%s4986_s1 + $0x2c8] sm:$0xff]  }
  0x58   : > { %3567 = vmatpush3.bf16.msra.mxu0 %v3968_v41  ;;  %3555 = vmatmul.mubr.bf16.gmra.mrb[20].mxu1 %v696_v34  ;;  %v1256_v34 = vld [vmem:[%s4186_s8 + $0x18] sm:$0x3] }
  0x59   : > { %3595 = vmatpush3.bf16.msra.mxu1 %v3969_v43  ;;  %3568 = vmatprep.subr.bf16.mxu0 %v4104_v1  ;;  %v1283_v38 = vrot.slane %v1281_v29, 2  ;;  %v3029_v40 = vcombine.low %v4355_v20, %v1256_v34  ;;  %v3996_v41 = vld [vmem:[%s4986_s1 + $0x1b8] sm:$0xff]   ;;  %v4019_v34 = vld [vmem:[%s4986_s1 + $0x280] sm:$0xff]  }
  0x5a   : > { %3596 = vmatprep.subr.bf16.mxu1 %v4104_v1  ;;  %3574 = vmatprep.mubr.msk.bf16.mxu0 %vm4105_vm0, %v4104_v1  ;;  %v3997_v43 = vld [vmem:[%s4986_s1 + $0x1f8] sm:$0xff]  }
  0x5b   : > { %3602 = vmatprep.mubr.msk.bf16.mxu1 %vm4105_vm0, %v4104_v1  ;;  %v4029_v20 = vld [vmem:[%s4186_s8 + $0x18] ss:$0 sps:$4 sm:$0xff]  }
  0x5c   : > { %3569 = vmatpush3.bf16.msra.mxu0 %v3970_v44  ;;  %v1139_v44 = vrot.slane %v3004_v25, 1  ;;  %v1550_v25 = vld [vmem:[%s4186_s8 + $0x1c] sm:$0x1] }
  0x5d   : > { %3597 = vmatpush3.bf16.msra.mxu1 %v3971_v45  ;;  %3570 = vmatprep.subr.bf16.mxu0 %v4104_v1  ;;  %v1284_v45 = vor.u32 %v1283_v38, %v1280_v37  ;;  %v4021_v38 = vld [vmem:[%s4986_s1 + $0x288] sm:$0xff]  }
  0x5e   : > { %3598 = vmatprep.subr.bf16.mxu1 %v4104_v1  ;;  %v1141_v50 = vsel %vm537_vm2, %v1139_v44, %v1140_v42  ;;  %v4027_v42 = vld [vmem:[%s4986_s1 + $0x298] sm:$0xff]  }
  0x5f   : > { %v1288_v51 = vsel %vm676_vm3, %v1284_v45, %v1287_v46  ;;  %v4028_v44 = vld [vmem:[%s4986_s1 + $0x2d8] sm:$0xff]  }
  0x60   : > { %3571 = vmatpush3.bf16.msra.mxu0 %v3972_v48  ;;  %v1290_v48 = vshrl.u32 %v3029_v40, 16 }
  0x61   : > { %3599 = vmatpush3.bf16.msra.mxu1 %v3973_v49  ;;  %3572 = vmatprep.subr.bf16.mxu0 %v4104_v1  ;;  %v1293_v49 = vshll.u32 %v3029_v40, 16 }
  0x62   : > { %3600 = vmatprep.subr.bf16.mxu1 %v4104_v1  ;;  %v1292_v53 = vrot.slane %v1290_v48, 1  ;;  %v3108_v48 = vcombine.low %v1718_v17, %v4461_v61  ;;  %v2150_v17 = vld [vmem:[%s4186_s8 + $0x20] sm:$0x1] }
  0x64   : > { %3573 = vmatpush3.bf16.msra.mxu0 %v3974_v54  ;;  %v1295_v54 = vrot.slane %v1293_v49, 2  ;;  %v4032_v49 = vld [vmem:[%s4986_s1 + $0x2a8] sm:$0xff]  }
  0x65   : > { %3601 = vmatpush3.bf16.msra.mxu1 %v3975_v55  ;;  %3614 = vmatprep.subr.bf16.mxu0 %v4104_v1  ;;  %v4001_v55 = vld [vmem:[%s4986_s1 + $0x208] sm:$0xff]  }
  0x66   : > { %3642 = vmatprep.subr.bf16.mxu1 %v4104_v1 }
  0x67   : > { %3575 = vmatmul.mubr.bf16.vlgmr.msra.gmra.mrb[24].mxu0 %v2950_v16  ;;  %v4495_v16 = vld [vmem:[%s4186_s8 + $0x18] sm:$0xf] }
  0x68   : > { %3603 = vmatmul.mubr.bf16.vlgmr.msra.gmra.mrb[24].mxu1 %v994_v2  ;;  %3615 = vmatpush3.bf16.msra.mxu0 %v3979_v59  ;;  %v3159_v18 = vcombine.low %v4492_v13, %v4495_v16  ;;  %v1296_v59 = vor.u32 %v1295_v54, %v1292_v53  ;;  %v4004_v2 = vld [vmem:[%s4986_s1 + $0x250] sm:$0xff]  }
  0x69   : > { %3643 = vmatpush3.bf16.msra.mxu1 %v3980_v60  ;;  %3616 = vmatprep.subr.bf16.mxu0 %v4104_v1  ;;  %v4003_v60 = vld [vmem:[%s4986_s1 + $0x210] sm:$0xff]  }
  0x6a   : > { %3644 = vmatprep.subr.bf16.mxu1 %v4104_v1  ;;  %3578 = vmatprep.mubr.msk.bf16.mxu0 %vm4105_vm0, %v4104_v1  ;;  %v1297_v4 = vsel %vm676_vm3, %v1287_v46, %v1296_v59  ;;  %v4031_v46 = vld [vmem:[%s4986_s1 + $0x2e0] sm:$0xff]   ;;  %v4034_v54 = vld [vmem:[%s4986_s1 + $0x2b0] sm:$0xff]  }
  0x6b   : > { %3606 = vmatprep.mubr.msk.bf16.mxu1 %vm4105_vm0, %v4104_v1 }
  0x6c   : > { %3617 = vmatpush3.bf16.msra.mxu0 %v3981_v7  ;;  %v4007_v7 = vld [vmem:[%s4986_s1 + $0x258] sm:$0xff]  }
  0x6d   : > { %3645 = vmatpush3.bf16.msra.mxu1 %v3982_v8  ;;  %3618 = vmatprep.subr.bf16.mxu0 %v4104_v1  ;;  %v1545_v8 = vld [vmem:[%s4186_s8 + $0x8] sm:$0xf] }
  0x6e   : > { %3646 = vmatprep.subr.bf16.mxu1 %v4104_v1 }
  0x6f   : > { %3579 = vmatmul.mubr.bf16.gmra.mrb[28].mxu0 %v2951_v33  ;;  %v1005_v33 = vor.u32 %v1003_v23, %v1001_v10  ;;  %v4009_v10 = vld [vmem:[%s4986_s1 + $0x260] sm:$0xff]   ;;  %v4012_v23 = vld [vmem:[%s4986_s1 + $0x230] sm:$0xff]  }
  0x70   : > { %3619 = vmatpush3.bf16.msra.mxu0 %v3984_v12  ;;  %3607 = vmatmul.mubr.bf16.gmra.mrb[28].mxu1 %v1002_v15  ;;  %v3081_v12 = vcombine.low %v1545_v8, %v4461_v61  ;;  %v4011_v15 = vld [vmem:[%s4986_s1 + $0x268] sm:$0xff]   ;;  %v4064_v61 = vld [vmem:[%s4986_s1 + $0x390] sm:$0xff]  }
  0x71   : > { %3647 = vmatpush3.bf16.msra.mxu1 %v3985_v11  ;;  %3620 = vmatprep.subr.bf16.mxu0 %v4104_v1  ;;  %v4010_v11 = vld [vmem:[%s4986_s1 + $0x228] sm:$0xff]  }
  0x72   : > { %3648 = vmatprep.subr.bf16.mxu1 %v4104_v1  ;;  %3582 = vmatprep.mubr.msk.bf16.mxu0 %vm4105_vm0, %v4104_v1 }
  0x73   : > { %3610 = vmatprep.mubr.msk.bf16.mxu1 %vm4105_vm0, %v4104_v1 }
  0x74   : > { %3621 = vmatpush3.bf16.msra.mxu0 %v3987_v19  ;;  %v4629_v19 = vcombine.low %v4464_v0, %v4492_v13  ;;  %v4065_v0 = vld [vmem:[%s4986_s1 + $0x3d0] sm:$0xff]   ;;  %v2318_v13 = vld [vmem:[%s4186_s8 + $0xc] sm:$0xe] }
  0x75   : > { %3649 = vmatpush3.bf16.msra.mxu1 %v3988_v22  ;;  %3622 = vmatprep.subr.bf16.mxu0 %v4104_v1  ;;  %v1586_v22 = vshll.u32 %v3081_v12, 16 }
  0x76   : > { %3650 = vmatprep.subr.bf16.mxu1 %v4104_v1 }
  0x77   : > { %3583 = vmatmul.mubr.bf16.gmra.mrb[32].mxu0 %v3989_v14  ;;  %v1584_v14 = vshrl.u32 %v3081_v12, 16 }
  0x78   : > { %3623 = vmatpush3.bf16.msra.mxu0 %v3990_v30  ;;  %3611 = vmatmul.mubr.bf16.gmra.mrb[32].mxu1 %v1005_v33  ;;  %v1588_v30 = vrot.slane %v1586_v22, 1  ;;  %v1591_v33 = vshll.u32 %v4629_v19, 16 }
  0x79   : > { %3651 = vmatpush3.bf16.msra.mxu1 %v3991_v26  ;;  %3624 = vmatprep.subr.bf16.mxu0 %v4104_v1  ;;  %v4014_v26 = vld [vmem:[%s4986_s1 + $0x238] sm:$0xff]  }
  0x7a   : > { %3652 = vmatprep.subr.bf16.mxu1 %v4104_v1  ;;  %3630 = vmatprep.mubr.msk.bf16.mxu0 %vm4105_vm0, %v4104_v1  ;;  %v1589_v28 = vor.u32 %v1588_v30, %v1584_v14  ;;  %v1593_v29 = vrot.slane %v1591_v33, 1  ;;  %v4042_v30 = vld [vmem:[%s4986_s1 + $0x348] sm:$0xff]  }
  0x7b   : > { %3658 = vmatprep.mubr.msk.bf16.mxu1 %vm4105_vm0, %v4104_v1 }
  0x7c   : > { %3625 = vmatpush3.bf16.msra.mxu0 %v3992_v27  ;;  %v4015_v27 = vld [vmem:[%s4986_s1 + $0x278] sm:$0xff]   ;;  %v1594_v32 = vsel %vm277_vm1, %v1589_v28, %v1593_v29 }
  0x7d   : > { %3653 = vmatpush3.bf16.msra.mxu1 %v3993_v31  ;;  %3626 = vmatprep.subr.bf16.mxu0 %v4104_v1  ;;  %v4656_v31 = vcombine.low %v4495_v16, %v1550_v25 }
  0x7e   : > { %3654 = vmatprep.subr.bf16.mxu1 %v4104_v1 }
  0x7f   : > { %v1599_v37 = vshll.u32 %v4656_v31, 16  ;;  %v1742_v14 = vrot.slane %v4656_v31, 1 }
  0x80   : > { %3627 = vmatpush3.bf16.msra.mxu0 %v3994_v35  ;;  %v4020_v35 = vld [vmem:[%s4986_s1 + $0x2c0] sm:$0xff]  }
  0x81   : > { %3655 = vmatpush3.bf16.msra.mxu1 %v3995_v36  ;;  %3628 = vmatprep.subr.bf16.mxu0 %v4104_v1  ;;  %v1595_v36 = vshrl.u32 %v4629_v19, 16 }
  0x82   : > { %3656 = vmatprep.subr.bf16.mxu1 %v4104_v1 }
  0x83   : > { %v1597_v40 = vor.u32 %v1595_v36, %v1593_v29  ;;  %v1885_v53 = vrot.slane %v1595_v36, 1  ;;  %v4046_v29 = vld [vmem:[%s4986_s1 + $0x318] sm:$0xff]   ;;  %v4049_v36 = vld [vmem:[%s4986_s1 + $0x360] sm:$0xff]  }
  0x84   : > { %3629 = vmatpush3.bf16.msra.mxu0 %v3996_v41  ;;  %v1601_v41 = vrot.slane %v1599_v37, 1 }
  0x85   : > { %3657 = vmatpush3.bf16.msra.mxu1 %v3997_v43  ;;  %3670 = vmatprep.subr.bf16.mxu0 %v4104_v1  ;;  %v1603_v43 = vshrl.u32 %v4656_v31, 16  ;;  %v4047_v31 = vld [vmem:[%s4986_s1 + $0x358] sm:$0xff]  }
  0x86   : > { %3698 = vmatprep.subr.bf16.mxu1 %v4104_v1 }
  0x87   : > { %3631 = vmatmul.mubr.bf16.vlgmr.msra.gmra.mrb[36].mxu0 %v1141_v50  ;;  %v1605_v45 = vor.u32 %v1603_v43, %v1601_v41  ;;  %v4033_v50 = vld [vmem:[%s4986_s1 + $0x2e8] sm:$0xff]  }
  0x88   : > { %3659 = vmatmul.mubr.bf16.vlgmr.msra.gmra.mrb[36].mxu1 %v1288_v51  ;;  %3671 = vmatpush3.bf16.msra.mxu0 %v3999_v47  ;;  %v1878_v47 = vshrl.u32 %v3108_v48, 16  ;;  %v1881_v51 = vshll.u32 %v3108_v48, 16 }
  0x89   : > { %3699 = vmatpush3.bf16.msra.mxu1 %v4000_v52  ;;  %3672 = vmatprep.subr.bf16.mxu0 %v4104_v1  ;;  %v1856_v52 = vld [vmem:[%s4186_s8 + $0x1c] sm:$0x3] }
  0x8a   : > { %3700 = vmatprep.subr.bf16.mxu1 %v4104_v1  ;;  %3634 = vmatprep.mubr.msk.bf16.mxu0 %vm4105_vm0, %v4104_v1 }
  0x8b   : > { %3662 = vmatprep.mubr.msk.bf16.mxu1 %vm4105_vm0, %v4104_v1 }
  0x8c   : > { %3673 = vmatpush3.bf16.msra.mxu0 %v4001_v55  ;;  %v4035_v55 = vld [vmem:[%s4986_s1 + $0x2f0] sm:$0xff]  }
  0x8d   : > { %3701 = vmatpush3.bf16.msra.mxu1 %v4002_v57  ;;  %3674 = vmatprep.subr.bf16.mxu0 %v4104_v1  ;;  %v1883_v57 = vrot.slane %v1881_v51, 2 }
  0x8e   : > { %3702 = vmatprep.subr.bf16.mxu1 %v4104_v1 }
  0x8f   : > { %3635 = vmatmul.mubr.bf16.gmra.mrb[40].mxu0 %v1143_v58  ;;  %v3133_v58 = vcombine.low %v4495_v16, %v1856_v52  ;;  %v4069_v16 = vld [vmem:[%s4186_s8 + $0x1c] ss:$0 sps:$4 sm:$0xff]  }
  0x90   : > { %3675 = vmatpush3.bf16.msra.mxu0 %v4003_v60  ;;  %3663 = vmatmul.mubr.bf16.gmra.mrb[40].mxu1 %v1297_v4  ;;  %v4036_v60 = vld [vmem:[%s4986_s1 + $0x2b8] sm:$0xff]   ;;  %v1740_v4 = vrot.slane %v4629_v19, 1  ;;  %v4040_v19 = vld [vmem:[%s4986_s1 + $0x340] sm:$0xff]  }
  0x91   : > { %3703 = vmatpush3.bf16.msra.mxu1 %v4004_v2  ;;  %3676 = vmatprep.subr.bf16.mxu0 %v4104_v1  ;;  %v1739_v2 = vrot.slane %v3108_v48, 1 }
  0x92   : > { %3704 = vmatprep.subr.bf16.mxu1 %v4104_v1  ;;  %3638 = vmatprep.mubr.msk.bf16.mxu0 %vm4105_vm0, %v4104_v1  ;;  %v1743_v25 = vsel %vm537_vm2, %v1740_v4, %v1742_v14 }
  0x93   : > { %3666 = vmatprep.mubr.msk.bf16.mxu1 %vm4105_vm0, %v4104_v1  ;;  %v1741_v12 = vsel %vm537_vm2, %v1739_v2, %v1740_v4  ;;  %v4071_v2 = vld [vmem:[%s4986_s1 + $0x3e0] sm:$0xff]  }
  0x94   : > { %3677 = vmatpush3.bf16.msra.mxu0 %v4006_v5  ;;  %v4037_v5 = vld [vmem:[%s4986_s1 + $0x2f8] sm:$0xff]  }
  0x95   : > { %3705 = vmatpush3.bf16.msra.mxu1 %v4007_v7  ;;  %3678 = vmatprep.subr.bf16.mxu0 %v4104_v1 }
  0x96   : > { %3706 = vmatprep.subr.bf16.mxu1 %v4104_v1 }
  0x97   : > { %3639 = vmatmul.mubr.bf16.gmra.mrb[44].mxu0 %v1142_v56  ;;  %v1880_v56 = vrot.slane %v1878_v47, 1  ;;  %v4060_v47 = vld [vmem:[%s4986_s1 + $0x3c0] sm:$0xff]  }
  0x98   : > { %3679 = vmatpush3.bf16.msra.mxu0 %v4008_v9  ;;  %3667 = vmatmul.mubr.bf16.gmra.mrb[44].mxu1 %v1296_v59  ;;  %v1886_v59 = vrot.slane %v1591_v33, 2  ;;  %v1890_v9 = vshrl.u32 %v3133_v58, 16 }
  0x99   : > { %3707 = vmatpush3.bf16.msra.mxu1 %v4009_v10  ;;  %3680 = vmatprep.subr.bf16.mxu0 %v4104_v1  ;;  %v1884_v7 = vor.u32 %v1883_v57, %v1880_v56  ;;  %v1893_v10 = vshll.u32 %v3133_v58, 16  ;;  %v4067_v57 = vld [vmem:[%s4986_s1 + $0x398] sm:$0xff]  }
  0x9a   : > { %3708 = vmatprep.subr.bf16.mxu1 %v4104_v1  ;;  %3686 = vmatprep.mubr.msk.bf16.mxu0 %vm4105_vm0, %v4104_v1  ;;  %v1887_v8 = vor.u32 %v1886_v59, %v1885_v53  ;;  %v1892_v22 = vrot.slane %v1890_v9, 1  ;;  %v4061_v53 = vld [vmem:[%s4986_s1 + $0x388] sm:$0xff]   ;;  %v4068_v58 = vld [vmem:[%s4986_s1 + $0x3d8] sm:$0xff]  }
  0x9b   : > { %3714 = vmatprep.mubr.msk.bf16.mxu1 %vm4105_vm0, %v4104_v1 }
  0x9c   : > { %3681 = vmatpush3.bf16.msra.mxu0 %v4010_v11  ;;  %v4039_v11 = vld [vmem:[%s4986_s1 + $0x300] sm:$0xff]  }
  0x9d   : > { %3709 = vmatpush3.bf16.msra.mxu1 %v4011_v15  ;;  %3682 = vmatprep.subr.bf16.mxu0 %v4104_v1  ;;  %v1888_v15 = vsel %vm676_vm3, %v1884_v7, %v1887_v8  ;;  %v4073_v7 = vld [vmem:[%s4986_s1 + $0x3e8] sm:$0xff]  }
  0x9e   : > { %3710 = vmatprep.subr.bf16.mxu1 %v4104_v1 }
  0xa0   : > { %3683 = vmatpush3.bf16.msra.mxu0 %v4012_v23  ;;  %v1895_v23 = vrot.slane %v1893_v10, 2 }
  0xa1   : > { %3711 = vmatpush3.bf16.msra.mxu1 %v4013_v24  ;;  %3684 = vmatprep.subr.bf16.mxu0 %v4104_v1  ;;  %v4041_v24 = vld [vmem:[%s4986_s1 + $0x308] sm:$0xff]  }
  0xa2   : > { %3712 = vmatprep.subr.bf16.mxu1 %v4104_v1  ;;  %v1896_v33 = vor.u32 %v1895_v23, %v1892_v22 }
  0xa4   : > { %3685 = vmatpush3.bf16.msra.mxu0 %v4014_v26  ;;  %v4043_v26 = vld [vmem:[%s4986_s1 + $0x310] sm:$0xff]   ;;  %v1897_v28 = vsel %vm676_vm3, %v1887_v8, %v1896_v33 }
  0xa5   : > { %3713 = vmatpush3.bf16.msra.mxu1 %v4015_v27  ;;  %3726 = vmatprep.subr.bf16.mxu0 %v4104_v1  ;;  %v4044_v27 = vld [vmem:[%s4986_s1 + $0x350] sm:$0xff]  }
  0xa6   : > { %3754 = vmatprep.subr.bf16.mxu1 %v4104_v1 }
  0xa7   : > { %3687 = vmatmul.mubr.bf16.vlgmr.msra.gmra.mrb[48].mxu0 %v3054_v3  ;;  %v1602_v3 = vsel %vm277_vm1, %v1597_v40, %v1601_v41  ;;  %v4820_v40 = vld [vmem:[%s4186_s8 + $0x14] sm:$0xff]  }
  0xa8   : > { %3715 = vmatmul.mubr.bf16.vlgmr.msra.gmra.mrb[48].mxu1 %v1594_v32  ;;  %3727 = vmatpush3.bf16.msra.mxu0 %v4019_v34  ;;  %v2145_v34 = vld [vmem:[%s4186_s8 + $0xc] sm:$0xf]  ;;  %v4799_v32 = vld [vmem:[%s4186_s8 + $0x10] sm:$0xf]  ;;  %v2191_v43 = vshll.u32 %v4820_v40, 16  ;;  %v2195_v51 = vshrl.u32 %v4820_v40, 16 }
  0xa9   : > { %3755 = vmatpush3.bf16.msra.mxu1 %v4020_v35  ;;  %3728 = vmatprep.subr.bf16.mxu0 %v4104_v1  ;;  %v4048_v35 = vld [vmem:[%s4986_s1 + $0x320] sm:$0xff]   ;;  %v3185_v37 = vcombine.low %v2145_v34, %v4799_v32  ;;  %v3212_v4 = vcombine.low %v2318_v13, %v4799_v32  ;;  %v4076_v32 = vld [vmem:[%s4986_s1 + $0x3b8] sm:$0xff]  }
  0xaa   : > { %3756 = vmatprep.subr.bf16.mxu1 %v4104_v1  ;;  %3690 = vmatprep.mubr.msk.bf16.mxu0 %vm4105_vm0, %v4104_v1 }
  0xab   : > { %3718 = vmatprep.mubr.msk.bf16.mxu1 %vm4105_vm0, %v4104_v1  ;;  %v2186_v41 = vshll.u32 %v3185_v37, 16  ;;  %v2478_v8 = vshrl.u32 %v3212_v4, 16  ;;  %v2481_v9 = vshll.u32 %v3212_v4, 16 }
  0xac   : > { %3729 = vmatpush3.bf16.msra.mxu0 %v4021_v38  ;;  %v4050_v38 = vld [vmem:[%s4986_s1 + $0x328] sm:$0xff]  }
  0xad   : > { %3757 = vmatpush3.bf16.msra.mxu1 %v4022_v39  ;;  %3730 = vmatprep.subr.bf16.mxu0 %v4104_v1  ;;  %v4051_v39 = vld [vmem:[%s4986_s1 + $0x368] sm:$0xff]  }
  0xae   : > { %3758 = vmatprep.subr.bf16.mxu1 %v4104_v1 }
  0xaf   : > { %3691 = vmatmul.mubr.bf16.gmra.mrb[52].mxu0 %v3055_v21  ;;  %v4030_v21 = vld [vmem:[%s4986_s1 + $0x2a0] sm:$0xff]  }
  0xb0   : > { %3731 = vmatpush3.bf16.msra.mxu0 %v4024_v62  ;;  %3719 = vmatmul.mubr.bf16.gmra.mrb[52].mxu1 %v1602_v3  ;;  %v4052_v62 = vld [vmem:[%s4986_s1 + $0x330] sm:$0xff]   ;;  %v2184_v3 = vshrl.u32 %v3185_v37, 16  ;;  %v4077_v37 = vld [vmem:[%s4986_s1 + $0x3f8] sm:$0xff]  }
  0xb1   : > { %3759 = vmatpush3.bf16.msra.mxu1 %v4025_v63  ;;  %3732 = vmatprep.subr.bf16.mxu0 %v4104_v1  ;;  %v4053_v63 = vld [vmem:[%s4986_s1 + $0x370] sm:$0xff]  }
  0xb2   : > { %3760 = vmatprep.subr.bf16.mxu1 %v4104_v1  ;;  %3694 = vmatprep.mubr.msk.bf16.mxu0 %vm4105_vm0, %v4104_v1 }
  0xb3   : > { %3722 = vmatprep.mubr.msk.bf16.mxu1 %vm4105_vm0, %v4104_v1 }
  0xb4   : > { %3733 = vmatpush3.bf16.msra.mxu0 %v4027_v42  ;;  %v2188_v42 = vrot.slane %v2186_v41, 1 }
  0xb5   : > { %3761 = vmatpush3.bf16.msra.mxu1 %v4028_v44  ;;  %3734 = vmatprep.subr.bf16.mxu0 %v4104_v1  ;;  %v4837_v44 = vld [vmem:[%s4186_s8 + $0x1c] sm:$0xf] }
  0xb6   : > { %3762 = vmatprep.subr.bf16.mxu1 %v4104_v1  ;;  %v4850_v48 = vcombine.low %v4837_v44, %v2150_v17 }
  0xb7   : > { %3695 = vmatmul.mubr.bf16.gmra.mrb[56].mxu0 %v4029_v20  ;;  %v4054_v20 = vld [vmem:[%s4986_s1 + $0x338] sm:$0xff]  }
  0xb8   : > { %3735 = vmatpush3.bf16.msra.mxu0 %v4030_v21  ;;  %3723 = vmatmul.mubr.bf16.gmra.mrb[56].mxu1 %v1605_v45  ;;  %v4055_v21 = vld [vmem:[%s4986_s1 + $0x378] sm:$0xff]   ;;  %v2189_v45 = vor.u32 %v2188_v42, %v2184_v3  ;;  %v2199_v52 = vshll.u32 %v4850_v48, 16  ;;  %v2203_v59 = vshrl.u32 %v4850_v48, 16 }
  0xb9   : > { %3763 = vmatpush3.bf16.msra.mxu1 %v4031_v46  ;;  %3736 = vmatprep.subr.bf16.mxu0 %v4104_v1  ;;  %v2193_v46 = vrot.slane %v2191_v43, 1 }
  0xba   : > { %3764 = vmatprep.subr.bf16.mxu1 %v4104_v1  ;;  %3742 = vmatprep.mubr.msk.bf16.mxu0 %vm4105_vm0, %v4104_v1  ;;  %v2201_v56 = vrot.slane %v2199_v52, 1 }
  0xbb   : > { %3770 = vmatprep.mubr.msk.bf16.mxu1 %vm4105_vm0, %v4104_v1 }
  0xbc   : > { %3737 = vmatpush3.bf16.msra.mxu0 %v4032_v49  ;;  %v4059_v49 = vld [vmem:[%s4986_s1 + $0x380] sm:$0xff]  }
  0xbd   : > { %3765 = vmatpush3.bf16.msra.mxu1 %v4033_v50  ;;  %3738 = vmatprep.subr.bf16.mxu0 %v4104_v1  ;;  %v2194_v50 = vsel %vm277_vm1, %v2189_v45, %v2193_v46 }
  0xbe   : > { %3766 = vmatprep.subr.bf16.mxu1 %v4104_v1 }
  0xc0   : > { %3739 = vmatpush3.bf16.msra.mxu0 %v4034_v54  ;;  %v4062_v54 = vld [vmem:[%s4986_s1 + $0x3c8] sm:$0xff]  }
  0xc1   : > { %3767 = vmatpush3.bf16.msra.mxu1 %v4035_v55  ;;  %3740 = vmatprep.subr.bf16.mxu0 %v4104_v1  ;;  %v2197_v55 = vor.u32 %v2195_v51, %v2193_v46 }
  0xc2   : > { %3768 = vmatprep.subr.bf16.mxu1 %v4104_v1 }
  0xc4   : > { %3741 = vmatpush3.bf16.msra.mxu0 %v4036_v60  ;;  %v2205_v60 = vor.u32 %v2203_v59, %v2201_v56 }
  0xc5   : > { %3769 = vmatpush3.bf16.msra.mxu1 %v4037_v5  ;;  %3782 = vmatprep.subr.bf16.mxu0 %v4104_v1  ;;  %v4072_v5 = vld [vmem:[%s4986_s1 + $0x3a8] sm:$0xff]  }
  0xc6   : > { %3810 = vmatprep.subr.bf16.mxu1 %v4104_v1 }
  0xc7   : > { %3743 = vmatmul.mubr.bf16.vlgmr.msra.gmra.mrb[60].mxu0 %v1741_v12  ;;  %v2456_v12 = vld [vmem:[%s4186_s8 + $0x20] sm:$0x3] }
  0xc8   : > { %3771 = vmatmul.mubr.bf16.vlgmr.msra.gmra.mrb[60].mxu1 %v1888_v15  ;;  %3783 = vmatpush3.bf16.msra.mxu0 %v4039_v11 }
  0xc9   : > { %3811 = vmatpush3.bf16.msra.mxu1 %v4040_v19  ;;  %3784 = vmatprep.subr.bf16.mxu0 %v4104_v1  ;;  %v2485_v19 = vrot.slane %v2195_v51, 1  ;;  %v2342_v51 = vrot.slane %v4850_v48, 1 }
  0xca   : > { %3812 = vmatprep.subr.bf16.mxu1 %v4104_v1  ;;  %3746 = vmatprep.mubr.msk.bf16.mxu0 %vm4105_vm0, %v4104_v1 }
  0xcb   : > { %3774 = vmatprep.mubr.msk.bf16.mxu1 %vm4105_vm0, %v4104_v1 }
  0xcc   : > { %3785 = vmatpush3.bf16.msra.mxu0 %v4041_v24 }
  0xcd   : > { %3813 = vmatpush3.bf16.msra.mxu1 %v4042_v30  ;;  %3786 = vmatprep.subr.bf16.mxu0 %v4104_v1 }
  0xce   : > { %3814 = vmatprep.subr.bf16.mxu1 %v4104_v1 }
  0xcf   : > { %3747 = vmatmul.mubr.bf16.gmra.mrb[64].mxu0 %v1743_v25  ;;  %v4075_v25 = vld [vmem:[%s4986_s1 + $0x3f0] sm:$0xff]  }
  0xd0   : > { %3787 = vmatpush3.bf16.msra.mxu0 %v4043_v26  ;;  %3775 = vmatmul.mubr.bf16.gmra.mrb[64].mxu1 %v1897_v28  ;;  %v2480_v26 = vrot.slane %v2478_v8, 1  ;;  %v2486_v28 = vrot.slane %v2191_v43, 2 }
  0xd1   : > { %3815 = vmatpush3.bf16.msra.mxu1 %v4044_v27  ;;  %3788 = vmatprep.subr.bf16.mxu0 %v4104_v1  ;;  %v2483_v27 = vrot.slane %v2481_v9, 2 }
  0xd2   : > { %3816 = vmatprep.subr.bf16.mxu1 %v4104_v1  ;;  %3750 = vmatprep.mubr.msk.bf16.mxu0 %vm4105_vm0, %v4104_v1 }
  0xd3   : > { %3778 = vmatprep.mubr.msk.bf16.mxu1 %vm4105_vm0, %v4104_v1 }
  0xd4   : > { %3789 = vmatpush3.bf16.msra.mxu0 %v4046_v29  ;;  %v3237_v29 = vcombine.low %v4837_v44, %v2456_v12 }
  0xd5   : > { %3817 = vmatpush3.bf16.msra.mxu1 %v4047_v31  ;;  %3790 = vmatprep.subr.bf16.mxu0 %v4104_v1 }
  0xd6   : > { %3818 = vmatprep.subr.bf16.mxu1 %v4104_v1  ;;  %v2490_v41 = vshrl.u32 %v3237_v29, 16 }
  0xd7   : > { %3751 = vmatmul.mubr.bf16.gmra.mrb[68].mxu0 %v1742_v14  ;;  %v4074_v14 = vld [vmem:[%s4986_s1 + $0x3b0] sm:$0xff]  }
  0xd8   : > { %3791 = vmatpush3.bf16.msra.mxu0 %v4048_v35  ;;  %3779 = vmatmul.mubr.bf16.gmra.mrb[68].mxu1 %v1896_v33  ;;  %v2339_v35 = vrot.slane %v3212_v4, 1  ;;  %v2492_v46 = vrot.slane %v2490_v41, 1 }
  0xd9   : > { %3819 = vmatpush3.bf16.msra.mxu1 %v4049_v36  ;;  %3792 = vmatprep.subr.bf16.mxu0 %v4104_v1  ;;  %v2340_v36 = vrot.slane %v4820_v40, 1 }
  0xda   : > { %3820 = vmatprep.subr.bf16.mxu1 %v4104_v1  ;;  %3798 = vmatprep.mubr.msk.bf16.mxu0 %vm4105_vm0, %v4104_v1 }
  0xdb   : > { %3826 = vmatprep.mubr.msk.bf16.mxu1 %vm4105_vm0, %v4104_v1  ;;  %v2341_v43 = vsel %vm537_vm2, %v2339_v35, %v2340_v36 }
  0xdc   : > { %3793 = vmatpush3.bf16.msra.mxu0 %v4050_v38  ;;  %v2484_v38 = vor.u32 %v2483_v27, %v2480_v26 }
  0xdd   : > { %3821 = vmatpush3.bf16.msra.mxu1 %v4051_v39  ;;  %3794 = vmatprep.subr.bf16.mxu0 %v4104_v1  ;;  %v2487_v39 = vor.u32 %v2486_v28, %v2485_v19 }
  0xde   : > { %3822 = vmatprep.subr.bf16.mxu1 %v4104_v1 }
  0xe0   : > { %3795 = vmatpush3.bf16.msra.mxu0 %v4052_v62  ;;  %v2493_v62 = vshll.u32 %v3237_v29, 16 }
  0xe1   : > { %3823 = vmatpush3.bf16.msra.mxu1 %v4053_v63  ;;  %3796 = vmatprep.subr.bf16.mxu0 %v4104_v1 }
  0xe2   : > { %3824 = vmatprep.subr.bf16.mxu1 %v4104_v1 }
  0xe4   : > { %3797 = vmatpush3.bf16.msra.mxu0 %v4054_v20  ;;  %v2488_v20 = vsel %vm676_vm3, %v2484_v38, %v2487_v39 }
  0xe5   : > { %3825 = vmatpush3.bf16.msra.mxu1 %v4055_v21  ;;  %3838 = vmatprep.subr.bf16.mxu0 %v4104_v1 }
  0xe6   : > { %3866 = vmatprep.subr.bf16.mxu1 %v4104_v1 }
  0xe7   : > { %3799 = vmatmul.mubr.bf16.vlgmr.msra.gmra.mrb[72].mxu0 %v3158_v6  ;;  %v2202_v6 = vsel %vm277_vm1, %v2197_v55, %v2201_v56  ;;  %v2343_v56 = vsel %vm537_vm2, %v2340_v36, %v2342_v51 }
  0xe8   : > { %3827 = vmatmul.mubr.bf16.vlgmr.msra.gmra.mrb[72].mxu1 %v2194_v50  ;;  %3839 = vmatpush3.bf16.msra.mxu0 %v4059_v49  ;;  %v2495_v49 = vrot.slane %v2493_v62, 2 }
  0xe9   : > { %3867 = vmatpush3.bf16.msra.mxu1 %v4060_v47  ;;  %3840 = vmatprep.subr.bf16.mxu0 %v4104_v1 }
  0xea   : > { %3868 = vmatprep.subr.bf16.mxu1 %v4104_v1  ;;  %3802 = vmatprep.mubr.msk.bf16.mxu0 %vm4105_vm0, %v4104_v1  ;;  %v2496_v52 = vor.u32 %v2495_v49, %v2492_v46 }
  0xeb   : > { %3830 = vmatprep.mubr.msk.bf16.mxu1 %vm4105_vm0, %v4104_v1 }
  0xec   : > { %3841 = vmatpush3.bf16.msra.mxu0 %v4061_v53 }
  0xed   : > { %3869 = vmatpush3.bf16.msra.mxu1 %v4062_v54  ;;  %3842 = vmatprep.subr.bf16.mxu0 %v4104_v1 }
  0xee   : > { %3870 = vmatprep.subr.bf16.mxu1 %v4104_v1 }
  0xef   : > { %3803 = vmatmul.mubr.bf16.gmra.mrb[76].mxu0 %v3159_v18  ;;  %v4070_v18 = vld [vmem:[%s4986_s1 + $0x3a0] sm:$0xff]  }
  0xf0   : > { %3843 = vmatpush3.bf16.msra.mxu0 %v4064_v61  ;;  %3831 = vmatmul.mubr.bf16.gmra.mrb[76].mxu1 %v2202_v6 }
  0xf1   : > { %3871 = vmatpush3.bf16.msra.mxu1 %v4065_v0  ;;  %3844 = vmatprep.subr.bf16.mxu0 %v4104_v1 }
  0xf2   : > { %3872 = vmatprep.subr.bf16.mxu1 %v4104_v1  ;;  %3806 = vmatprep.mubr.msk.bf16.mxu0 %vm4105_vm0, %v4104_v1 }
  0xf3   : > { %3834 = vmatprep.mubr.msk.bf16.mxu1 %vm4105_vm0, %v4104_v1 }
  0xf4   : > { %3845 = vmatpush3.bf16.msra.mxu0 %v4067_v57  ;;  %v2497_v57 = vsel %vm676_vm3, %v2487_v39, %v2496_v52 }
  0xf5   : > { %3873 = vmatpush3.bf16.msra.mxu1 %v4068_v58  ;;  %3846 = vmatprep.subr.bf16.mxu0 %v4104_v1 }
  0xf6   : > { %3874 = vmatprep.subr.bf16.mxu1 %v4104_v1 }
  0xf7   : > { %3807 = vmatmul.mubr.bf16.gmra.mrb[80].mxu0 %v4069_v16 }
  0xf8   : > { %3847 = vmatpush3.bf16.msra.mxu0 %v4070_v18  ;;  %3835 = vmatmul.mubr.bf16.gmra.mrb[80].mxu1 %v2205_v60 }
  0xf9   : > { %3875 = vmatpush3.bf16.msra.mxu1 %v4071_v2  ;;  %3848 = vmatprep.subr.bf16.mxu0 %v4104_v1 }
  0xfa   : > { %v386_v10 = vpop.f32.mrb[0].mxu0  ;;  %3876 = vmatprep.subr.bf16.mxu1 %v4104_v1  ;;  %3854 = vmatprep.mubr.msk.bf16.mxu0 %vm4105_vm0, %v4104_v1 }
  0xfb   : > { %v494_v11 = vpop.f32.mrb[0].mxu1  ;;  %v3464_v15 = vpop.f32.mrb[1].mxu0  ;;  %3882 = vmatprep.mubr.msk.bf16.mxu1 %vm4105_vm0, %v4104_v1 }
  0xfc   : > { %v4928_v22 = vadd.f32 %v494_v11, %v386_v10  ;;  %v3492_v23 = vpop.f32.mrb[1].mxu1  ;;  %v389_v24 = vpop.f32.mrb[2].mxu0  ;;  %3849 = vmatpush3.bf16.msra.mxu0 %v4072_v5 }
  0xfd   : > { %v497_v30 = vpop.f32.mrb[2].mxu1  ;;  %3877 = vmatpush3.bf16.msra.mxu1 %v4073_v7  ;;  %v3465_v33 = vpop.f32.mrb[3].mxu0  ;;  %3850 = vmatprep.subr.bf16.mxu0 %v4104_v1 }
  0xfe   : > { %v498_v31 = vadd.f32 %v497_v30, %v389_v24  ;;  %v3493_v34 = vpop.f32.mrb[3].mxu1  ;;  %3878 = vmatprep.subr.bf16.mxu1 %v4104_v1 }
 0x100   : > { %3851 = vmatpush3.bf16.msra.mxu0 %v4074_v14 }
 0x101   : > { %3879 = vmatpush3.bf16.msra.mxu1 %v4075_v25  ;;  %3852 = vmatprep.subr.bf16.mxu0 %v4104_v1 }
 0x102   : > { %3880 = vmatprep.subr.bf16.mxu1 %v4104_v1  ;;  %v394_v63 = vpop.f32.mrb[4].mxu0 }
 0x103   : > { %v3468_v3 = vpop.f32.mrb[5].mxu0  ;;  %v502_v42 = vpop.f32.mrb[4].mxu1 }
 0x104   : > { %3853 = vmatpush3.bf16.msra.mxu0 %v4076_v32  ;;  %v503_v40 = vadd.f32 %v502_v42, %v394_v63  ;;  %v397_v44 = vpop.f32.mrb[6].mxu0  ;;  %v3496_v17 = vpop.f32.mrb[5].mxu1 }
 0x105   : > { %3881 = vmatpush3.bf16.msra.mxu1 %v4077_v37  ;;  %v3469_v21 = vpop.f32.mrb[7].mxu0  ;;  %v505_v45 = vpop.f32.mrb[6].mxu1 }
 0x106   : > { %v506_v50 = vadd.f32 %v505_v45, %v397_v44  ;;  %v3497_v47 = vpop.f32.mrb[7].mxu1 }
 0x107   : > { %3855 = vmatmul.mubr.bf16.vlgmr.msra.gmra.mrb[84].mxu0 %v2341_v43 }
 0x108   : > { %3883 = vmatmul.mubr.bf16.vlgmr.msra.gmra.mrb[84].mxu1 %v2488_v20  ;;  %3858 = vmatprep.mubr.msk.bf16.mxu0 %vm4105_vm0, %v4104_v1 }
 0x109   : > { %3886 = vmatprep.mubr.msk.bf16.mxu1 %vm4105_vm0, %v4104_v1 }
 0x10a   : > { %v402_v53 = vpop.f32.mrb[8].mxu0 }
 0x10b   : > { %v3472_v54 = vpop.f32.mrb[9].mxu0  ;;  %v510_v55 = vpop.f32.mrb[8].mxu1 }
 0x10c   : > { %v405_v61 = vpop.f32.mrb[10].mxu0  ;;  %v511_v0 = vadd.f32 %v510_v55, %v402_v53  ;;  %v3500_v6 = vpop.f32.mrb[9].mxu1 }
 0x10d   : > { %v3473_v59 = vpop.f32.mrb[11].mxu0  ;;  %v513_v58 = vpop.f32.mrb[10].mxu1 }
 0x10e   : > { %v3501_v13 = vpop.f32.mrb[11].mxu1 }
 0x10f   : > { %3859 = vmatmul.mubr.bf16.gmra.mrb[88].mxu0 %v2343_v56 }
 0x110   : > { %3887 = vmatmul.mubr.bf16.gmra.mrb[88].mxu1 %v2497_v57  ;;  %3862 = vmatprep.mubr.msk.bf16.mxu0 %vm4105_vm0, %v4104_v1 }
 0x111   : > { %3890 = vmatprep.mubr.msk.bf16.mxu1 %vm4105_vm0, %v4104_v1 }
 0x117   : > { %3863 = vmatmul.mubr.bf16.gmra.mrb[92].mxu0 %v2342_v51 }
 0x118   : > { %3891 = vmatmul.mubr.bf16.gmra.mrb[92].mxu1 %v2496_v52 }
 0x11a   : > { %v628_v48 = vpop.f32.mrb[12].mxu0 }
 0x11b   : > { %v650_v16 = vadd.f32 %v628_v48, %v4928_v22  ;;  %v783_v18 = vpop.f32.mrb[12].mxu1  ;;  %v3520_v60 = vpop.f32.mrb[13].mxu0 }
 0x11c   : > { %v3548_v2 = vpop.f32.mrb[13].mxu1  ;;  %v631_v4 = vpop.f32.mrb[14].mxu0 }
 0x11d   : > { %v805_v5 = vadd.f32 %v783_v18, %v650_v16  ;;  %v651_v7 = vadd.f32 %v631_v4, %v498_v31  ;;  %v786_v8 = vpop.f32.mrb[14].mxu1  ;;  %v3521_v9 = vpop.f32.mrb[15].mxu0 }
 0x11e   : > { %v3549_v10 = vpop.f32.mrb[15].mxu1 }
 0x11f   : > { %v806_v12 = vadd.f32 %v786_v8, %v651_v7 }
 0x122   : > { %v636_v11 = vpop.f32.mrb[16].mxu0 }
 0x123   : > { %v652_v15 = vadd.f32 %v636_v11, %v503_v40  ;;  %v3524_v19 = vpop.f32.mrb[17].mxu0  ;;  %v791_v23 = vpop.f32.mrb[16].mxu1 }
 0x124   : > { %v639_v1 = vpop.f32.mrb[18].mxu0  ;;  %v3552_v24 = vpop.f32.mrb[17].mxu1 }
 0x125   : > { %v653_v14 = vadd.f32 %v639_v1, %v506_v50  ;;  %v807_v30 = vadd.f32 %v791_v23, %v652_v15  ;;  %v794_v33 = vpop.f32.mrb[18].mxu1  ;;  %v3525_v22 = vpop.f32.mrb[19].mxu0 }
 0x126   : > { %v3553_v25 = vpop.f32.mrb[19].mxu1 }
 0x127   : > { %v808_v26 = vadd.f32 %v794_v33, %v653_v14 }
 0x12a   : > { %v644_v27 = vpop.f32.mrb[20].mxu0 }
 0x12b   : > { %v654_v28 = vadd.f32 %v644_v27, %v511_v0  ;;  %v799_v29 = vpop.f32.mrb[20].mxu1  ;;  %v3528_v31 = vpop.f32.mrb[21].mxu0 }
 0x12c   : > { %v647_v34 = vpop.f32.mrb[22].mxu0  ;;  %v3556_v32 = vpop.f32.mrb[21].mxu1 }
 0x12d   : > { %v809_v35 = vadd.f32 %v799_v29, %v654_v28  ;;  %v3529_v36 = vpop.f32.mrb[23].mxu0  ;;  %v802_v37 = vpop.f32.mrb[22].mxu1 }
 0x12e   : > { %v3557_v38 = vpop.f32.mrb[23].mxu1 }
 0x13a   : > { %v918_v39 = vpop.f32.mrb[24].mxu0 }
 0x13b   : > { %v940_v41 = vadd.f32 %v918_v39, %v805_v5  ;;  %v1091_v62 = vpop.f32.mrb[24].mxu1  ;;  %v3576_v63 = vpop.f32.mrb[25].mxu0 }
 0x13c   : > { %v3604_v3 = vpop.f32.mrb[25].mxu1  ;;  %v921_v42 = vpop.f32.mrb[26].mxu0 }
 0x13d   : > { %v1113_v43 = vadd.f32 %v1091_v62, %v940_v41  ;;  %v941_v40 = vadd.f32 %v921_v42, %v806_v12  ;;  %v1094_v44 = vpop.f32.mrb[26].mxu1  ;;  %v3577_v17 = vpop.f32.mrb[27].mxu0 }
 0x13e   : > { %v3605_v20 = vpop.f32.mrb[27].mxu1 }
 0x13f   : > { %v1114_v21 = vadd.f32 %v1094_v44, %v941_v40 }
 0x142   : > { %v926_v45 = vpop.f32.mrb[28].mxu0 }
 0x143   : > { %v942_v46 = vadd.f32 %v926_v45, %v807_v30  ;;  %v3580_v49 = vpop.f32.mrb[29].mxu0  ;;  %v1099_v50 = vpop.f32.mrb[28].mxu1 }
 0x144   : > { %v929_v47 = vpop.f32.mrb[30].mxu0  ;;  %v3608_v51 = vpop.f32.mrb[29].mxu1 }
 0x145   : > { %v943_v52 = vadd.f32 %v929_v47, %v808_v26  ;;  %v1115_v53 = vadd.f32 %v1099_v50, %v942_v46  ;;  %v1102_v54 = vpop.f32.mrb[30].mxu1  ;;  %v3581_v55 = vpop.f32.mrb[31].mxu0 }
 0x146   : > { %v3609_v56 = vpop.f32.mrb[31].mxu1 }
 0x147   : > { %v1116_v61 = vadd.f32 %v1102_v54, %v943_v52 }
 0x14a   : > { %v934_v0 = vpop.f32.mrb[32].mxu0 }
 0x14b   : > { %v944_v6 = vadd.f32 %v934_v0, %v809_v35  ;;  %v1107_v57 = vpop.f32.mrb[32].mxu1  ;;  %v3584_v59 = vpop.f32.mrb[33].mxu0 }
 0x14c   : > { %v937_v58 = vpop.f32.mrb[34].mxu0  ;;  %v3612_v13 = vpop.f32.mrb[33].mxu1 }
 0x14d   : > { %v1117_v48 = vadd.f32 %v1107_v57, %v944_v6  ;;  %v3585_v16 = vpop.f32.mrb[35].mxu0  ;;  %v1110_v18 = vpop.f32.mrb[34].mxu1 }
 0x14e   : > { %v3613_v60 = vpop.f32.mrb[35].mxu1 }
 0x15a   : > { %v1229_v2 = vpop.f32.mrb[36].mxu0 }
 0x15b   : > { %v1251_v4 = vadd.f32 %v1229_v2, %v1113_v43  ;;  %v1383_v5 = vpop.f32.mrb[36].mxu1  ;;  %v3632_v7 = vpop.f32.mrb[37].mxu0 }
 0x15c   : > { %v3660_v8 = vpop.f32.mrb[37].mxu1  ;;  %v1232_v9 = vpop.f32.mrb[38].mxu0 }
 0x15d   : > { %v1405_v10 = vadd.f32 %v1383_v5, %v1251_v4  ;;  %v1252_v12 = vadd.f32 %v1232_v9, %v1114_v21  ;;  %v1386_v11 = vpop.f32.mrb[38].mxu1  ;;  %v3633_v15 = vpop.f32.mrb[39].mxu0 }
 0x15e   : > { %v3661_v19 = vpop.f32.mrb[39].mxu1 }
 0x15f   : > { %v1406_v23 = vadd.f32 %v1386_v11, %v1252_v12 }
 0x162   : > { %v1237_v1 = vpop.f32.mrb[40].mxu0 }
 0x163   : > { %v1253_v24 = vadd.f32 %v1237_v1, %v1115_v53  ;;  %v3636_v14 = vpop.f32.mrb[41].mxu0  ;;  %v1391_v30 = vpop.f32.mrb[40].mxu1 }
 0x164   : > { %v1240_v33 = vpop.f32.mrb[42].mxu0  ;;  %v3664_v22 = vpop.f32.mrb[41].mxu1 }
 0x165   : > { %v1254_v25 = vadd.f32 %v1240_v33, %v1116_v61  ;;  %v1407_v26 = vadd.f32 %v1391_v30, %v1253_v24  ;;  %v1394_v27 = vpop.f32.mrb[42].mxu1  ;;  %v3637_v28 = vpop.f32.mrb[43].mxu0 }
 0x166   : > { %v3665_v29 = vpop.f32.mrb[43].mxu1 }
 0x167   : > { %v1408_v31 = vadd.f32 %v1394_v27, %v1254_v25 }
 0x16a   : > { %v1245_v34 = vpop.f32.mrb[44].mxu0 }
 0x16b   : > { %v1255_v32 = vadd.f32 %v1245_v34, %v1117_v48  ;;  %v1399_v35 = vpop.f32.mrb[44].mxu1  ;;  %v3640_v36 = vpop.f32.mrb[45].mxu0 }
 0x16c   : > { %v1248_v37 = vpop.f32.mrb[46].mxu0  ;;  %v3668_v38 = vpop.f32.mrb[45].mxu1 }
 0x16d   : > { %v1409_v39 = vadd.f32 %v1399_v35, %v1255_v32  ;;  %v3641_v41 = vpop.f32.mrb[47].mxu0  ;;  %v1402_v62 = vpop.f32.mrb[46].mxu1 }
 0x16e   : > { %v3669_v63 = vpop.f32.mrb[47].mxu1 }
 0x17a   : > { %v1518_v3 = vpop.f32.mrb[48].mxu0 }
 0x17b   : > { %v1540_v42 = vadd.f32 %v1518_v3, %v1405_v10  ;;  %v1691_v43 = vpop.f32.mrb[48].mxu1  ;;  %v3688_v40 = vpop.f32.mrb[49].mxu0 }
 0x17c   : > { %v3716_v44 = vpop.f32.mrb[49].mxu1  ;;  %v1521_v17 = vpop.f32.mrb[50].mxu0 }
 0x17d   : > { %v1713_v20 = vadd.f32 %v1691_v43, %v1540_v42  ;;  %v1541_v21 = vadd.f32 %v1521_v17, %v1406_v23  ;;  %v1694_v45 = vpop.f32.mrb[50].mxu1  ;;  %v3689_v46 = vpop.f32.mrb[51].mxu0 }
 0x17e   : > { %v3717_v49 = vpop.f32.mrb[51].mxu1 }
 0x17f   : > { %v1714_v50 = vadd.f32 %v1694_v45, %v1541_v21 }
 0x182   : > { %v1526_v47 = vpop.f32.mrb[52].mxu0 }
 0x183   : > { %v1542_v51 = vadd.f32 %v1526_v47, %v1407_v26  ;;  %v3692_v52 = vpop.f32.mrb[53].mxu0  ;;  %v1699_v53 = vpop.f32.mrb[52].mxu1 }
 0x184   : > { %v1529_v54 = vpop.f32.mrb[54].mxu0  ;;  %v3720_v55 = vpop.f32.mrb[53].mxu1 }
 0x185   : > { %v1543_v56 = vadd.f32 %v1529_v54, %v1408_v31  ;;  %v1715_v61 = vadd.f32 %v1699_v53, %v1542_v51  ;;  %v1702_v0 = vpop.f32.mrb[54].mxu1  ;;  %v3693_v6 = vpop.f32.mrb[55].mxu0 }
 0x186   : > { %v3721_v57 = vpop.f32.mrb[55].mxu1 }
 0x187   : > { %v1716_v59 = vadd.f32 %v1702_v0, %v1543_v56 }
 0x18a   : > { %v1534_v58 = vpop.f32.mrb[56].mxu0 }
 0x18b   : > { %v1544_v13 = vadd.f32 %v1534_v58, %v1409_v39  ;;  %v1707_v48 = vpop.f32.mrb[56].mxu1  ;;  %v3696_v16 = vpop.f32.mrb[57].mxu0 }
 0x18c   : > { %v1537_v18 = vpop.f32.mrb[58].mxu0  ;;  %v3724_v60 = vpop.f32.mrb[57].mxu1 }
 0x18d   : > { %v1717_v2 = vadd.f32 %v1707_v48, %v1544_v13  ;;  %v3697_v4 = vpop.f32.mrb[59].mxu0  ;;  %v1710_v5 = vpop.f32.mrb[58].mxu1 }
 0x18e   : > { %v3725_v7 = vpop.f32.mrb[59].mxu1 }
 0x19a   : > { %v1829_v8 = vpop.f32.mrb[60].mxu0 }
 0x19b   : > { %v1851_v9 = vadd.f32 %v1829_v8, %v1713_v20  ;;  %v1983_v10 = vpop.f32.mrb[60].mxu1  ;;  %v3744_v12 = vpop.f32.mrb[61].mxu0 }
 0x19c   : > { %v3772_v11 = vpop.f32.mrb[61].mxu1  ;;  %v1832_v15 = vpop.f32.mrb[62].mxu0 }
 0x19d   : > { %v2005_v19 = vadd.f32 %v1983_v10, %v1851_v9  ;;  %v1852_v23 = vadd.f32 %v1832_v15, %v1714_v50  ;;  %v1986_v1 = vpop.f32.mrb[62].mxu1  ;;  %v3745_v24 = vpop.f32.mrb[63].mxu0  ;;  %v2610_v11 = vlaneseq }
 0x19e   : > { %v3773_v14 = vpop.f32.mrb[63].mxu1 }
 0x19f   : > { %v2006_v30 = vadd.f32 %v1986_v1, %v1852_v23  ;;  %v2611_v15 = vshrl.u32 %v2610_v11, 7 }
 0x1a2   : > { %v1837_v33 = vpop.f32.mrb[64].mxu0 }
 0x1a3   : > { %v1853_v22 = vadd.f32 %v1837_v33, %v1715_v61  ;;  %v3748_v25 = vpop.f32.mrb[65].mxu0  ;;  %v1991_v26 = vpop.f32.mrb[64].mxu1  ;;  %v3246_v33 = vld [vmem:[%s4987_s2] ss:$0 sm:$0xff] }
 0x1a4   : > { %v1840_v27 = vpop.f32.mrb[66].mxu0  ;;  %v3776_v28 = vpop.f32.mrb[65].mxu1 }
 0x1a5   : > { %v1854_v29 = vadd.f32 %v1840_v27, %v1716_v59  ;;  %v2007_v31 = vadd.f32 %v1991_v26, %v1853_v22  ;;  %v1994_v34 = vpop.f32.mrb[66].mxu1  ;;  %v3749_v32 = vpop.f32.mrb[67].mxu0 }
 0x1a6   : > { %v3777_v35 = vpop.f32.mrb[67].mxu1 }
 0x1a7   : > { %v2008_v36 = vadd.f32 %v1994_v34, %v1854_v29 }
 0x1aa   : > { %v1845_v37 = vpop.f32.mrb[68].mxu0 }
 0x1ab   : > { %v1855_v38 = vadd.f32 %v1845_v37, %v1717_v2  ;;  %v1999_v39 = vpop.f32.mrb[68].mxu1  ;;  %v3752_v41 = vpop.f32.mrb[69].mxu0  ;;  %v2614_v37 = vadd.s32 24, %v2611_v15 }
 0x1ac   : > { %v1848_v62 = vpop.f32.mrb[70].mxu0  ;;  %v3780_v63 = vpop.f32.mrb[69].mxu1 }
 0x1ad   : > { %v2009_v3 = vadd.f32 %v1999_v39, %v1855_v38  ;;  %v3753_v42 = vpop.f32.mrb[71].mxu0  ;;  %v2002_v43 = vpop.f32.mrb[70].mxu1 }
 0x1ae   : > { %v3781_v40 = vpop.f32.mrb[71].mxu1 }
 0x1ba   : > { %v2118_v44 = vpop.f32.mrb[72].mxu0 }
 0x1bb   : > { %v2140_v17 = vadd.f32 %v2118_v44, %v2005_v19  ;;  %v2291_v20 = vpop.f32.mrb[72].mxu1  ;;  %v3800_v21 = vpop.f32.mrb[73].mxu0  ;;  %v2612_v19 = vadd.s32 8, %v2611_v15 }
 0x1bc   : > { %v3828_v45 = vpop.f32.mrb[73].mxu1  ;;  %v2121_v46 = vpop.f32.mrb[74].mxu0 }
 0x1bd   : > { %v2313_v49 = vadd.f32 %v2291_v20, %v2140_v17  ;;  %v2141_v50 = vadd.f32 %v2121_v46, %v2006_v30  ;;  %v2294_v47 = vpop.f32.mrb[74].mxu1  ;;  %v3801_v51 = vpop.f32.mrb[75].mxu0  ;;  %v2620_v30 = vand.u32 7, %v2611_v15  ;;  %v2627_v26 = vand.u32 7, %v2612_v19 }
 0x1be   : > { %v3829_v52 = vpop.f32.mrb[75].mxu1  ;;  %v2641_v20 = vand.u32 7, %v2614_v37 }
 0x1bf   : > { %v2314_v53 = vadd.f32 %v2294_v47, %v2141_v50  ;;  %vm2676_vm4 = vcmp.lt.s32.totalorder %v2620_v30, 5  ;;  %vm2677_vm5 = vcmp.lt.s32.totalorder %v2627_v26, 5  ;;  %v2615_v47 = vadd.s32 32, %v2611_v15 }
 0x1c0   : > { %vm2679_vm7 = vcmp.lt.s32.totalorder %v2641_v20, 5 }
 0x1c2   : > { %v2126_v54 = vpop.f32.mrb[76].mxu0 }
 0x1c3   : > { %v2142_v55 = vadd.f32 %v2126_v54, %v2007_v31  ;;  %v3804_v56 = vpop.f32.mrb[77].mxu0  ;;  %v2299_v61 = vpop.f32.mrb[76].mxu1 }
 0x1c4   : > { %v2129_v0 = vpop.f32.mrb[78].mxu0  ;;  %v3832_v6 = vpop.f32.mrb[77].mxu1 }
 0x1c5   : > { %v2143_v57 = vadd.f32 %v2129_v0, %v2008_v36  ;;  %v2315_v59 = vadd.f32 %v2299_v61, %v2142_v55  ;;  %v2302_v58 = vpop.f32.mrb[78].mxu1  ;;  %v3805_v13 = vpop.f32.mrb[79].mxu0  ;;  %v2613_v36 = vadd.s32 16, %v2611_v15  ;;  %v2648_v55 = vand.u32 7, %v2615_v47 }
 0x1c6   : > { %v3833_v48 = vpop.f32.mrb[79].mxu1 }
 0x1c7   : > { %v2316_v16 = vadd.f32 %v2302_v58, %v2143_v57  ;;  %v2634_v40 = vand.u32 7, %v2613_v36  ;;  %vm2680_vm8 = vcmp.lt.s32.totalorder %v2648_v55, 5 }
 0x1c9   : > { %vm2678_vm6 = vcmp.lt.s32.totalorder %v2634_v40, 5 }
 0x1ca   : > { %v2134_v18 = vpop.f32.mrb[80].mxu0 }
 0x1cb   : > { %v2144_v60 = vadd.f32 %v2134_v18, %v2009_v3  ;;  %v2307_v2 = vpop.f32.mrb[80].mxu1  ;;  %v3808_v4 = vpop.f32.mrb[81].mxu0 }
 0x1cc   : > { %v2137_v5 = vpop.f32.mrb[82].mxu0  ;;  %v3836_v7 = vpop.f32.mrb[81].mxu1 }
 0x1cd   : > { %v2317_v8 = vadd.f32 %v2307_v2, %v2144_v60  ;;  %v3809_v9 = vpop.f32.mrb[83].mxu0  ;;  %v2310_v10 = vpop.f32.mrb[82].mxu1 }
 0x1ce   : > { %v3837_v12 = vpop.f32.mrb[83].mxu1 }
 0x1da   : > { %v2429_v23 = vpop.f32.mrb[84].mxu0 }
 0x1db   : > { %v2451_v1 = vadd.f32 %v2429_v23, %v2313_v49  ;;  %v2583_v24 = vpop.f32.mrb[84].mxu1  ;;  %v3856_v14 = vpop.f32.mrb[85].mxu0 }
 0x1dc   : > { %v3884_v22 = vpop.f32.mrb[85].mxu1  ;;  %v2432_v25 = vpop.f32.mrb[86].mxu0 }
 0x1dd   : > { %v2605_v27 = vadd.f32 %v2583_v24, %v2451_v1  ;;  %v2452_v28 = vadd.f32 %v2432_v25, %v2314_v53  ;;  %v2586_v29 = vpop.f32.mrb[86].mxu1  ;;  %v3857_v31 = vpop.f32.mrb[87].mxu0 }
 0x1de   : > { %v3885_v34 = vpop.f32.mrb[87].mxu1 }
 0x1df   : > { %v2688_v32 = vadd.f32 %v3246_v33, %v2605_v27  ;;  %v2606_v35 = vadd.f32 %v2586_v29, %v2452_v28 }
 0x1e1   : > { %v2689_v38 = vadd.f32 %v3246_v33, %v2606_v35  ;;  %v2703_v41 = vsel %vm2676_vm4, %v2688_v32, 0.0 }
 0x1e2   : > { %v2437_v39 = vpop.f32.mrb[88].mxu0 }
 0x1e3   : > { %v2704_v62 = vsel %vm2677_vm5, %v2689_v38, 0.0  ;;  %v2453_v63 = vadd.f32 %v2437_v39, %v2315_v59  ;;  %v2591_v3 = vpop.f32.mrb[88].mxu1  ;;  %v3860_v42 = vpop.f32.mrb[89].mxu0 }
 0x1e4   : > { %v3262_v43 = vpack.c.bf16 %v2704_v62, %v2703_v41  ;;  %v3888_v44 = vpop.f32.mrb[89].mxu1  ;;  %v2440_v17 = vpop.f32.mrb[90].mxu0 }
 0x1e5   : > { %v2607_v21 = vadd.f32 %v2591_v3, %v2453_v63  ;;  %v2454_v45 = vadd.f32 %v2440_v17, %v2316_v16  ;;  %v2594_v46 = vpop.f32.mrb[90].mxu1  ;;  %v3861_v49 = vpop.f32.mrb[91].mxu0 }
 0x1e6   : > { %3263 = vst [vmem:[%s4971_s11] sm:$0xff] %v3262_v43   ;;  %v3889_v50 = vpop.f32.mrb[91].mxu1 }
 0x1e7   : > { %v2690_v51 = vadd.f32 %v3246_v33, %v2607_v21  ;;  %v2608_v52 = vadd.f32 %v2594_v46, %v2454_v45 }
 0x1e9   : > { %v2691_v53 = vadd.f32 %v3246_v33, %v2608_v52  ;;  %v2705_v56 = vsel %vm2678_vm6, %v2690_v51, 0.0 }
 0x1ea   : > { %v2445_v54 = vpop.f32.mrb[92].mxu0 }
 0x1eb   : > { %v2706_v61 = vsel %vm2679_vm7, %v2691_v53, 0.0  ;;  %v2455_v0 = vadd.f32 %v2445_v54, %v2317_v8  ;;  %v2599_v6 = vpop.f32.mrb[92].mxu1  ;;  %v3864_v57 = vpop.f32.mrb[93].mxu0 }
 0x1ec   : > { %v3267_v59 = vpack.c.bf16 %v2706_v61, %v2705_v56  ;;  %v3892_v58 = vpop.f32.mrb[93].mxu1  ;;  %v2448_v13 = vpop.f32.mrb[94].mxu0 }
 0x1ed   : > { %v2609_v48 = vadd.f32 %v2599_v6, %v2455_v0  ;;  %v2602_v16 = vpop.f32.mrb[94].mxu1  ;;  %v3865_v18 = vpop.f32.mrb[95].mxu0 }
 0x1ee   : > { %3269 = vst [vmem:[%s4971_s11 + $0x8] sm:$0xff] %v3267_v59   ;;  %v3893_v60 = vpop.f32.mrb[95].mxu1 }
 0x1ef   : > { %v2692_v2 = vadd.f32 %v3246_v33, %v2609_v48 }
 0x1f1   : > { %v2707_v4 = vsel %vm2680_vm8, %v2692_v2, 0.0 }
 0x1f2   : > { %v3258_v5 = vpack.c.bf16 %v2707_v4, %v2707_v4 }
 0x1f4   : > { %2733 = vst [vmem:[%s4971_s11 + $0x10] sm:$0xf] %v3258_v5 }
 0x1f5 PF: > { %s13_s14 = sadd.s32 1, %s4102_s14   ;;  %s4989_s12 = smov %s4098_s13 }
 0x1f6   : > { %p10_p5 = scmp.ge.s32.totalorder %s13_s14, 4   ;;  %s4990_s13 = smov %s4992_s15 }
 0x1f8   :  { %12 = sbr.rel (!%p10_p5) target bundleno = 2 (0x2), region = 83 }

</bundles_post_ra>
